<compile_context>
chip_gen: v6e
topology: v6e:2x2x1
jax: 0.10.0
libtpu: 0.0.40
codegen_flags: <defaults>
</compile_context>

<pallas_src>
import functools

import jax
import jax.numpy as jnp
from jax.experimental import pallas as pl
from jax.experimental.pallas import tpu as pltpu

LRELU_SLOPE = 0.2
BN_EPS = 1e-5
VMEM_LIMIT = 32 * 1024 * 1024  # safe on v5e (128 MiB) and v7x (64 MiB physical)


def _round_up(x, m):
    return (x + m - 1) // m * m


def _pick_tm(M):
    """Row-tile for the matmul.  Keeps the big A matrix unpadded for this net
    and gives >=2 i-tiles where possible so both v7x TensorCores get work."""
    Mp = _round_up(M, 16)  # bf16 packs 16 sublanes / vreg
    if Mp >= 1024:
        tm = 512
    elif Mp >= 64 and (Mp // 2) % 16 == 0:
        tm = Mp // 2
    else:
        tm = Mp
    return tm, _round_up(M, tm)


def _pick_tk(K):
    for tk in (512, 256, 128):
        if K % tk == 0:
            return tk
    return K  # small/odd K (layer 1: K=48): take it whole


def _pick_tn(N):
    if N <= 512:
        return N  # every layer here has Cout <= 512 -> j axis collapses
    for tn in (512, 256, 128):
        if N % tn == 0:
            return tn
    return N


# ----------------------------------------------------------------------------
# Pallas kernels
# ----------------------------------------------------------------------------
def _conv_act_kernel(a_ref, b_ref, o_ref, *, act):
    """Single-K-step matmul with fused activation (layer 1 / generic small K)."""
    y = jnp.dot(a_ref[...], b_ref[...], preferred_element_type=jnp.float32)
    if act == "leaky_relu":
        y = jnp.where(y >= 0, y, LRELU_SLOPE * y)
    elif act == "sigmoid":
        y = 1.0 / (1.0 + jnp.exp(-y))
    o_ref[...] = y.astype(o_ref.dtype)


def _conv_stats_kernel(a_ref, b_ref, o_ref, stats_ref):
    """K-tiled matmul accumulating in the f32 output block; epilogue emits
    per-(i-tile, channel) sum and sum-of-squares for fused BatchNorm stats."""
    k = pl.program_id(2)

    @pl.when(k == 0)
    def _():
        o_ref[...] = jnp.zeros_like(o_ref)

    o_ref[...] += jnp.dot(a_ref[...], b_ref[...],
                          preferred_element_type=jnp.float32)

    @pl.when(k == pl.num_programs(2) - 1)
    def _():
        y = o_ref[...]
        s = jnp.sum(y, axis=0, keepdims=True)
        q = jnp.sum(y * y, axis=0, keepdims=True)
        stats_ref[...] = jnp.concatenate([s, q], axis=0).reshape(
            1, 2, y.shape[1])


def _bn_lrelu_kernel(x_ref, scale_ref, shift_ref, o_ref):
    y = x_ref[...] * scale_ref[...] + shift_ref[...]
    o_ref[...] = jnp.where(y >= 0, y, LRELU_SLOPE * y).astype(o_ref.dtype)


def _matvec_sigmoid_kernel(a_ref, w_ref, o_ref):
    s = jnp.sum(a_ref[...].astype(jnp.float32) * w_ref[...],
                axis=-1, keepdims=True)
    o_ref[...] = 1.0 / (1.0 + jnp.exp(-s))


# ----------------------------------------------------------------------------
# Pallas wrappers
# ----------------------------------------------------------------------------
def conv_act(a_bf16, b_bf16, act, out_dtype=jnp.bfloat16):
    """act(A @ B) with A bf16 (M,K), B bf16 (K,N); whole K per block."""
    M, K = a_bf16.shape
    _, N = b_bf16.shape
    tm, Mp = _pick_tm(M)
    tn = _pick_tn(N)
    Np = _round_up(N, tn)
    if Mp != M:
        a_bf16 = jnp.pad(a_bf16, ((0, Mp - M), (0, 0)))
    if Np != N:
        b_bf16 = jnp.pad(b_bf16, ((0, 0), (0, Np - N)))

    out = pl.pallas_call(
        functools.partial(_conv_act_kernel, act=act),
        out_shape=jax.ShapeDtypeStruct((Mp, Np), out_dtype),
        grid_spec=pltpu.PrefetchScalarGridSpec(
            num_scalar_prefetch=0,
            grid=(Mp // tm, Np // tn),
            in_specs=[
                pl.BlockSpec((tm, K), lambda i, j: (i, 0)),
                pl.BlockSpec((K, tn), lambda i, j: (0, j)),
            ],
            out_specs=pl.BlockSpec((tm, tn), lambda i, j: (i, j)),
        ),
        compiler_params=pltpu.CompilerParams(
            dimension_semantics=("parallel", "parallel"),
            vmem_limit_bytes=VMEM_LIMIT),
    )(a_bf16, b_bf16)
    return out[:M, :N]


def conv_bn_stats(a_bf16, b_bf16):
    """Y = A @ B (f32) plus fused per-i-tile channel sum / sum-of-squares."""
    M, K = a_bf16.shape
    _, N = b_bf16.shape
    tm, Mp = _pick_tm(M)
    tk = _pick_tk(K)
    tn = _pick_tn(N)
    Np = _round_up(N, tn)
    # Tile choices above keep the big activation matrix unpadded for this
    # architecture; pads below are no-ops at these shapes.
    if Mp != M:
        a_bf16 = jnp.pad(a_bf16, ((0, Mp - M), (0, 0)))
    if Np != N:
        b_bf16 = jnp.pad(b_bf16, ((0, 0), (0, Np - N)))
    mi = Mp // tm
    grid = (mi, Np // tn, K // tk)

    y, stats = pl.pallas_call(
        _conv_stats_kernel,
        out_shape=(
            jax.ShapeDtypeStruct((Mp, Np), jnp.float32),
            jax.ShapeDtypeStruct((mi, 2, Np), jnp.float32),
        ),
        grid_spec=pltpu.PrefetchScalarGridSpec(
            num_scalar_prefetch=0,
            grid=grid,
            in_specs=[
                pl.BlockSpec((tm, tk), lambda i, j, k: (i, k)),
                pl.BlockSpec((tk, tn), lambda i, j, k: (k, j)),
            ],
            out_specs=[
                pl.BlockSpec((tm, tn), lambda i, j, k: (i, j)),
                pl.BlockSpec((1, 2, tn), lambda i, j, k: (i, 0, j)),
            ],
        ),
        compiler_params=pltpu.CompilerParams(
            dimension_semantics=("parallel", "parallel", "arbitrary"),
            vmem_limit_bytes=VMEM_LIMIT),
    )(a_bf16, b_bf16)
    return y[:M, :N], stats[:, :, :N]


def bn_lrelu(x_f32, scale, shift, out_dtype=jnp.bfloat16):
    """Per-channel affine (folded BatchNorm) + LeakyReLU, row-tiled, bf16 out."""
    M, C = x_f32.shape
    tm = min(1024, _round_up(M, 8))
    Mp = _round_up(M, tm)
    if Mp != M:
        x_f32 = jnp.pad(x_f32, ((0, Mp - M), (0, 0)))
    out = pl.pallas_call(
        _bn_lrelu_kernel,
        out_shape=jax.ShapeDtypeStruct((Mp, C), out_dtype),
        grid=(Mp // tm,),
        in_specs=[
            pl.BlockSpec((tm, C), lambda i: (i, 0)),
            pl.BlockSpec((1, C), lambda i: (0, 0)),
            pl.BlockSpec((1, C), lambda i: (0, 0)),
        ],
        out_specs=pl.BlockSpec((tm, C), lambda i: (i, 0)),
        compiler_params=pltpu.CompilerParams(
            dimension_semantics=("parallel",),
            vmem_limit_bytes=VMEM_LIMIT),
    )(x_f32, scale.reshape(1, C).astype(jnp.float32),
      shift.reshape(1, C).astype(jnp.float32))
    return out[:M]


def matvec_sigmoid(a, w_row):
    """sigmoid(a @ w_row^T) for a:(M,K) bf16, w_row:(1,K) f32. Tiny final layer."""
    M, K = a.shape
    Mp = _round_up(M, 8)
    if Mp != M:
        a = jnp.pad(a, ((0, Mp - M), (0, 0)))
    out = pl.pallas_call(
        _matvec_sigmoid_kernel,
        out_shape=jax.ShapeDtypeStruct((Mp, 1), jnp.float32),
        grid=(1,),
        in_specs=[
            pl.BlockSpec((Mp, K), lambda i: (0, 0)),
            pl.BlockSpec((1, K), lambda i: (0, 0)),
        ],
        out_specs=pl.BlockSpec((Mp, 1), lambda i: (0, 0)),
        compiler_params=pltpu.CompilerParams(vmem_limit_bytes=VMEM_LIMIT),
    )(a, w_row.astype(jnp.float32))
    return out[:M, 0]


# ----------------------------------------------------------------------------
# Glue: im2col / weight flattening (plain JAX, bf16)
# ----------------------------------------------------------------------------
def im2col(x_nhwc, k, stride, pad):
    N, H, W, C = x_nhwc.shape
    xp = jnp.pad(x_nhwc, ((0, 0), (pad, pad), (pad, pad), (0, 0)))
    OH = (H + 2 * pad - k) // stride + 1
    OW = (W + 2 * pad - k) // stride + 1
    patches = []
    for i in range(k):
        for j in range(k):
            patches.append(
                xp[:, i:i + OH * stride:stride, j:j + OW * stride:stride, :])
    cols = jnp.concatenate(patches, axis=-1)  # (N, OH, OW, k*k*C), (kh,kw,c)
    return cols.reshape(N * OH * OW, k * k * C), OH, OW


def flatten_weight(w_oihw):
    # (Cout, Cin, KH, KW) -> (KH*KW*Cin, Cout), matching im2col patch ordering.
    Cout, Cin, KH, KW = w_oihw.shape
    return jnp.transpose(w_oihw, (2, 3, 1, 0)).reshape(KH * KW * Cin, Cout)


# ----------------------------------------------------------------------------
# Discriminator forward
# ----------------------------------------------------------------------------
def discriminator_forward(x_nchw, params):
    # NHWC, bf16 activations (f32 accumulation / BN stats inside the kernels).
    x = jnp.transpose(x_nchw, (0, 2, 3, 1)).astype(jnp.bfloat16)
    N = x.shape[0]

    # layer 1: Conv(3->64, 4, s2, p1) + LeakyReLU(0.2) fused, bf16 out.
    cols, OH, OW = im2col(x, 4, 2, 1)
    w1 = flatten_weight(params["w1"]).astype(jnp.bfloat16)
    y = conv_act(cols, w1, act="leaky_relu")
    x = y.reshape(N, OH, OW, -1)

    # layers 2-4: Conv + BatchNorm(batch stats, fused reduction) + LeakyReLU.
    for idx in (2, 3, 4):
        w = flatten_weight(params[f"w{idx}"]).astype(jnp.bfloat16)
        cols, OH, OW = im2col(x, 4, 2, 1)
        y, stats = conv_bn_stats(cols, w)          # y: f32 (M, C)
        M = y.shape[0]
        ssum = jnp.sum(stats[:, 0, :], axis=0)     # per-channel sums (f32)
        ssq = jnp.sum(stats[:, 1, :], axis=0)
        mean = ssum / M
        var = jnp.maximum(ssq / M - mean * mean, 0.0)  # biased, like PyTorch BN fwd
        g, b = params[f"g{idx}"], params[f"b{idx}"]
        bn_scale = g * jax.lax.rsqrt(var + BN_EPS)
        bn_shift = b - mean * bn_scale
        y = bn_lrelu(y, bn_scale, bn_shift)        # bf16 out for next layer
        x = y.reshape(N, OH, OW, -1)

    # layer 5: Conv(512->1, 4, s1, p0) on a 4x4 map == matvec over the
    # flattened (h, w, c) features; Sigmoid fused.  Requires 64x64 input.
    a5 = x.reshape(N, -1)                                    # (N, 4*4*512) bf16
    w5_row = flatten_weight(params["w5"]).reshape(1, -1)     # (1, 8192) f32
    return matvec_sigmoid(a5, w5_row)                        # (N,) f32


# ----------------------------------------------------------------------------
# Pure-JAX reference (for correctness check only)
# ----------------------------------------------------------------------------
def ref_forward(x, params):
    def conv(h, w, stride, pad):
        return jax.lax.conv_general_dilated(
            h, w, (stride, stride), [(pad, pad), (pad, pad)],
            dimension_numbers=("NCHW", "OIHW", "NCHW"))

    def lrelu(h):
        return jnp.where(h >= 0, h, LRELU_SLOPE * h)

    def bn(h, g, b):
        m = h.mean(axis=(0, 2, 3), keepdims=True)
        v = h.var(axis=(0, 2, 3), keepdims=True)
        return ((h - m) / jnp.sqrt(v + BN_EPS) * g.reshape(1, -1, 1, 1)
                + b.reshape(1, -1, 1, 1))

    h = lrelu(conv(x, params["w1"], 2, 1))
    h = lrelu(bn(conv(h, params["w2"], 2, 1), params["g2"], params["b2"]))
    h = lrelu(bn(conv(h, params["w3"], 2, 1), params["g3"], params["b3"]))
    h = lrelu(bn(conv(h, params["w4"], 2, 1), params["g4"], params["b4"]))
    h = conv(h, params["w5"], 1, 0)
    return jax.nn.sigmoid(h).reshape(-1)


if __name__ == "__main__":
    key = jax.random.PRNGKey(0)
    ks = jax.random.split(key, 6)
    # Deterministic DCGAN-style init (conv weights ~ N(0, 0.02); BN gamma=1, beta=0).
    params = {
        "w1": 0.02 * jax.random.normal(ks[0], (64, 3, 4, 4), jnp.float32),
        "w2": 0.02 * jax.random.normal(ks[1], (128, 64, 4, 4), jnp.float32),
        "w3": 0.02 * jax.random.normal(ks[2], (256, 128, 4, 4), jnp.float32),
        "w4": 0.02 * jax.random.normal(ks[3], (512, 256, 4, 4), jnp.float32),
        "w5": 0.02 * jax.random.normal(ks[4], (1, 512, 4, 4), jnp.float32),
        "g2": jnp.ones((128,), jnp.float32), "b2": jnp.zeros((128,), jnp.float32),
        "g3": jnp.ones((256,), jnp.float32), "b3": jnp.zeros((256,), jnp.float32),
        "g4": jnp.ones((512,), jnp.float32), "b4": jnp.zeros((512,), jnp.float32),
    }
    # 64x64 input is required by the architecture (final 4x4 valid conv -> 1x1).
    x = jax.random.normal(ks[5], (2, 3, 64, 64), jnp.float32)

    out = jax.jit(discriminator_forward)(x, params)
    out = jax.block_until_ready(out)

    ref = ref_forward(x, params)
    assert out.shape == (2,), out.shape
    # bf16 MXU operands vs f32 XLA reference -> allow bf16-level tolerance.
    assert jnp.allclose(out, ref, atol=3e-2, rtol=3e-2), (out, ref)
    print("KERNEL_OK")
</pallas_src>

<mosaic_0001>
module attributes {stable_mosaic.version = 11 : i64} {
  func.func @_conv_act_kernel(%arg0: i32, %arg1: i32, %arg2: memref<512x48xbf16, #tpu.memory_space<vmem>>, %arg3: memref<48x64xbf16, #tpu.memory_space<vmem>>, %arg4: memref<512x64xbf16, #tpu.memory_space<vmem>>) attributes {dimension_semantics = [#tpu.dimension_semantics<parallel>, #tpu.dimension_semantics<parallel>], iteration_bounds = array<i64: 4, 1>, scalar_prefetch = 0 : i64, scratch_operands = 0 : i64, tpu.core_type = #tpu.core_type<tc>, window_params = [{transform_indices = @transform_0, window_bounds = array<i64: 512, 48>}, {transform_indices = @transform_1, window_bounds = array<i64: 48, 64>}, {transform_indices = @transform_2, window_bounds = array<i64: 512, 64>}]} {
    %c0 = arith.constant 0 : index
    %c0_0 = arith.constant 0 : index
    %0 = vector.load %arg2[%c0, %c0_0] : memref<512x48xbf16, #tpu.memory_space<vmem>>, vector<512x48xbf16>
    %c0_1 = arith.constant 0 : index
    %c0_2 = arith.constant 0 : index
    %1 = vector.load %arg3[%c0_1, %c0_2] : memref<48x64xbf16, #tpu.memory_space<vmem>>, vector<48x64xbf16>
    %cst = arith.constant dense<0.000000e+00> : vector<512x64xf32>
    %2 = tpu.matmul %0, %1, %cst {dimension_numbers = #tpu.dot_dimension_numbers<[1], [0], [0], [1], [0, 0, 1, 1], [], []>} : vector<512x48xbf16>, vector<48x64xbf16>, vector<512x64xf32> -> vector<512x64xf32>
    %cst_3 = arith.constant 0.000000e+00 : f32
    %3 = vector.broadcast %cst_3 : f32 to vector<512x64xf32>
    %4 = arith.cmpf oge, %2, %3 : vector<512x64xf32>
    %cst_4 = arith.constant 2.000000e-01 : f32
    %5 = vector.broadcast %cst_4 : f32 to vector<512x64xf32>
    %6 = arith.mulf %5, %2 : vector<512x64xf32>
    %7 = arith.select %4, %2, %6 : vector<512x64xi1>, vector<512x64xf32>
    %8 = arith.truncf %7 : vector<512x64xf32> to vector<512x64xbf16>
    %c0_5 = arith.constant 0 : index
    %c0_6 = arith.constant 0 : index
    %9 = vector.load %arg4[%c0_5, %c0_6] : memref<512x64xbf16, #tpu.memory_space<vmem>>, vector<512x64xbf16>
    tpu.vector_store %arg4[%c0_5, %c0_6], %8 {strides = array<i32>} : memref<512x64xbf16, #tpu.memory_space<vmem>>, vector<512x64xbf16>,
    return
  }
  func.func @transform_0(%arg0: i32, %arg1: i32) -> (i32, i32) {
    %c0_i32 = arith.constant 0 : i32
    %c0_i32_0 = arith.constant 0 : i32
    return %arg0, %c0_i32 : i32, i32
  }
  func.func @transform_1(%arg0: i32, %arg1: i32) -> (i32, i32) {
    %c0_i32 = arith.constant 0 : i32
    %c0_i32_0 = arith.constant 0 : i32
    return %c0_i32, %arg1 : i32, i32
  }
  func.func @transform_2(%arg0: i32, %arg1: i32) -> (i32, i32) {
    %c0_i32 = arith.constant 0 : i32
    return %arg0, %arg1 : i32, i32
  }
}

module attributes {stable_mosaic.version = 11 : i64} {
  func.func @_conv_stats_kernel(%arg0: i32, %arg1: i32, %arg2: i32, %arg3: memref<256x512xbf16, #tpu.memory_space<vmem>>, %arg4: memref<512x128xbf16, #tpu.memory_space<vmem>>, %arg5: memref<256x128xf32, #tpu.memory_space<vmem>>, %arg6: memref<1x2x128xf32, #tpu.memory_space<vmem>>) attributes {dimension_semantics = [#tpu.dimension_semantics<parallel>, #tpu.dimension_semantics<parallel>, #tpu.dimension_semantics<arbitrary>], iteration_bounds = array<i64: 2, 1, 2>, scalar_prefetch = 0 : i64, scratch_operands = 0 : i64, tpu.core_type = #tpu.core_type<tc>, window_params = [{transform_indices = @transform_0, window_bounds = array<i64: 256, 512>}, {transform_indices = @transform_1, window_bounds = array<i64: 512, 128>}, {transform_indices = @transform_2, window_bounds = array<i64: 256, 128>}, {transform_indices = @transform_3, window_bounds = array<i64: 1, 2, 128>}]} {
    %c0_i32 = arith.constant 0 : i32
    %0 = arith.cmpi eq, %arg2, %c0_i32 : i32
    %1 = arith.extui %0 : i1 to i32
    %c0_i32_0 = arith.constant 0 : i32
    %2 = arith.cmpi ne, %1, %c0_i32_0 : i32
    scf.if %2 {
      %cst_9 = arith.constant 0.000000e+00 : f32
      %12 = vector.broadcast %cst_9 : f32 to vector<256x128xf32>
      %c0_10 = arith.constant 0 : index
      %c0_11 = arith.constant 0 : index
      %13 = vector.load %arg5[%c0_10, %c0_11] : memref<256x128xf32, #tpu.memory_space<vmem>>, vector<256x128xf32>
      tpu.vector_store %arg5[%c0_10, %c0_11], %12 {strides = array<i32>} : memref<256x128xf32, #tpu.memory_space<vmem>>, vector<256x128xf32>,
    } else {
    }
    %c0 = arith.constant 0 : index
    %c0_1 = arith.constant 0 : index
    %3 = vector.load %arg5[%c0, %c0_1] : memref<256x128xf32, #tpu.memory_space<vmem>>, vector<256x128xf32>
    %c0_2 = arith.constant 0 : index
    %c0_3 = arith.constant 0 : index
    %4 = vector.load %arg3[%c0_2, %c0_3] : memref<256x512xbf16, #tpu.memory_space<vmem>>, vector<256x512xbf16>
    %c0_4 = arith.constant 0 : index
    %c0_5 = arith.constant 0 : index
    %5 = vector.load %arg4[%c0_4, %c0_5] : memref<512x128xbf16, #tpu.memory_space<vmem>>, vector<512x128xbf16>
    %cst = arith.constant dense<0.000000e+00> : vector<256x128xf32>
    %6 = tpu.matmul %4, %5, %cst {dimension_numbers = #tpu.dot_dimension_numbers<[1], [0], [0], [1], [0, 0, 1, 1], [], []>} : vector<256x512xbf16>, vector<512x128xbf16>, vector<256x128xf32> -> vector<256x128xf32>
    %7 = arith.addf %3, %6 : vector<256x128xf32>
    %c0_6 = arith.constant 0 : index
    %c0_7 = arith.constant 0 : index
    %8 = vector.load %arg5[%c0_6, %c0_7] : memref<256x128xf32, #tpu.memory_space<vmem>>, vector<256x128xf32>
    tpu.vector_store %arg5[%c0_6, %c0_7], %7 {strides = array<i32>} : memref<256x128xf32, #tpu.memory_space<vmem>>, vector<256x128xf32>,
    %c1_i32 = arith.constant 1 : i32
    %9 = arith.cmpi eq, %arg2, %c1_i32 : i32
    %10 = arith.extui %9 : i1 to i32
    %c0_i32_8 = arith.constant 0 : i32
    %11 = arith.cmpi ne, %10, %c0_i32_8 : i32
    scf.if %11 {
      %c0_9 = arith.constant 0 : index
      %c0_10 = arith.constant 0 : index
      %12 = vector.load %arg5[%c0_9, %c0_10] : memref<256x128xf32, #tpu.memory_space<vmem>>, vector<256x128xf32>
      %cst_11 = arith.constant dense<0.000000e+00> : vector<128xf32>
      %13 = vector.multi_reduction <add>, %12, %cst_11 [0] : vector<256x128xf32> to vector<128xf32>
      %14 = vector.shape_cast %13 : vector<128xf32> to vector<1x128xf32>
      %15 = arith.mulf %12, %12 : vector<256x128xf32>
      %cst_12 = arith.constant dense<0.000000e+00> : vector<128xf32>
      %16 = vector.multi_reduction <add>, %15, %cst_12 [0] : vector<256x128xf32> to vector<128xf32>
      %17 = vector.shape_cast %16 : vector<128xf32> to vector<1x128xf32>
      %18 = tpu.concatenate %14, %17 in 0 : vector<1x128xf32>, vector<1x128xf32> -> vector<2x128xf32>
      %19 = vector.shape_cast %18 : vector<2x128xf32> to vector<1x2x128xf32>
      %c0_13 = arith.constant 0 : index
      %c0_14 = arith.constant 0 : index
      %c0_15 = arith.constant 0 : index
      %20 = vector.load %arg6[%c0_13, %c0_14, %c0_15] : memref<1x2x128xf32, #tpu.memory_space<vmem>>, vector<1x2x128xf32>
      tpu.vector_store %arg6[%c0_13, %c0_14, %c0_15], %19 {strides = array<i32>} : memref<1x2x128xf32, #tpu.memory_space<vmem>>, vector<1x2x128xf32>,
    } else {
    }
    return
  }
  func.func @transform_0(%arg0: i32, %arg1: i32, %arg2: i32) -> (i32, i32) {
    %c0_i32 = arith.constant 0 : i32
    return %arg0, %arg2 : i32, i32
  }
  func.func @transform_1(%arg0: i32, %arg1: i32, %arg2: i32) -> (i32, i32) {
    %c0_i32 = arith.constant 0 : i32
    return %arg2, %arg1 : i32, i32
  }
  func.func @transform_2(%arg0: i32, %arg1: i32, %arg2: i32) -> (i32, i32) {
    %c0_i32 = arith.constant 0 : i32
    return %arg0, %arg1 : i32, i32
  }
  func.func @transform_3(%arg0: i32, %arg1: i32, %arg2: i32) -> (i32, i32, i32) {
    %c0_i32 = arith.constant 0 : i32
    %c0_i32_0 = arith.constant 0 : i32
    return %arg0, %c0_i32, %arg1 : i32, i32, i32
  }
}

module attributes {stable_mosaic.version = 11 : i64} {
  func.func @_bn_lrelu_kernel(%arg0: i32, %arg1: memref<512x128xf32, #tpu.memory_space<vmem>>, %arg2: memref<1x128xf32, #tpu.memory_space<vmem>>, %arg3: memref<1x128xf32, #tpu.memory_space<vmem>>, %arg4: memref<512x128xbf16, #tpu.memory_space<vmem>>) attributes {dimension_semantics = [#tpu.dimension_semantics<parallel>], iteration_bounds = array<i64: 1>, scalar_prefetch = 0 : i64, scratch_operands = 0 : i64, tpu.core_type = #tpu.core_type<tc>, window_params = [{transform_indices = @transform_0, window_bounds = array<i64: 512, 128>}, {pipeline_mode = #tpu.pipeline_mode<synchronous>, transform_indices = @transform_1, window_bounds = array<i64: 1, 128>}, {pipeline_mode = #tpu.pipeline_mode<synchronous>, transform_indices = @transform_2, window_bounds = array<i64: 1, 128>}, {transform_indices = @transform_3, window_bounds = array<i64: 512, 128>}]} {
    %c0 = arith.constant 0 : index
    %c0_0 = arith.constant 0 : index
    %0 = vector.load %arg1[%c0, %c0_0] : memref<512x128xf32, #tpu.memory_space<vmem>>, vector<512x128xf32>
    %c0_1 = arith.constant 0 : index
    %c0_2 = arith.constant 0 : index
    %1 = vector.load %arg2[%c0_1, %c0_2] : memref<1x128xf32, #tpu.memory_space<vmem>>, vector<1x128xf32>
    %2 = vector.broadcast %1 : vector<1x128xf32> to vector<512x128xf32>
    %3 = arith.mulf %0, %2 : vector<512x128xf32>
    %c0_3 = arith.constant 0 : index
    %c0_4 = arith.constant 0 : index
    %4 = vector.load %arg3[%c0_3, %c0_4] : memref<1x128xf32, #tpu.memory_space<vmem>>, vector<1x128xf32>
    %5 = vector.broadcast %4 : vector<1x128xf32> to vector<512x128xf32>
    %6 = arith.addf %3, %5 : vector<512x128xf32>
    %cst = arith.constant 0.000000e+00 : f32
    %7 = vector.broadcast %cst : f32 to vector<512x128xf32>
    %8 = arith.cmpf oge, %6, %7 : vector<512x128xf32>
    %cst_5 = arith.constant 2.000000e-01 : f32
    %9 = vector.broadcast %cst_5 : f32 to vector<512x128xf32>
    %10 = arith.mulf %9, %6 : vector<512x128xf32>
    %11 = arith.select %8, %6, %10 : vector<512x128xi1>, vector<512x128xf32>
    %12 = arith.truncf %11 : vector<512x128xf32> to vector<512x128xbf16>
    %c0_6 = arith.constant 0 : index
    %c0_7 = arith.constant 0 : index
    %13 = vector.load %arg4[%c0_6, %c0_7] : memref<512x128xbf16, #tpu.memory_space<vmem>>, vector<512x128xbf16>
    tpu.vector_store %arg4[%c0_6, %c0_7], %12 {strides = array<i32>} : memref<512x128xbf16, #tpu.memory_space<vmem>>, vector<512x128xbf16>,
    return
  }
  func.func @transform_0(%arg0: i32) -> (i32, i32) {
    %c0_i32 = arith.constant 0 : i32
    %c0_i32_0 = arith.constant 0 : i32
    return %arg0, %c0_i32 : i32, i32
  }
  func.func @transform_1(%arg0: i32) -> (i32, i32) {
    %c0_i32 = arith.constant 0 : i32
    %c0_i32_0 = arith.constant 0 : i32
    %c0_i32_1 = arith.constant 0 : i32
    return %c0_i32, %c0_i32_0 : i32, i32
  }
  func.func @transform_2(%arg0: i32) -> (i32, i32) {
    %c0_i32 = arith.constant 0 : i32
    %c0_i32_0 = arith.constant 0 : i32
    %c0_i32_1 = arith.constant 0 : i32
    return %c0_i32, %c0_i32_0 : i32, i32
  }
  func.func @transform_3(%arg0: i32) -> (i32, i32) {
    %c0_i32 = arith.constant 0 : i32
    %c0_i32_0 = arith.constant 0 : i32
    return %arg0, %c0_i32 : i32, i32
  }
}

module attributes {stable_mosaic.version = 11 : i64} {
  func.func @_conv_stats_kernel(%arg0: i32, %arg1: i32, %arg2: i32, %arg3: memref<64x512xbf16, #tpu.memory_space<vmem>>, %arg4: memref<512x256xbf16, #tpu.memory_space<vmem>>, %arg5: memref<64x256xf32, #tpu.memory_space<vmem>>, %arg6: memref<1x2x256xf32, #tpu.memory_space<vmem>>) attributes {dimension_semantics = [#tpu.dimension_semantics<parallel>, #tpu.dimension_semantics<parallel>, #tpu.dimension_semantics<arbitrary>], iteration_bounds = array<i64: 2, 1, 4>, scalar_prefetch = 0 : i64, scratch_operands = 0 : i64, tpu.core_type = #tpu.core_type<tc>, window_params = [{transform_indices = @transform_0, window_bounds = array<i64: 64, 512>}, {transform_indices = @transform_1, window_bounds = array<i64: 512, 256>}, {transform_indices = @transform_2, window_bounds = array<i64: 64, 256>}, {transform_indices = @transform_3, window_bounds = array<i64: 1, 2, 256>}]} {
    %c0_i32 = arith.constant 0 : i32
    %0 = arith.cmpi eq, %arg2, %c0_i32 : i32
    %1 = arith.extui %0 : i1 to i32
    %c0_i32_0 = arith.constant 0 : i32
    %2 = arith.cmpi ne, %1, %c0_i32_0 : i32
    scf.if %2 {
      %cst_9 = arith.constant 0.000000e+00 : f32
      %12 = vector.broadcast %cst_9 : f32 to vector<64x256xf32>
      %c0_10 = arith.constant 0 : index
      %c0_11 = arith.constant 0 : index
      %13 = vector.load %arg5[%c0_10, %c0_11] : memref<64x256xf32, #tpu.memory_space<vmem>>, vector<64x256xf32>
      tpu.vector_store %arg5[%c0_10, %c0_11], %12 {strides = array<i32>} : memref<64x256xf32, #tpu.memory_space<vmem>>, vector<64x256xf32>,
    } else {
    }
    %c0 = arith.constant 0 : index
    %c0_1 = arith.constant 0 : index
    %3 = vector.load %arg5[%c0, %c0_1] : memref<64x256xf32, #tpu.memory_space<vmem>>, vector<64x256xf32>
    %c0_2 = arith.constant 0 : index
    %c0_3 = arith.constant 0 : index
    %4 = vector.load %arg3[%c0_2, %c0_3] : memref<64x512xbf16, #tpu.memory_space<vmem>>, vector<64x512xbf16>
    %c0_4 = arith.constant 0 : index
    %c0_5 = arith.constant 0 : index
    %5 = vector.load %arg4[%c0_4, %c0_5] : memref<512x256xbf16, #tpu.memory_space<vmem>>, vector<512x256xbf16>
    %cst = arith.constant dense<0.000000e+00> : vector<64x256xf32>
    %6 = tpu.matmul %4, %5, %cst {dimension_numbers = #tpu.dot_dimension_numbers<[1], [0], [0], [1], [0, 0, 1, 1], [], []>} : vector<64x512xbf16>, vector<512x256xbf16>, vector<64x256xf32> -> vector<64x256xf32>
    %7 = arith.addf %3, %6 : vector<64x256xf32>
    %c0_6 = arith.constant 0 : index
    %c0_7 = arith.constant 0 : index
    %8 = vector.load %arg5[%c0_6, %c0_7] : memref<64x256xf32, #tpu.memory_space<vmem>>, vector<64x256xf32>
    tpu.vector_store %arg5[%c0_6, %c0_7], %7 {strides = array<i32>} : memref<64x256xf32, #tpu.memory_space<vmem>>, vector<64x256xf32>,
    %c3_i32 = arith.constant 3 : i32
    %9 = arith.cmpi eq, %arg2, %c3_i32 : i32
    %10 = arith.extui %9 : i1 to i32
    %c0_i32_8 = arith.constant 0 : i32
    %11 = arith.cmpi ne, %10, %c0_i32_8 : i32
    scf.if %11 {
      %c0_9 = arith.constant 0 : index
      %c0_10 = arith.constant 0 : index
      %12 = vector.load %arg5[%c0_9, %c0_10] : memref<64x256xf32, #tpu.memory_space<vmem>>, vector<64x256xf32>
      %cst_11 = arith.constant dense<0.000000e+00> : vector<256xf32>
      %13 = vector.multi_reduction <add>, %12, %cst_11 [0] : vector<64x256xf32> to vector<256xf32>
      %14 = vector.shape_cast %13 : vector<256xf32> to vector<1x256xf32>
      %15 = arith.mulf %12, %12 : vector<64x256xf32>
      %cst_12 = arith.constant dense<0.000000e+00> : vector<256xf32>
      %16 = vector.multi_reduction <add>, %15, %cst_12 [0] : vector<64x256xf32> to vector<256xf32>
      %17 = vector.shape_cast %16 : vector<256xf32> to vector<1x256xf32>
      %18 = tpu.concatenate %14, %17 in 0 : vector<1x256xf32>, vector<1x256xf32> -> vector<2x256xf32>
      %19 = vector.shape_cast %18 : vector<2x256xf32> to vector<1x2x256xf32>
      %c0_13 = arith.constant 0 : index
      %c0_14 = arith.constant 0 : index
      %c0_15 = arith.constant 0 : index
      %20 = vector.load %arg6[%c0_13, %c0_14, %c0_15] : memref<1x2x256xf32, #tpu.memory_space<vmem>>, vector<1x2x256xf32>
      tpu.vector_store %arg6[%c0_13, %c0_14, %c0_15], %19 {strides = array<i32>} : memref<1x2x256xf32, #tpu.memory_space<vmem>>, vector<1x2x256xf32>,
    } else {
    }
    return
  }
  func.func @transform_0(%arg0: i32, %arg1: i32, %arg2: i32) -> (i32, i32) {
    %c0_i32 = arith.constant 0 : i32
    return %arg0, %arg2 : i32, i32
  }
  func.func @transform_1(%arg0: i32, %arg1: i32, %arg2: i32) -> (i32, i32) {
    %c0_i32 = arith.constant 0 : i32
    return %arg2, %arg1 : i32, i32
  }
  func.func @transform_2(%arg0: i32, %arg1: i32, %arg2: i32) -> (i32, i32) {
    %c0_i32 = arith.constant 0 : i32
    return %arg0, %arg1 : i32, i32
  }
  func.func @transform_3(%arg0: i32, %arg1: i32, %arg2: i32) -> (i32, i32, i32) {
    %c0_i32 = arith.constant 0 : i32
    %c0_i32_0 = arith.constant 0 : i32
    return %arg0, %c0_i32, %arg1 : i32, i32, i32
  }
}

module attributes {stable_mosaic.version = 11 : i64} {
  func.func @_bn_lrelu_kernel(%arg0: i32, %arg1: memref<128x256xf32, #tpu.memory_space<vmem>>, %arg2: memref<1x256xf32, #tpu.memory_space<vmem>>, %arg3: memref<1x256xf32, #tpu.memory_space<vmem>>, %arg4: memref<128x256xbf16, #tpu.memory_space<vmem>>) attributes {dimension_semantics = [#tpu.dimension_semantics<parallel>], iteration_bounds = array<i64: 1>, scalar_prefetch = 0 : i64, scratch_operands = 0 : i64, tpu.core_type = #tpu.core_type<tc>, window_params = [{transform_indices = @transform_0, window_bounds = array<i64: 128, 256>}, {pipeline_mode = #tpu.pipeline_mode<synchronous>, transform_indices = @transform_1, window_bounds = array<i64: 1, 256>}, {pipeline_mode = #tpu.pipeline_mode<synchronous>, transform_indices = @transform_2, window_bounds = array<i64: 1, 256>}, {transform_indices = @transform_3, window_bounds = array<i64: 128, 256>}]} {
    %c0 = arith.constant 0 : index
    %c0_0 = arith.constant 0 : index
    %0 = vector.load %arg1[%c0, %c0_0] : memref<128x256xf32, #tpu.memory_space<vmem>>, vector<128x256xf32>
    %c0_1 = arith.constant 0 : index
    %c0_2 = arith.constant 0 : index
    %1 = vector.load %arg2[%c0_1, %c0_2] : memref<1x256xf32, #tpu.memory_space<vmem>>, vector<1x256xf32>
    %2 = vector.broadcast %1 : vector<1x256xf32> to vector<128x256xf32>
    %3 = arith.mulf %0, %2 : vector<128x256xf32>
    %c0_3 = arith.constant 0 : index
    %c0_4 = arith.constant 0 : index
    %4 = vector.load %arg3[%c0_3, %c0_4] : memref<1x256xf32, #tpu.memory_space<vmem>>, vector<1x256xf32>
    %5 = vector.broadcast %4 : vector<1x256xf32> to vector<128x256xf32>
    %6 = arith.addf %3, %5 : vector<128x256xf32>
    %cst = arith.constant 0.000000e+00 : f32
    %7 = vector.broadcast %cst : f32 to vector<128x256xf32>
    %8 = arith.cmpf oge, %6, %7 : vector<128x256xf32>
    %cst_5 = arith.constant 2.000000e-01 : f32
    %9 = vector.broadcast %cst_5 : f32 to vector<128x256xf32>
    %10 = arith.mulf %9, %6 : vector<128x256xf32>
    %11 = arith.select %8, %6, %10 : vector<128x256xi1>, vector<128x256xf32>
    %12 = arith.truncf %11 : vector<128x256xf32> to vector<128x256xbf16>
    %c0_6 = arith.constant 0 : index
    %c0_7 = arith.constant 0 : index
    %13 = vector.load %arg4[%c0_6, %c0_7] : memref<128x256xbf16, #tpu.memory_space<vmem>>, vector<128x256xbf16>
    tpu.vector_store %arg4[%c0_6, %c0_7], %12 {strides = array<i32>} : memref<128x256xbf16, #tpu.memory_space<vmem>>, vector<128x256xbf16>,
    return
  }
  func.func @transform_0(%arg0: i32) -> (i32, i32) {
    %c0_i32 = arith.constant 0 : i32
    %c0_i32_0 = arith.constant 0 : i32
    return %arg0, %c0_i32 : i32, i32
  }
  func.func @transform_1(%arg0: i32) -> (i32, i32) {
    %c0_i32 = arith.constant 0 : i32
    %c0_i32_0 = arith.constant 0 : i32
    %c0_i32_1 = arith.constant 0 : i32
    return %c0_i32, %c0_i32_0 : i32, i32
  }
  func.func @transform_2(%arg0: i32) -> (i32, i32) {
    %c0_i32 = arith.constant 0 : i32
    %c0_i32_0 = arith.constant 0 : i32
    %c0_i32_1 = arith.constant 0 : i32
    return %c0_i32, %c0_i32_0 : i32, i32
  }
  func.func @transform_3(%arg0: i32) -> (i32, i32) {
    %c0_i32 = arith.constant 0 : i32
    %c0_i32_0 = arith.constant 0 : i32
    return %arg0, %c0_i32 : i32, i32
  }
}

module attributes {stable_mosaic.version = 11 : i64} {
  func.func @_conv_stats_kernel(%arg0: i32, %arg1: i32, %arg2: i32, %arg3: memref<32x512xbf16, #tpu.memory_space<vmem>>, %arg4: memref<512x512xbf16, #tpu.memory_space<vmem>>, %arg5: memref<32x512xf32, #tpu.memory_space<vmem>>, %arg6: memref<1x2x512xf32, #tpu.memory_space<vmem>>) attributes {dimension_semantics = [#tpu.dimension_semantics<parallel>, #tpu.dimension_semantics<parallel>, #tpu.dimension_semantics<arbitrary>], iteration_bounds = array<i64: 1, 1, 8>, scalar_prefetch = 0 : i64, scratch_operands = 0 : i64, tpu.core_type = #tpu.core_type<tc>, window_params = [{transform_indices = @transform_0, window_bounds = array<i64: 32, 512>}, {transform_indices = @transform_1, window_bounds = array<i64: 512, 512>}, {transform_indices = @transform_2, window_bounds = array<i64: 32, 512>}, {transform_indices = @transform_3, window_bounds = array<i64: 1, 2, 512>}]} {
    %c0_i32 = arith.constant 0 : i32
    %0 = arith.cmpi eq, %arg2, %c0_i32 : i32
    %1 = arith.extui %0 : i1 to i32
    %c0_i32_0 = arith.constant 0 : i32
    %2 = arith.cmpi ne, %1, %c0_i32_0 : i32
    scf.if %2 {
      %cst_9 = arith.constant 0.000000e+00 : f32
      %12 = vector.broadcast %cst_9 : f32 to vector<32x512xf32>
      %c0_10 = arith.constant 0 : index
      %c0_11 = arith.constant 0 : index
      %13 = vector.load %arg5[%c0_10, %c0_11] : memref<32x512xf32, #tpu.memory_space<vmem>>, vector<32x512xf32>
      tpu.vector_store %arg5[%c0_10, %c0_11], %12 {strides = array<i32>} : memref<32x512xf32, #tpu.memory_space<vmem>>, vector<32x512xf32>,
    } else {
    }
    %c0 = arith.constant 0 : index
    %c0_1 = arith.constant 0 : index
    %3 = vector.load %arg5[%c0, %c0_1] : memref<32x512xf32, #tpu.memory_space<vmem>>, vector<32x512xf32>
    %c0_2 = arith.constant 0 : index
    %c0_3 = arith.constant 0 : index
    %4 = vector.load %arg3[%c0_2, %c0_3] : memref<32x512xbf16, #tpu.memory_space<vmem>>, vector<32x512xbf16>
    %c0_4 = arith.constant 0 : index
    %c0_5 = arith.constant 0 : index
    %5 = vector.load %arg4[%c0_4, %c0_5] : memref<512x512xbf16, #tpu.memory_space<vmem>>, vector<512x512xbf16>
    %cst = arith.constant dense<0.000000e+00> : vector<32x512xf32>
    %6 = tpu.matmul %4, %5, %cst {dimension_numbers = #tpu.dot_dimension_numbers<[1], [0], [0], [1], [0, 0, 1, 1], [], []>} : vector<32x512xbf16>, vector<512x512xbf16>, vector<32x512xf32> -> vector<32x512xf32>
    %7 = arith.addf %3, %6 : vector<32x512xf32>
    %c0_6 = arith.constant 0 : index
    %c0_7 = arith.constant 0 : index
    %8 = vector.load %arg5[%c0_6, %c0_7] : memref<32x512xf32, #tpu.memory_space<vmem>>, vector<32x512xf32>
    tpu.vector_store %arg5[%c0_6, %c0_7], %7 {strides = array<i32>} : memref<32x512xf32, #tpu.memory_space<vmem>>, vector<32x512xf32>,
    %c7_i32 = arith.constant 7 : i32
    %9 = arith.cmpi eq, %arg2, %c7_i32 : i32
    %10 = arith.extui %9 : i1 to i32
    %c0_i32_8 = arith.constant 0 : i32
    %11 = arith.cmpi ne, %10, %c0_i32_8 : i32
    scf.if %11 {
      %c0_9 = arith.constant 0 : index
      %c0_10 = arith.constant 0 : index
      %12 = vector.load %arg5[%c0_9, %c0_10] : memref<32x512xf32, #tpu.memory_space<vmem>>, vector<32x512xf32>
      %cst_11 = arith.constant dense<0.000000e+00> : vector<512xf32>
      %13 = vector.multi_reduction <add>, %12, %cst_11 [0] : vector<32x512xf32> to vector<512xf32>
      %14 = vector.shape_cast %13 : vector<512xf32> to vector<1x512xf32>
      %15 = arith.mulf %12, %12 : vector<32x512xf32>
      %cst_12 = arith.constant dense<0.000000e+00> : vector<512xf32>
      %16 = vector.multi_reduction <add>, %15, %cst_12 [0] : vector<32x512xf32> to vector<512xf32>
      %17 = vector.shape_cast %16 : vector<512xf32> to vector<1x512xf32>
      %18 = tpu.concatenate %14, %17 in 0 : vector<1x512xf32>, vector<1x512xf32> -> vector<2x512xf32>
      %19 = vector.shape_cast %18 : vector<2x512xf32> to vector<1x2x512xf32>
      %c0_13 = arith.constant 0 : index
      %c0_14 = arith.constant 0 : index
      %c0_15 = arith.constant 0 : index
      %20 = vector.load %arg6[%c0_13, %c0_14, %c0_15] : memref<1x2x512xf32, #tpu.memory_space<vmem>>, vector<1x2x512xf32>
      tpu.vector_store %arg6[%c0_13, %c0_14, %c0_15], %19 {strides = array<i32>} : memref<1x2x512xf32, #tpu.memory_space<vmem>>, vector<1x2x512xf32>,
    } else {
    }
    return
  }
  func.func @transform_0(%arg0: i32, %arg1: i32, %arg2: i32) -> (i32, i32) {
    %c0_i32 = arith.constant 0 : i32
    return %arg0, %arg2 : i32, i32
  }
  func.func @transform_1(%arg0: i32, %arg1: i32, %arg2: i32) -> (i32, i32) {
    %c0_i32 = arith.constant 0 : i32
    return %arg2, %arg1 : i32, i32
  }
  func.func @transform_2(%arg0: i32, %arg1: i32, %arg2: i32) -> (i32, i32) {
    %c0_i32 = arith.constant 0 : i32
    return %arg0, %arg1 : i32, i32
  }
  func.func @transform_3(%arg0: i32, %arg1: i32, %arg2: i32) -> (i32, i32, i32) {
    %c0_i32 = arith.constant 0 : i32
    %c0_i32_0 = arith.constant 0 : i32
    return %arg0, %c0_i32, %arg1 : i32, i32, i32
  }
}

module attributes {stable_mosaic.version = 11 : i64} {
  func.func @_bn_lrelu_kernel(%arg0: i32, %arg1: memref<32x512xf32, #tpu.memory_space<vmem>>, %arg2: memref<1x512xf32, #tpu.memory_space<vmem>>, %arg3: memref<1x512xf32, #tpu.memory_space<vmem>>, %arg4: memref<32x512xbf16, #tpu.memory_space<vmem>>) attributes {dimension_semantics = [#tpu.dimension_semantics<parallel>], iteration_bounds = array<i64: 1>, scalar_prefetch = 0 : i64, scratch_operands = 0 : i64, tpu.core_type = #tpu.core_type<tc>, window_params = [{transform_indices = @transform_0, window_bounds = array<i64: 32, 512>}, {pipeline_mode = #tpu.pipeline_mode<synchronous>, transform_indices = @transform_1, window_bounds = array<i64: 1, 512>}, {pipeline_mode = #tpu.pipeline_mode<synchronous>, transform_indices = @transform_2, window_bounds = array<i64: 1, 512>}, {transform_indices = @transform_3, window_bounds = array<i64: 32, 512>}]} {
    %c0 = arith.constant 0 : index
    %c0_0 = arith.constant 0 : index
    %0 = vector.load %arg1[%c0, %c0_0] : memref<32x512xf32, #tpu.memory_space<vmem>>, vector<32x512xf32>
    %c0_1 = arith.constant 0 : index
    %c0_2 = arith.constant 0 : index
    %1 = vector.load %arg2[%c0_1, %c0_2] : memref<1x512xf32, #tpu.memory_space<vmem>>, vector<1x512xf32>
    %2 = vector.broadcast %1 : vector<1x512xf32> to vector<32x512xf32>
    %3 = arith.mulf %0, %2 : vector<32x512xf32>
    %c0_3 = arith.constant 0 : index
    %c0_4 = arith.constant 0 : index
    %4 = vector.load %arg3[%c0_3, %c0_4] : memref<1x512xf32, #tpu.memory_space<vmem>>, vector<1x512xf32>
    %5 = vector.broadcast %4 : vector<1x512xf32> to vector<32x512xf32>
    %6 = arith.addf %3, %5 : vector<32x512xf32>
    %cst = arith.constant 0.000000e+00 : f32
    %7 = vector.broadcast %cst : f32 to vector<32x512xf32>
    %8 = arith.cmpf oge, %6, %7 : vector<32x512xf32>
    %cst_5 = arith.constant 2.000000e-01 : f32
    %9 = vector.broadcast %cst_5 : f32 to vector<32x512xf32>
    %10 = arith.mulf %9, %6 : vector<32x512xf32>
    %11 = arith.select %8, %6, %10 : vector<32x512xi1>, vector<32x512xf32>
    %12 = arith.truncf %11 : vector<32x512xf32> to vector<32x512xbf16>
    %c0_6 = arith.constant 0 : index
    %c0_7 = arith.constant 0 : index
    %13 = vector.load %arg4[%c0_6, %c0_7] : memref<32x512xbf16, #tpu.memory_space<vmem>>, vector<32x512xbf16>
    tpu.vector_store %arg4[%c0_6, %c0_7], %12 {strides = array<i32>} : memref<32x512xbf16, #tpu.memory_space<vmem>>, vector<32x512xbf16>,
    return
  }
  func.func @transform_0(%arg0: i32) -> (i32, i32) {
    %c0_i32 = arith.constant 0 : i32
    %c0_i32_0 = arith.constant 0 : i32
    return %arg0, %c0_i32 : i32, i32
  }
  func.func @transform_1(%arg0: i32) -> (i32, i32) {
    %c0_i32 = arith.constant 0 : i32
    %c0_i32_0 = arith.constant 0 : i32
    %c0_i32_1 = arith.constant 0 : i32
    return %c0_i32, %c0_i32_0 : i32, i32
  }
  func.func @transform_2(%arg0: i32) -> (i32, i32) {
    %c0_i32 = arith.constant 0 : i32
    %c0_i32_0 = arith.constant 0 : i32
    %c0_i32_1 = arith.constant 0 : i32
    return %c0_i32, %c0_i32_0 : i32, i32
  }
  func.func @transform_3(%arg0: i32) -> (i32, i32) {
    %c0_i32 = arith.constant 0 : i32
    %c0_i32_0 = arith.constant 0 : i32
    return %arg0, %c0_i32 : i32, i32
  }
}

module attributes {stable_mosaic.version = 11 : i64} {
  func.func @_matvec_sigmoid_kernel(%arg0: i32, %arg1: memref<8x8192xbf16, #tpu.memory_space<vmem>>, %arg2: memref<1x8192xf32, #tpu.memory_space<vmem>>, %arg3: memref<8x1xf32, #tpu.memory_space<vmem>>) attributes {dimension_semantics = [#tpu.dimension_semantics<arbitrary>], iteration_bounds = array<i64: 1>, scalar_prefetch = 0 : i64, scratch_operands = 0 : i64, tpu.core_type = #tpu.core_type<tc>, window_params = [{pipeline_mode = #tpu.pipeline_mode<synchronous>, transform_indices = @transform_0, window_bounds = array<i64: 8, 8192>}, {pipeline_mode = #tpu.pipeline_mode<synchronous>, transform_indices = @transform_1, window_bounds = array<i64: 1, 8192>}, {pipeline_mode = #tpu.pipeline_mode<synchronous>, transform_indices = @transform_2, window_bounds = array<i64: 8, 1>}]} {
    %c0 = arith.constant 0 : index
    %c0_0 = arith.constant 0 : index
    %0 = vector.load %arg1[%c0, %c0_0] : memref<8x8192xbf16, #tpu.memory_space<vmem>>, vector<8x8192xbf16>
    %1 = arith.extf %0 : vector<8x8192xbf16> to vector<8x8192xf32>
    %c0_1 = arith.constant 0 : index
    %c0_2 = arith.constant 0 : index
    %2 = vector.load %arg2[%c0_1, %c0_2] : memref<1x8192xf32, #tpu.memory_space<vmem>>, vector<1x8192xf32>
    %3 = vector.broadcast %2 : vector<1x8192xf32> to vector<8x8192xf32>
    %4 = arith.mulf %1, %3 : vector<8x8192xf32>
    %cst = arith.constant dense<0.000000e+00> : vector<8xf32>
    %5 = vector.multi_reduction <add>, %4, %cst [1] : vector<8x8192xf32> to vector<8xf32>
    %6 = vector.shape_cast %5 : vector<8xf32> to vector<8x1xf32>
    %cst_3 = arith.constant 0.000000e+00 : f32
    %7 = vector.broadcast %cst_3 : f32 to vector<8x1xf32>
    %8 = arith.subf %7, %6 : vector<8x1xf32>
    %9 = math.exp %8 : vector<8x1xf32>
    %cst_4 = arith.constant 1.000000e+00 : f32
    %10 = vector.broadcast %cst_4 : f32 to vector<8x1xf32>
    %11 = arith.addf %10, %9 : vector<8x1xf32>
    %cst_5 = arith.constant 1.000000e+00 : f32
    %12 = vector.broadcast %cst_5 : f32 to vector<8x1xf32>
    %13 = arith.divf %12, %11 : vector<8x1xf32>
    %c0_6 = arith.constant 0 : index
    %c0_7 = arith.constant 0 : index
    %14 = vector.load %arg3[%c0_6, %c0_7] : memref<8x1xf32, #tpu.memory_space<vmem>>, vector<8x1xf32>
    tpu.vector_store %arg3[%c0_6, %c0_7], %13 {strides = array<i32>} : memref<8x1xf32, #tpu.memory_space<vmem>>, vector<8x1xf32>,
    return
  }
  func.func @transform_0(%arg0: i32) -> (i32, i32) {
    %c0_i32 = arith.constant 0 : i32
    %c0_i32_0 = arith.constant 0 : i32
    %c0_i32_1 = arith.constant 0 : i32
    return %c0_i32, %c0_i32_0 : i32, i32
  }
  func.func @transform_1(%arg0: i32) -> (i32, i32) {
    %c0_i32 = arith.constant 0 : i32
    %c0_i32_0 = arith.constant 0 : i32
    %c0_i32_1 = arith.constant 0 : i32
    return %c0_i32, %c0_i32_0 : i32, i32
  }
  func.func @transform_2(%arg0: i32) -> (i32, i32) {
    %c0_i32 = arith.constant 0 : i32
    %c0_i32_0 = arith.constant 0 : i32
    %c0_i32_1 = arith.constant 0 : i32
    return %c0_i32, %c0_i32_0 : i32, i32
  }
}

</mosaic_0001>

<bundles_post_ra>
// kernel: discriminator_forward.8
= control target key start
LH: loop header
LB: loop body
LE: loop exit
PB: predicated region body
PF: predicated region fallthrough
CT: control target
= control target key end

     0   :  { %s1838_s9 = smov 0   ;;  %s1840_s10 = smov 0   ;;  %s2083_s0 = inlined_call_operand.vmem [shape: bf16[2048,48], index: 0, kind: input, shape index: {}]   ;;  %s2084_s1 = inlined_call_operand.vmem [shape: bf16[48,64], index: 1, kind: input, shape index: {}]   ;;  %s2085_s2 = inlined_call_operand.vmem [shape: bf16[2048,64], index: 2, kind: output, shape index: {}]  }
   0x1   :  { %s1842_s11 = smov 0  }
   0x2 LB: > { %s24_s12 = sadd.s32 1, %s1817_s10  ;;  %p1427_p0 = scmp.ge.s32.totalorder %s1821_s11, 1  ;;  %s1821_s11 = sphi %s1842_s11, %s12_s11   ;;  %s1817_s10 = sphi %s1840_s10, %s2087_s10   ;;  %s1813_s9 = sphi %s1838_s9, %s2086_s9  }
   0x3   : > { %p26_p1 = scmp.ge.s32.totalorder %s24_s12, 4  ;;  %p136_p2 = scmp.lt.s32.totalorder %s1821_s11, 5 }
   0x5   : > { %s2089_s12 = smov (%p26_p1, %s24_s12), 0  ;;  %p137_p3 = pnand %p1427_p0, %p136_p2 }
   0x6   : > { %s1428_s15 = sshll.u32 (!%p137_p3), %s1813_s9, 6 }
   0x7   : > { %140 = sbr.rel (%p137_p3) target bundleno = 287 (0x11f), region = 28  ;;  %p166_p4 = scmp.lt.s32.totalorder (!%p137_p3), %s1428_s15, 255 }
   0xc   : > { %v1764_v0 = vld [vmem:[%s2084_s1 + $0x10] sm:$0xff]   ;;  %v1765_v1 = vld [vmem:[%s2084_s1 + $0x8] sm:$0xff]   ;;  %s2091_s15 = smov (!%p166_p4, %s1428_s15), 255  ;;  %v1766_v2 = vld [vmem:[%s2084_s1] sm:$0xff]   ;;  %vm433_vm0 = vcmask 392192   ;;  %vm1267_vm3 = vcmask 519168  }
   0xd   : > { %1664 = vmatprep.subr.bf16.mxu0 %v1764_v0  ;;  %1734 = vmatprep.subr.bf16.mxu1 %v1764_v0  ;;  %s1429_s20 = sshll.u32 %s2091_s15, 2 }
   0xe   : > { %1665 = vmatpush3.bf16.msra.mxu0 %v1764_v0  ;;  %1737 = vmatpush3.bf16.msra.mxu1 %v1764_v0  ;;  %s1873_s23 = scalar_lea.vmem %s2083_s0, %s1429_s20  ;;  %s1944_s26 = scalar_lea.vmem %s2085_s2, %s1429_s20 }
   0xf   : > { %1666 = vmatprep.subr.bf16.mxu0 %v1765_v1  ;;  %1735 = vmatprep.subr.bf16.mxu1 %v1765_v1  ;;  %v1767_v3 = vld [vmem:[%s1873_s23] sm:$0xff]   ;;  %v1769_v5 = vld [vmem:[%s1873_s23 + $0x8] sm:$0xff]   ;;  %v1771_v7 = vld [vmem:[%s1873_s23 + $0x10] sm:$0xff]  }
  0x10   : > { %v1768_v4 = vld [vmem:[%s1873_s23 + $0x80] sm:$0xff]   ;;  %1670 = vmatprep.mubr.msk.bf16.mxu0 %vm433_vm0, %v1767_v3  ;;  %v1770_v6 = vld [vmem:[%s1873_s23 + $0x88] sm:$0xff]   ;;  %v1772_v8 = vld [vmem:[%s1873_s23 + $0x90] sm:$0xff]  }
  0x11   : > { %1702 = vmatprep.mubr.msk.bf16.mxu1 %vm433_vm0, %v1768_v4  ;;  %v1773_v9 = vld [vmem:[%s1873_s23 + $0x18] sm:$0xff]   ;;  %v1775_v11 = vld [vmem:[%s1873_s23 + $0x20] sm:$0xff]   ;;  %v1777_v13 = vld [vmem:[%s1873_s23 + $0x28] sm:$0xff]  }
  0x12   : > { %1667 = vmatpush3.bf16.msra.mxu0 %v1765_v1  ;;  %1738 = vmatpush3.bf16.msra.mxu1 %v1765_v1  ;;  %v1774_v10 = vld [vmem:[%s1873_s23 + $0x98] sm:$0xff]   ;;  %v1776_v12 = vld [vmem:[%s1873_s23 + $0xa0] sm:$0xff]   ;;  %v1778_v14 = vld [vmem:[%s1873_s23 + $0xa8] sm:$0xff]  }
  0x13   : > { %1668 = vmatprep.subr.bf16.mxu0 %v1766_v2  ;;  %1736 = vmatprep.subr.bf16.mxu1 %v1766_v2  ;;  %v1779_v15 = vld [vmem:[%s1873_s23 + $0x30] sm:$0xff]   ;;  %v1781_v17 = vld [vmem:[%s1873_s23 + $0x38] sm:$0xff]   ;;  %v1783_v19 = vld [vmem:[%s1873_s23 + $0x40] sm:$0xff]  }
  0x14   : > { %v1780_v16 = vld [vmem:[%s1873_s23 + $0xb0] sm:$0xff]   ;;  %v1782_v18 = vld [vmem:[%s1873_s23 + $0xb8] sm:$0xff]   ;;  %v1784_v20 = vld [vmem:[%s1873_s23 + $0xc0] sm:$0xff]  }
  0x15   : > { %v1785_v21 = vld [vmem:[%s1873_s23 + $0x48] sm:$0xff]   ;;  %v1787_v23 = vld [vmem:[%s1873_s23 + $0x50] sm:$0xff]   ;;  %v1789_v25 = vld [vmem:[%s1873_s23 + $0x58] sm:$0xff]  }
  0x16   : > { %1669 = vmatpush3.bf16.msra.mxu0 %v1766_v2  ;;  %1739 = vmatpush3.bf16.msra.mxu1 %v1766_v2  ;;  %v1786_v22 = vld [vmem:[%s1873_s23 + $0xc8] sm:$0xff]   ;;  %v1788_v24 = vld [vmem:[%s1873_s23 + $0xd0] sm:$0xff]   ;;  %v1790_v26 = vld [vmem:[%s1873_s23 + $0xd8] sm:$0xff]  }
  0x17   : > { %v1791_v27 = vld [vmem:[%s1873_s23 + $0x60] sm:$0xff]   ;;  %v1793_v29 = vld [vmem:[%s1873_s23 + $0x68] sm:$0xff]   ;;  %v1795_v31 = vld [vmem:[%s1873_s23 + $0x70] sm:$0xff]  }
  0x18   : > { %v1792_v28 = vld [vmem:[%s1873_s23 + $0xe0] sm:$0xff]   ;;  %v1794_v30 = vld [vmem:[%s1873_s23 + $0xe8] sm:$0xff]   ;;  %v1796_v32 = vld [vmem:[%s1873_s23 + $0xf0] sm:$0xff]  }
  0x19   : > { %1671 = vmatmul.mubr.msk.bf16.vlgmr.msra.gmra.mxu0 %vm433_vm0, %v1769_v5  ;;  %1703 = vmatmul.mubr.msk.bf16.vlgmr.msra.gmra.mxu1 %vm433_vm0, %v1770_v6  ;;  %v1797_v33 = vld [vmem:[%s1873_s23 + $0x78] sm:$0xff]  }
  0x1a   : > { %1674 = vmatprep.mubr.msk.bf16.mxu0 %vm433_vm0, %v1771_v7  ;;  %1706 = vmatprep.mubr.msk.bf16.mxu1 %vm433_vm0, %v1772_v8  ;;  %v1798_v34 = vld [vmem:[%s1873_s23 + $0xf8] sm:$0xff]  }
  0x21   : > { %1675 = vmatmul.mubr.msk.bf16.gmra.mxu0 %vm433_vm0, %v1773_v9  ;;  %1707 = vmatmul.mubr.msk.bf16.gmra.mxu1 %vm433_vm0, %v1774_v10 }
  0x22   : > { %1678 = vmatprep.mubr.msk.bf16.mxu0 %vm433_vm0, %v1775_v11  ;;  %1710 = vmatprep.mubr.msk.bf16.mxu1 %vm433_vm0, %v1776_v12 }
  0x29   : > { %1679 = vmatmul.mubr.msk.bf16.gmra.mxu0 %vm433_vm0, %v1777_v13  ;;  %1711 = vmatmul.mubr.msk.bf16.gmra.mxu1 %vm433_vm0, %v1778_v14 }
  0x2a   : > { %1682 = vmatprep.mubr.msk.bf16.mxu0 %vm433_vm0, %v1779_v15  ;;  %1714 = vmatprep.mubr.msk.bf16.mxu1 %vm433_vm0, %v1780_v16 }
  0x31   : > { %1683 = vmatmul.mubr.msk.bf16.gmra.mxu0 %vm433_vm0, %v1781_v17  ;;  %1715 = vmatmul.mubr.msk.bf16.gmra.mxu1 %vm433_vm0, %v1782_v18 }
  0x32   : > { %1686 = vmatprep.mubr.msk.bf16.mxu0 %vm433_vm0, %v1783_v19  ;;  %1718 = vmatprep.mubr.msk.bf16.mxu1 %vm433_vm0, %v1784_v20 }
  0x39   : > { %1687 = vmatmul.mubr.msk.bf16.gmra.mxu0 %vm433_vm0, %v1785_v21  ;;  %1719 = vmatmul.mubr.msk.bf16.gmra.mxu1 %vm433_vm0, %v1786_v22 }
  0x3a   : > { %1690 = vmatprep.mubr.msk.bf16.mxu0 %vm433_vm0, %v1787_v23  ;;  %1722 = vmatprep.mubr.msk.bf16.mxu1 %vm433_vm0, %v1788_v24 }
  0x41   : > { %1691 = vmatmul.mubr.msk.bf16.gmra.mxu0 %vm433_vm0, %v1789_v25  ;;  %1723 = vmatmul.mubr.msk.bf16.gmra.mxu1 %vm433_vm0, %v1790_v26 }
  0x42   : > { %1694 = vmatprep.mubr.msk.bf16.mxu0 %vm433_vm0, %v1791_v27  ;;  %1726 = vmatprep.mubr.msk.bf16.mxu1 %vm433_vm0, %v1792_v28 }
  0x49   : > { %1695 = vmatmul.mubr.msk.bf16.gmra.mxu0 %vm433_vm0, %v1793_v29  ;;  %1727 = vmatmul.mubr.msk.bf16.gmra.mxu1 %vm433_vm0, %v1794_v30 }
  0x4a   : > { %1698 = vmatprep.mubr.msk.bf16.mxu0 %vm433_vm0, %v1795_v31  ;;  %1730 = vmatprep.mubr.msk.bf16.mxu1 %vm433_vm0, %v1796_v32 }
  0x51   : > { %1699 = vmatmul.mubr.msk.bf16.gmra.mxu0 %vm433_vm0, %v1797_v33  ;;  %1731 = vmatmul.mubr.msk.bf16.gmra.mxu1 %vm433_vm0, %v1798_v34 }
  0xd9   : > { %v1672_v35 = vpop.f32.mrf.mxu0  ;;  %v1704_v36 = vpop.f32.mrf.mxu1 }
  0xda   : > { %vm821_vm1 = vcmp.ge.f32.partialorder %v1672_v35, 0.0  ;;  %v885_v37 = vmul.f32 0.2, %v1672_v35  ;;  %vm853_vm2 = vcmp.ge.f32.partialorder %v1704_v36, 0.0  ;;  %v917_v38 = vmul.f32 0.2, %v1704_v36 }
  0xdb   : > { %v564_v39 = vpop.f32.mrf.mxu0  ;;  %v692_v40 = vpop.f32.mrf.mxu1 }
  0xdc   : > { %v949_v41 = vsel %vm821_vm1, %v1672_v35, %v885_v37  ;;  %v981_v42 = vsel %vm853_vm2, %v1704_v36, %v917_v38  ;;  %vm819_vm4 = vcmp.ge.f32.partialorder %v564_v39, 0.0  ;;  %v883_v43 = vmul.f32 0.2, %v564_v39 }
  0xdd   : > { %v1567_v44 = vpack.c.bf16 %v949_v41, %v949_v41  ;;  %v1599_v45 = vpack.c.bf16 %v981_v42, %v981_v42  ;;  %vm851_vm5 = vcmp.ge.f32.partialorder %v692_v40, 0.0  ;;  %v915_v46 = vmul.f32 0.2, %v692_v40  ;;  %v1673_v47 = vpop.f32.mrf.mxu0  ;;  %v1705_v48 = vpop.f32.mrf.mxu1 }
  0xde   : > { %v947_v49 = vsel %vm819_vm4, %v564_v39, %v883_v43  ;;  %vm822_vm6 = vcmp.ge.f32.partialorder %v1673_v47, 0.0  ;;  %v886_v50 = vmul.f32 0.2, %v1673_v47  ;;  %vm854_vm7 = vcmp.ge.f32.partialorder %v1705_v48, 0.0 }
  0xdf   : > { %1270 = vst.msk [vmem:[%s1944_s26 + $0x8] sm:$0xf] %vm1267_vm3, %v1567_v44  ;;  %1302 = vst.msk [vmem:[%s1944_s26 + $0x88] sm:$0xf] %vm1267_vm3, %v1599_v45  ;;  %v1565_v51 = vpack.c.bf16 %v947_v49, %v947_v49  ;;  %v979_v52 = vsel %vm851_vm5, %v692_v40, %v915_v46  ;;  %v918_v53 = vmul.f32 0.2, %v1705_v48  ;;  %v567_v54 = vpop.f32.mrf.mxu0  ;;  %v695_v55 = vpop.f32.mrf.mxu1 }
  0xe0   : > { %v1597_v56 = vpack.c.bf16 %v979_v52, %v979_v52  ;;  %v950_v57 = vsel %vm822_vm6, %v1673_v47, %v886_v50  ;;  %vm820_vm8 = vcmp.ge.f32.partialorder %v567_v54, 0.0  ;;  %v884_v58 = vmul.f32 0.2, %v567_v54 }
  0xe1   : > { %1268 = vst.msk [vmem:[%s1944_s26] sm:$0xf] %vm1267_vm3, %v1565_v51  ;;  %v1568_v59 = vpack.c.bf16 %v950_v57, %v950_v57  ;;  %v982_v60 = vsel %vm854_vm7, %v1705_v48, %v918_v53  ;;  %vm852_vm9 = vcmp.ge.f32.partialorder %v695_v55, 0.0  ;;  %v916_v61 = vmul.f32 0.2, %v695_v55  ;;  %v1676_v62 = vpop.f32.mrf.mxu0  ;;  %v1708_v63 = vpop.f32.mrf.mxu1 }
  0xe2   : > { %1300 = vst.msk [vmem:[%s1944_s26 + $0x80] sm:$0xf] %vm1267_vm3, %v1597_v56  ;;  %v1600_v0 = vpack.c.bf16 %v982_v60, %v982_v60  ;;  %v948_v1 = vsel %vm820_vm8, %v567_v54, %v884_v58  ;;  %vm825_vm10 = vcmp.ge.f32.partialorder %v1676_v62, 0.0  ;;  %v889_v2 = vmul.f32 0.2, %v1676_v62 }
  0xe3   : > { %1271 = vst.msk [vmem:[%s1944_s26 + $0xc] sm:$0xf] %vm1267_vm3, %v1568_v59  ;;  %v1566_v3 = vpack.c.bf16 %v948_v1, %v948_v1  ;;  %v980_v4 = vsel %vm852_vm9, %v695_v55, %v916_v61  ;;  %vm857_vm11 = vcmp.ge.f32.partialorder %v1708_v63, 0.0  ;;  %v921_v5 = vmul.f32 0.2, %v1708_v63  ;;  %v580_v6 = vpop.f32.mrf.mxu0  ;;  %v708_v7 = vpop.f32.mrf.mxu1 }
  0xe4   : > { %1303 = vst.msk [vmem:[%s1944_s26 + $0x8c] sm:$0xf] %vm1267_vm3, %v1600_v0  ;;  %v1598_v8 = vpack.c.bf16 %v980_v4, %v980_v4  ;;  %v953_v9 = vsel %vm825_vm10, %v1676_v62, %v889_v2  ;;  %vm823_vm12 = vcmp.ge.f32.partialorder %v580_v6, 0.0  ;;  %v887_v10 = vmul.f32 0.2, %v580_v6 }
  0xe5   : > { %1269 = vst.msk [vmem:[%s1944_s26 + $0x4] sm:$0xf] %vm1267_vm3, %v1566_v3  ;;  %v1571_v11 = vpack.c.bf16 %v953_v9, %v953_v9  ;;  %v985_v12 = vsel %vm857_vm11, %v1708_v63, %v921_v5  ;;  %vm855_vm13 = vcmp.ge.f32.partialorder %v708_v7, 0.0  ;;  %v919_v13 = vmul.f32 0.2, %v708_v7  ;;  %v1677_v14 = vpop.f32.mrf.mxu0  ;;  %v1709_v15 = vpop.f32.mrf.mxu1 }
  0xe6   : > { %1301 = vst.msk [vmem:[%s1944_s26 + $0x84] sm:$0xf] %vm1267_vm3, %v1598_v8  ;;  %v1603_v16 = vpack.c.bf16 %v985_v12, %v985_v12  ;;  %v951_v17 = vsel %vm823_vm12, %v580_v6, %v887_v10  ;;  %vm826_vm14 = vcmp.ge.f32.partialorder %v1677_v14, 0.0  ;;  %v890_v18 = vmul.f32 0.2, %v1677_v14 }
  0xe7   : > { %1274 = vst.msk [vmem:[%s1944_s26 + $0x18] sm:$0xf] %vm1267_vm3, %v1571_v11  ;;  %v1569_v19 = vpack.c.bf16 %v951_v17, %v951_v17  ;;  %v983_v20 = vsel %vm855_vm13, %v708_v7, %v919_v13  ;;  %vm858_vm15 = vcmp.ge.f32.partialorder %v1709_v15, 0.0  ;;  %v922_v21 = vmul.f32 0.2, %v1709_v15  ;;  %v583_v22 = vpop.f32.mrf.mxu0  ;;  %v711_v23 = vpop.f32.mrf.mxu1 }
  0xe8   : > { %1306 = vst.msk [vmem:[%s1944_s26 + $0x98] sm:$0xf] %vm1267_vm3, %v1603_v16  ;;  %v1601_v24 = vpack.c.bf16 %v983_v20, %v983_v20  ;;  %v954_v25 = vsel %vm826_vm14, %v1677_v14, %v890_v18  ;;  %vm824_vm0 = vcmp.ge.f32.partialorder %v583_v22, 0.0  ;;  %v888_v26 = vmul.f32 0.2, %v583_v22 }
  0xe9   : > { %1272 = vst.msk [vmem:[%s1944_s26 + $0x10] sm:$0xf] %vm1267_vm3, %v1569_v19  ;;  %v1572_v27 = vpack.c.bf16 %v954_v25, %v954_v25  ;;  %v986_v28 = vsel %vm858_vm15, %v1709_v15, %v922_v21  ;;  %vm856_vm1 = vcmp.ge.f32.partialorder %v711_v23, 0.0  ;;  %v920_v29 = vmul.f32 0.2, %v711_v23  ;;  %v1680_v30 = vpop.f32.mrf.mxu0  ;;  %v1712_v31 = vpop.f32.mrf.mxu1 }
  0xea   : > { %1304 = vst.msk [vmem:[%s1944_s26 + $0x90] sm:$0xf] %vm1267_vm3, %v1601_v24  ;;  %v1604_v32 = vpack.c.bf16 %v986_v28, %v986_v28  ;;  %v952_v33 = vsel %vm824_vm0, %v583_v22, %v888_v26  ;;  %vm829_vm2 = vcmp.ge.f32.partialorder %v1680_v30, 0.0  ;;  %v893_v34 = vmul.f32 0.2, %v1680_v30 }
  0xeb   : > { %1275 = vst.msk [vmem:[%s1944_s26 + $0x1c] sm:$0xf] %vm1267_vm3, %v1572_v27  ;;  %v1570_v35 = vpack.c.bf16 %v952_v33, %v952_v33  ;;  %v984_v36 = vsel %vm856_vm1, %v711_v23, %v920_v29  ;;  %vm861_vm4 = vcmp.ge.f32.partialorder %v1712_v31, 0.0  ;;  %v925_v37 = vmul.f32 0.2, %v1712_v31  ;;  %v596_v38 = vpop.f32.mrf.mxu0  ;;  %v724_v39 = vpop.f32.mrf.mxu1 }
  0xec   : > { %1307 = vst.msk [vmem:[%s1944_s26 + $0x9c] sm:$0xf] %vm1267_vm3, %v1604_v32  ;;  %v1602_v40 = vpack.c.bf16 %v984_v36, %v984_v36  ;;  %v957_v41 = vsel %vm829_vm2, %v1680_v30, %v893_v34  ;;  %vm827_vm5 = vcmp.ge.f32.partialorder %v596_v38, 0.0  ;;  %v891_v42 = vmul.f32 0.2, %v596_v38 }
  0xed   : > { %1273 = vst.msk [vmem:[%s1944_s26 + $0x14] sm:$0xf] %vm1267_vm3, %v1570_v35  ;;  %v1575_v43 = vpack.c.bf16 %v957_v41, %v957_v41  ;;  %v989_v44 = vsel %vm861_vm4, %v1712_v31, %v925_v37  ;;  %vm859_vm6 = vcmp.ge.f32.partialorder %v724_v39, 0.0  ;;  %v923_v45 = vmul.f32 0.2, %v724_v39  ;;  %v1681_v46 = vpop.f32.mrf.mxu0  ;;  %v1713_v47 = vpop.f32.mrf.mxu1 }
  0xee   : > { %1305 = vst.msk [vmem:[%s1944_s26 + $0x94] sm:$0xf] %vm1267_vm3, %v1602_v40  ;;  %v1607_v48 = vpack.c.bf16 %v989_v44, %v989_v44  ;;  %v955_v49 = vsel %vm827_vm5, %v596_v38, %v891_v42  ;;  %vm830_vm7 = vcmp.ge.f32.partialorder %v1681_v46, 0.0  ;;  %v894_v50 = vmul.f32 0.2, %v1681_v46 }
  0xef   : > { %1278 = vst.msk [vmem:[%s1944_s26 + $0x28] sm:$0xf] %vm1267_vm3, %v1575_v43  ;;  %v1573_v51 = vpack.c.bf16 %v955_v49, %v955_v49  ;;  %v987_v52 = vsel %vm859_vm6, %v724_v39, %v923_v45  ;;  %vm862_vm8 = vcmp.ge.f32.partialorder %v1713_v47, 0.0  ;;  %v926_v53 = vmul.f32 0.2, %v1713_v47  ;;  %v599_v54 = vpop.f32.mrf.mxu0  ;;  %v727_v55 = vpop.f32.mrf.mxu1 }
  0xf0   : > { %1310 = vst.msk [vmem:[%s1944_s26 + $0xa8] sm:$0xf] %vm1267_vm3, %v1607_v48  ;;  %v1605_v56 = vpack.c.bf16 %v987_v52, %v987_v52  ;;  %v958_v57 = vsel %vm830_vm7, %v1681_v46, %v894_v50  ;;  %vm828_vm9 = vcmp.ge.f32.partialorder %v599_v54, 0.0  ;;  %v892_v58 = vmul.f32 0.2, %v599_v54 }
  0xf1   : > { %1276 = vst.msk [vmem:[%s1944_s26 + $0x20] sm:$0xf] %vm1267_vm3, %v1573_v51  ;;  %v1576_v59 = vpack.c.bf16 %v958_v57, %v958_v57  ;;  %v990_v60 = vsel %vm862_vm8, %v1713_v47, %v926_v53  ;;  %vm860_vm10 = vcmp.ge.f32.partialorder %v727_v55, 0.0  ;;  %v924_v61 = vmul.f32 0.2, %v727_v55  ;;  %v1684_v62 = vpop.f32.mrf.mxu0  ;;  %v1716_v63 = vpop.f32.mrf.mxu1 }
  0xf2   : > { %1308 = vst.msk [vmem:[%s1944_s26 + $0xa0] sm:$0xf] %vm1267_vm3, %v1605_v56  ;;  %v1608_v0 = vpack.c.bf16 %v990_v60, %v990_v60  ;;  %v956_v1 = vsel %vm828_vm9, %v599_v54, %v892_v58  ;;  %vm833_vm11 = vcmp.ge.f32.partialorder %v1684_v62, 0.0  ;;  %v897_v2 = vmul.f32 0.2, %v1684_v62 }
  0xf3   : > { %1279 = vst.msk [vmem:[%s1944_s26 + $0x2c] sm:$0xf] %vm1267_vm3, %v1576_v59  ;;  %v1574_v3 = vpack.c.bf16 %v956_v1, %v956_v1  ;;  %v988_v4 = vsel %vm860_vm10, %v727_v55, %v924_v61  ;;  %vm865_vm12 = vcmp.ge.f32.partialorder %v1716_v63, 0.0  ;;  %v929_v5 = vmul.f32 0.2, %v1716_v63  ;;  %v612_v6 = vpop.f32.mrf.mxu0  ;;  %v740_v7 = vpop.f32.mrf.mxu1 }
  0xf4   : > { %1311 = vst.msk [vmem:[%s1944_s26 + $0xac] sm:$0xf] %vm1267_vm3, %v1608_v0  ;;  %v1606_v8 = vpack.c.bf16 %v988_v4, %v988_v4  ;;  %v961_v9 = vsel %vm833_vm11, %v1684_v62, %v897_v2  ;;  %vm831_vm13 = vcmp.ge.f32.partialorder %v612_v6, 0.0  ;;  %v895_v10 = vmul.f32 0.2, %v612_v6 }
  0xf5   : > { %1277 = vst.msk [vmem:[%s1944_s26 + $0x24] sm:$0xf] %vm1267_vm3, %v1574_v3  ;;  %v1579_v11 = vpack.c.bf16 %v961_v9, %v961_v9  ;;  %v993_v12 = vsel %vm865_vm12, %v1716_v63, %v929_v5  ;;  %vm863_vm14 = vcmp.ge.f32.partialorder %v740_v7, 0.0  ;;  %v927_v13 = vmul.f32 0.2, %v740_v7  ;;  %v1685_v14 = vpop.f32.mrf.mxu0  ;;  %v1717_v15 = vpop.f32.mrf.mxu1 }
  0xf6   : > { %1309 = vst.msk [vmem:[%s1944_s26 + $0xa4] sm:$0xf] %vm1267_vm3, %v1606_v8  ;;  %v1611_v16 = vpack.c.bf16 %v993_v12, %v993_v12  ;;  %v959_v17 = vsel %vm831_vm13, %v612_v6, %v895_v10  ;;  %vm834_vm15 = vcmp.ge.f32.partialorder %v1685_v14, 0.0  ;;  %v898_v18 = vmul.f32 0.2, %v1685_v14 }
  0xf7   : > { %1282 = vst.msk [vmem:[%s1944_s26 + $0x38] sm:$0xf] %vm1267_vm3, %v1579_v11  ;;  %v1577_v19 = vpack.c.bf16 %v959_v17, %v959_v17  ;;  %v991_v20 = vsel %vm863_vm14, %v740_v7, %v927_v13  ;;  %vm866_vm0 = vcmp.ge.f32.partialorder %v1717_v15, 0.0  ;;  %v930_v21 = vmul.f32 0.2, %v1717_v15  ;;  %v615_v22 = vpop.f32.mrf.mxu0  ;;  %v743_v23 = vpop.f32.mrf.mxu1 }
  0xf8   : > { %1314 = vst.msk [vmem:[%s1944_s26 + $0xb8] sm:$0xf] %vm1267_vm3, %v1611_v16  ;;  %v1609_v24 = vpack.c.bf16 %v991_v20, %v991_v20  ;;  %v962_v25 = vsel %vm834_vm15, %v1685_v14, %v898_v18  ;;  %vm832_vm1 = vcmp.ge.f32.partialorder %v615_v22, 0.0  ;;  %v896_v26 = vmul.f32 0.2, %v615_v22 }
  0xf9   : > { %1280 = vst.msk [vmem:[%s1944_s26 + $0x30] sm:$0xf] %vm1267_vm3, %v1577_v19  ;;  %v1580_v27 = vpack.c.bf16 %v962_v25, %v962_v25  ;;  %v994_v28 = vsel %vm866_vm0, %v1717_v15, %v930_v21  ;;  %vm864_vm2 = vcmp.ge.f32.partialorder %v743_v23, 0.0  ;;  %v928_v29 = vmul.f32 0.2, %v743_v23  ;;  %v1688_v30 = vpop.f32.mrf.mxu0  ;;  %v1720_v31 = vpop.f32.mrf.mxu1 }
  0xfa   : > { %1312 = vst.msk [vmem:[%s1944_s26 + $0xb0] sm:$0xf] %vm1267_vm3, %v1609_v24  ;;  %v1612_v32 = vpack.c.bf16 %v994_v28, %v994_v28  ;;  %v960_v33 = vsel %vm832_vm1, %v615_v22, %v896_v26  ;;  %vm837_vm4 = vcmp.ge.f32.partialorder %v1688_v30, 0.0  ;;  %v901_v34 = vmul.f32 0.2, %v1688_v30 }
  0xfb   : > { %1283 = vst.msk [vmem:[%s1944_s26 + $0x3c] sm:$0xf] %vm1267_vm3, %v1580_v27  ;;  %v1578_v35 = vpack.c.bf16 %v960_v33, %v960_v33  ;;  %v992_v36 = vsel %vm864_vm2, %v743_v23, %v928_v29  ;;  %vm869_vm5 = vcmp.ge.f32.partialorder %v1720_v31, 0.0  ;;  %v933_v37 = vmul.f32 0.2, %v1720_v31  ;;  %v628_v38 = vpop.f32.mrf.mxu0  ;;  %v756_v39 = vpop.f32.mrf.mxu1 }
  0xfc   : > { %1315 = vst.msk [vmem:[%s1944_s26 + $0xbc] sm:$0xf] %vm1267_vm3, %v1612_v32  ;;  %v1610_v40 = vpack.c.bf16 %v992_v36, %v992_v36  ;;  %v965_v41 = vsel %vm837_vm4, %v1688_v30, %v901_v34  ;;  %vm835_vm6 = vcmp.ge.f32.partialorder %v628_v38, 0.0  ;;  %v899_v42 = vmul.f32 0.2, %v628_v38 }
  0xfd   : > { %1281 = vst.msk [vmem:[%s1944_s26 + $0x34] sm:$0xf] %vm1267_vm3, %v1578_v35  ;;  %v1583_v43 = vpack.c.bf16 %v965_v41, %v965_v41  ;;  %v997_v44 = vsel %vm869_vm5, %v1720_v31, %v933_v37  ;;  %vm867_vm7 = vcmp.ge.f32.partialorder %v756_v39, 0.0  ;;  %v931_v45 = vmul.f32 0.2, %v756_v39  ;;  %v1689_v46 = vpop.f32.mrf.mxu0  ;;  %v1721_v47 = vpop.f32.mrf.mxu1 }
  0xfe   : > { %1313 = vst.msk [vmem:[%s1944_s26 + $0xb4] sm:$0xf] %vm1267_vm3, %v1610_v40  ;;  %v1615_v48 = vpack.c.bf16 %v997_v44, %v997_v44  ;;  %v963_v49 = vsel %vm835_vm6, %v628_v38, %v899_v42  ;;  %vm838_vm8 = vcmp.ge.f32.partialorder %v1689_v46, 0.0  ;;  %v902_v50 = vmul.f32 0.2, %v1689_v46 }
  0xff   : > { %1286 = vst.msk [vmem:[%s1944_s26 + $0x48] sm:$0xf] %vm1267_vm3, %v1583_v43  ;;  %v1581_v51 = vpack.c.bf16 %v963_v49, %v963_v49  ;;  %v995_v52 = vsel %vm867_vm7, %v756_v39, %v931_v45  ;;  %vm870_vm9 = vcmp.ge.f32.partialorder %v1721_v47, 0.0  ;;  %v934_v53 = vmul.f32 0.2, %v1721_v47  ;;  %v631_v54 = vpop.f32.mrf.mxu0  ;;  %v759_v55 = vpop.f32.mrf.mxu1 }
 0x100   : > { %1318 = vst.msk [vmem:[%s1944_s26 + $0xc8] sm:$0xf] %vm1267_vm3, %v1615_v48  ;;  %v1613_v56 = vpack.c.bf16 %v995_v52, %v995_v52  ;;  %v966_v57 = vsel %vm838_vm8, %v1689_v46, %v902_v50  ;;  %vm836_vm10 = vcmp.ge.f32.partialorder %v631_v54, 0.0  ;;  %v900_v58 = vmul.f32 0.2, %v631_v54 }
 0x101   : > { %1284 = vst.msk [vmem:[%s1944_s26 + $0x40] sm:$0xf] %vm1267_vm3, %v1581_v51  ;;  %v1584_v59 = vpack.c.bf16 %v966_v57, %v966_v57  ;;  %v998_v60 = vsel %vm870_vm9, %v1721_v47, %v934_v53  ;;  %vm868_vm11 = vcmp.ge.f32.partialorder %v759_v55, 0.0  ;;  %v932_v61 = vmul.f32 0.2, %v759_v55  ;;  %v1692_v62 = vpop.f32.mrf.mxu0  ;;  %v1724_v63 = vpop.f32.mrf.mxu1 }
 0x102   : > { %1316 = vst.msk [vmem:[%s1944_s26 + $0xc0] sm:$0xf] %vm1267_vm3, %v1613_v56  ;;  %v1616_v0 = vpack.c.bf16 %v998_v60, %v998_v60  ;;  %v964_v1 = vsel %vm836_vm10, %v631_v54, %v900_v58  ;;  %vm841_vm12 = vcmp.ge.f32.partialorder %v1692_v62, 0.0  ;;  %v905_v2 = vmul.f32 0.2, %v1692_v62 }
 0x103   : > { %1287 = vst.msk [vmem:[%s1944_s26 + $0x4c] sm:$0xf] %vm1267_vm3, %v1584_v59  ;;  %v1582_v3 = vpack.c.bf16 %v964_v1, %v964_v1  ;;  %v996_v4 = vsel %vm868_vm11, %v759_v55, %v932_v61  ;;  %vm873_vm13 = vcmp.ge.f32.partialorder %v1724_v63, 0.0  ;;  %v937_v5 = vmul.f32 0.2, %v1724_v63  ;;  %v644_v6 = vpop.f32.mrf.mxu0  ;;  %v772_v7 = vpop.f32.mrf.mxu1 }
 0x104   : > { %1319 = vst.msk [vmem:[%s1944_s26 + $0xcc] sm:$0xf] %vm1267_vm3, %v1616_v0  ;;  %v1614_v8 = vpack.c.bf16 %v996_v4, %v996_v4  ;;  %v969_v9 = vsel %vm841_vm12, %v1692_v62, %v905_v2  ;;  %vm839_vm14 = vcmp.ge.f32.partialorder %v644_v6, 0.0  ;;  %v903_v10 = vmul.f32 0.2, %v644_v6 }
 0x105   : > { %1285 = vst.msk [vmem:[%s1944_s26 + $0x44] sm:$0xf] %vm1267_vm3, %v1582_v3  ;;  %v1587_v11 = vpack.c.bf16 %v969_v9, %v969_v9  ;;  %v1001_v12 = vsel %vm873_vm13, %v1724_v63, %v937_v5  ;;  %vm871_vm15 = vcmp.ge.f32.partialorder %v772_v7, 0.0  ;;  %v935_v13 = vmul.f32 0.2, %v772_v7  ;;  %v1693_v14 = vpop.f32.mrf.mxu0  ;;  %v1725_v15 = vpop.f32.mrf.mxu1 }
 0x106   : > { %1317 = vst.msk [vmem:[%s1944_s26 + $0xc4] sm:$0xf] %vm1267_vm3, %v1614_v8  ;;  %v1619_v16 = vpack.c.bf16 %v1001_v12, %v1001_v12  ;;  %v967_v17 = vsel %vm839_vm14, %v644_v6, %v903_v10  ;;  %vm842_vm0 = vcmp.ge.f32.partialorder %v1693_v14, 0.0  ;;  %v906_v18 = vmul.f32 0.2, %v1693_v14 }
 0x107   : > { %1290 = vst.msk [vmem:[%s1944_s26 + $0x58] sm:$0xf] %vm1267_vm3, %v1587_v11  ;;  %v1585_v19 = vpack.c.bf16 %v967_v17, %v967_v17  ;;  %v999_v20 = vsel %vm871_vm15, %v772_v7, %v935_v13  ;;  %vm874_vm1 = vcmp.ge.f32.partialorder %v1725_v15, 0.0  ;;  %v938_v21 = vmul.f32 0.2, %v1725_v15  ;;  %v647_v22 = vpop.f32.mrf.mxu0  ;;  %v775_v23 = vpop.f32.mrf.mxu1 }
 0x108   : > { %1322 = vst.msk [vmem:[%s1944_s26 + $0xd8] sm:$0xf] %vm1267_vm3, %v1619_v16  ;;  %v1617_v24 = vpack.c.bf16 %v999_v20, %v999_v20  ;;  %v970_v25 = vsel %vm842_vm0, %v1693_v14, %v906_v18  ;;  %vm840_vm2 = vcmp.ge.f32.partialorder %v647_v22, 0.0  ;;  %v904_v26 = vmul.f32 0.2, %v647_v22 }
 0x109   : > { %1288 = vst.msk [vmem:[%s1944_s26 + $0x50] sm:$0xf] %vm1267_vm3, %v1585_v19  ;;  %v1588_v27 = vpack.c.bf16 %v970_v25, %v970_v25  ;;  %v1002_v28 = vsel %vm874_vm1, %v1725_v15, %v938_v21  ;;  %vm872_vm4 = vcmp.ge.f32.partialorder %v775_v23, 0.0  ;;  %v936_v29 = vmul.f32 0.2, %v775_v23  ;;  %v1696_v30 = vpop.f32.mrf.mxu0  ;;  %v1728_v31 = vpop.f32.mrf.mxu1 }
 0x10a   : > { %1320 = vst.msk [vmem:[%s1944_s26 + $0xd0] sm:$0xf] %vm1267_vm3, %v1617_v24  ;;  %v1620_v32 = vpack.c.bf16 %v1002_v28, %v1002_v28  ;;  %v968_v33 = vsel %vm840_vm2, %v647_v22, %v904_v26  ;;  %vm845_vm5 = vcmp.ge.f32.partialorder %v1696_v30, 0.0  ;;  %v909_v34 = vmul.f32 0.2, %v1696_v30 }
 0x10b   : > { %1291 = vst.msk [vmem:[%s1944_s26 + $0x5c] sm:$0xf] %vm1267_vm3, %v1588_v27  ;;  %v1586_v35 = vpack.c.bf16 %v968_v33, %v968_v33  ;;  %v1000_v36 = vsel %vm872_vm4, %v775_v23, %v936_v29  ;;  %vm877_vm6 = vcmp.ge.f32.partialorder %v1728_v31, 0.0  ;;  %v941_v37 = vmul.f32 0.2, %v1728_v31  ;;  %v660_v38 = vpop.f32.mrf.mxu0  ;;  %v788_v39 = vpop.f32.mrf.mxu1 }
 0x10c   : > { %1323 = vst.msk [vmem:[%s1944_s26 + $0xdc] sm:$0xf] %vm1267_vm3, %v1620_v32  ;;  %v1618_v40 = vpack.c.bf16 %v1000_v36, %v1000_v36  ;;  %v973_v41 = vsel %vm845_vm5, %v1696_v30, %v909_v34  ;;  %vm843_vm7 = vcmp.ge.f32.partialorder %v660_v38, 0.0  ;;  %v907_v42 = vmul.f32 0.2, %v660_v38 }
 0x10d   : > { %1289 = vst.msk [vmem:[%s1944_s26 + $0x54] sm:$0xf] %vm1267_vm3, %v1586_v35  ;;  %v1591_v43 = vpack.c.bf16 %v973_v41, %v973_v41  ;;  %v1005_v44 = vsel %vm877_vm6, %v1728_v31, %v941_v37  ;;  %vm875_vm8 = vcmp.ge.f32.partialorder %v788_v39, 0.0  ;;  %v939_v45 = vmul.f32 0.2, %v788_v39  ;;  %v1697_v46 = vpop.f32.mrf.mxu0  ;;  %v1729_v47 = vpop.f32.mrf.mxu1 }
 0x10e   : > { %1321 = vst.msk [vmem:[%s1944_s26 + $0xd4] sm:$0xf] %vm1267_vm3, %v1618_v40  ;;  %v1623_v48 = vpack.c.bf16 %v1005_v44, %v1005_v44  ;;  %v971_v49 = vsel %vm843_vm7, %v660_v38, %v907_v42  ;;  %vm846_vm9 = vcmp.ge.f32.partialorder %v1697_v46, 0.0  ;;  %v910_v50 = vmul.f32 0.2, %v1697_v46 }
 0x10f   : > { %1294 = vst.msk [vmem:[%s1944_s26 + $0x68] sm:$0xf] %vm1267_vm3, %v1591_v43  ;;  %v1589_v51 = vpack.c.bf16 %v971_v49, %v971_v49  ;;  %v1003_v52 = vsel %vm875_vm8, %v788_v39, %v939_v45  ;;  %vm878_vm10 = vcmp.ge.f32.partialorder %v1729_v47, 0.0  ;;  %v942_v53 = vmul.f32 0.2, %v1729_v47  ;;  %v663_v54 = vpop.f32.mrf.mxu0  ;;  %v791_v55 = vpop.f32.mrf.mxu1 }
 0x110   : > { %1326 = vst.msk [vmem:[%s1944_s26 + $0xe8] sm:$0xf] %vm1267_vm3, %v1623_v48  ;;  %v1621_v56 = vpack.c.bf16 %v1003_v52, %v1003_v52  ;;  %v974_v57 = vsel %vm846_vm9, %v1697_v46, %v910_v50  ;;  %vm844_vm11 = vcmp.ge.f32.partialorder %v663_v54, 0.0  ;;  %v908_v58 = vmul.f32 0.2, %v663_v54 }
 0x111   : > { %1292 = vst.msk [vmem:[%s1944_s26 + $0x60] sm:$0xf] %vm1267_vm3, %v1589_v51  ;;  %v1592_v59 = vpack.c.bf16 %v974_v57, %v974_v57  ;;  %v1006_v60 = vsel %vm878_vm10, %v1729_v47, %v942_v53  ;;  %vm876_vm12 = vcmp.ge.f32.partialorder %v791_v55, 0.0  ;;  %v940_v61 = vmul.f32 0.2, %v791_v55  ;;  %v1700_v62 = vpop.f32.mrf.mxu0  ;;  %v1732_v63 = vpop.f32.mrf.mxu1 }
 0x112   : > { %1324 = vst.msk [vmem:[%s1944_s26 + $0xe0] sm:$0xf] %vm1267_vm3, %v1621_v56  ;;  %v1624_v0 = vpack.c.bf16 %v1006_v60, %v1006_v60  ;;  %v972_v1 = vsel %vm844_vm11, %v663_v54, %v908_v58  ;;  %vm849_vm13 = vcmp.ge.f32.partialorder %v1700_v62, 0.0  ;;  %v913_v2 = vmul.f32 0.2, %v1700_v62 }
 0x113   : > { %1295 = vst.msk [vmem:[%s1944_s26 + $0x6c] sm:$0xf] %vm1267_vm3, %v1592_v59  ;;  %v1590_v3 = vpack.c.bf16 %v972_v1, %v972_v1  ;;  %v1004_v4 = vsel %vm876_vm12, %v791_v55, %v940_v61  ;;  %vm881_vm14 = vcmp.ge.f32.partialorder %v1732_v63, 0.0  ;;  %v945_v5 = vmul.f32 0.2, %v1732_v63  ;;  %v676_v6 = vpop.f32.mrf.mxu0  ;;  %v804_v7 = vpop.f32.mrf.mxu1 }
 0x114   : > { %1327 = vst.msk [vmem:[%s1944_s26 + $0xec] sm:$0xf] %vm1267_vm3, %v1624_v0  ;;  %v1622_v8 = vpack.c.bf16 %v1004_v4, %v1004_v4  ;;  %v977_v9 = vsel %vm849_vm13, %v1700_v62, %v913_v2  ;;  %vm847_vm15 = vcmp.ge.f32.partialorder %v676_v6, 0.0  ;;  %v911_v10 = vmul.f32 0.2, %v676_v6 }
 0x115   : > { %1293 = vst.msk [vmem:[%s1944_s26 + $0x64] sm:$0xf] %vm1267_vm3, %v1590_v3  ;;  %v1595_v11 = vpack.c.bf16 %v977_v9, %v977_v9  ;;  %v1009_v12 = vsel %vm881_vm14, %v1732_v63, %v945_v5  ;;  %vm879_vm0 = vcmp.ge.f32.partialorder %v804_v7, 0.0  ;;  %v943_v13 = vmul.f32 0.2, %v804_v7  ;;  %v1701_v14 = vpop.f32.mrf.mxu0  ;;  %v1733_v15 = vpop.f32.mrf.mxu1 }
 0x116   : > { %1325 = vst.msk [vmem:[%s1944_s26 + $0xe4] sm:$0xf] %vm1267_vm3, %v1622_v8  ;;  %v1627_v16 = vpack.c.bf16 %v1009_v12, %v1009_v12  ;;  %v975_v17 = vsel %vm847_vm15, %v676_v6, %v911_v10  ;;  %vm850_vm1 = vcmp.ge.f32.partialorder %v1701_v14, 0.0  ;;  %v914_v18 = vmul.f32 0.2, %v1701_v14 }
 0x117   : > { %1298 = vst.msk [vmem:[%s1944_s26 + $0x78] sm:$0xf] %vm1267_vm3, %v1595_v11  ;;  %v1593_v19 = vpack.c.bf16 %v975_v17, %v975_v17  ;;  %v1007_v20 = vsel %vm879_vm0, %v804_v7, %v943_v13  ;;  %vm882_vm2 = vcmp.ge.f32.partialorder %v1733_v15, 0.0  ;;  %v946_v21 = vmul.f32 0.2, %v1733_v15  ;;  %v679_v22 = vpop.f32.mrf.mxu0  ;;  %v807_v23 = vpop.f32.mrf.mxu1 }
 0x118   : > { %1330 = vst.msk [vmem:[%s1944_s26 + $0xf8] sm:$0xf] %vm1267_vm3, %v1627_v16  ;;  %v1625_v24 = vpack.c.bf16 %v1007_v20, %v1007_v20  ;;  %v978_v25 = vsel %vm850_vm1, %v1701_v14, %v914_v18  ;;  %vm848_vm4 = vcmp.ge.f32.partialorder %v679_v22, 0.0  ;;  %v912_v26 = vmul.f32 0.2, %v679_v22 }
 0x119   : > { %1296 = vst.msk [vmem:[%s1944_s26 + $0x70] sm:$0xf] %vm1267_vm3, %v1593_v19  ;;  %v1596_v27 = vpack.c.bf16 %v978_v25, %v978_v25  ;;  %v1010_v28 = vsel %vm882_vm2, %v1733_v15, %v946_v21  ;;  %vm880_vm5 = vcmp.ge.f32.partialorder %v807_v23, 0.0  ;;  %v944_v29 = vmul.f32 0.2, %v807_v23 }
 0x11a   : > { %1328 = vst.msk [vmem:[%s1944_s26 + $0xf0] sm:$0xf] %vm1267_vm3, %v1625_v24  ;;  %v1628_v30 = vpack.c.bf16 %v1010_v28, %v1010_v28  ;;  %v976_v31 = vsel %vm848_vm4, %v679_v22, %v912_v26 }
 0x11b   : > { %1299 = vst.msk [vmem:[%s1944_s26 + $0x7c] sm:$0xf] %vm1267_vm3, %v1596_v27  ;;  %v1594_v32 = vpack.c.bf16 %v976_v31, %v976_v31  ;;  %v1008_v33 = vsel %vm880_vm5, %v807_v23, %v944_v29 }
 0x11c   : > { %1331 = vst.msk [vmem:[%s1944_s26 + $0xfc] sm:$0xf] %vm1267_vm3, %v1628_v30  ;;  %v1626_v34 = vpack.c.bf16 %v1008_v33, %v1008_v33 }
 0x11d   : > { %1297 = vst.msk [vmem:[%s1944_s26 + $0x74] sm:$0xf] %vm1267_vm3, %v1594_v32 }
 0x11e   : > { %1329 = vst.msk [vmem:[%s1944_s26 + $0xf4] sm:$0xf] %vm1267_vm3, %v1626_v34 }
 0x11f PF: > { %s12_s11 = sadd.s32 1, %s1821_s11   ;;  %s2086_s9 = smov %s1817_s10 }
 0x120   : > { %p9_p5 = scmp.ge.s32.totalorder %s12_s11, 6   ;;  %s2087_s10 = smov %s2089_s12 }
 0x122   :  { %11 = sbr.rel (!%p9_p5) target bundleno = 2 (0x2), region = 61 }

// kernel: discriminator_forward.9
= control target key start
LH: loop header
LB: loop body
LE: loop exit
PB: predicated region body
PF: predicated region fallthrough
CT: control target
= control target key end

     0   :  { %s2393_s12 = smov 0   ;;  %s2395_s13 = smov 0   ;;  %s2857_s0 = inlined_call_operand.vmem [shape: bf16[512,1024], index: 0, kind: input, shape index: {}]   ;;  %s2858_s1 = inlined_call_operand.vmem [shape: bf16[1024,128], index: 1, kind: input, shape index: {}]   ;;  %s2859_s2 = inlined_call_operand.vmem [shape: f32[512,128], index: 2, kind: output, shape index: {0}]   ;;  %s2860_s3 = inlined_call_operand.vmem [shape: f32[2,2,128], index: 3, kind: output, shape index: {1}]  }
   0x1   :  { %s2397_s14 = smov 0   ;;  %s2399_s15 = smov 0  }
   0x2   :  { %s2401_s16 = smov 0   ;;  %s2403_s17 = smov 0  }
   0x3   :  { %s2405_s18 = smov 0  }
   0x4 LB: > { %s26_s19 = sadd.s32 1, %s2362_s16  ;;  %s33_s20 = sadd.s32 1, %s2366_s17  ;;  %s2370_s18 = sphi %s2405_s18, %s14_s18   ;;  %s2366_s17 = sphi %s2403_s17, %s2866_s17   ;;  %s2362_s16 = sphi %s2401_s16, %s2865_s16   ;;  %s2358_s15 = sphi %s2399_s15, %s2864_s15   ;;  %s2354_s14 = sphi %s2397_s14, %s2863_s14   ;;  %s2350_s13 = sphi %s2395_s13, %s2862_s13   ;;  %s2346_s12 = sphi %s2393_s12, %s2861_s12  }
   0x5   : > { %p27_p0 = scmp.ge.s32.totalorder %s26_s19, 2  ;;  %p49_p1 = scmp.ne.s32.totalorder %s2350_s13, %s2346_s12 }
   0x6   : > { %p50_p2 = scmp.eq.s32.totalorder %s2370_s18, 0  ;;  %s42_s24 = sadd.s32 1, %s2350_s13 }
   0x7   : > { %s2868_s19 = smov (%p27_p0, %s26_s19), 0  ;;  %s2870_s20 = smov (!%p27_p0, %s33_s20), %s2366_s17 }
   0x8   : > { %p51_p3 = por %p50_p2, %p49_p1  ;;  %p35_p4 = scmp.ge.s32.totalorder %s2870_s20, 2 }
   0x9   : > { %s38_s21 = ssub.s32 %s2362_s16, %s2868_s19  ;;  %p1793_p6 = scmp.ge.s32.totalorder %s2370_s18, 4 }
   0xa   : > { %s2872_s20 = smov (%p35_p4, %s2870_s20), 0 }
   0xb   : > { %s37_s22 = ssub.s32 %s2366_s17, %s2872_s20  ;;  %159 = sbr.rel (%p1793_p6) target bundleno = 55 (0x37), region = 16 }
   0xc   : > { %s39_s23 = sor.u32 %s38_s21, %s37_s22 }
   0xd   : > { %p40_p5 = scmp.eq.s32.totalorder %s39_s23, 0 }
   0xf   : > { %s2444_s25 = scalar_select %p40_p5, %s2350_s13, %s42_s24  }
  0x10   : > { %162 = sbr.rel (!%p51_p3) target bundleno = 55 (0x37), region = 20  ;;  %s164_s26 = sand.u32 (%p51_p3), 1, %s2350_s13  }
  0x11   : > { %s1796_s27 = sshll.u32 (%p51_p3), %s2362_s16, 2  ;;  %s1794_s28 = sshll.u32 (%p51_p3), %s164_s26, 9 }
  0x12   : > { %s1906_s29 = sshll.u32 (%p51_p3), %s2366_s17, 8  ;;  %s2458_s8 = scalar_lea.vmem (%p51_p3), [#allocation2], %s1794_s28 }
  0x13   : > { %s170_s30 = sadd.s32 (%p51_p3), %s1906_s29, %s1796_s27 }
  0x14   : > { %s1798_s4 = sshll.u32 (%p51_p3), %s170_s30, 2 }
  0x15   : > { %s2453_s7 = scalar_lea.vmem %s2857_s0, %s1798_s4 }
  0x16   : > { %v185_v0 = vld [vmem:[%s2453_s7] sm:$0xff]  ;;  %v187_v1 = vld [vmem:[%s2453_s7 + $0x8] sm:$0xff] }
  0x17   : > { %v189_v2 = vld [vmem:[%s2453_s7 + $0x20] sm:$0xff]  ;;  %186 = vst [vmem:[%s2458_s8] sm:$0xff] %v185_v0  ;;  %188 = vst [vmem:[%s2458_s8 + $0x8] sm:$0xff] %v187_v1  ;;  %v191_v3 = vld [vmem:[%s2453_s7 + $0x28] sm:$0xff] }
  0x18   : > { %190 = vst [vmem:[%s2458_s8 + $0x10] sm:$0xff] %v189_v2  ;;  %v193_v4 = vld [vmem:[%s2453_s7 + $0x40] sm:$0xff]  ;;  %v195_v5 = vld [vmem:[%s2453_s7 + $0x48] sm:$0xff]  ;;  %192 = vst [vmem:[%s2458_s8 + $0x18] sm:$0xff] %v191_v3 }
  0x19   : > { %194 = vst [vmem:[%s2458_s8 + $0x20] sm:$0xff] %v193_v4  ;;  %196 = vst [vmem:[%s2458_s8 + $0x28] sm:$0xff] %v195_v5  ;;  %v197_v6 = vld [vmem:[%s2453_s7 + $0x60] sm:$0xff]  ;;  %v199_v7 = vld [vmem:[%s2453_s7 + $0x68] sm:$0xff] }
  0x1a   : > { %v201_v8 = vld [vmem:[%s2453_s7 + $0x80] sm:$0xff]  ;;  %198 = vst [vmem:[%s2458_s8 + $0x30] sm:$0xff] %v197_v6  ;;  %200 = vst [vmem:[%s2458_s8 + $0x38] sm:$0xff] %v199_v7  ;;  %v203_v9 = vld [vmem:[%s2453_s7 + $0x88] sm:$0xff] }
  0x1b   : > { %202 = vst [vmem:[%s2458_s8 + $0x40] sm:$0xff] %v201_v8  ;;  %v205_v10 = vld [vmem:[%s2453_s7 + $0xa0] sm:$0xff]  ;;  %v207_v11 = vld [vmem:[%s2453_s7 + $0xa8] sm:$0xff]  ;;  %204 = vst [vmem:[%s2458_s8 + $0x48] sm:$0xff] %v203_v9 }
  0x1c   : > { %206 = vst [vmem:[%s2458_s8 + $0x50] sm:$0xff] %v205_v10  ;;  %208 = vst [vmem:[%s2458_s8 + $0x58] sm:$0xff] %v207_v11  ;;  %v209_v12 = vld [vmem:[%s2453_s7 + $0xc0] sm:$0xff]  ;;  %v211_v13 = vld [vmem:[%s2453_s7 + $0xc8] sm:$0xff] }
  0x1d   : > { %v213_v14 = vld [vmem:[%s2453_s7 + $0xe0] sm:$0xff]  ;;  %210 = vst [vmem:[%s2458_s8 + $0x60] sm:$0xff] %v209_v12  ;;  %212 = vst [vmem:[%s2458_s8 + $0x68] sm:$0xff] %v211_v13  ;;  %v215_v15 = vld [vmem:[%s2453_s7 + $0xe8] sm:$0xff] }
  0x1e   : > { %214 = vst [vmem:[%s2458_s8 + $0x70] sm:$0xff] %v213_v14  ;;  %v217_v16 = vld [vmem:[%s2453_s7 + $0x100] sm:$0xff]  ;;  %v219_v17 = vld [vmem:[%s2453_s7 + $0x108] sm:$0xff]  ;;  %216 = vst [vmem:[%s2458_s8 + $0x78] sm:$0xff] %v215_v15 }
  0x1f   : > { %218 = vst [vmem:[%s2458_s8 + $0x80] sm:$0xff] %v217_v16  ;;  %220 = vst [vmem:[%s2458_s8 + $0x88] sm:$0xff] %v219_v17  ;;  %v221_v18 = vld [vmem:[%s2453_s7 + $0x120] sm:$0xff]  ;;  %v223_v19 = vld [vmem:[%s2453_s7 + $0x128] sm:$0xff] }
  0x20   : > { %v225_v20 = vld [vmem:[%s2453_s7 + $0x140] sm:$0xff]  ;;  %222 = vst [vmem:[%s2458_s8 + $0x90] sm:$0xff] %v221_v18  ;;  %224 = vst [vmem:[%s2458_s8 + $0x98] sm:$0xff] %v223_v19  ;;  %v227_v21 = vld [vmem:[%s2453_s7 + $0x148] sm:$0xff] }
  0x21   : > { %226 = vst [vmem:[%s2458_s8 + $0xa0] sm:$0xff] %v225_v20  ;;  %v229_v22 = vld [vmem:[%s2453_s7 + $0x160] sm:$0xff]  ;;  %v231_v23 = vld [vmem:[%s2453_s7 + $0x168] sm:$0xff]  ;;  %228 = vst [vmem:[%s2458_s8 + $0xa8] sm:$0xff] %v227_v21 }
  0x22   : > { %230 = vst [vmem:[%s2458_s8 + $0xb0] sm:$0xff] %v229_v22  ;;  %232 = vst [vmem:[%s2458_s8 + $0xb8] sm:$0xff] %v231_v23  ;;  %v233_v24 = vld [vmem:[%s2453_s7 + $0x180] sm:$0xff]  ;;  %v235_v25 = vld [vmem:[%s2453_s7 + $0x188] sm:$0xff] }
  0x23   : > { %v237_v26 = vld [vmem:[%s2453_s7 + $0x1a0] sm:$0xff]  ;;  %234 = vst [vmem:[%s2458_s8 + $0xc0] sm:$0xff] %v233_v24  ;;  %236 = vst [vmem:[%s2458_s8 + $0xc8] sm:$0xff] %v235_v25  ;;  %v239_v27 = vld [vmem:[%s2453_s7 + $0x1a8] sm:$0xff] }
  0x24   : > { %238 = vst [vmem:[%s2458_s8 + $0xd0] sm:$0xff] %v237_v26  ;;  %v241_v28 = vld [vmem:[%s2453_s7 + $0x1c0] sm:$0xff]  ;;  %v243_v29 = vld [vmem:[%s2453_s7 + $0x1c8] sm:$0xff]  ;;  %240 = vst [vmem:[%s2458_s8 + $0xd8] sm:$0xff] %v239_v27 }
  0x25   : > { %242 = vst [vmem:[%s2458_s8 + $0xe0] sm:$0xff] %v241_v28  ;;  %244 = vst [vmem:[%s2458_s8 + $0xe8] sm:$0xff] %v243_v29  ;;  %v245_v30 = vld [vmem:[%s2453_s7 + $0x1e0] sm:$0xff]  ;;  %v247_v31 = vld [vmem:[%s2453_s7 + $0x1e8] sm:$0xff] }
  0x26   : > { %v249_v32 = vld [vmem:[%s2453_s7 + $0x200] sm:$0xff]  ;;  %246 = vst [vmem:[%s2458_s8 + $0xf0] sm:$0xff] %v245_v30  ;;  %248 = vst [vmem:[%s2458_s8 + $0xf8] sm:$0xff] %v247_v31  ;;  %v251_v33 = vld [vmem:[%s2453_s7 + $0x208] sm:$0xff] }
  0x27   : > { %250 = vst [vmem:[%s2458_s8 + $0x100] sm:$0xff] %v249_v32  ;;  %v253_v34 = vld [vmem:[%s2453_s7 + $0x220] sm:$0xff]  ;;  %v255_v35 = vld [vmem:[%s2453_s7 + $0x228] sm:$0xff]  ;;  %252 = vst [vmem:[%s2458_s8 + $0x108] sm:$0xff] %v251_v33 }
  0x28   : > { %254 = vst [vmem:[%s2458_s8 + $0x110] sm:$0xff] %v253_v34  ;;  %256 = vst [vmem:[%s2458_s8 + $0x118] sm:$0xff] %v255_v35  ;;  %v257_v36 = vld [vmem:[%s2453_s7 + $0x240] sm:$0xff]  ;;  %v259_v37 = vld [vmem:[%s2453_s7 + $0x248] sm:$0xff] }
  0x29   : > { %v261_v38 = vld [vmem:[%s2453_s7 + $0x260] sm:$0xff]  ;;  %258 = vst [vmem:[%s2458_s8 + $0x120] sm:$0xff] %v257_v36  ;;  %260 = vst [vmem:[%s2458_s8 + $0x128] sm:$0xff] %v259_v37  ;;  %v263_v39 = vld [vmem:[%s2453_s7 + $0x268] sm:$0xff] }
  0x2a   : > { %262 = vst [vmem:[%s2458_s8 + $0x130] sm:$0xff] %v261_v38  ;;  %v265_v40 = vld [vmem:[%s2453_s7 + $0x280] sm:$0xff]  ;;  %v267_v41 = vld [vmem:[%s2453_s7 + $0x288] sm:$0xff]  ;;  %264 = vst [vmem:[%s2458_s8 + $0x138] sm:$0xff] %v263_v39 }
  0x2b   : > { %266 = vst [vmem:[%s2458_s8 + $0x140] sm:$0xff] %v265_v40  ;;  %268 = vst [vmem:[%s2458_s8 + $0x148] sm:$0xff] %v267_v41  ;;  %v269_v42 = vld [vmem:[%s2453_s7 + $0x2a0] sm:$0xff]  ;;  %v271_v43 = vld [vmem:[%s2453_s7 + $0x2a8] sm:$0xff] }
  0x2c   : > { %v273_v44 = vld [vmem:[%s2453_s7 + $0x2c0] sm:$0xff]  ;;  %270 = vst [vmem:[%s2458_s8 + $0x150] sm:$0xff] %v269_v42  ;;  %272 = vst [vmem:[%s2458_s8 + $0x158] sm:$0xff] %v271_v43  ;;  %v275_v45 = vld [vmem:[%s2453_s7 + $0x2c8] sm:$0xff] }
  0x2d   : > { %274 = vst [vmem:[%s2458_s8 + $0x160] sm:$0xff] %v273_v44  ;;  %v277_v46 = vld [vmem:[%s2453_s7 + $0x2e0] sm:$0xff]  ;;  %v279_v47 = vld [vmem:[%s2453_s7 + $0x2e8] sm:$0xff]  ;;  %276 = vst [vmem:[%s2458_s8 + $0x168] sm:$0xff] %v275_v45 }
  0x2e   : > { %278 = vst [vmem:[%s2458_s8 + $0x170] sm:$0xff] %v277_v46  ;;  %280 = vst [vmem:[%s2458_s8 + $0x178] sm:$0xff] %v279_v47  ;;  %v281_v48 = vld [vmem:[%s2453_s7 + $0x300] sm:$0xff]  ;;  %v283_v49 = vld [vmem:[%s2453_s7 + $0x308] sm:$0xff] }
  0x2f   : > { %v285_v50 = vld [vmem:[%s2453_s7 + $0x320] sm:$0xff]  ;;  %282 = vst [vmem:[%s2458_s8 + $0x180] sm:$0xff] %v281_v48  ;;  %284 = vst [vmem:[%s2458_s8 + $0x188] sm:$0xff] %v283_v49  ;;  %v287_v51 = vld [vmem:[%s2453_s7 + $0x328] sm:$0xff] }
  0x30   : > { %286 = vst [vmem:[%s2458_s8 + $0x190] sm:$0xff] %v285_v50  ;;  %v289_v52 = vld [vmem:[%s2453_s7 + $0x340] sm:$0xff]  ;;  %v291_v53 = vld [vmem:[%s2453_s7 + $0x348] sm:$0xff]  ;;  %288 = vst [vmem:[%s2458_s8 + $0x198] sm:$0xff] %v287_v51 }
  0x31   : > { %290 = vst [vmem:[%s2458_s8 + $0x1a0] sm:$0xff] %v289_v52  ;;  %292 = vst [vmem:[%s2458_s8 + $0x1a8] sm:$0xff] %v291_v53  ;;  %v293_v54 = vld [vmem:[%s2453_s7 + $0x360] sm:$0xff]  ;;  %v295_v55 = vld [vmem:[%s2453_s7 + $0x368] sm:$0xff] }
  0x32   : > { %v297_v56 = vld [vmem:[%s2453_s7 + $0x380] sm:$0xff]  ;;  %294 = vst [vmem:[%s2458_s8 + $0x1b0] sm:$0xff] %v293_v54  ;;  %296 = vst [vmem:[%s2458_s8 + $0x1b8] sm:$0xff] %v295_v55  ;;  %v299_v57 = vld [vmem:[%s2453_s7 + $0x388] sm:$0xff] }
  0x33   : > { %298 = vst [vmem:[%s2458_s8 + $0x1c0] sm:$0xff] %v297_v56  ;;  %v301_v58 = vld [vmem:[%s2453_s7 + $0x3a0] sm:$0xff]  ;;  %v303_v59 = vld [vmem:[%s2453_s7 + $0x3a8] sm:$0xff]  ;;  %300 = vst [vmem:[%s2458_s8 + $0x1c8] sm:$0xff] %v299_v57 }
  0x34   : > { %302 = vst [vmem:[%s2458_s8 + $0x1d0] sm:$0xff] %v301_v58  ;;  %304 = vst [vmem:[%s2458_s8 + $0x1d8] sm:$0xff] %v303_v59  ;;  %v305_v60 = vld [vmem:[%s2453_s7 + $0x3c0] sm:$0xff]  ;;  %v307_v61 = vld [vmem:[%s2453_s7 + $0x3c8] sm:$0xff] }
  0x35   : > { %v309_v62 = vld [vmem:[%s2453_s7 + $0x3e0] sm:$0xff]  ;;  %306 = vst [vmem:[%s2458_s8 + $0x1e0] sm:$0xff] %v305_v60  ;;  %308 = vst [vmem:[%s2458_s8 + $0x1e8] sm:$0xff] %v307_v61  ;;  %v311_v63 = vld [vmem:[%s2453_s7 + $0x3e8] sm:$0xff] }
  0x36   : > { %310 = vst [vmem:[%s2458_s8 + $0x1f0] sm:$0xff] %v309_v62  ;;  %312 = vst [vmem:[%s2458_s8 + $0x1f8] sm:$0xff] %v311_v63 }
  0x37 PF: > { %p1799_p7 = scmp.ge.s32.totalorder %s2370_s18, 1  ;;  %p329_p8 = scmp.lt.s32.totalorder %s2370_s18, 5 }
  0x39   : > { %p330_p9 = pnand %p1799_p7, %p329_p8 }
  0x3a   : > { %s336_s9 = sand.u32 (!%p330_p9), 1, %s2346_s12   ;;  %s1801_s10 = sshll.u32 (!%p330_p9), %s2354_s14, 6 }
  0x3b   : > { %333 = sbr.rel (%p330_p9) target bundleno = 530 (0x212), region = 47  ;;  %s1800_s11 = sshll.u32 (!%p330_p9), %s336_s9, 9 }
  0x3c   : > { %p380_p10 = scmp.lt.s32.totalorder (!%p330_p9), %s1801_s10, 127  ;;  %s1803_s21 = sshll.u32 (!%p330_p9), %s2358_s15, 5 }
  0x3d   : > { %p389_p11 = scmp.lt.s32.totalorder (!%p330_p9), %s1803_s21, 63  ;;  %p397_p12 = scmp.lt.s32.totalorder (!%p330_p9), %s2358_s15, 1 }
  0x3e   : > { %s2607_s7 = scalar_lea.vmem (!%p330_p9), [#allocation2], %s1800_s11  ;;  %p1806_p13 = scmp.ne.s32.totalorder (!%p330_p9), %s2354_s14, 0 }
  0x40   : > { %s2874_s10 = smov (!%p380_p10, %s1801_s10), 127  ;;  %s2876_s21 = smov (!%p389_p11, %s1803_s21), 63 }
  0x41   : > { %s1802_s22 = sshll.u32 %s2874_s10, 2  ;;  %s2878_s15 = smov (!%p397_p12, %s2358_s15), 1 }
  0x42   : > { %s2594_s26 = scalar_lea.vmem %s2858_s1, %s1802_s22  ;;  %s1804_s27 = sshll.u32 %s2876_s21, 3 }
  0x43   : > { %s2600_s12 = scalar_lea.vmem %s2859_s2, %s1804_s27  ;;  %s1805_s30 = sshll.u32 %s2878_s15, 1 }
  0x44   : > { %s2605_s6 = scalar_lea.vmem %s2860_s3, %s1805_s30  ;;  %408 = sbr.rel (%p1806_p13) target bundleno = 90 (0x5a), region = 55 }
  0x49   : > { %v2372_v0 = vmov 0.0  }
  0x4a   : > { %409 = vst [vmem:[%s2600_s12] sm:$0xff] %v2372_v0  ;;  %410 = vst [vmem:[%s2600_s12 + $0x8] sm:$0xff] %v2372_v0 }
  0x4b   : > { %411 = vst [vmem:[%s2600_s12 + $0x10] sm:$0xff] %v2372_v0  ;;  %412 = vst [vmem:[%s2600_s12 + $0x18] sm:$0xff] %v2372_v0 }
  0x4c   : > { %413 = vst [vmem:[%s2600_s12 + $0x20] sm:$0xff] %v2372_v0  ;;  %414 = vst [vmem:[%s2600_s12 + $0x28] sm:$0xff] %v2372_v0 }
  0x4d   : > { %415 = vst [vmem:[%s2600_s12 + $0x30] sm:$0xff] %v2372_v0  ;;  %416 = vst [vmem:[%s2600_s12 + $0x38] sm:$0xff] %v2372_v0 }
  0x4e   : > { %417 = vst [vmem:[%s2600_s12 + $0x40] sm:$0xff] %v2372_v0  ;;  %418 = vst [vmem:[%s2600_s12 + $0x48] sm:$0xff] %v2372_v0 }
  0x4f   : > { %419 = vst [vmem:[%s2600_s12 + $0x50] sm:$0xff] %v2372_v0  ;;  %420 = vst [vmem:[%s2600_s12 + $0x58] sm:$0xff] %v2372_v0 }
  0x50   : > { %421 = vst [vmem:[%s2600_s12 + $0x60] sm:$0xff] %v2372_v0  ;;  %422 = vst [vmem:[%s2600_s12 + $0x68] sm:$0xff] %v2372_v0 }
  0x51   : > { %423 = vst [vmem:[%s2600_s12 + $0x70] sm:$0xff] %v2372_v0  ;;  %424 = vst [vmem:[%s2600_s12 + $0x78] sm:$0xff] %v2372_v0 }
  0x52   : > { %425 = vst [vmem:[%s2600_s12 + $0x80] sm:$0xff] %v2372_v0  ;;  %426 = vst [vmem:[%s2600_s12 + $0x88] sm:$0xff] %v2372_v0 }
  0x53   : > { %427 = vst [vmem:[%s2600_s12 + $0x90] sm:$0xff] %v2372_v0  ;;  %428 = vst [vmem:[%s2600_s12 + $0x98] sm:$0xff] %v2372_v0 }
  0x54   : > { %429 = vst [vmem:[%s2600_s12 + $0xa0] sm:$0xff] %v2372_v0  ;;  %430 = vst [vmem:[%s2600_s12 + $0xa8] sm:$0xff] %v2372_v0 }
  0x55   : > { %431 = vst [vmem:[%s2600_s12 + $0xb0] sm:$0xff] %v2372_v0  ;;  %432 = vst [vmem:[%s2600_s12 + $0xb8] sm:$0xff] %v2372_v0 }
  0x56   : > { %433 = vst [vmem:[%s2600_s12 + $0xc0] sm:$0xff] %v2372_v0  ;;  %434 = vst [vmem:[%s2600_s12 + $0xc8] sm:$0xff] %v2372_v0 }
  0x57   : > { %435 = vst [vmem:[%s2600_s12 + $0xd0] sm:$0xff] %v2372_v0  ;;  %436 = vst [vmem:[%s2600_s12 + $0xd8] sm:$0xff] %v2372_v0 }
  0x58   : > { %437 = vst [vmem:[%s2600_s12 + $0xe0] sm:$0xff] %v2372_v0  ;;  %438 = vst [vmem:[%s2600_s12 + $0xe8] sm:$0xff] %v2372_v0 }
  0x59   : > { %439 = vst [vmem:[%s2600_s12 + $0xf0] sm:$0xff] %v2372_v0  ;;  %440 = vst [vmem:[%s2600_s12 + $0xf8] sm:$0xff] %v2372_v0 }
  0x5a PF: > { %v2188_v1 = vld [vmem:[%s2594_s26 + $0x78] sm:$0xff]   ;;  %v2192_v5 = vld [vmem:[%s2594_s26 + $0x70] sm:$0xff]   ;;  %v2196_v9 = vld [vmem:[%s2594_s26 + $0x68] sm:$0xff]   ;;  %p1903_p0 = scmp.ne.s32.totalorder %s2354_s14, 1 }
  0x5b   : > { %v2189_v2 = vld [vmem:[%s2594_s26 + $0xf8] sm:$0xff]   ;;  %1907 = vmatprep.subr.bf16.mxu0 %v2188_v1  ;;  %v2193_v6 = vld [vmem:[%s2594_s26 + $0xf0] sm:$0xff]   ;;  %v2197_v10 = vld [vmem:[%s2594_s26 + $0xe8] sm:$0xff]  }
  0x5c   : > { %v2190_v3 = vld [vmem:[%s2594_s26 + $0x38] sm:$0xff]   ;;  %2019 = vmatprep.subr.bf16.mxu1 %v2189_v2  ;;  %v2194_v7 = vld [vmem:[%s2594_s26 + $0x30] sm:$0xff]   ;;  %v2198_v11 = vld [vmem:[%s2594_s26 + $0x28] sm:$0xff]  }
  0x5d   : > { %v2191_v4 = vld [vmem:[%s2594_s26 + $0xb8] sm:$0xff]   ;;  %1908 = vmatpush3.bf16.msra.mxu0 %v2190_v3  ;;  %v2195_v8 = vld [vmem:[%s2594_s26 + $0xb0] sm:$0xff]   ;;  %v2199_v12 = vld [vmem:[%s2594_s26 + $0xa8] sm:$0xff]  }
  0x5e   : > { %2020 = vmatpush3.bf16.msra.mxu1 %v2191_v4  ;;  %1909 = vmatprep.subr.bf16.mxu0 %v2192_v5  ;;  %v2200_v13 = vld [vmem:[%s2594_s26 + $0x60] sm:$0xff]   ;;  %v2204_v17 = vld [vmem:[%s2594_s26 + $0x58] sm:$0xff]   ;;  %v2208_v21 = vld [vmem:[%s2594_s26 + $0x50] sm:$0xff]  }
  0x5f   : > { %2021 = vmatprep.subr.bf16.mxu1 %v2193_v6  ;;  %v2201_v14 = vld [vmem:[%s2594_s26 + $0xe0] sm:$0xff]   ;;  %v2205_v18 = vld [vmem:[%s2594_s26 + $0xd8] sm:$0xff]   ;;  %v2209_v22 = vld [vmem:[%s2594_s26 + $0xd0] sm:$0xff]  }
  0x60   : > { %v2202_v15 = vld [vmem:[%s2594_s26 + $0x20] sm:$0xff]   ;;  %v2206_v19 = vld [vmem:[%s2594_s26 + $0x18] sm:$0xff]   ;;  %v2210_v23 = vld [vmem:[%s2594_s26 + $0x10] sm:$0xff]  }
  0x61   : > { %1910 = vmatpush3.bf16.msra.mxu0 %v2194_v7  ;;  %v2203_v16 = vld [vmem:[%s2594_s26 + $0xa0] sm:$0xff]   ;;  %v2207_v20 = vld [vmem:[%s2594_s26 + $0x98] sm:$0xff]   ;;  %v2211_v24 = vld [vmem:[%s2594_s26 + $0x90] sm:$0xff]  }
  0x62   : > { %2022 = vmatpush3.bf16.msra.mxu1 %v2195_v8  ;;  %1911 = vmatprep.subr.bf16.mxu0 %v2196_v9  ;;  %v2212_v25 = vld [vmem:[%s2594_s26 + $0x48] sm:$0xff]   ;;  %v2216_v29 = vld [vmem:[%s2594_s26 + $0x40] sm:$0xff]  }
  0x63   : > { %2023 = vmatprep.subr.bf16.mxu1 %v2197_v10  ;;  %v2213_v26 = vld [vmem:[%s2594_s26 + $0xc8] sm:$0xff]   ;;  %v2217_v30 = vld [vmem:[%s2594_s26 + $0xc0] sm:$0xff]  }
  0x64   : > { %v2214_v27 = vld [vmem:[%s2594_s26 + $0x8] sm:$0xff]   ;;  %v2218_v31 = vld [vmem:[%s2594_s26] sm:$0xff]  }
  0x65   : > { %1912 = vmatpush3.bf16.msra.mxu0 %v2198_v11  ;;  %v2215_v28 = vld [vmem:[%s2594_s26 + $0x88] sm:$0xff]   ;;  %v2219_v32 = vld [vmem:[%s2594_s26 + $0x80] sm:$0xff]  }
  0x66   : > { %2024 = vmatpush3.bf16.msra.mxu1 %v2199_v12  ;;  %1913 = vmatprep.subr.bf16.mxu0 %v2200_v13  ;;  %v2220_v33 = vld [vmem:[%s2607_s7] ss:$16 sps:$4 sm:$0xff]   ;;  %v2222_v34 = vld [vmem:[%s2607_s7 + $0x4] ss:$16 sps:$4 sm:$0xff]   ;;  %v2223_v35 = vld [vmem:[%s2607_s7 + $0x8] ss:$16 sps:$4 sm:$0xff]  }
  0x67   : > { %2025 = vmatprep.subr.bf16.mxu1 %v2201_v14  ;;  %v2225_v36 = vld [vmem:[%s2607_s7 + $0xc] ss:$16 sps:$4 sm:$0xff]   ;;  %1145 = vmatprep.mubr.bf16.mxu0 %v2222_v34  ;;  %v2226_v37 = vld [vmem:[%s2607_s7 + $0x24] ss:$16 sps:$4 sm:$0xff]   ;;  %v2230_v39 = vld [vmem:[%s2607_s7 + $0x20] ss:$16 sps:$4 sm:$0xff]  }
  0x68   : > { %1306 = vmatprep.mubr.bf16.mxu1 %v2225_v36  ;;  %v2228_v38 = vld [vmem:[%s2607_s7 + $0x2c] ss:$16 sps:$4 sm:$0xff]   ;;  %v2231_v40 = vld [vmem:[%s2607_s7 + $0x28] ss:$16 sps:$4 sm:$0xff]   ;;  %v2232_v41 = vld [vmem:[%s2607_s7 + $0x44] ss:$16 sps:$4 sm:$0xff]  }
  0x69   : > { %1914 = vmatpush3.bf16.msra.mxu0 %v2202_v15  ;;  %v2234_v42 = vld [vmem:[%s2607_s7 + $0x4c] ss:$16 sps:$4 sm:$0xff]   ;;  %v2236_v43 = vld [vmem:[%s2607_s7 + $0x40] ss:$16 sps:$4 sm:$0xff]   ;;  %v2237_v44 = vld [vmem:[%s2607_s7 + $0x48] ss:$16 sps:$4 sm:$0xff]  }
  0x6a   : > { %2026 = vmatpush3.bf16.msra.mxu1 %v2203_v16  ;;  %1915 = vmatprep.subr.bf16.mxu0 %v2204_v17  ;;  %v2238_v45 = vld [vmem:[%s2607_s7 + $0x64] ss:$16 sps:$4 sm:$0xff]   ;;  %v2240_v46 = vld [vmem:[%s2607_s7 + $0x6c] ss:$16 sps:$4 sm:$0xff]   ;;  %v2242_v47 = vld [vmem:[%s2607_s7 + $0x60] ss:$16 sps:$4 sm:$0xff]  }
  0x6b   : > { %2027 = vmatprep.subr.bf16.mxu1 %v2205_v18  ;;  %v2243_v48 = vld [vmem:[%s2607_s7 + $0x68] ss:$16 sps:$4 sm:$0xff]   ;;  %v2244_v49 = vld [vmem:[%s2607_s7 + $0x84] ss:$16 sps:$4 sm:$0xff]   ;;  %v2246_v50 = vld [vmem:[%s2607_s7 + $0x8c] ss:$16 sps:$4 sm:$0xff]  }
  0x6c   : > { %v2248_v51 = vld [vmem:[%s2607_s7 + $0x80] ss:$16 sps:$4 sm:$0xff]   ;;  %v2249_v52 = vld [vmem:[%s2607_s7 + $0x88] ss:$16 sps:$4 sm:$0xff]   ;;  %v2250_v53 = vld [vmem:[%s2607_s7 + $0xa4] ss:$16 sps:$4 sm:$0xff]  }
  0x6d   : > { %1916 = vmatpush3.bf16.msra.mxu0 %v2206_v19  ;;  %v2252_v54 = vld [vmem:[%s2607_s7 + $0xac] ss:$16 sps:$4 sm:$0xff]   ;;  %v2254_v55 = vld [vmem:[%s2607_s7 + $0xa0] ss:$16 sps:$4 sm:$0xff]   ;;  %v2255_v56 = vld [vmem:[%s2607_s7 + $0xa8] ss:$16 sps:$4 sm:$0xff]  }
  0x6e   : > { %2028 = vmatpush3.bf16.msra.mxu1 %v2207_v20  ;;  %1917 = vmatprep.subr.bf16.mxu0 %v2208_v21  ;;  %v2256_v57 = vld [vmem:[%s2607_s7 + $0xc4] ss:$16 sps:$4 sm:$0xff]   ;;  %v2258_v58 = vld [vmem:[%s2607_s7 + $0xcc] ss:$16 sps:$4 sm:$0xff]   ;;  %v2260_v59 = vld [vmem:[%s2607_s7 + $0xc0] ss:$16 sps:$4 sm:$0xff]  }
  0x6f   : > { %2029 = vmatprep.subr.bf16.mxu1 %v2209_v22  ;;  %v2261_v60 = vld [vmem:[%s2607_s7 + $0xc8] ss:$16 sps:$4 sm:$0xff]   ;;  %v2262_v61 = vld [vmem:[%s2607_s7 + $0xe4] ss:$16 sps:$4 sm:$0xff]   ;;  %v2264_v62 = vld [vmem:[%s2607_s7 + $0xec] ss:$16 sps:$4 sm:$0xff]  }
  0x70   : > { %v2266_v63 = vld [vmem:[%s2607_s7 + $0xe0] ss:$16 sps:$4 sm:$0xff]   ;;  %v2267_v0 = vld [vmem:[%s2607_s7 + $0xe8] ss:$16 sps:$4 sm:$0xff]   ;;  %v2268_v1 = vld [vmem:[%s2607_s7 + $0x104] ss:$16 sps:$4 sm:$0xff]  }
  0x71   : > { %1918 = vmatpush3.bf16.msra.mxu0 %v2210_v23  ;;  %v2270_v2 = vld [vmem:[%s2607_s7 + $0x10c] ss:$16 sps:$4 sm:$0xff]   ;;  %v2272_v3 = vld [vmem:[%s2607_s7 + $0x100] ss:$16 sps:$4 sm:$0xff]   ;;  %v2273_v4 = vld [vmem:[%s2607_s7 + $0x108] ss:$16 sps:$4 sm:$0xff]  }
  0x72   : > { %2030 = vmatpush3.bf16.msra.mxu1 %v2211_v24  ;;  %1919 = vmatprep.subr.bf16.mxu0 %v2212_v25  ;;  %v2274_v5 = vld [vmem:[%s2607_s7 + $0x124] ss:$16 sps:$4 sm:$0xff]   ;;  %v2276_v6 = vld [vmem:[%s2607_s7 + $0x12c] ss:$16 sps:$4 sm:$0xff]   ;;  %v2278_v7 = vld [vmem:[%s2607_s7 + $0x120] ss:$16 sps:$4 sm:$0xff]  }
  0x73   : > { %2031 = vmatprep.subr.bf16.mxu1 %v2213_v26  ;;  %v2279_v8 = vld [vmem:[%s2607_s7 + $0x128] ss:$16 sps:$4 sm:$0xff]   ;;  %v2280_v9 = vld [vmem:[%s2607_s7 + $0x144] ss:$16 sps:$4 sm:$0xff]   ;;  %v2282_v10 = vld [vmem:[%s2607_s7 + $0x14c] ss:$16 sps:$4 sm:$0xff]  }
  0x74   : > { %v2284_v11 = vld [vmem:[%s2607_s7 + $0x140] ss:$16 sps:$4 sm:$0xff]   ;;  %v2285_v12 = vld [vmem:[%s2607_s7 + $0x148] ss:$16 sps:$4 sm:$0xff]   ;;  %v2286_v13 = vld [vmem:[%s2607_s7 + $0x164] ss:$16 sps:$4 sm:$0xff]  }
  0x75   : > { %1920 = vmatpush3.bf16.msra.mxu0 %v2214_v27  ;;  %v2288_v14 = vld [vmem:[%s2607_s7 + $0x16c] ss:$16 sps:$4 sm:$0xff]   ;;  %v2290_v15 = vld [vmem:[%s2607_s7 + $0x160] ss:$16 sps:$4 sm:$0xff]   ;;  %v2291_v16 = vld [vmem:[%s2607_s7 + $0x168] ss:$16 sps:$4 sm:$0xff]  }
  0x76   : > { %2032 = vmatpush3.bf16.msra.mxu1 %v2215_v28  ;;  %1921 = vmatprep.subr.bf16.mxu0 %v2216_v29  ;;  %v2292_v17 = vld [vmem:[%s2607_s7 + $0x184] ss:$16 sps:$4 sm:$0xff]   ;;  %v2294_v18 = vld [vmem:[%s2607_s7 + $0x18c] ss:$16 sps:$4 sm:$0xff]   ;;  %v2296_v19 = vld [vmem:[%s2607_s7 + $0x180] ss:$16 sps:$4 sm:$0xff]  }
  0x77   : > { %2033 = vmatprep.subr.bf16.mxu1 %v2217_v30  ;;  %v2297_v20 = vld [vmem:[%s2607_s7 + $0x188] ss:$16 sps:$4 sm:$0xff]   ;;  %v2298_v21 = vld [vmem:[%s2607_s7 + $0x1a4] ss:$16 sps:$4 sm:$0xff]   ;;  %v2300_v22 = vld [vmem:[%s2607_s7 + $0x1ac] ss:$16 sps:$4 sm:$0xff]  }
  0x78   : > { %v2302_v23 = vld [vmem:[%s2607_s7 + $0x1a0] ss:$16 sps:$4 sm:$0xff]   ;;  %v2303_v24 = vld [vmem:[%s2607_s7 + $0x1a8] ss:$16 sps:$4 sm:$0xff]   ;;  %v2304_v25 = vld [vmem:[%s2607_s7 + $0x1c4] ss:$16 sps:$4 sm:$0xff]  }
  0x79   : > { %1922 = vmatpush3.bf16.msra.mxu0 %v2218_v31  ;;  %v2306_v26 = vld [vmem:[%s2607_s7 + $0x1cc] ss:$16 sps:$4 sm:$0xff]   ;;  %v2308_v27 = vld [vmem:[%s2607_s7 + $0x1c0] ss:$16 sps:$4 sm:$0xff]   ;;  %v2309_v28 = vld [vmem:[%s2607_s7 + $0x1c8] ss:$16 sps:$4 sm:$0xff]  }
  0x7a   : > { %2034 = vmatpush3.bf16.msra.mxu1 %v2219_v32  ;;  %v2310_v29 = vld [vmem:[%s2607_s7 + $0x1e4] ss:$16 sps:$4 sm:$0xff]   ;;  %v2312_v30 = vld [vmem:[%s2607_s7 + $0x1ec] ss:$16 sps:$4 sm:$0xff]   ;;  %v2314_v31 = vld [vmem:[%s2607_s7 + $0x1e0] ss:$16 sps:$4 sm:$0xff]  }
  0x7b   : > { %v2315_v32 = vld [vmem:[%s2607_s7 + $0x1e8] ss:$16 sps:$4 sm:$0xff]  }
  0x7c   : > { %1146 = vmatmul.mubr.bf16.vlgmr.msra.gmra.mxu0 %v2220_v33 }
  0x7d   : > { %1307 = vmatmul.mubr.bf16.vlgmr.msra.gmra.mxu1 %v2223_v35  ;;  %1153 = vmatprep.mubr.bf16.mxu0 %v2226_v37 }
  0x7e   : > { %1314 = vmatprep.mubr.bf16.mxu1 %v2228_v38 }
  0x84   : > { %1154 = vmatmul.mubr.bf16.gmra.mxu0 %v2230_v39 }
  0x85   : > { %1315 = vmatmul.mubr.bf16.gmra.mxu1 %v2231_v40  ;;  %1161 = vmatprep.mubr.bf16.mxu0 %v2232_v41  ;;  %v441_v40 = vld [vmem:[%s2600_s12] sm:$0xff] }
  0x86   : > { %1322 = vmatprep.mubr.bf16.mxu1 %v2234_v42 }
  0x8c   : > { %1162 = vmatmul.mubr.bf16.gmra.mxu0 %v2236_v43 }
  0x8d   : > { %1323 = vmatmul.mubr.bf16.gmra.mxu1 %v2237_v44  ;;  %1169 = vmatprep.mubr.bf16.mxu0 %v2238_v45 }
  0x8e   : > { %1330 = vmatprep.mubr.bf16.mxu1 %v2240_v46 }
  0x94   : > { %1170 = vmatmul.mubr.bf16.gmra.mxu0 %v2242_v47 }
  0x95   : > { %1331 = vmatmul.mubr.bf16.gmra.mxu1 %v2243_v48  ;;  %1177 = vmatprep.mubr.bf16.mxu0 %v2244_v49  ;;  %v442_v49 = vld [vmem:[%s2600_s12 + $0x8] sm:$0xff] }
  0x96   : > { %1338 = vmatprep.mubr.bf16.mxu1 %v2246_v50 }
  0x9c   : > { %1178 = vmatmul.mubr.bf16.gmra.mxu0 %v2248_v51 }
  0x9d   : > { %1339 = vmatmul.mubr.bf16.gmra.mxu1 %v2249_v52  ;;  %1185 = vmatprep.mubr.bf16.mxu0 %v2250_v53 }
  0x9e   : > { %1346 = vmatprep.mubr.bf16.mxu1 %v2252_v54 }
  0xa4   : > { %1186 = vmatmul.mubr.bf16.gmra.mxu0 %v2254_v55 }
  0xa5   : > { %1347 = vmatmul.mubr.bf16.gmra.mxu1 %v2255_v56  ;;  %1193 = vmatprep.mubr.bf16.mxu0 %v2256_v57 }
  0xa6   : > { %1354 = vmatprep.mubr.bf16.mxu1 %v2258_v58  ;;  %v443_v58 = vld [vmem:[%s2600_s12 + $0x10] sm:$0xff] }
  0xac   : > { %1194 = vmatmul.mubr.bf16.gmra.mxu0 %v2260_v59 }
  0xad   : > { %1355 = vmatmul.mubr.bf16.gmra.mxu1 %v2261_v60  ;;  %1201 = vmatprep.mubr.bf16.mxu0 %v2262_v61 }
  0xae   : > { %1362 = vmatprep.mubr.bf16.mxu1 %v2264_v62 }
  0xb4   : > { %1202 = vmatmul.mubr.bf16.gmra.mxu0 %v2266_v63 }
  0xb5   : > { %1363 = vmatmul.mubr.bf16.gmra.mxu1 %v2267_v0  ;;  %1209 = vmatprep.mubr.bf16.mxu0 %v2268_v1 }
  0xb6   : > { %1370 = vmatprep.mubr.bf16.mxu1 %v2270_v2 }
  0xbc   : > { %1210 = vmatmul.mubr.bf16.gmra.mxu0 %v2272_v3  ;;  %v444_v3 = vld [vmem:[%s2600_s12 + $0x18] sm:$0xff] }
  0xbd   : > { %1371 = vmatmul.mubr.bf16.gmra.mxu1 %v2273_v4  ;;  %1217 = vmatprep.mubr.bf16.mxu0 %v2274_v5 }
  0xbe   : > { %1378 = vmatprep.mubr.bf16.mxu1 %v2276_v6 }
  0xc4   : > { %1218 = vmatmul.mubr.bf16.gmra.mxu0 %v2278_v7 }
  0xc5   : > { %1379 = vmatmul.mubr.bf16.gmra.mxu1 %v2279_v8  ;;  %1225 = vmatprep.mubr.bf16.mxu0 %v2280_v9 }
  0xc6   : > { %1386 = vmatprep.mubr.bf16.mxu1 %v2282_v10 }
  0xcc   : > { %1226 = vmatmul.mubr.bf16.gmra.mxu0 %v2284_v11 }
  0xcd   : > { %1387 = vmatmul.mubr.bf16.gmra.mxu1 %v2285_v12  ;;  %1233 = vmatprep.mubr.bf16.mxu0 %v2286_v13  ;;  %v445_v12 = vld [vmem:[%s2600_s12 + $0x20] sm:$0xff] }
  0xce   : > { %1394 = vmatprep.mubr.bf16.mxu1 %v2288_v14 }
  0xd4   : > { %1234 = vmatmul.mubr.bf16.gmra.mxu0 %v2290_v15 }
  0xd5   : > { %1395 = vmatmul.mubr.bf16.gmra.mxu1 %v2291_v16  ;;  %1241 = vmatprep.mubr.bf16.mxu0 %v2292_v17 }
  0xd6   : > { %1402 = vmatprep.mubr.bf16.mxu1 %v2294_v18 }
  0xdc   : > { %1242 = vmatmul.mubr.bf16.gmra.mxu0 %v2296_v19 }
  0xdd   : > { %1403 = vmatmul.mubr.bf16.gmra.mxu1 %v2297_v20  ;;  %1249 = vmatprep.mubr.bf16.mxu0 %v2298_v21  ;;  %v446_v21 = vld [vmem:[%s2600_s12 + $0x28] sm:$0xff] }
  0xde   : > { %1410 = vmatprep.mubr.bf16.mxu1 %v2300_v22 }
  0xe4   : > { %1250 = vmatmul.mubr.bf16.gmra.mxu0 %v2302_v23 }
  0xe5   : > { %1411 = vmatmul.mubr.bf16.gmra.mxu1 %v2303_v24  ;;  %1257 = vmatprep.mubr.bf16.mxu0 %v2304_v25 }
  0xe6   : > { %1418 = vmatprep.mubr.bf16.mxu1 %v2306_v26 }
  0xec   : > { %1258 = vmatmul.mubr.bf16.gmra.mxu0 %v2308_v27 }
  0xed   : > { %1419 = vmatmul.mubr.bf16.gmra.mxu1 %v2309_v28  ;;  %1265 = vmatprep.mubr.bf16.mxu0 %v2310_v29 }
  0xee   : > { %1426 = vmatprep.mubr.bf16.mxu1 %v2312_v30  ;;  %v447_v30 = vld [vmem:[%s2600_s12 + $0x30] sm:$0xff] }
  0xf4   : > { %1266 = vmatmul.mubr.bf16.gmra.mxu0 %v2314_v31 }
  0xf5   : > { %1427 = vmatmul.mubr.bf16.gmra.mxu1 %v2315_v32 }
 0x13c   : > { %v1923_v33 = vpop.f32.mrf.mxu0 }
 0x13d   : > { %v2035_v34 = vpop.f32.mrf.mxu1 }
 0x13e   : > { %v1924_v35 = vpop.f32.mrf.mxu0 }
 0x13f   : > { %v1925_v36 = vadd.f32 %v1924_v35, %v1923_v33  ;;  %v2036_v37 = vpop.f32.mrf.mxu1 }
 0x140   : > { %v2037_v38 = vadd.f32 %v2036_v37, %v2035_v34  ;;  %v1926_v39 = vpop.f32.mrf.mxu0 }
 0x141   : > { %v2038_v41 = vpop.f32.mrf.mxu1 }
 0x142   : > { %v1309_v42 = vadd.f32 %v2037_v38, %v1925_v36  ;;  %v1927_v43 = vpop.f32.mrf.mxu0 }
 0x143   : > { %v1928_v44 = vadd.f32 %v1927_v43, %v1926_v39  ;;  %v2039_v45 = vpop.f32.mrf.mxu1  ;;  %v448_v39 = vld [vmem:[%s2600_s12 + $0x38] sm:$0xff] }
 0x144   : > { %v1435_v46 = vadd.f32 %v1309_v42, %v441_v40  ;;  %v2040_v47 = vadd.f32 %v2039_v45, %v2038_v41  ;;  %v1929_v48 = vpop.f32.mrf.mxu0 }
 0x145   : > { %v2041_v50 = vpop.f32.mrf.mxu1 }
 0x146   : > { %1467 = vst [vmem:[%s2600_s12] sm:$0xff] %v1435_v46  ;;  %v1312_v51 = vadd.f32 %v2040_v47, %v1928_v44  ;;  %v1930_v52 = vpop.f32.mrf.mxu0 }
 0x147   : > { %v1931_v53 = vadd.f32 %v1930_v52, %v1929_v48  ;;  %v2042_v54 = vpop.f32.mrf.mxu1  ;;  %v449_v48 = vld [vmem:[%s2600_s12 + $0x40] sm:$0xff] }
 0x148   : > { %v1436_v55 = vadd.f32 %v1312_v51, %v442_v49  ;;  %v2043_v56 = vadd.f32 %v2042_v54, %v2041_v50  ;;  %v1932_v57 = vpop.f32.mrf.mxu0 }
 0x149   : > { %v2044_v59 = vpop.f32.mrf.mxu1 }
 0x14a   : > { %1468 = vst [vmem:[%s2600_s12 + $0x8] sm:$0xff] %v1436_v55  ;;  %v1317_v60 = vadd.f32 %v2043_v56, %v1931_v53  ;;  %v1933_v61 = vpop.f32.mrf.mxu0 }
 0x14b   : > { %v1934_v62 = vadd.f32 %v1933_v61, %v1932_v57  ;;  %v2045_v63 = vpop.f32.mrf.mxu1  ;;  %v450_v57 = vld [vmem:[%s2600_s12 + $0x48] sm:$0xff] }
 0x14c   : > { %v1437_v0 = vadd.f32 %v1317_v60, %v443_v58  ;;  %v2046_v1 = vadd.f32 %v2045_v63, %v2044_v59  ;;  %v1935_v2 = vpop.f32.mrf.mxu0 }
 0x14d   : > { %v2047_v4 = vpop.f32.mrf.mxu1 }
 0x14e   : > { %1469 = vst [vmem:[%s2600_s12 + $0x10] sm:$0xff] %v1437_v0  ;;  %v1320_v5 = vadd.f32 %v2046_v1, %v1934_v62  ;;  %v1936_v6 = vpop.f32.mrf.mxu0 }
 0x14f   : > { %v1937_v7 = vadd.f32 %v1936_v6, %v1935_v2  ;;  %v2048_v8 = vpop.f32.mrf.mxu1  ;;  %v451_v2 = vld [vmem:[%s2600_s12 + $0x50] sm:$0xff] }
 0x150   : > { %v1438_v9 = vadd.f32 %v1320_v5, %v444_v3  ;;  %v2049_v10 = vadd.f32 %v2048_v8, %v2047_v4  ;;  %v1938_v11 = vpop.f32.mrf.mxu0 }
 0x151   : > { %v2050_v13 = vpop.f32.mrf.mxu1 }
 0x152   : > { %1470 = vst [vmem:[%s2600_s12 + $0x18] sm:$0xff] %v1438_v9  ;;  %v1325_v14 = vadd.f32 %v2049_v10, %v1937_v7  ;;  %v1939_v15 = vpop.f32.mrf.mxu0 }
 0x153   : > { %v1940_v16 = vadd.f32 %v1939_v15, %v1938_v11  ;;  %v2051_v17 = vpop.f32.mrf.mxu1  ;;  %v452_v11 = vld [vmem:[%s2600_s12 + $0x58] sm:$0xff] }
 0x154   : > { %v1439_v18 = vadd.f32 %v1325_v14, %v445_v12  ;;  %v2052_v19 = vadd.f32 %v2051_v17, %v2050_v13  ;;  %v1941_v20 = vpop.f32.mrf.mxu0 }
 0x155   : > { %v2053_v22 = vpop.f32.mrf.mxu1 }
 0x156   : > { %1471 = vst [vmem:[%s2600_s12 + $0x20] sm:$0xff] %v1439_v18  ;;  %v1328_v23 = vadd.f32 %v2052_v19, %v1940_v16  ;;  %v1942_v24 = vpop.f32.mrf.mxu0 }
 0x157   : > { %v1943_v25 = vadd.f32 %v1942_v24, %v1941_v20  ;;  %v2054_v26 = vpop.f32.mrf.mxu1  ;;  %v453_v20 = vld [vmem:[%s2600_s12 + $0x60] sm:$0xff] }
 0x158   : > { %v1440_v27 = vadd.f32 %v1328_v23, %v446_v21  ;;  %v2055_v28 = vadd.f32 %v2054_v26, %v2053_v22  ;;  %v1944_v29 = vpop.f32.mrf.mxu0 }
 0x159   : > { %v2056_v31 = vpop.f32.mrf.mxu1 }
 0x15a   : > { %1472 = vst [vmem:[%s2600_s12 + $0x28] sm:$0xff] %v1440_v27  ;;  %v1333_v32 = vadd.f32 %v2055_v28, %v1943_v25  ;;  %v1945_v33 = vpop.f32.mrf.mxu0 }
 0x15b   : > { %v1946_v34 = vadd.f32 %v1945_v33, %v1944_v29  ;;  %v2057_v35 = vpop.f32.mrf.mxu1  ;;  %v454_v29 = vld [vmem:[%s2600_s12 + $0x68] sm:$0xff] }
 0x15c   : > { %v1441_v36 = vadd.f32 %v1333_v32, %v447_v30  ;;  %v2058_v37 = vadd.f32 %v2057_v35, %v2056_v31  ;;  %v1947_v38 = vpop.f32.mrf.mxu0 }
 0x15d   : > { %v2059_v40 = vpop.f32.mrf.mxu1 }
 0x15e   : > { %1473 = vst [vmem:[%s2600_s12 + $0x30] sm:$0xff] %v1441_v36  ;;  %v1336_v41 = vadd.f32 %v2058_v37, %v1946_v34  ;;  %v1948_v42 = vpop.f32.mrf.mxu0 }
 0x15f   : > { %v1949_v43 = vadd.f32 %v1948_v42, %v1947_v38  ;;  %v2060_v44 = vpop.f32.mrf.mxu1  ;;  %v455_v38 = vld [vmem:[%s2600_s12 + $0x70] sm:$0xff] }
 0x160   : > { %v1442_v45 = vadd.f32 %v1336_v41, %v448_v39  ;;  %v2061_v46 = vadd.f32 %v2060_v44, %v2059_v40  ;;  %v1950_v47 = vpop.f32.mrf.mxu0 }
 0x161   : > { %v2062_v49 = vpop.f32.mrf.mxu1 }
 0x162   : > { %1474 = vst [vmem:[%s2600_s12 + $0x38] sm:$0xff] %v1442_v45  ;;  %v1341_v50 = vadd.f32 %v2061_v46, %v1949_v43  ;;  %v1951_v51 = vpop.f32.mrf.mxu0 }
 0x163   : > { %v1952_v52 = vadd.f32 %v1951_v51, %v1950_v47  ;;  %v2063_v53 = vpop.f32.mrf.mxu1  ;;  %v456_v47 = vld [vmem:[%s2600_s12 + $0x78] sm:$0xff] }
 0x164   : > { %v1443_v54 = vadd.f32 %v1341_v50, %v449_v48  ;;  %v2064_v55 = vadd.f32 %v2063_v53, %v2062_v49  ;;  %v1953_v56 = vpop.f32.mrf.mxu0 }
 0x165   : > { %v2065_v58 = vpop.f32.mrf.mxu1 }
 0x166   : > { %1475 = vst [vmem:[%s2600_s12 + $0x40] sm:$0xff] %v1443_v54  ;;  %v1344_v59 = vadd.f32 %v2064_v55, %v1952_v52  ;;  %v1954_v60 = vpop.f32.mrf.mxu0 }
 0x167   : > { %v1955_v61 = vadd.f32 %v1954_v60, %v1953_v56  ;;  %v2066_v62 = vpop.f32.mrf.mxu1  ;;  %v457_v56 = vld [vmem:[%s2600_s12 + $0x80] sm:$0xff] }
 0x168   : > { %v1444_v63 = vadd.f32 %v1344_v59, %v450_v57  ;;  %v2067_v0 = vadd.f32 %v2066_v62, %v2065_v58  ;;  %v1956_v1 = vpop.f32.mrf.mxu0 }
 0x169   : > { %v2068_v3 = vpop.f32.mrf.mxu1 }
 0x16a   : > { %1476 = vst [vmem:[%s2600_s12 + $0x48] sm:$0xff] %v1444_v63  ;;  %v1349_v4 = vadd.f32 %v2067_v0, %v1955_v61  ;;  %v1957_v5 = vpop.f32.mrf.mxu0 }
 0x16b   : > { %v1958_v6 = vadd.f32 %v1957_v5, %v1956_v1  ;;  %v2069_v7 = vpop.f32.mrf.mxu1  ;;  %v458_v1 = vld [vmem:[%s2600_s12 + $0x88] sm:$0xff] }
 0x16c   : > { %v1445_v8 = vadd.f32 %v1349_v4, %v451_v2  ;;  %v2070_v9 = vadd.f32 %v2069_v7, %v2068_v3  ;;  %v1959_v10 = vpop.f32.mrf.mxu0 }
 0x16d   : > { %v2071_v12 = vpop.f32.mrf.mxu1 }
 0x16e   : > { %1477 = vst [vmem:[%s2600_s12 + $0x50] sm:$0xff] %v1445_v8  ;;  %v1352_v13 = vadd.f32 %v2070_v9, %v1958_v6  ;;  %v1960_v14 = vpop.f32.mrf.mxu0 }
 0x16f   : > { %v1961_v15 = vadd.f32 %v1960_v14, %v1959_v10  ;;  %v2072_v16 = vpop.f32.mrf.mxu1  ;;  %v459_v10 = vld [vmem:[%s2600_s12 + $0x90] sm:$0xff] }
 0x170   : > { %v1446_v17 = vadd.f32 %v1352_v13, %v452_v11  ;;  %v2073_v18 = vadd.f32 %v2072_v16, %v2071_v12  ;;  %v1962_v19 = vpop.f32.mrf.mxu0 }
 0x171   : > { %v2074_v21 = vpop.f32.mrf.mxu1 }
 0x172   : > { %1478 = vst [vmem:[%s2600_s12 + $0x58] sm:$0xff] %v1446_v17  ;;  %v1357_v22 = vadd.f32 %v2073_v18, %v1961_v15  ;;  %v1963_v23 = vpop.f32.mrf.mxu0 }
 0x173   : > { %v1964_v24 = vadd.f32 %v1963_v23, %v1962_v19  ;;  %v2075_v25 = vpop.f32.mrf.mxu1  ;;  %v460_v19 = vld [vmem:[%s2600_s12 + $0x98] sm:$0xff] }
 0x174   : > { %v1447_v26 = vadd.f32 %v1357_v22, %v453_v20  ;;  %v2076_v27 = vadd.f32 %v2075_v25, %v2074_v21  ;;  %v1965_v28 = vpop.f32.mrf.mxu0 }
 0x175   : > { %v2077_v30 = vpop.f32.mrf.mxu1 }
 0x176   : > { %1479 = vst [vmem:[%s2600_s12 + $0x60] sm:$0xff] %v1447_v26  ;;  %v1360_v31 = vadd.f32 %v2076_v27, %v1964_v24  ;;  %v1966_v32 = vpop.f32.mrf.mxu0 }
 0x177   : > { %v1967_v33 = vadd.f32 %v1966_v32, %v1965_v28  ;;  %v2078_v34 = vpop.f32.mrf.mxu1  ;;  %v461_v28 = vld [vmem:[%s2600_s12 + $0xa0] sm:$0xff] }
 0x178   : > { %v1448_v35 = vadd.f32 %v1360_v31, %v454_v29  ;;  %v2079_v36 = vadd.f32 %v2078_v34, %v2077_v30  ;;  %v1968_v37 = vpop.f32.mrf.mxu0 }
 0x179   : > { %v2080_v39 = vpop.f32.mrf.mxu1 }
 0x17a   : > { %1480 = vst [vmem:[%s2600_s12 + $0x68] sm:$0xff] %v1448_v35  ;;  %v1365_v40 = vadd.f32 %v2079_v36, %v1967_v33  ;;  %v1969_v41 = vpop.f32.mrf.mxu0 }
 0x17b   : > { %v1970_v42 = vadd.f32 %v1969_v41, %v1968_v37  ;;  %v2081_v43 = vpop.f32.mrf.mxu1  ;;  %v462_v37 = vld [vmem:[%s2600_s12 + $0xa8] sm:$0xff] }
 0x17c   : > { %v1449_v44 = vadd.f32 %v1365_v40, %v455_v38  ;;  %v2082_v45 = vadd.f32 %v2081_v43, %v2080_v39  ;;  %v1971_v46 = vpop.f32.mrf.mxu0 }
 0x17d   : > { %v2083_v48 = vpop.f32.mrf.mxu1 }
 0x17e   : > { %1481 = vst [vmem:[%s2600_s12 + $0x70] sm:$0xff] %v1449_v44  ;;  %v1368_v49 = vadd.f32 %v2082_v45, %v1970_v42  ;;  %v1972_v50 = vpop.f32.mrf.mxu0 }
 0x17f   : > { %v1973_v51 = vadd.f32 %v1972_v50, %v1971_v46  ;;  %v2084_v52 = vpop.f32.mrf.mxu1  ;;  %v463_v46 = vld [vmem:[%s2600_s12 + $0xb0] sm:$0xff] }
 0x180   : > { %v1450_v53 = vadd.f32 %v1368_v49, %v456_v47  ;;  %v2085_v54 = vadd.f32 %v2084_v52, %v2083_v48  ;;  %v1974_v55 = vpop.f32.mrf.mxu0 }
 0x181   : > { %v2086_v57 = vpop.f32.mrf.mxu1 }
 0x182   : > { %1482 = vst [vmem:[%s2600_s12 + $0x78] sm:$0xff] %v1450_v53  ;;  %v1373_v58 = vadd.f32 %v2085_v54, %v1973_v51  ;;  %v1975_v59 = vpop.f32.mrf.mxu0 }
 0x183   : > { %v1976_v60 = vadd.f32 %v1975_v59, %v1974_v55  ;;  %v2087_v61 = vpop.f32.mrf.mxu1  ;;  %v464_v55 = vld [vmem:[%s2600_s12 + $0xb8] sm:$0xff] }
 0x184   : > { %v1451_v62 = vadd.f32 %v1373_v58, %v457_v56  ;;  %v2088_v63 = vadd.f32 %v2087_v61, %v2086_v57  ;;  %v1977_v0 = vpop.f32.mrf.mxu0 }
 0x185   : > { %v2089_v2 = vpop.f32.mrf.mxu1 }
 0x186   : > { %1483 = vst [vmem:[%s2600_s12 + $0x80] sm:$0xff] %v1451_v62  ;;  %v1376_v3 = vadd.f32 %v2088_v63, %v1976_v60  ;;  %v1978_v4 = vpop.f32.mrf.mxu0 }
 0x187   : > { %v1979_v5 = vadd.f32 %v1978_v4, %v1977_v0  ;;  %v2090_v6 = vpop.f32.mrf.mxu1  ;;  %v465_v0 = vld [vmem:[%s2600_s12 + $0xc0] sm:$0xff] }
 0x188   : > { %v1452_v7 = vadd.f32 %v1376_v3, %v458_v1  ;;  %v2091_v8 = vadd.f32 %v2090_v6, %v2089_v2  ;;  %v1980_v9 = vpop.f32.mrf.mxu0 }
 0x189   : > { %v2092_v11 = vpop.f32.mrf.mxu1 }
 0x18a   : > { %1484 = vst [vmem:[%s2600_s12 + $0x88] sm:$0xff] %v1452_v7  ;;  %v1381_v12 = vadd.f32 %v2091_v8, %v1979_v5  ;;  %v1981_v13 = vpop.f32.mrf.mxu0 }
 0x18b   : > { %v1982_v14 = vadd.f32 %v1981_v13, %v1980_v9  ;;  %v2093_v15 = vpop.f32.mrf.mxu1  ;;  %v466_v9 = vld [vmem:[%s2600_s12 + $0xc8] sm:$0xff] }
 0x18c   : > { %v1453_v16 = vadd.f32 %v1381_v12, %v459_v10  ;;  %v2094_v17 = vadd.f32 %v2093_v15, %v2092_v11  ;;  %v1983_v18 = vpop.f32.mrf.mxu0 }
 0x18d   : > { %v2095_v20 = vpop.f32.mrf.mxu1 }
 0x18e   : > { %1485 = vst [vmem:[%s2600_s12 + $0x90] sm:$0xff] %v1453_v16  ;;  %v1384_v21 = vadd.f32 %v2094_v17, %v1982_v14  ;;  %v1984_v22 = vpop.f32.mrf.mxu0 }
 0x18f   : > { %v1985_v23 = vadd.f32 %v1984_v22, %v1983_v18  ;;  %v2096_v24 = vpop.f32.mrf.mxu1  ;;  %v467_v18 = vld [vmem:[%s2600_s12 + $0xd0] sm:$0xff] }
 0x190   : > { %v1454_v25 = vadd.f32 %v1384_v21, %v460_v19  ;;  %v2097_v26 = vadd.f32 %v2096_v24, %v2095_v20  ;;  %v1986_v27 = vpop.f32.mrf.mxu0 }
 0x191   : > { %v2098_v29 = vpop.f32.mrf.mxu1 }
 0x192   : > { %1486 = vst [vmem:[%s2600_s12 + $0x98] sm:$0xff] %v1454_v25  ;;  %v1389_v30 = vadd.f32 %v2097_v26, %v1985_v23  ;;  %v1987_v31 = vpop.f32.mrf.mxu0 }
 0x193   : > { %v1988_v32 = vadd.f32 %v1987_v31, %v1986_v27  ;;  %v2099_v33 = vpop.f32.mrf.mxu1  ;;  %v468_v27 = vld [vmem:[%s2600_s12 + $0xd8] sm:$0xff] }
 0x194   : > { %v1455_v34 = vadd.f32 %v1389_v30, %v461_v28  ;;  %v2100_v35 = vadd.f32 %v2099_v33, %v2098_v29  ;;  %v1989_v36 = vpop.f32.mrf.mxu0 }
 0x195   : > { %v2101_v38 = vpop.f32.mrf.mxu1 }
 0x196   : > { %1487 = vst [vmem:[%s2600_s12 + $0xa0] sm:$0xff] %v1455_v34  ;;  %v1392_v39 = vadd.f32 %v2100_v35, %v1988_v32  ;;  %v1990_v40 = vpop.f32.mrf.mxu0 }
 0x197   : > { %v1991_v41 = vadd.f32 %v1990_v40, %v1989_v36  ;;  %v2102_v42 = vpop.f32.mrf.mxu1  ;;  %v469_v36 = vld [vmem:[%s2600_s12 + $0xe0] sm:$0xff] }
 0x198   : > { %v1456_v43 = vadd.f32 %v1392_v39, %v462_v37  ;;  %v2103_v44 = vadd.f32 %v2102_v42, %v2101_v38  ;;  %v1992_v45 = vpop.f32.mrf.mxu0 }
 0x199   : > { %v2104_v47 = vpop.f32.mrf.mxu1 }
 0x19a   : > { %1488 = vst [vmem:[%s2600_s12 + $0xa8] sm:$0xff] %v1456_v43  ;;  %v1397_v48 = vadd.f32 %v2103_v44, %v1991_v41  ;;  %v1993_v49 = vpop.f32.mrf.mxu0 }
 0x19b   : > { %v1994_v50 = vadd.f32 %v1993_v49, %v1992_v45  ;;  %v2105_v51 = vpop.f32.mrf.mxu1  ;;  %v470_v45 = vld [vmem:[%s2600_s12 + $0xe8] sm:$0xff] }
 0x19c   : > { %v1457_v52 = vadd.f32 %v1397_v48, %v463_v46  ;;  %v2106_v53 = vadd.f32 %v2105_v51, %v2104_v47  ;;  %v1995_v54 = vpop.f32.mrf.mxu0 }
 0x19d   : > { %v2107_v56 = vpop.f32.mrf.mxu1 }
 0x19e   : > { %1489 = vst [vmem:[%s2600_s12 + $0xb0] sm:$0xff] %v1457_v52  ;;  %v1400_v57 = vadd.f32 %v2106_v53, %v1994_v50  ;;  %v1996_v58 = vpop.f32.mrf.mxu0 }
 0x19f   : > { %v1997_v59 = vadd.f32 %v1996_v58, %v1995_v54  ;;  %v2108_v60 = vpop.f32.mrf.mxu1  ;;  %v471_v54 = vld [vmem:[%s2600_s12 + $0xf0] sm:$0xff] }
 0x1a0   : > { %v1458_v61 = vadd.f32 %v1400_v57, %v464_v55  ;;  %v2109_v62 = vadd.f32 %v2108_v60, %v2107_v56  ;;  %v1998_v63 = vpop.f32.mrf.mxu0 }
 0x1a1   : > { %v2110_v1 = vpop.f32.mrf.mxu1 }
 0x1a2   : > { %1490 = vst [vmem:[%s2600_s12 + $0xb8] sm:$0xff] %v1458_v61  ;;  %v1405_v2 = vadd.f32 %v2109_v62, %v1997_v59  ;;  %v1999_v3 = vpop.f32.mrf.mxu0  ;;  %v472_v62 = vld [vmem:[%s2600_s12 + $0xf8] sm:$0xff] }
 0x1a3   : > { %v2000_v4 = vadd.f32 %v1999_v3, %v1998_v63  ;;  %v2111_v5 = vpop.f32.mrf.mxu1 }
 0x1a4   : > { %v1459_v6 = vadd.f32 %v1405_v2, %v465_v0  ;;  %v2112_v7 = vadd.f32 %v2111_v5, %v2110_v1  ;;  %v2001_v8 = vpop.f32.mrf.mxu0 }
 0x1a5   : > { %v2113_v10 = vpop.f32.mrf.mxu1 }
 0x1a6   : > { %1491 = vst [vmem:[%s2600_s12 + $0xc0] sm:$0xff] %v1459_v6  ;;  %v1408_v11 = vadd.f32 %v2112_v7, %v2000_v4  ;;  %v2002_v12 = vpop.f32.mrf.mxu0 }
 0x1a7   : > { %v2003_v13 = vadd.f32 %v2002_v12, %v2001_v8  ;;  %v2114_v14 = vpop.f32.mrf.mxu1 }
 0x1a8   : > { %v1460_v15 = vadd.f32 %v1408_v11, %v466_v9  ;;  %v2115_v16 = vadd.f32 %v2114_v14, %v2113_v10  ;;  %v2004_v17 = vpop.f32.mrf.mxu0 }
 0x1a9   : > { %v2116_v19 = vpop.f32.mrf.mxu1 }
 0x1aa   : > { %1492 = vst [vmem:[%s2600_s12 + $0xc8] sm:$0xff] %v1460_v15  ;;  %v1413_v20 = vadd.f32 %v2115_v16, %v2003_v13  ;;  %v2005_v21 = vpop.f32.mrf.mxu0 }
 0x1ab   : > { %v2006_v22 = vadd.f32 %v2005_v21, %v2004_v17  ;;  %v2117_v23 = vpop.f32.mrf.mxu1 }
 0x1ac   : > { %v1461_v24 = vadd.f32 %v1413_v20, %v467_v18  ;;  %v2118_v25 = vadd.f32 %v2117_v23, %v2116_v19  ;;  %v2007_v26 = vpop.f32.mrf.mxu0 }
 0x1ad   : > { %v2119_v28 = vpop.f32.mrf.mxu1 }
 0x1ae   : > { %1493 = vst [vmem:[%s2600_s12 + $0xd0] sm:$0xff] %v1461_v24  ;;  %v1416_v29 = vadd.f32 %v2118_v25, %v2006_v22  ;;  %v2008_v30 = vpop.f32.mrf.mxu0 }
 0x1af   : > { %v2009_v31 = vadd.f32 %v2008_v30, %v2007_v26  ;;  %v2120_v32 = vpop.f32.mrf.mxu1 }
 0x1b0   : > { %v1462_v33 = vadd.f32 %v1416_v29, %v468_v27  ;;  %v2121_v34 = vadd.f32 %v2120_v32, %v2119_v28  ;;  %v2010_v35 = vpop.f32.mrf.mxu0 }
 0x1b1   : > { %v2122_v37 = vpop.f32.mrf.mxu1 }
 0x1b2   : > { %1494 = vst [vmem:[%s2600_s12 + $0xd8] sm:$0xff] %v1462_v33  ;;  %v1421_v38 = vadd.f32 %v2121_v34, %v2009_v31  ;;  %v2011_v39 = vpop.f32.mrf.mxu0 }
 0x1b3   : > { %v2012_v40 = vadd.f32 %v2011_v39, %v2010_v35  ;;  %v2123_v41 = vpop.f32.mrf.mxu1 }
 0x1b4   : > { %v1463_v42 = vadd.f32 %v1421_v38, %v469_v36  ;;  %v2124_v43 = vadd.f32 %v2123_v41, %v2122_v37  ;;  %v2013_v44 = vpop.f32.mrf.mxu0 }
 0x1b5   : > { %v2125_v46 = vpop.f32.mrf.mxu1 }
 0x1b6   : > { %1495 = vst [vmem:[%s2600_s12 + $0xe0] sm:$0xff] %v1463_v42  ;;  %v1424_v47 = vadd.f32 %v2124_v43, %v2012_v40  ;;  %v2014_v48 = vpop.f32.mrf.mxu0 }
 0x1b7   : > { %v2015_v49 = vadd.f32 %v2014_v48, %v2013_v44  ;;  %v2126_v50 = vpop.f32.mrf.mxu1 }
 0x1b8   : > { %v1464_v51 = vadd.f32 %v1424_v47, %v470_v45  ;;  %v2127_v52 = vadd.f32 %v2126_v50, %v2125_v46  ;;  %v2016_v53 = vpop.f32.mrf.mxu0 }
 0x1b9   : > { %v2128_v55 = vpop.f32.mrf.mxu1 }
 0x1ba   : > { %1496 = vst [vmem:[%s2600_s12 + $0xe8] sm:$0xff] %v1464_v51  ;;  %v1429_v56 = vadd.f32 %v2127_v52, %v2015_v49  ;;  %v2017_v57 = vpop.f32.mrf.mxu0 }
 0x1bb   : > { %v2018_v58 = vadd.f32 %v2017_v57, %v2016_v53  ;;  %v2129_v59 = vpop.f32.mrf.mxu1 }
 0x1bc   : > { %v1465_v60 = vadd.f32 %v1429_v56, %v471_v54  ;;  %v2130_v61 = vadd.f32 %v2129_v59, %v2128_v55 }
 0x1be   : > { %1497 = vst [vmem:[%s2600_s12 + $0xf0] sm:$0xff] %v1465_v60  ;;  %v1432_v63 = vadd.f32 %v2130_v61, %v2018_v58  ;;  %1502 = sbr.rel (%p1903_p0) target bundleno = 530 (0x212), region = 59 }
 0x1c0   : > { %v1466_v0 = vadd.f32 %v1432_v63, %v472_v62 }
 0x1c2   : > { %1498 = vst [vmem:[%s2600_s12 + $0xf8] sm:$0xff] %v1466_v0 }
 0x1c3   : > { %v1503_v1 = vld [vmem:[%s2600_s12] sm:$0xff]  ;;  %v1504_v2 = vld [vmem:[%s2600_s12 + $0x8] sm:$0xff]  ;;  %v1505_v3 = vld [vmem:[%s2600_s12 + $0x10] sm:$0xff]  ;;  %vm1641_vm0 = vcmask 1040384  }
 0x1c4   : > { %v1506_v4 = vld [vmem:[%s2600_s12 + $0x18] sm:$0xff]  ;;  %v1535_v5 = vadd.f32 %v1504_v2, %v1503_v1  ;;  %v1572_v6 = vmul.f32 %v1503_v1, %v1503_v1  ;;  %v1573_v7 = vmul.f32 %v1504_v2, %v1504_v2  ;;  %v1574_v8 = vmul.f32 %v1505_v3, %v1505_v3  ;;  %v1507_v9 = vld [vmem:[%s2600_s12 + $0x20] sm:$0xff]  ;;  %v1508_v13 = vld [vmem:[%s2600_s12 + $0x28] sm:$0xff] }
 0x1c5   : > { %v1575_v11 = vmul.f32 %v1506_v4, %v1506_v4  ;;  %v1576_v15 = vmul.f32 %v1507_v9, %v1507_v9  ;;  %v1509_v17 = vld [vmem:[%s2600_s12 + $0x30] sm:$0xff]  ;;  %v1577_v19 = vmul.f32 %v1508_v13, %v1508_v13  ;;  %v1510_v21 = vld [vmem:[%s2600_s12 + $0x38] sm:$0xff]  ;;  %v1511_v25 = vld [vmem:[%s2600_s12 + $0x40] sm:$0xff] }
 0x1c6   : > { %v1536_v10 = vadd.f32 %v1535_v5, %v1505_v3  ;;  %v1604_v12 = vadd.f32 %v1573_v7, %v1572_v6  ;;  %v1578_v23 = vmul.f32 %v1509_v17, %v1509_v17  ;;  %v1579_v27 = vmul.f32 %v1510_v21, %v1510_v21  ;;  %v1512_v29 = vld [vmem:[%s2600_s12 + $0x48] sm:$0xff]  ;;  %v1513_v33 = vld [vmem:[%s2600_s12 + $0x50] sm:$0xff]  ;;  %v1514_v37 = vld [vmem:[%s2600_s12 + $0x58] sm:$0xff] }
 0x1c7   : > { %v1580_v31 = vmul.f32 %v1511_v25, %v1511_v25  ;;  %v1581_v35 = vmul.f32 %v1512_v29, %v1512_v29  ;;  %v1582_v39 = vmul.f32 %v1513_v33, %v1513_v33  ;;  %v1515_v41 = vld [vmem:[%s2600_s12 + $0x60] sm:$0xff]  ;;  %v1583_v43 = vmul.f32 %v1514_v37, %v1514_v37  ;;  %v1516_v45 = vld [vmem:[%s2600_s12 + $0x68] sm:$0xff]  ;;  %v1517_v49 = vld [vmem:[%s2600_s12 + $0x70] sm:$0xff] }
 0x1c8   : > { %v1537_v14 = vadd.f32 %v1536_v10, %v1506_v4  ;;  %v1605_v16 = vadd.f32 %v1604_v12, %v1574_v8  ;;  %v1584_v47 = vmul.f32 %v1515_v41, %v1515_v41  ;;  %v1585_v51 = vmul.f32 %v1516_v45, %v1516_v45  ;;  %v1518_v53 = vld [vmem:[%s2600_s12 + $0x78] sm:$0xff]  ;;  %v1519_v57 = vld [vmem:[%s2600_s12 + $0x80] sm:$0xff]  ;;  %v1520_v61 = vld [vmem:[%s2600_s12 + $0x88] sm:$0xff] }
 0x1c9   : > { %v1586_v55 = vmul.f32 %v1517_v49, %v1517_v49  ;;  %v1587_v59 = vmul.f32 %v1518_v53, %v1518_v53  ;;  %v1588_v63 = vmul.f32 %v1519_v57, %v1519_v57  ;;  %v1521_v1 = vld [vmem:[%s2600_s12 + $0x90] sm:$0xff]  ;;  %v1589_v3 = vmul.f32 %v1520_v61, %v1520_v61  ;;  %v1522_v5 = vld [vmem:[%s2600_s12 + $0x98] sm:$0xff] }
 0x1ca   : > { %v1538_v18 = vadd.f32 %v1537_v14, %v1507_v9  ;;  %v1606_v20 = vadd.f32 %v1605_v16, %v1575_v11  ;;  %v1590_v7 = vmul.f32 %v1521_v1, %v1521_v1  ;;  %v1523_v9 = vld [vmem:[%s2600_s12 + $0xa0] sm:$0xff]  ;;  %v1591_v11 = vmul.f32 %v1522_v5, %v1522_v5 }
 0x1cc   : > { %v1539_v22 = vadd.f32 %v1538_v18, %v1508_v13  ;;  %v1607_v24 = vadd.f32 %v1606_v20, %v1576_v15  ;;  %v1524_v13 = vld [vmem:[%s2600_s12 + $0xa8] sm:$0xff]  ;;  %v1592_v15 = vmul.f32 %v1523_v9, %v1523_v9 }
 0x1ce   : > { %v1540_v26 = vadd.f32 %v1539_v22, %v1509_v17  ;;  %v1608_v28 = vadd.f32 %v1607_v24, %v1577_v19  ;;  %v1525_v17 = vld [vmem:[%s2600_s12 + $0xb0] sm:$0xff]  ;;  %v1593_v19 = vmul.f32 %v1524_v13, %v1524_v13 }
 0x1d0   : > { %v1541_v30 = vadd.f32 %v1540_v26, %v1510_v21  ;;  %v1609_v32 = vadd.f32 %v1608_v28, %v1578_v23  ;;  %v1526_v21 = vld [vmem:[%s2600_s12 + $0xb8] sm:$0xff]  ;;  %v1594_v23 = vmul.f32 %v1525_v17, %v1525_v17 }
 0x1d2   : > { %v1542_v34 = vadd.f32 %v1541_v30, %v1511_v25  ;;  %v1610_v36 = vadd.f32 %v1609_v32, %v1579_v27  ;;  %v1527_v25 = vld [vmem:[%s2600_s12 + $0xc0] sm:$0xff]  ;;  %v1595_v27 = vmul.f32 %v1526_v21, %v1526_v21 }
 0x1d4   : > { %v1543_v38 = vadd.f32 %v1542_v34, %v1512_v29  ;;  %v1611_v40 = vadd.f32 %v1610_v36, %v1580_v31  ;;  %v1528_v29 = vld [vmem:[%s2600_s12 + $0xc8] sm:$0xff]  ;;  %v1596_v31 = vmul.f32 %v1527_v25, %v1527_v25 }
 0x1d6   : > { %v1544_v42 = vadd.f32 %v1543_v38, %v1513_v33  ;;  %v1612_v44 = vadd.f32 %v1611_v40, %v1581_v35  ;;  %v1529_v33 = vld [vmem:[%s2600_s12 + $0xd0] sm:$0xff]  ;;  %v1597_v35 = vmul.f32 %v1528_v29, %v1528_v29 }
 0x1d8   : > { %v1545_v46 = vadd.f32 %v1544_v42, %v1514_v37  ;;  %v1613_v48 = vadd.f32 %v1612_v44, %v1582_v39  ;;  %v1530_v37 = vld [vmem:[%s2600_s12 + $0xd8] sm:$0xff]  ;;  %v1598_v39 = vmul.f32 %v1529_v33, %v1529_v33 }
 0x1da   : > { %v1546_v50 = vadd.f32 %v1545_v46, %v1515_v41  ;;  %v1614_v52 = vadd.f32 %v1613_v48, %v1583_v43  ;;  %v1531_v41 = vld [vmem:[%s2600_s12 + $0xe0] sm:$0xff]  ;;  %v1599_v43 = vmul.f32 %v1530_v37, %v1530_v37 }
 0x1dc   : > { %v1547_v54 = vadd.f32 %v1546_v50, %v1516_v45  ;;  %v1615_v56 = vadd.f32 %v1614_v52, %v1584_v47  ;;  %v1532_v45 = vld [vmem:[%s2600_s12 + $0xe8] sm:$0xff]  ;;  %v1600_v47 = vmul.f32 %v1531_v41, %v1531_v41 }
 0x1de   : > { %v1548_v58 = vadd.f32 %v1547_v54, %v1517_v49  ;;  %v1616_v60 = vadd.f32 %v1615_v56, %v1585_v51  ;;  %v1533_v49 = vld [vmem:[%s2600_s12 + $0xf0] sm:$0xff]  ;;  %v1601_v51 = vmul.f32 %v1532_v45, %v1532_v45 }
 0x1e0   : > { %v1549_v62 = vadd.f32 %v1548_v58, %v1518_v53  ;;  %v1617_v0 = vadd.f32 %v1616_v60, %v1586_v55  ;;  %v1534_v53 = vld [vmem:[%s2600_s12 + $0xf8] sm:$0xff]  ;;  %v1602_v55 = vmul.f32 %v1533_v49, %v1533_v49 }
 0x1e1   : > { %v1603_v58 = vmul.f32 %v1534_v53, %v1534_v53 }
 0x1e2   : > { %v1550_v2 = vadd.f32 %v1549_v62, %v1519_v57  ;;  %v1618_v4 = vadd.f32 %v1617_v0, %v1587_v59 }
 0x1e4   : > { %v1551_v6 = vadd.f32 %v1550_v2, %v1520_v61  ;;  %v1619_v8 = vadd.f32 %v1618_v4, %v1588_v63 }
 0x1e6   : > { %v1552_v10 = vadd.f32 %v1551_v6, %v1521_v1  ;;  %v1620_v12 = vadd.f32 %v1619_v8, %v1589_v3 }
 0x1e8   : > { %v1553_v14 = vadd.f32 %v1552_v10, %v1522_v5  ;;  %v1621_v16 = vadd.f32 %v1620_v12, %v1590_v7 }
 0x1ea   : > { %v1554_v18 = vadd.f32 %v1553_v14, %v1523_v9  ;;  %v1622_v20 = vadd.f32 %v1621_v16, %v1591_v11 }
 0x1ec   : > { %v1555_v22 = vadd.f32 %v1554_v18, %v1524_v13  ;;  %v1623_v24 = vadd.f32 %v1622_v20, %v1592_v15 }
 0x1ee   : > { %v1556_v26 = vadd.f32 %v1555_v22, %v1525_v17  ;;  %v1624_v28 = vadd.f32 %v1623_v24, %v1593_v19 }
 0x1f0   : > { %v1557_v30 = vadd.f32 %v1556_v26, %v1526_v21  ;;  %v1625_v32 = vadd.f32 %v1624_v28, %v1594_v23 }
 0x1f2   : > { %v1558_v34 = vadd.f32 %v1557_v30, %v1527_v25  ;;  %v1626_v36 = vadd.f32 %v1625_v32, %v1595_v27 }
 0x1f4   : > { %v1559_v38 = vadd.f32 %v1558_v34, %v1528_v29  ;;  %v1627_v40 = vadd.f32 %v1626_v36, %v1596_v31 }
 0x1f6   : > { %v1560_v42 = vadd.f32 %v1559_v38, %v1529_v33  ;;  %v1628_v44 = vadd.f32 %v1627_v40, %v1597_v35 }
 0x1f8   : > { %v1561_v46 = vadd.f32 %v1560_v42, %v1530_v37  ;;  %v1629_v48 = vadd.f32 %v1628_v44, %v1598_v39 }
 0x1fa   : > { %v1562_v50 = vadd.f32 %v1561_v46, %v1531_v41  ;;  %v1630_v52 = vadd.f32 %v1629_v48, %v1599_v43 }
 0x1fc   : > { %v1563_v54 = vadd.f32 %v1562_v50, %v1532_v45  ;;  %v1631_v56 = vadd.f32 %v1630_v52, %v1600_v47 }
 0x1fe   : > { %v1564_v57 = vadd.f32 %v1563_v54, %v1533_v49  ;;  %v1632_v59 = vadd.f32 %v1631_v56, %v1601_v51 }
 0x200   : > { %v1565_v60 = vadd.f32 %v1564_v57, %v1534_v53  ;;  %v1633_v61 = vadd.f32 %v1632_v59, %v1602_v55 }
 0x202   : > { %v1566_v62 = vrot.slane %v1565_v60, 4  ;;  %v1634_v63 = vadd.f32 %v1633_v61, %v1603_v58 }
 0x204   : > { %v1567_v0 = vadd.f32 %v1566_v62, %v1565_v60  ;;  %v1635_v1 = vrot.slane %v1634_v63, 4 }
 0x206   : > { %v1568_v2 = vrot.slane %v1567_v0, 2  ;;  %v1636_v3 = vadd.f32 %v1635_v1, %v1634_v63 }
 0x208   : > { %v1569_v4 = vadd.f32 %v1568_v2, %v1567_v0  ;;  %v1637_v5 = vrot.slane %v1636_v3, 2 }
 0x20a   : > { %v1570_v6 = vrot.slane %v1569_v4, 1  ;;  %v1638_v7 = vadd.f32 %v1637_v5, %v1636_v3 }
 0x20c   : > { %v1571_v8 = vadd.f32 %v1570_v6, %v1569_v4  ;;  %v1639_v9 = vrot.slane %v1638_v7, 1 }
 0x20e   : > { %v1640_v10 = vadd.f32 %v1639_v9, %v1638_v7 }
 0x210   : > { %v1642_v11 = vsel %vm1641_vm0, %v1571_v8, %v1640_v10 }
 0x211   : > { %1643 = vst [vmem:[%s2605_s6] sm:$0x3] %v1642_v11 }
 0x212 PF: > { %s14_s18 = sadd.s32 1, %s2370_s18   ;;  %s2861_s12 = smov %s2350_s13 }
 0x213   : > { %p11_p1 = scmp.ge.s32.totalorder %s14_s18, 6   ;;  %s2862_s13 = smov %s2444_s25 }
 0x214   : > { %s2863_s14 = smov %s2362_s16  ;;  %s2864_s15 = smov %s2366_s17 }
 0x215   : > { %s2865_s16 = smov %s2868_s19  ;;  %s2866_s17 = smov %s2872_s20 }
 0x216   :  { %13 = sbr.rel (!%p11_p1) target bundleno = 4 (0x4), region = 109 }

// kernel: discriminator_forward.10
= control target key start
LH: loop header
LB: loop body
LE: loop exit
PB: predicated region body
PF: predicated region fallthrough
CT: control target
= control target key end

     0   :  { %s1503_s0 = inlined_call_operand.vmem [shape: f32[512,128], index: 0, kind: input, shape index: {}]   ;;  %s1504_s1 = inlined_call_operand.vmem [shape: f32[1,128], index: 1, kind: input, shape index: {}]   ;;  %s1505_s2 = inlined_call_operand.vmem [shape: f32[1,128], index: 2, kind: input, shape index: {}]   ;;  %s1506_s3 = inlined_call_operand.vmem [shape: bf16[512,128], index: 3, kind: output, shape index: {}]  }
   0x1   :  { %v14_v0 = vld [vmem:[%s1503_s0] sm:$0xff]  ;;  %v15_v1 = vld [vmem:[%s1503_s0 + $0x8] sm:$0xff]  ;;  %v16_v6 = vld [vmem:[%s1503_s0 + $0x10] sm:$0xff] }
   0x2   :  { %v1086_v2 = vld [vmem:[%s1504_s1] ss:$0 sm:$0xff]  ;;  %v17_v7 = vld [vmem:[%s1503_s0 + $0x18] sm:$0xff]  ;;  %v19_v11 = vld [vmem:[%s1503_s0 + $0x28] sm:$0xff] }
   0x3   :  { %v85_v3 = vmul.f32 %v1086_v2, %v14_v0  ;;  %v86_v4 = vmul.f32 %v1086_v2, %v15_v1  ;;  %v1093_v5 = vld [vmem:[%s1505_s2] ss:$0 sm:$0xff]  ;;  %v87_v8 = vmul.f32 %v1086_v2, %v16_v6  ;;  %v88_v9 = vmul.f32 %v1086_v2, %v17_v7  ;;  %v20_v12 = vld [vmem:[%s1503_s0 + $0x30] sm:$0xff]  ;;  %v21_v17 = vld [vmem:[%s1503_s0 + $0x38] sm:$0xff] }
   0x4   :  { %v18_v10 = vld [vmem:[%s1503_s0 + $0x20] sm:$0xff]  ;;  %v90_v16 = vmul.f32 %v1086_v2, %v19_v11  ;;  %v91_v20 = vmul.f32 %v1086_v2, %v20_v12  ;;  %v92_v21 = vmul.f32 %v1086_v2, %v21_v17  ;;  %v23_v35 = vld [vmem:[%s1503_s0 + $0x48] sm:$0xff]  ;;  %v24_v36 = vld [vmem:[%s1503_s0 + $0x50] sm:$0xff] }
   0x5   :  { %v156_v13 = vadd.f32 %v1093_v5, %v85_v3  ;;  %v157_v14 = vadd.f32 %v1093_v5, %v86_v4  ;;  %v89_v15 = vmul.f32 %v1086_v2, %v18_v10  ;;  %v158_v18 = vadd.f32 %v1093_v5, %v87_v8  ;;  %v22_v34 = vld [vmem:[%s1503_s0 + $0x40] sm:$0xff]  ;;  %v25_v42 = vld [vmem:[%s1503_s0 + $0x58] sm:$0xff]  ;;  %v27_v48 = vld [vmem:[%s1503_s0 + $0x68] sm:$0xff] }
   0x6   :  { %v159_v19 = vadd.f32 %v1093_v5, %v88_v9  ;;  %v161_v29 = vadd.f32 %v1093_v5, %v90_v16  ;;  %v162_v33 = vadd.f32 %v1093_v5, %v91_v20  ;;  %v163_v40 = vadd.f32 %v1093_v5, %v92_v21  ;;  %v26_v47 = vld [vmem:[%s1503_s0 + $0x60] sm:$0xff]  ;;  %v28_v60 = vld [vmem:[%s1503_s0 + $0x70] sm:$0xff]  ;;  %v29_v7 = vld [vmem:[%s1503_s0 + $0x78] sm:$0xff] }
   0x7   :  { %vm220_vm0 = vcmp.ge.f32.partialorder %v156_v13, 0.0  ;;  %vm221_vm1 = vcmp.ge.f32.partialorder %v157_v14, 0.0  ;;  %v284_v22 = vmul.f32 0.2, %v156_v13  ;;  %v285_v23 = vmul.f32 0.2, %v157_v14 }
   0x8   :  { %vm222_vm2 = vcmp.ge.f32.partialorder %v158_v18, 0.0  ;;  %vm223_vm3 = vcmp.ge.f32.partialorder %v159_v19, 0.0  ;;  %v286_v24 = vmul.f32 0.2, %v158_v18  ;;  %v287_v25 = vmul.f32 0.2, %v159_v19 }
   0x9   :  { %v348_v26 = vsel %vm220_vm0, %v156_v13, %v284_v22  ;;  %v349_v27 = vsel %vm221_vm1, %v157_v14, %v285_v23  ;;  %v160_v28 = vadd.f32 %v1093_v5, %v89_v15  ;;  %vm225_vm5 = vcmp.ge.f32.partialorder %v161_v29, 0.0  ;;  %v30_v12 = vld [vmem:[%s1503_s0 + $0x80] sm:$0xff]  ;;  %v31_v13 = vld [vmem:[%s1503_s0 + $0x88] sm:$0xff]  ;;  %v32_v20 = vld [vmem:[%s1503_s0 + $0x90] sm:$0xff] }
   0xa   :  { %v869_v30 = vpack.c.bf16 %v349_v27, %v348_v26  ;;  %v350_v31 = vsel %vm222_vm2, %v158_v18, %v286_v24  ;;  %v351_v32 = vsel %vm223_vm3, %v159_v19, %v287_v25  ;;  %v289_v39 = vmul.f32 0.2, %v161_v29  ;;  %v33_v25 = vld [vmem:[%s1503_s0 + $0x98] sm:$0xff] }
   0xb   :  { %v874_v37 = vpack.c.bf16 %v351_v32, %v350_v31  ;;  %vm224_vm4 = vcmp.ge.f32.partialorder %v160_v28, 0.0  ;;  %v288_v38 = vmul.f32 0.2, %v160_v28  ;;  %vm226_vm6 = vcmp.ge.f32.partialorder %v162_v33, 0.0 }
   0xc   :  { %870 = vst [vmem:[%s1506_s3] sm:$0xff] %v869_v30   ;;  %v290_v41 = vmul.f32 0.2, %v162_v33  ;;  %v93_v44 = vmul.f32 %v1086_v2, %v22_v34  ;;  %v94_v45 = vmul.f32 %v1086_v2, %v23_v35  ;;  %v95_v46 = vmul.f32 %v1086_v2, %v24_v36 }
   0xd   :  { %1026 = vst [vmem:[%s1506_s3 + $0x8] sm:$0xff] %v874_v37   ;;  %v352_v43 = vsel %vm224_vm4, %v160_v28, %v288_v38  ;;  %v353_v49 = vsel %vm225_vm5, %v161_v29, %v289_v39  ;;  %vm227_vm7 = vcmp.ge.f32.partialorder %v163_v40, 0.0  ;;  %v291_v50 = vmul.f32 0.2, %v163_v40  ;;  %v35_v37 = vld [vmem:[%s1503_s0 + $0xa8] sm:$0xff] }
   0xe   :  { %v354_v51 = vsel %vm226_vm6, %v162_v33, %v290_v41  ;;  %v879_v52 = vpack.c.bf16 %v353_v49, %v352_v43  ;;  %v164_v53 = vadd.f32 %v1093_v5, %v93_v44  ;;  %v165_v54 = vadd.f32 %v1093_v5, %v94_v45  ;;  %v34_v33 = vld [vmem:[%s1503_s0 + $0xa0] sm:$0xff]  ;;  %v36_v44 = vld [vmem:[%s1503_s0 + $0xb0] sm:$0xff]  ;;  %v37_v49 = vld [vmem:[%s1503_s0 + $0xb8] sm:$0xff] }
   0xf   :  { %v96_v55 = vmul.f32 %v1086_v2, %v25_v42  ;;  %v355_v56 = vsel %vm227_vm7, %v163_v40, %v291_v50  ;;  %v166_v57 = vadd.f32 %v1093_v5, %v95_v46  ;;  %v97_v58 = vmul.f32 %v1086_v2, %v26_v47  ;;  %v38_v50 = vld [vmem:[%s1503_s0 + $0xc0] sm:$0xff] }
  0x10   :  { %v98_v59 = vmul.f32 %v1086_v2, %v27_v48  ;;  %1027 = vst [vmem:[%s1506_s3 + $0x10] sm:$0xff] %v879_v52   ;;  %v884_v61 = vpack.c.bf16 %v355_v56, %v354_v51  ;;  %vm228_vm8 = vcmp.ge.f32.partialorder %v164_v53, 0.0  ;;  %vm229_vm9 = vcmp.ge.f32.partialorder %v165_v54, 0.0  ;;  %v39_v51 = vld [vmem:[%s1503_s0 + $0xc8] sm:$0xff] }
  0x11   :  { %v292_v62 = vmul.f32 0.2, %v164_v53  ;;  %v293_v63 = vmul.f32 0.2, %v165_v54  ;;  %v167_v0 = vadd.f32 %v1093_v5, %v96_v55  ;;  %vm230_vm10 = vcmp.ge.f32.partialorder %v166_v57, 0.0 }
  0x12   :  { %v294_v1 = vmul.f32 0.2, %v166_v57  ;;  %1028 = vst [vmem:[%s1506_s3 + $0x18] sm:$0xff] %v884_v61   ;;  %v168_v4 = vadd.f32 %v1093_v5, %v97_v58  ;;  %v169_v6 = vadd.f32 %v1093_v5, %v98_v59  ;;  %v99_v8 = vmul.f32 %v1086_v2, %v28_v60 }
  0x13   :  { %v356_v3 = vsel %vm228_vm8, %v164_v53, %v292_v62  ;;  %v357_v9 = vsel %vm229_vm9, %v165_v54, %v293_v63  ;;  %vm231_vm11 = vcmp.ge.f32.partialorder %v167_v0, 0.0  ;;  %v295_v10 = vmul.f32 0.2, %v167_v0  ;;  %v40_v62 = vld [vmem:[%s1503_s0 + $0xd0] sm:$0xff] }
  0x14   :  { %v358_v11 = vsel %vm230_vm10, %v166_v57, %v294_v1  ;;  %v889_v14 = vpack.c.bf16 %v357_v9, %v356_v3  ;;  %vm232_vm12 = vcmp.ge.f32.partialorder %v168_v4, 0.0  ;;  %vm233_vm13 = vcmp.ge.f32.partialorder %v169_v6, 0.0 }
  0x15   :  { %v296_v15 = vmul.f32 0.2, %v168_v4  ;;  %v359_v16 = vsel %vm231_vm11, %v167_v0, %v295_v10  ;;  %v297_v17 = vmul.f32 0.2, %v169_v6  ;;  %v100_v18 = vmul.f32 %v1086_v2, %v29_v7  ;;  %v41_v10 = vld [vmem:[%s1503_s0 + $0xd8] sm:$0xff] }
  0x16   :  { %v170_v19 = vadd.f32 %v1093_v5, %v99_v8  ;;  %1029 = vst [vmem:[%s1506_s3 + $0x20] sm:$0xff] %v889_v14   ;;  %v894_v21 = vpack.c.bf16 %v359_v16, %v358_v11  ;;  %v101_v23 = vmul.f32 %v1086_v2, %v30_v12  ;;  %v102_v24 = vmul.f32 %v1086_v2, %v31_v13  ;;  %v42_v14 = vld [vmem:[%s1503_s0 + $0xe0] sm:$0xff] }
  0x17   :  { %v360_v22 = vsel %vm232_vm12, %v168_v4, %v296_v15  ;;  %v361_v26 = vsel %vm233_vm13, %v169_v6, %v297_v17  ;;  %v171_v27 = vadd.f32 %v1093_v5, %v100_v18  ;;  %v103_v32 = vmul.f32 %v1086_v2, %v32_v20  ;;  %v43_v15 = vld [vmem:[%s1503_s0 + $0xe8] sm:$0xff] }
  0x18   :  { %vm234_vm14 = vcmp.ge.f32.partialorder %v170_v19, 0.0  ;;  %v298_v28 = vmul.f32 0.2, %v170_v19  ;;  %1030 = vst [vmem:[%s1506_s3 + $0x28] sm:$0xff] %v894_v21   ;;  %v899_v29 = vpack.c.bf16 %v361_v26, %v360_v22  ;;  %v172_v30 = vadd.f32 %v1093_v5, %v101_v23  ;;  %v44_v26 = vld [vmem:[%s1503_s0 + $0xf0] sm:$0xff] }
  0x19   :  { %v173_v31 = vadd.f32 %v1093_v5, %v102_v24  ;;  %vm235_vm15 = vcmp.ge.f32.partialorder %v171_v27, 0.0  ;;  %v299_v34 = vmul.f32 0.2, %v171_v27  ;;  %v104_v36 = vmul.f32 %v1086_v2, %v33_v25 }
  0x1a   :  { %v362_v35 = vsel %vm234_vm14, %v170_v19, %v298_v28  ;;  %1031 = vst [vmem:[%s1506_s3 + $0x30] sm:$0xff] %v899_v29   ;;  %vm236_vm0 = vcmp.ge.f32.partialorder %v172_v30, 0.0  ;;  %v300_v38 = vmul.f32 0.2, %v172_v30  ;;  %v174_v41 = vadd.f32 %v1093_v5, %v103_v32 }
  0x1b   :  { %vm237_vm1 = vcmp.ge.f32.partialorder %v173_v31, 0.0  ;;  %v301_v39 = vmul.f32 0.2, %v173_v31  ;;  %v363_v40 = vsel %vm235_vm15, %v171_v27, %v299_v34  ;;  %v175_v42 = vadd.f32 %v1093_v5, %v104_v36 }
  0x1c   :  { %v105_v43 = vmul.f32 %v1086_v2, %v34_v33  ;;  %v904_v45 = vpack.c.bf16 %v363_v40, %v362_v35  ;;  %v364_v46 = vsel %vm236_vm0, %v172_v30, %v300_v38  ;;  %v106_v48 = vmul.f32 %v1086_v2, %v35_v37  ;;  %v46_v38 = vld [vmem:[%s1503_s0 + $0x100] sm:$0xff] }
  0x1d   :  { %v365_v47 = vsel %vm237_vm1, %v173_v31, %v301_v39  ;;  %vm238_vm2 = vcmp.ge.f32.partialorder %v174_v41, 0.0  ;;  %vm239_vm3 = vcmp.ge.f32.partialorder %v175_v42, 0.0  ;;  %v302_v53 = vmul.f32 0.2, %v174_v41  ;;  %v45_v31 = vld [vmem:[%s1503_s0 + $0xf8] sm:$0xff] }
  0x1e   :  { %v909_v52 = vpack.c.bf16 %v365_v47, %v364_v46  ;;  %1032 = vst [vmem:[%s1506_s3 + $0x38] sm:$0xff] %v904_v45   ;;  %v303_v54 = vmul.f32 0.2, %v175_v42  ;;  %v176_v55 = vadd.f32 %v1093_v5, %v105_v43  ;;  %v177_v56 = vadd.f32 %v1093_v5, %v106_v48 }
  0x1f   :  { %v107_v57 = vmul.f32 %v1086_v2, %v36_v44  ;;  %v366_v58 = vsel %vm238_vm2, %v174_v41, %v302_v53  ;;  %v108_v59 = vmul.f32 %v1086_v2, %v37_v49  ;;  %v109_v60 = vmul.f32 %v1086_v2, %v38_v50  ;;  %v48_v50 = vld [vmem:[%s1503_s0 + $0x110] sm:$0xff] }
  0x20   :  { %1033 = vst [vmem:[%s1506_s3 + $0x40] sm:$0xff] %v909_v52   ;;  %v110_v61 = vmul.f32 %v1086_v2, %v39_v51  ;;  %v367_v63 = vsel %vm239_vm3, %v175_v42, %v303_v54  ;;  %vm240_vm4 = vcmp.ge.f32.partialorder %v176_v55, 0.0  ;;  %vm241_vm5 = vcmp.ge.f32.partialorder %v177_v56, 0.0  ;;  %v47_v42 = vld [vmem:[%s1503_s0 + $0x108] sm:$0xff]  ;;  %v49_v51 = vld [vmem:[%s1503_s0 + $0x118] sm:$0xff] }
  0x21   :  { %v304_v0 = vmul.f32 0.2, %v176_v55  ;;  %v914_v1 = vpack.c.bf16 %v367_v63, %v366_v58  ;;  %v305_v3 = vmul.f32 0.2, %v177_v56  ;;  %v178_v4 = vadd.f32 %v1093_v5, %v107_v57  ;;  %v51_v63 = vld [vmem:[%s1503_s0 + $0x128] sm:$0xff] }
  0x22   :  { %v179_v6 = vadd.f32 %v1093_v5, %v108_v59  ;;  %v180_v8 = vadd.f32 %v1093_v5, %v109_v60  ;;  %v181_v9 = vadd.f32 %v1093_v5, %v110_v61  ;;  %v111_v11 = vmul.f32 %v1086_v2, %v40_v62 }
  0x23   :  { %v368_v7 = vsel %vm240_vm4, %v176_v55, %v304_v0  ;;  %1034 = vst [vmem:[%s1506_s3 + $0x48] sm:$0xff] %v914_v1   ;;  %v369_v12 = vsel %vm241_vm5, %v177_v56, %v305_v3  ;;  %vm242_vm6 = vcmp.ge.f32.partialorder %v178_v4, 0.0  ;;  %v306_v13 = vmul.f32 0.2, %v178_v4  ;;  %v50_v55 = vld [vmem:[%s1503_s0 + $0x120] sm:$0xff] }
  0x24   :  { %vm243_vm7 = vcmp.ge.f32.partialorder %v179_v6, 0.0  ;;  %v919_v16 = vpack.c.bf16 %v369_v12, %v368_v7  ;;  %v307_v17 = vmul.f32 0.2, %v179_v6  ;;  %vm244_vm8 = vcmp.ge.f32.partialorder %v180_v8, 0.0 }
  0x25   :  { %vm245_vm9 = vcmp.ge.f32.partialorder %v181_v9, 0.0  ;;  %v370_v18 = vsel %vm242_vm6, %v178_v4, %v306_v13  ;;  %v308_v19 = vmul.f32 0.2, %v180_v8  ;;  %v309_v20 = vmul.f32 0.2, %v181_v9  ;;  %v52_v4 = vld [vmem:[%s1503_s0 + $0x130] sm:$0xff] }
  0x26   :  { %v112_v21 = vmul.f32 %v1086_v2, %v41_v10  ;;  %1035 = vst [vmem:[%s1506_s3 + $0x50] sm:$0xff] %v919_v16   ;;  %v371_v22 = vsel %vm243_vm7, %v179_v6, %v307_v17  ;;  %v182_v23 = vadd.f32 %v1093_v5, %v111_v11  ;;  %v113_v24 = vmul.f32 %v1086_v2, %v42_v14  ;;  %v53_v13 = vld [vmem:[%s1503_s0 + $0x138] sm:$0xff] }
  0x27   :  { %v114_v25 = vmul.f32 %v1086_v2, %v43_v15  ;;  %v924_v27 = vpack.c.bf16 %v371_v22, %v370_v18  ;;  %v372_v28 = vsel %vm244_vm8, %v180_v8, %v308_v19  ;;  %v373_v29 = vsel %vm245_vm9, %v181_v9, %v309_v20  ;;  %v54_v20 = vld [vmem:[%s1503_s0 + $0x140] sm:$0xff] }
  0x28   :  { %v183_v30 = vadd.f32 %v1093_v5, %v112_v21  ;;  %v929_v32 = vpack.c.bf16 %v373_v29, %v372_v28  ;;  %vm246_vm10 = vcmp.ge.f32.partialorder %v182_v23, 0.0  ;;  %v310_v33 = vmul.f32 0.2, %v182_v23 }
  0x29   :  { %v184_v34 = vadd.f32 %v1093_v5, %v113_v24  ;;  %1036 = vst [vmem:[%s1506_s3 + $0x58] sm:$0xff] %v924_v27   ;;  %v185_v36 = vadd.f32 %v1093_v5, %v114_v25  ;;  %v115_v37 = vmul.f32 %v1086_v2, %v44_v26  ;;  %v116_v41 = vmul.f32 %v1086_v2, %v45_v31  ;;  %v55_v24 = vld [vmem:[%s1503_s0 + $0x148] sm:$0xff] }
  0x2a   :  { %vm247_vm11 = vcmp.ge.f32.partialorder %v183_v30, 0.0  ;;  %v311_v35 = vmul.f32 0.2, %v183_v30  ;;  %1037 = vst [vmem:[%s1506_s3 + $0x60] sm:$0xff] %v929_v32   ;;  %v374_v39 = vsel %vm246_vm10, %v182_v23, %v310_v33  ;;  %v117_v49 = vmul.f32 %v1086_v2, %v46_v38  ;;  %v56_v32 = vld [vmem:[%s1503_s0 + $0x150] sm:$0xff]  ;;  %v57_v33 = vld [vmem:[%s1503_s0 + $0x158] sm:$0xff] }
  0x2b   :  { %vm248_vm12 = vcmp.ge.f32.partialorder %v184_v34, 0.0  ;;  %v312_v40 = vmul.f32 0.2, %v184_v34  ;;  %vm249_vm13 = vcmp.ge.f32.partialorder %v185_v36, 0.0  ;;  %v313_v44 = vmul.f32 0.2, %v185_v36 }
  0x2c   :  { %v375_v43 = vsel %vm247_vm11, %v183_v30, %v311_v35  ;;  %v186_v45 = vadd.f32 %v1093_v5, %v115_v37  ;;  %v187_v48 = vadd.f32 %v1093_v5, %v116_v41  ;;  %v118_v54 = vmul.f32 %v1086_v2, %v47_v42  ;;  %v58_v37 = vld [vmem:[%s1503_s0 + $0x160] sm:$0xff] }
  0x2d   :  { %v934_v46 = vpack.c.bf16 %v375_v43, %v374_v39  ;;  %v376_v47 = vsel %vm248_vm12, %v184_v34, %v312_v40  ;;  %v377_v52 = vsel %vm249_vm13, %v185_v36, %v313_v44  ;;  %v188_v58 = vadd.f32 %v1093_v5, %v117_v49  ;;  %v60_v49 = vld [vmem:[%s1503_s0 + $0x170] sm:$0xff] }
  0x2e   :  { %vm250_vm14 = vcmp.ge.f32.partialorder %v186_v45, 0.0  ;;  %v314_v53 = vmul.f32 0.2, %v186_v45  ;;  %v939_v56 = vpack.c.bf16 %v377_v52, %v376_v47  ;;  %vm251_vm15 = vcmp.ge.f32.partialorder %v187_v48, 0.0 }
  0x2f   :  { %1038 = vst [vmem:[%s1506_s3 + $0x68] sm:$0xff] %v934_v46   ;;  %v315_v57 = vmul.f32 0.2, %v187_v48  ;;  %v189_v60 = vadd.f32 %v1093_v5, %v118_v54  ;;  %v119_v61 = vmul.f32 %v1086_v2, %v48_v50  ;;  %v120_v62 = vmul.f32 %v1086_v2, %v49_v51 }
  0x30   :  { %v378_v59 = vsel %vm250_vm14, %v186_v45, %v314_v53  ;;  %1039 = vst [vmem:[%s1506_s3 + $0x70] sm:$0xff] %v939_v56   ;;  %vm252_vm0 = vcmp.ge.f32.partialorder %v188_v58, 0.0  ;;  %v316_v1 = vmul.f32 0.2, %v188_v58  ;;  %v121_v3 = vmul.f32 %v1086_v2, %v50_v55  ;;  %v59_v45 = vld [vmem:[%s1503_s0 + $0x168] sm:$0xff] }
  0x31   :  { %v379_v0 = vsel %vm251_vm15, %v187_v48, %v315_v57  ;;  %vm253_vm1 = vcmp.ge.f32.partialorder %v189_v60, 0.0  ;;  %v317_v7 = vmul.f32 0.2, %v189_v60  ;;  %v190_v8 = vadd.f32 %v1093_v5, %v119_v61  ;;  %v61_v57 = vld [vmem:[%s1503_s0 + $0x178] sm:$0xff] }
  0x32   :  { %v944_v6 = vpack.c.bf16 %v379_v0, %v378_v59  ;;  %v380_v9 = vsel %vm252_vm0, %v188_v58, %v316_v1  ;;  %v191_v10 = vadd.f32 %v1093_v5, %v120_v62  ;;  %v122_v11 = vmul.f32 %v1086_v2, %v51_v63  ;;  %v62_v0 = vld [vmem:[%s1503_s0 + $0x180] sm:$0xff] }
  0x33   :  { %v192_v12 = vadd.f32 %v1093_v5, %v121_v3  ;;  %v381_v14 = vsel %vm253_vm1, %v189_v60, %v317_v7  ;;  %vm254_vm2 = vcmp.ge.f32.partialorder %v190_v8, 0.0  ;;  %v318_v15 = vmul.f32 0.2, %v190_v8 }
  0x34   :  { %1040 = vst [vmem:[%s1506_s3 + $0x78] sm:$0xff] %v944_v6   ;;  %v123_v16 = vmul.f32 %v1086_v2, %v52_v4  ;;  %v949_v17 = vpack.c.bf16 %v381_v14, %v380_v9  ;;  %vm255_vm3 = vcmp.ge.f32.partialorder %v191_v10, 0.0  ;;  %v319_v18 = vmul.f32 0.2, %v191_v10  ;;  %v63_v6 = vld [vmem:[%s1503_s0 + $0x188] sm:$0xff]  ;;  %v64_v14 = vld [vmem:[%s1503_s0 + $0x190] sm:$0xff] }
  0x35   :  { %v193_v19 = vadd.f32 %v1093_v5, %v122_v11  ;;  %v382_v21 = vsel %vm254_vm2, %v190_v8, %v318_v15  ;;  %vm256_vm4 = vcmp.ge.f32.partialorder %v192_v12, 0.0  ;;  %v320_v22 = vmul.f32 0.2, %v192_v12  ;;  %v65_v15 = vld [vmem:[%s1503_s0 + $0x198] sm:$0xff] }
  0x36   :  { %v124_v23 = vmul.f32 %v1086_v2, %v53_v13  ;;  %1041 = vst [vmem:[%s1506_s3 + $0x80] sm:$0xff] %v949_v17   ;;  %v383_v25 = vsel %vm255_vm3, %v191_v10, %v319_v18  ;;  %v194_v27 = vadd.f32 %v1093_v5, %v123_v16  ;;  %v125_v31 = vmul.f32 %v1086_v2, %v54_v20 }
  0x37   :  { %vm257_vm5 = vcmp.ge.f32.partialorder %v193_v19, 0.0  ;;  %v321_v26 = vmul.f32 0.2, %v193_v19  ;;  %v954_v28 = vpack.c.bf16 %v383_v25, %v382_v21  ;;  %v384_v29 = vsel %vm256_vm4, %v192_v12, %v320_v22 }
  0x38   :  { %v195_v30 = vadd.f32 %v1093_v5, %v124_v23  ;;  %vm258_vm6 = vcmp.ge.f32.partialorder %v194_v27, 0.0  ;;  %v322_v35 = vmul.f32 0.2, %v194_v27  ;;  %v126_v36 = vmul.f32 %v1086_v2, %v55_v24 }
  0x39   :  { %v385_v34 = vsel %vm257_vm5, %v193_v19, %v321_v26  ;;  %1042 = vst [vmem:[%s1506_s3 + $0x88] sm:$0xff] %v954_v28   ;;  %v196_v40 = vadd.f32 %v1093_v5, %v125_v31  ;;  %v127_v43 = vmul.f32 %v1086_v2, %v56_v32  ;;  %v128_v44 = vmul.f32 %v1086_v2, %v57_v33  ;;  %v66_v19 = vld [vmem:[%s1503_s0 + $0x1a0] sm:$0xff]  ;;  %v68_v31 = vld [vmem:[%s1503_s0 + $0x1b0] sm:$0xff] }
  0x3a   :  { %v959_v38 = vpack.c.bf16 %v385_v34, %v384_v29  ;;  %vm259_vm7 = vcmp.ge.f32.partialorder %v195_v30, 0.0  ;;  %v323_v39 = vmul.f32 0.2, %v195_v30  ;;  %v386_v41 = vsel %vm258_vm6, %v194_v27, %v322_v35  ;;  %v67_v27 = vld [vmem:[%s1503_s0 + $0x1a8] sm:$0xff] }
  0x3b   :  { %v197_v42 = vadd.f32 %v1093_v5, %v126_v36  ;;  %vm260_vm8 = vcmp.ge.f32.partialorder %v196_v40, 0.0  ;;  %v324_v47 = vmul.f32 0.2, %v196_v40  ;;  %v129_v48 = vmul.f32 %v1086_v2, %v58_v37 }
  0x3c   :  { %1043 = vst [vmem:[%s1506_s3 + $0x90] sm:$0xff] %v959_v38   ;;  %v387_v46 = vsel %vm259_vm7, %v195_v30, %v323_v39  ;;  %v198_v52 = vadd.f32 %v1093_v5, %v127_v43  ;;  %v199_v54 = vadd.f32 %v1093_v5, %v128_v44  ;;  %v130_v55 = vmul.f32 %v1086_v2, %v59_v45  ;;  %v69_v39 = vld [vmem:[%s1503_s0 + $0x1b8] sm:$0xff] }
  0x3d   :  { %v964_v50 = vpack.c.bf16 %v387_v46, %v386_v41  ;;  %vm261_vm9 = vcmp.ge.f32.partialorder %v197_v42, 0.0  ;;  %v325_v51 = vmul.f32 0.2, %v197_v42  ;;  %v388_v53 = vsel %vm260_vm8, %v196_v40, %v324_v47  ;;  %v70_v46 = vld [vmem:[%s1503_s0 + $0x1c0] sm:$0xff] }
  0x3e   :  { %v200_v56 = vadd.f32 %v1093_v5, %v129_v48  ;;  %vm262_vm10 = vcmp.ge.f32.partialorder %v198_v52, 0.0  ;;  %v326_v59 = vmul.f32 0.2, %v198_v52  ;;  %v131_v60 = vmul.f32 %v1086_v2, %v60_v49 }
  0x3f   :  { %1044 = vst [vmem:[%s1506_s3 + $0x98] sm:$0xff] %v964_v50   ;;  %v389_v58 = vsel %vm261_vm9, %v197_v42, %v325_v51  ;;  %vm263_vm11 = vcmp.ge.f32.partialorder %v199_v54, 0.0  ;;  %v327_v62 = vmul.f32 0.2, %v199_v54  ;;  %v201_v63 = vadd.f32 %v1093_v5, %v130_v55  ;;  %v71_v50 = vld [vmem:[%s1503_s0 + $0x1c8] sm:$0xff] }
  0x40   :  { %v969_v61 = vpack.c.bf16 %v389_v58, %v388_v53  ;;  %v390_v1 = vsel %vm262_vm10, %v198_v52, %v326_v59  ;;  %vm264_vm12 = vcmp.ge.f32.partialorder %v200_v56, 0.0  ;;  %v328_v3 = vmul.f32 0.2, %v200_v56  ;;  %v72_v58 = vld [vmem:[%s1503_s0 + $0x1d0] sm:$0xff]  ;;  %v73_v59 = vld [vmem:[%s1503_s0 + $0x1d8] sm:$0xff] }
  0x41   :  { %v132_v4 = vmul.f32 %v1086_v2, %v61_v57  ;;  %v391_v7 = vsel %vm263_vm11, %v199_v54, %v327_v62  ;;  %vm265_vm13 = vcmp.ge.f32.partialorder %v201_v63, 0.0  ;;  %v329_v8 = vmul.f32 0.2, %v201_v63 }
  0x42   :  { %1045 = vst [vmem:[%s1506_s3 + $0xa0] sm:$0xff] %v969_v61   ;;  %v202_v9 = vadd.f32 %v1093_v5, %v131_v60  ;;  %v974_v10 = vpack.c.bf16 %v391_v7, %v390_v1  ;;  %v392_v11 = vsel %vm264_vm12, %v200_v56, %v328_v3  ;;  %v133_v13 = vmul.f32 %v1086_v2, %v62_v0 }
  0x43   :  { %v203_v12 = vadd.f32 %v1093_v5, %v132_v4  ;;  %v393_v16 = vsel %vm265_vm13, %v201_v63, %v329_v8  ;;  %v134_v18 = vmul.f32 %v1086_v2, %v63_v6  ;;  %v135_v25 = vmul.f32 %v1086_v2, %v64_v14  ;;  %v74_v63 = vld [vmem:[%s1503_s0 + $0x1e0] sm:$0xff] }
  0x44   :  { %vm266_vm14 = vcmp.ge.f32.partialorder %v202_v9, 0.0  ;;  %v330_v17 = vmul.f32 0.2, %v202_v9  ;;  %1046 = vst [vmem:[%s1506_s3 + $0xa8] sm:$0xff] %v974_v10   ;;  %v979_v20 = vpack.c.bf16 %v393_v16, %v392_v11  ;;  %v204_v22 = vadd.f32 %v1093_v5, %v133_v13  ;;  %v76_v13 = vld [vmem:[%s1503_s0 + $0x1f0] sm:$0xff] }
  0x45   :  { %vm267_vm15 = vcmp.ge.f32.partialorder %v203_v12, 0.0  ;;  %v331_v21 = vmul.f32 0.2, %v203_v12  ;;  %v205_v24 = vadd.f32 %v1093_v5, %v134_v18  ;;  %v136_v26 = vmul.f32 %v1086_v2, %v65_v15 }
  0x46   :  { %v394_v23 = vsel %vm266_vm14, %v202_v9, %v330_v17  ;;  %1047 = vst [vmem:[%s1506_s3 + $0xb0] sm:$0xff] %v979_v20   ;;  %vm268_vm0 = vcmp.ge.f32.partialorder %v204_v22, 0.0  ;;  %v332_v29 = vmul.f32 0.2, %v204_v22  ;;  %v137_v30 = vmul.f32 %v1086_v2, %v66_v19  ;;  %v75_v9 = vld [vmem:[%s1503_s0 + $0x1e8] sm:$0xff] }
  0x47   :  { %v395_v28 = vsel %vm267_vm15, %v203_v12, %v331_v21  ;;  %vm269_vm1 = vcmp.ge.f32.partialorder %v205_v24, 0.0  ;;  %v333_v33 = vmul.f32 0.2, %v205_v24  ;;  %v206_v34 = vadd.f32 %v1093_v5, %v135_v25  ;;  %v77_v21 = vld [vmem:[%s1503_s0 + $0x1f8] sm:$0xff] }
  0x48   :  { %v984_v32 = vpack.c.bf16 %v395_v28, %v394_v23  ;;  %v396_v35 = vsel %vm268_vm0, %v204_v22, %v332_v29  ;;  %v207_v36 = vadd.f32 %v1093_v5, %v136_v26  ;;  %v138_v37 = vmul.f32 %v1086_v2, %v67_v27 }
  0x49   :  { %v208_v38 = vadd.f32 %v1093_v5, %v137_v30  ;;  %v397_v40 = vsel %vm269_vm1, %v205_v24, %v333_v33  ;;  %vm270_vm2 = vcmp.ge.f32.partialorder %v206_v34, 0.0  ;;  %v334_v41 = vmul.f32 0.2, %v206_v34 }
  0x4a   :  { %1048 = vst [vmem:[%s1506_s3 + $0xb8] sm:$0xff] %v984_v32   ;;  %v139_v42 = vmul.f32 %v1086_v2, %v68_v31  ;;  %v989_v43 = vpack.c.bf16 %v397_v40, %v396_v35  ;;  %vm271_vm3 = vcmp.ge.f32.partialorder %v207_v36, 0.0  ;;  %v335_v44 = vmul.f32 0.2, %v207_v36 }
  0x4b   :  { %v209_v45 = vadd.f32 %v1093_v5, %v138_v37  ;;  %v398_v47 = vsel %vm270_vm2, %v206_v34, %v334_v41  ;;  %vm272_vm4 = vcmp.ge.f32.partialorder %v208_v38, 0.0  ;;  %v336_v48 = vmul.f32 0.2, %v208_v38 }
  0x4c   :  { %v140_v49 = vmul.f32 %v1086_v2, %v69_v39  ;;  %1049 = vst [vmem:[%s1506_s3 + $0xc0] sm:$0xff] %v989_v43   ;;  %v399_v51 = vsel %vm271_vm3, %v207_v36, %v335_v44  ;;  %v210_v53 = vadd.f32 %v1093_v5, %v139_v42  ;;  %v141_v57 = vmul.f32 %v1086_v2, %v70_v46 }
  0x4d   :  { %vm273_vm5 = vcmp.ge.f32.partialorder %v209_v45, 0.0  ;;  %v337_v52 = vmul.f32 0.2, %v209_v45  ;;  %v994_v54 = vpack.c.bf16 %v399_v51, %v398_v47  ;;  %v400_v55 = vsel %vm272_vm4, %v208_v38, %v336_v48 }
  0x4e   :  { %v211_v56 = vadd.f32 %v1093_v5, %v140_v49  ;;  %vm274_vm6 = vcmp.ge.f32.partialorder %v210_v53, 0.0  ;;  %v338_v61 = vmul.f32 0.2, %v210_v53  ;;  %v142_v62 = vmul.f32 %v1086_v2, %v71_v50 }
  0x4f   :  { %v401_v60 = vsel %vm273_vm5, %v209_v45, %v337_v52  ;;  %1050 = vst [vmem:[%s1506_s3 + $0xc8] sm:$0xff] %v994_v54   ;;  %v212_v3 = vadd.f32 %v1093_v5, %v141_v57  ;;  %v143_v7 = vmul.f32 %v1086_v2, %v72_v58  ;;  %v144_v8 = vmul.f32 %v1086_v2, %v73_v59 }
  0x50   :  { %v999_v0 = vpack.c.bf16 %v401_v60, %v400_v55  ;;  %vm275_vm7 = vcmp.ge.f32.partialorder %v211_v56, 0.0  ;;  %v339_v1 = vmul.f32 0.2, %v211_v56  ;;  %v402_v4 = vsel %vm274_vm6, %v210_v53, %v338_v61 }
  0x51   :  { %v213_v6 = vadd.f32 %v1093_v5, %v142_v62  ;;  %vm276_vm8 = vcmp.ge.f32.partialorder %v212_v3, 0.0  ;;  %v340_v11 = vmul.f32 0.2, %v212_v3  ;;  %v145_v12 = vmul.f32 %v1086_v2, %v74_v63 }
  0x52   :  { %1051 = vst [vmem:[%s1506_s3 + $0xd0] sm:$0xff] %v999_v0   ;;  %v403_v10 = vsel %vm275_vm7, %v211_v56, %v339_v1  ;;  %v214_v16 = vadd.f32 %v1093_v5, %v143_v7  ;;  %v215_v18 = vadd.f32 %v1093_v5, %v144_v8  ;;  %v146_v19 = vmul.f32 %v1086_v2, %v75_v9 }
  0x53   :  { %v1004_v14 = vpack.c.bf16 %v403_v10, %v402_v4  ;;  %vm277_vm9 = vcmp.ge.f32.partialorder %v213_v6, 0.0  ;;  %v341_v15 = vmul.f32 0.2, %v213_v6  ;;  %v404_v17 = vsel %vm276_vm8, %v212_v3, %v340_v11 }
  0x54   :  { %v216_v20 = vadd.f32 %v1093_v5, %v145_v12  ;;  %vm278_vm10 = vcmp.ge.f32.partialorder %v214_v16, 0.0  ;;  %v342_v23 = vmul.f32 0.2, %v214_v16  ;;  %v147_v24 = vmul.f32 %v1086_v2, %v76_v13 }
  0x55   :  { %1052 = vst [vmem:[%s1506_s3 + $0xd8] sm:$0xff] %v1004_v14   ;;  %v405_v22 = vsel %vm277_vm9, %v213_v6, %v341_v15  ;;  %vm279_vm11 = vcmp.ge.f32.partialorder %v215_v18, 0.0  ;;  %v343_v26 = vmul.f32 0.2, %v215_v18  ;;  %v217_v27 = vadd.f32 %v1093_v5, %v146_v19 }
  0x56   :  { %v1009_v25 = vpack.c.bf16 %v405_v22, %v404_v17  ;;  %v406_v28 = vsel %vm278_vm10, %v214_v16, %v342_v23  ;;  %vm280_vm12 = vcmp.ge.f32.partialorder %v216_v20, 0.0  ;;  %v344_v29 = vmul.f32 0.2, %v216_v20 }
  0x57   :  { %v148_v30 = vmul.f32 %v1086_v2, %v77_v21  ;;  %v407_v31 = vsel %vm279_vm11, %v215_v18, %v343_v26  ;;  %vm281_vm13 = vcmp.ge.f32.partialorder %v217_v27, 0.0  ;;  %v345_v32 = vmul.f32 0.2, %v217_v27 }
  0x58   :  { %1053 = vst [vmem:[%s1506_s3 + $0xe0] sm:$0xff] %v1009_v25   ;;  %v218_v33 = vadd.f32 %v1093_v5, %v147_v24  ;;  %v1014_v34 = vpack.c.bf16 %v407_v31, %v406_v28  ;;  %v408_v35 = vsel %vm280_vm12, %v216_v20, %v344_v29 }
  0x59   :  { %v219_v36 = vadd.f32 %v1093_v5, %v148_v30  ;;  %v409_v37 = vsel %vm281_vm13, %v217_v27, %v345_v32 }
  0x5a   :  { %vm282_vm14 = vcmp.ge.f32.partialorder %v218_v33, 0.0  ;;  %v346_v38 = vmul.f32 0.2, %v218_v33  ;;  %1054 = vst [vmem:[%s1506_s3 + $0xe8] sm:$0xff] %v1014_v34   ;;  %v1019_v2 = vpack.c.bf16 %v409_v37, %v408_v35 }
  0x5b   :  { %vm283_vm15 = vcmp.ge.f32.partialorder %v219_v36, 0.0  ;;  %v347_v39 = vmul.f32 0.2, %v219_v36 }
  0x5c   :  { %v410_v40 = vsel %vm282_vm14, %v218_v33, %v346_v38  ;;  %1055 = vst [vmem:[%s1506_s3 + $0xf0] sm:$0xff] %v1019_v2  }
  0x5d   :  { %v411_v41 = vsel %vm283_vm15, %v219_v36, %v347_v39 }
  0x5e   :  { %v1024_v42 = vpack.c.bf16 %v411_v41, %v410_v40 }
  0x60   :  { %1056 = vst [vmem:[%s1506_s3 + $0xf8] sm:$0xff] %v1024_v42  }

// kernel: discriminator_forward.11
= control target key start
LH: loop header
LB: loop body
LE: loop exit
PB: predicated region body
PF: predicated region fallthrough
CT: control target
= control target key end

     0   :  { %s1652_s12 = smov 0   ;;  %s1654_s13 = smov 0   ;;  %s1922_s0 = inlined_call_operand.vmem [shape: bf16[128,2048], index: 0, kind: input, shape index: {}]   ;;  %s1923_s1 = inlined_call_operand.vmem [shape: bf16[2048,256], index: 1, kind: input, shape index: {}]   ;;  %s1924_s2 = inlined_call_operand.vmem [shape: f32[128,256], index: 2, kind: output, shape index: {0}]   ;;  %s1925_s3 = inlined_call_operand.vmem [shape: f32[2,2,256], index: 3, kind: output, shape index: {1}]  }
   0x1   :  { %s1656_s14 = smov 0   ;;  %s1658_s15 = smov 0  }
   0x2   :  { %s1660_s16 = smov 0   ;;  %s1662_s17 = smov 0  }
   0x3   :  { %s1664_s18 = smov 0  }
   0x4 LB: > { %s26_s19 = sadd.s32 1, %s1621_s16  ;;  %s33_s20 = sadd.s32 1, %s1625_s17  ;;  %s1629_s18 = sphi %s1664_s18, %s14_s18   ;;  %s1625_s17 = sphi %s1662_s17, %s1931_s17   ;;  %s1621_s16 = sphi %s1660_s16, %s1930_s16   ;;  %s1617_s15 = sphi %s1658_s15, %s1929_s15   ;;  %s1613_s14 = sphi %s1656_s14, %s1928_s14   ;;  %s1609_s13 = sphi %s1654_s13, %s1927_s13   ;;  %s1605_s12 = sphi %s1652_s12, %s1926_s12  }
   0x5   : > { %p27_p0 = scmp.ge.s32.totalorder %s26_s19, 4  ;;  %p49_p1 = scmp.ne.s32.totalorder %s1609_s13, %s1605_s12 }
   0x6   : > { %p50_p2 = scmp.eq.s32.totalorder %s1629_s18, 0  ;;  %s42_s24 = sadd.s32 1, %s1609_s13 }
   0x7   : > { %s1933_s19 = smov (%p27_p0, %s26_s19), 0  ;;  %s1935_s20 = smov (!%p27_p0, %s33_s20), %s1625_s17 }
   0x8   : > { %p51_p3 = por %p50_p2, %p49_p1  ;;  %p35_p4 = scmp.ge.s32.totalorder %s1935_s20, 2 }
   0x9   : > { %s38_s21 = ssub.s32 %s1621_s16, %s1933_s19  ;;  %p1293_p6 = scmp.ge.s32.totalorder %s1629_s18, 8 }
   0xa   : > { %s1937_s20 = smov (%p35_p4, %s1935_s20), 0 }
   0xb   : > { %s37_s22 = ssub.s32 %s1625_s17, %s1937_s20  ;;  %159 = sbr.rel (%p1293_p6) target bundleno = 31 (0x1f), region = 16 }
   0xc   : > { %s39_s23 = sor.u32 %s38_s21, %s37_s22 }
   0xd   : > { %p40_p5 = scmp.eq.s32.totalorder %s39_s23, 0 }
   0xf   : > { %s1703_s25 = scalar_select %p40_p5, %s1609_s13, %s42_s24  }
  0x10   : > { %162 = sbr.rel (!%p51_p3) target bundleno = 31 (0x1f), region = 20  ;;  %s164_s26 = sand.u32 (%p51_p3), 1, %s1609_s13  }
  0x11   : > { %s1296_s27 = sshll.u32 (%p51_p3), %s1621_s16, 2  ;;  %s1294_s28 = sshll.u32 (%p51_p3), %s164_s26, 7 }
  0x12   : > { %s1394_s29 = sshll.u32 (%p51_p3), %s1625_s17, 7  ;;  %s166_s8 = scalar_lea.vmem (%p51_p3), [#allocation2], %s1294_s28 }
  0x13   : > { %s170_s30 = sadd.s32 (%p51_p3), %s1394_s29, %s1296_s27 }
  0x14   : > { %s1298_s4 = sshll.u32 (%p51_p3), %s170_s30, 2 }
  0x15   : > { %s1712_s7 = scalar_lea.vmem %s1922_s0, %s1298_s4 }
  0x16   : > { %v185_v0 = vld [vmem:[%s1712_s7] sm:$0xff]  ;;  %v187_v1 = vld [vmem:[%s1712_s7 + $0x8] sm:$0xff] }
  0x17   : > { %v189_v2 = vld [vmem:[%s1712_s7 + $0x40] sm:$0xff]  ;;  %186 = vst [vmem:[%s166_s8] sm:$0xff] %v185_v0  ;;  %188 = vst [vmem:[%s166_s8 + $0x8] sm:$0xff] %v187_v1  ;;  %v191_v3 = vld [vmem:[%s1712_s7 + $0x48] sm:$0xff] }
  0x18   : > { %190 = vst [vmem:[%s166_s8 + $0x10] sm:$0xff] %v189_v2  ;;  %v193_v4 = vld [vmem:[%s1712_s7 + $0x80] sm:$0xff]  ;;  %v195_v5 = vld [vmem:[%s1712_s7 + $0x88] sm:$0xff]  ;;  %192 = vst [vmem:[%s166_s8 + $0x18] sm:$0xff] %v191_v3 }
  0x19   : > { %194 = vst [vmem:[%s166_s8 + $0x20] sm:$0xff] %v193_v4  ;;  %196 = vst [vmem:[%s166_s8 + $0x28] sm:$0xff] %v195_v5  ;;  %v197_v6 = vld [vmem:[%s1712_s7 + $0xc0] sm:$0xff]  ;;  %v199_v7 = vld [vmem:[%s1712_s7 + $0xc8] sm:$0xff] }
  0x1a   : > { %v201_v8 = vld [vmem:[%s1712_s7 + $0x100] sm:$0xff]  ;;  %198 = vst [vmem:[%s166_s8 + $0x30] sm:$0xff] %v197_v6  ;;  %200 = vst [vmem:[%s166_s8 + $0x38] sm:$0xff] %v199_v7  ;;  %v203_v9 = vld [vmem:[%s1712_s7 + $0x108] sm:$0xff] }
  0x1b   : > { %202 = vst [vmem:[%s166_s8 + $0x40] sm:$0xff] %v201_v8  ;;  %v205_v10 = vld [vmem:[%s1712_s7 + $0x140] sm:$0xff]  ;;  %v207_v11 = vld [vmem:[%s1712_s7 + $0x148] sm:$0xff]  ;;  %204 = vst [vmem:[%s166_s8 + $0x48] sm:$0xff] %v203_v9 }
  0x1c   : > { %206 = vst [vmem:[%s166_s8 + $0x50] sm:$0xff] %v205_v10  ;;  %208 = vst [vmem:[%s166_s8 + $0x58] sm:$0xff] %v207_v11  ;;  %v209_v12 = vld [vmem:[%s1712_s7 + $0x180] sm:$0xff]  ;;  %v211_v13 = vld [vmem:[%s1712_s7 + $0x188] sm:$0xff] }
  0x1d   : > { %v213_v14 = vld [vmem:[%s1712_s7 + $0x1c0] sm:$0xff]  ;;  %210 = vst [vmem:[%s166_s8 + $0x60] sm:$0xff] %v209_v12  ;;  %212 = vst [vmem:[%s166_s8 + $0x68] sm:$0xff] %v211_v13  ;;  %v215_v15 = vld [vmem:[%s1712_s7 + $0x1c8] sm:$0xff] }
  0x1e   : > { %214 = vst [vmem:[%s166_s8 + $0x70] sm:$0xff] %v213_v14  ;;  %216 = vst [vmem:[%s166_s8 + $0x78] sm:$0xff] %v215_v15 }
  0x1f PF: > { %p1299_p7 = scmp.ge.s32.totalorder %s1629_s18, 1  ;;  %p236_p8 = scmp.lt.s32.totalorder %s1629_s18, 9 }
  0x21   : > { %p237_p9 = pnand %p1299_p7, %p236_p8 }
  0x22   : > { %s243_s9 = sand.u32 (!%p237_p9), 1, %s1605_s12   ;;  %s1301_s10 = sshll.u32 (!%p237_p9), %s1613_s14, 6 }
  0x23   : > { %240 = sbr.rel (%p237_p9) target bundleno = 386 (0x182), region = 47  ;;  %s1300_s11 = sshll.u32 (!%p237_p9), %s243_s9, 7 }
  0x24   : > { %p294_p10 = scmp.lt.s32.totalorder (!%p237_p9), %s1301_s10, 255  ;;  %s1304_s21 = sshll.u32 (!%p237_p9), %s1617_s15, 3 }
  0x25   : > { %p306_p11 = scmp.lt.s32.totalorder (!%p237_p9), %s1304_s21, 15  ;;  %p317_p12 = scmp.lt.s32.totalorder (!%p237_p9), %s1617_s15, 1 }
  0x26   : > { %s1752_s7 = scalar_lea.vmem (!%p237_p9), [#allocation2], %s1300_s11  ;;  %p1309_p13 = scmp.ne.s32.totalorder (!%p237_p9), %s1613_s14, 0 }
  0x28   : > { %s1939_s10 = smov (!%p294_p10, %s1301_s10), 255  ;;  %s1941_s21 = smov (!%p306_p11, %s1304_s21), 15 }
  0x29   : > { %s1395_s22 = sshll.u32 %s1939_s10, 3  ;;  %s1943_s15 = smov (!%p317_p12, %s1617_s15), 1 }
  0x2a   : > { %s1739_s26 = scalar_lea.vmem %s1923_s1, %s1395_s22  ;;  %s1396_s27 = sshll.u32 %s1941_s21, 4 }
  0x2b   : > { %s1745_s12 = scalar_lea.vmem %s1924_s2, %s1396_s27  ;;  %s1397_s30 = sshll.u32 %s1943_s15, 2 }
  0x2c   : > { %s1750_s6 = scalar_lea.vmem %s1925_s3, %s1397_s30  ;;  %329 = sbr.rel (%p1309_p13) target bundleno = 58 (0x3a), region = 55 }
  0x31   : > { %v1631_v16 = vmov 0.0  }
  0x32   : > { %330 = vst [vmem:[%s1745_s12] sm:$0xff] %v1631_v16  ;;  %331 = vst [vmem:[%s1745_s12 + $0x8] sm:$0xff] %v1631_v16 }
  0x33   : > { %332 = vst [vmem:[%s1745_s12 + $0x10] sm:$0xff] %v1631_v16  ;;  %333 = vst [vmem:[%s1745_s12 + $0x18] sm:$0xff] %v1631_v16 }
  0x34   : > { %334 = vst [vmem:[%s1745_s12 + $0x20] sm:$0xff] %v1631_v16  ;;  %335 = vst [vmem:[%s1745_s12 + $0x28] sm:$0xff] %v1631_v16 }
  0x35   : > { %336 = vst [vmem:[%s1745_s12 + $0x30] sm:$0xff] %v1631_v16  ;;  %337 = vst [vmem:[%s1745_s12 + $0x38] sm:$0xff] %v1631_v16 }
  0x36   : > { %338 = vst [vmem:[%s1745_s12 + $0x40] sm:$0xff] %v1631_v16  ;;  %339 = vst [vmem:[%s1745_s12 + $0x48] sm:$0xff] %v1631_v16 }
  0x37   : > { %340 = vst [vmem:[%s1745_s12 + $0x50] sm:$0xff] %v1631_v16  ;;  %341 = vst [vmem:[%s1745_s12 + $0x58] sm:$0xff] %v1631_v16 }
  0x38   : > { %342 = vst [vmem:[%s1745_s12 + $0x60] sm:$0xff] %v1631_v16  ;;  %343 = vst [vmem:[%s1745_s12 + $0x68] sm:$0xff] %v1631_v16 }
  0x39   : > { %344 = vst [vmem:[%s1745_s12 + $0x70] sm:$0xff] %v1631_v16  ;;  %345 = vst [vmem:[%s1745_s12 + $0x78] sm:$0xff] %v1631_v16 }
  0x3a PF: > { %v1455_v17 = vld [vmem:[%s1739_s26 + $0x74] ss:$8 sps:$4 sm:$0xff]   ;;  %v1459_v19 = vld [vmem:[%s1739_s26 + $0x70] ss:$8 sps:$4 sm:$0xff]   ;;  %v1461_v21 = vld [vmem:[%s1739_s26 + $0x64] ss:$8 sps:$4 sm:$0xff]  }
  0x3b   : > { %v1457_v18 = vld [vmem:[%s1739_s26 + $0x174] ss:$8 sps:$4 sm:$0xff]   ;;  %842 = vmatprep.subr.bf16.mxu0 %v1455_v17  ;;  %v1460_v20 = vld [vmem:[%s1739_s26 + $0x170] ss:$8 sps:$4 sm:$0xff]   ;;  %v1463_v22 = vld [vmem:[%s1739_s26 + $0x164] ss:$8 sps:$4 sm:$0xff]  }
  0x3c   : > { %915 = vmatprep.subr.bf16.mxu1 %v1457_v18  ;;  %843 = vmatpush1.bf16.msra.mxu0 %v1459_v19  ;;  %v1465_v23 = vld [vmem:[%s1739_s26 + $0x60] ss:$8 sps:$4 sm:$0xff]   ;;  %v1467_v25 = vld [vmem:[%s1739_s26 + $0x54] ss:$8 sps:$4 sm:$0xff]   ;;  %v1471_v27 = vld [vmem:[%s1739_s26 + $0x50] ss:$8 sps:$4 sm:$0xff]  }
  0x3d   : > { %916 = vmatpush1.bf16.msra.mxu1 %v1460_v20  ;;  %844 = vmatprep.subr.bf16.mxu0 %v1461_v21  ;;  %v1466_v24 = vld [vmem:[%s1739_s26 + $0x160] ss:$8 sps:$4 sm:$0xff]   ;;  %v1469_v26 = vld [vmem:[%s1739_s26 + $0x154] ss:$8 sps:$4 sm:$0xff]   ;;  %v1472_v28 = vld [vmem:[%s1739_s26 + $0x150] ss:$8 sps:$4 sm:$0xff]  }
  0x3e   : > { %917 = vmatprep.subr.bf16.mxu1 %v1463_v22  ;;  %v1473_v29 = vld [vmem:[%s1739_s26 + $0x44] ss:$8 sps:$4 sm:$0xff]   ;;  %v1477_v31 = vld [vmem:[%s1739_s26 + $0x40] ss:$8 sps:$4 sm:$0xff]   ;;  %v1479_v33 = vld [vmem:[%s1739_s26 + $0x34] ss:$8 sps:$4 sm:$0xff]  }
  0x3f   : > { %v1475_v30 = vld [vmem:[%s1739_s26 + $0x144] ss:$8 sps:$4 sm:$0xff]   ;;  %v1478_v32 = vld [vmem:[%s1739_s26 + $0x140] ss:$8 sps:$4 sm:$0xff]   ;;  %v1481_v34 = vld [vmem:[%s1739_s26 + $0x134] ss:$8 sps:$4 sm:$0xff]  }
  0x40   : > { %845 = vmatpush1.bf16.msra.mxu0 %v1465_v23  ;;  %v1483_v35 = vld [vmem:[%s1739_s26 + $0x30] ss:$8 sps:$4 sm:$0xff]   ;;  %v1485_v37 = vld [vmem:[%s1739_s26 + $0x24] ss:$8 sps:$4 sm:$0xff]   ;;  %v1489_v39 = vld [vmem:[%s1739_s26 + $0x20] ss:$8 sps:$4 sm:$0xff]  }
  0x41   : > { %918 = vmatpush1.bf16.msra.mxu1 %v1466_v24  ;;  %846 = vmatprep.subr.bf16.mxu0 %v1467_v25  ;;  %v1484_v36 = vld [vmem:[%s1739_s26 + $0x130] ss:$8 sps:$4 sm:$0xff]   ;;  %v1487_v38 = vld [vmem:[%s1739_s26 + $0x124] ss:$8 sps:$4 sm:$0xff]   ;;  %v1490_v40 = vld [vmem:[%s1739_s26 + $0x120] ss:$8 sps:$4 sm:$0xff]  }
  0x42   : > { %919 = vmatprep.subr.bf16.mxu1 %v1469_v26  ;;  %v1491_v41 = vld [vmem:[%s1739_s26 + $0x14] ss:$8 sps:$4 sm:$0xff]   ;;  %v1495_v43 = vld [vmem:[%s1739_s26 + $0x10] ss:$8 sps:$4 sm:$0xff]   ;;  %v1497_v45 = vld [vmem:[%s1739_s26 + $0x4] ss:$8 sps:$4 sm:$0xff]  }
  0x43   : > { %v1493_v42 = vld [vmem:[%s1739_s26 + $0x114] ss:$8 sps:$4 sm:$0xff]   ;;  %v1496_v44 = vld [vmem:[%s1739_s26 + $0x110] ss:$8 sps:$4 sm:$0xff]   ;;  %v1499_v46 = vld [vmem:[%s1739_s26 + $0x104] ss:$8 sps:$4 sm:$0xff]  }
  0x44   : > { %847 = vmatpush1.bf16.msra.mxu0 %v1471_v27  ;;  %v1501_v47 = vld [vmem:[%s1739_s26] ss:$8 sps:$4 sm:$0xff]   ;;  %v1503_v49 = vld [vmem:[%s1739_s26 + $0xf4] ss:$8 sps:$4 sm:$0xff]   ;;  %v1507_v51 = vld [vmem:[%s1739_s26 + $0xf0] ss:$8 sps:$4 sm:$0xff]  }
  0x45   : > { %920 = vmatpush1.bf16.msra.mxu1 %v1472_v28  ;;  %848 = vmatprep.subr.bf16.mxu0 %v1473_v29  ;;  %v1502_v48 = vld [vmem:[%s1739_s26 + $0x100] ss:$8 sps:$4 sm:$0xff]   ;;  %v1505_v50 = vld [vmem:[%s1739_s26 + $0x1f4] ss:$8 sps:$4 sm:$0xff]   ;;  %v1508_v52 = vld [vmem:[%s1739_s26 + $0x1f0] ss:$8 sps:$4 sm:$0xff]  }
  0x46   : > { %921 = vmatprep.subr.bf16.mxu1 %v1475_v30  ;;  %v1509_v53 = vld [vmem:[%s1739_s26 + $0xe4] ss:$8 sps:$4 sm:$0xff]   ;;  %v1513_v55 = vld [vmem:[%s1739_s26 + $0xe0] ss:$8 sps:$4 sm:$0xff]   ;;  %v1515_v57 = vld [vmem:[%s1739_s26 + $0xd4] ss:$8 sps:$4 sm:$0xff]  }
  0x47   : > { %v1511_v54 = vld [vmem:[%s1739_s26 + $0x1e4] ss:$8 sps:$4 sm:$0xff]   ;;  %v1514_v56 = vld [vmem:[%s1739_s26 + $0x1e0] ss:$8 sps:$4 sm:$0xff]   ;;  %v1517_v58 = vld [vmem:[%s1739_s26 + $0x1d4] ss:$8 sps:$4 sm:$0xff]  }
  0x48   : > { %849 = vmatpush1.bf16.msra.mxu0 %v1477_v31  ;;  %v1519_v59 = vld [vmem:[%s1739_s26 + $0xd0] ss:$8 sps:$4 sm:$0xff]   ;;  %v1521_v61 = vld [vmem:[%s1739_s26 + $0xc4] ss:$8 sps:$4 sm:$0xff]   ;;  %v1525_v63 = vld [vmem:[%s1739_s26 + $0xc0] ss:$8 sps:$4 sm:$0xff]  }
  0x49   : > { %922 = vmatpush1.bf16.msra.mxu1 %v1478_v32  ;;  %850 = vmatprep.subr.bf16.mxu0 %v1479_v33  ;;  %v1520_v60 = vld [vmem:[%s1739_s26 + $0x1d0] ss:$8 sps:$4 sm:$0xff]   ;;  %v1523_v62 = vld [vmem:[%s1739_s26 + $0x1c4] ss:$8 sps:$4 sm:$0xff]   ;;  %v1526_v0 = vld [vmem:[%s1739_s26 + $0x1c0] ss:$8 sps:$4 sm:$0xff]  }
  0x4a   : > { %923 = vmatprep.subr.bf16.mxu1 %v1481_v34  ;;  %v1527_v1 = vld [vmem:[%s1739_s26 + $0xb4] ss:$8 sps:$4 sm:$0xff]   ;;  %v1531_v5 = vld [vmem:[%s1739_s26 + $0xb0] ss:$8 sps:$4 sm:$0xff]   ;;  %v1533_v7 = vld [vmem:[%s1739_s26 + $0xa4] ss:$8 sps:$4 sm:$0xff]  }
  0x4b   : > { %v1553_v2 = vld [vmem:[%s1752_s7 + $0x4] ss:$16 sps:$4 sm:$0xff]   ;;  %v1556_v4 = vld [vmem:[%s1752_s7 + $0xc] ss:$16 sps:$4 sm:$0xff]   ;;  %v1532_v6 = vld [vmem:[%s1739_s26 + $0x1b0] ss:$8 sps:$4 sm:$0xff]  }
  0x4c   : > { %851 = vmatpush1.bf16.msra.mxu0 %v1483_v35  ;;  %v1529_v3 = vld [vmem:[%s1739_s26 + $0x1b4] ss:$8 sps:$4 sm:$0xff]   ;;  %874 = vmatprep.mubr.bf16.mxu0 %v1553_v2  ;;  %v1535_v8 = vld [vmem:[%s1739_s26 + $0x1a4] ss:$8 sps:$4 sm:$0xff]   ;;  %v1537_v9 = vld [vmem:[%s1739_s26 + $0xa0] ss:$8 sps:$4 sm:$0xff]  }
  0x4d   : > { %924 = vmatpush1.bf16.msra.mxu1 %v1484_v36  ;;  %852 = vmatprep.subr.bf16.mxu0 %v1485_v37  ;;  %v1538_v10 = vld [vmem:[%s1739_s26 + $0x1a0] ss:$8 sps:$4 sm:$0xff]   ;;  %v1539_v11 = vld [vmem:[%s1739_s26 + $0x94] ss:$8 sps:$4 sm:$0xff]   ;;  %v1543_v13 = vld [vmem:[%s1739_s26 + $0x90] ss:$8 sps:$4 sm:$0xff]  }
  0x4e   : > { %925 = vmatprep.subr.bf16.mxu1 %v1487_v38  ;;  %947 = vmatprep.mubr.bf16.mxu1 %v1556_v4  ;;  %v1541_v12 = vld [vmem:[%s1739_s26 + $0x194] ss:$8 sps:$4 sm:$0xff]   ;;  %v1544_v14 = vld [vmem:[%s1739_s26 + $0x190] ss:$8 sps:$4 sm:$0xff]   ;;  %v1545_v15 = vld [vmem:[%s1739_s26 + $0x84] ss:$8 sps:$4 sm:$0xff]  }
  0x4f   : > { %v1547_v16 = vld [vmem:[%s1739_s26 + $0x184] ss:$8 sps:$4 sm:$0xff]   ;;  %v1549_v17 = vld [vmem:[%s1739_s26 + $0x80] ss:$8 sps:$4 sm:$0xff]   ;;  %v353_v4 = vld [vmem:[%s1745_s12 + $0x38] sm:$0xff]  ;;  %p1390_p0 = scmp.ne.s32.totalorder %s1613_s14, 3 }
  0x50   : > { %853 = vmatpush1.bf16.msra.mxu0 %v1489_v39  ;;  %v1550_v18 = vld [vmem:[%s1739_s26 + $0x180] ss:$8 sps:$4 sm:$0xff]   ;;  %v1557_v21 = vld [vmem:[%s1752_s7 + $0x24] ss:$16 sps:$4 sm:$0xff]   ;;  %v1559_v22 = vld [vmem:[%s1752_s7 + $0x2c] ss:$16 sps:$4 sm:$0xff]  }
  0x51   : > { %926 = vmatpush1.bf16.msra.mxu1 %v1490_v40  ;;  %854 = vmatprep.subr.bf16.mxu0 %v1491_v41  ;;  %v1551_v19 = vld [vmem:[%s1752_s7] ss:$16 sps:$4 sm:$0xff]   ;;  %v1554_v20 = vld [vmem:[%s1752_s7 + $0x8] ss:$16 sps:$4 sm:$0xff]   ;;  %v1563_v25 = vld [vmem:[%s1752_s7 + $0x44] ss:$16 sps:$4 sm:$0xff]  }
  0x52   : > { %927 = vmatprep.subr.bf16.mxu1 %v1493_v42  ;;  %v1561_v23 = vld [vmem:[%s1752_s7 + $0x20] ss:$16 sps:$4 sm:$0xff]   ;;  %v1562_v24 = vld [vmem:[%s1752_s7 + $0x28] ss:$16 sps:$4 sm:$0xff]   ;;  %v1565_v26 = vld [vmem:[%s1752_s7 + $0x4c] ss:$16 sps:$4 sm:$0xff]  }
  0x53   : > { %v1567_v27 = vld [vmem:[%s1752_s7 + $0x40] ss:$16 sps:$4 sm:$0xff]   ;;  %v1568_v28 = vld [vmem:[%s1752_s7 + $0x48] ss:$16 sps:$4 sm:$0xff]   ;;  %v1569_v29 = vld [vmem:[%s1752_s7 + $0x64] ss:$16 sps:$4 sm:$0xff]  }
  0x54   : > { %855 = vmatpush1.bf16.msra.mxu0 %v1495_v43  ;;  %v1571_v30 = vld [vmem:[%s1752_s7 + $0x6c] ss:$16 sps:$4 sm:$0xff]   ;;  %v1573_v31 = vld [vmem:[%s1752_s7 + $0x60] ss:$16 sps:$4 sm:$0xff]   ;;  %v1574_v32 = vld [vmem:[%s1752_s7 + $0x68] ss:$16 sps:$4 sm:$0xff]  }
  0x55   : > { %928 = vmatpush1.bf16.msra.mxu1 %v1496_v44  ;;  %856 = vmatprep.subr.bf16.mxu0 %v1497_v45  ;;  %v346_v34 = vld [vmem:[%s1745_s12] sm:$0xff]  ;;  %v347_v38 = vld [vmem:[%s1745_s12 + $0x8] sm:$0xff]  ;;  %v348_v43 = vld [vmem:[%s1745_s12 + $0x10] sm:$0xff] }
  0x56   : > { %929 = vmatprep.subr.bf16.mxu1 %v1499_v46 }
  0x58   : > { %857 = vmatpush1.bf16.msra.mxu0 %v1501_v47 }
  0x59   : > { %930 = vmatpush1.bf16.msra.mxu1 %v1502_v48  ;;  %858 = vmatprep.subr.bf16.mxu0 %v1503_v49  ;;  %v349_v48 = vld [vmem:[%s1745_s12 + $0x18] sm:$0xff] }
  0x5a   : > { %931 = vmatprep.subr.bf16.mxu1 %v1505_v50 }
  0x5c   : > { %859 = vmatpush2.bf16.msra.mxu0 %v1507_v51 }
  0x5d   : > { %932 = vmatpush2.bf16.msra.mxu1 %v1508_v52  ;;  %860 = vmatprep.subr.bf16.mxu0 %v1509_v53  ;;  %v350_v53 = vld [vmem:[%s1745_s12 + $0x20] sm:$0xff] }
  0x5e   : > { %933 = vmatprep.subr.bf16.mxu1 %v1511_v54 }
  0x60   : > { %861 = vmatpush2.bf16.msra.mxu0 %v1513_v55 }
  0x61   : > { %934 = vmatpush2.bf16.msra.mxu1 %v1514_v56  ;;  %862 = vmatprep.subr.bf16.mxu0 %v1515_v57 }
  0x62   : > { %935 = vmatprep.subr.bf16.mxu1 %v1517_v58  ;;  %v351_v58 = vld [vmem:[%s1745_s12 + $0x28] sm:$0xff] }
  0x64   : > { %863 = vmatpush2.bf16.msra.mxu0 %v1519_v59 }
  0x65   : > { %936 = vmatpush2.bf16.msra.mxu1 %v1520_v60  ;;  %864 = vmatprep.subr.bf16.mxu0 %v1521_v61 }
  0x66   : > { %937 = vmatprep.subr.bf16.mxu1 %v1523_v62 }
  0x68   : > { %865 = vmatpush2.bf16.msra.mxu0 %v1525_v63  ;;  %v352_v63 = vld [vmem:[%s1745_s12 + $0x30] sm:$0xff] }
  0x69   : > { %938 = vmatpush2.bf16.msra.mxu1 %v1526_v0  ;;  %866 = vmatprep.subr.bf16.mxu0 %v1527_v1 }
  0x6a   : > { %939 = vmatprep.subr.bf16.mxu1 %v1529_v3 }
  0x6c   : > { %867 = vmatpush2.bf16.msra.mxu0 %v1531_v5 }
  0x6d   : > { %940 = vmatpush2.bf16.msra.mxu1 %v1532_v6  ;;  %868 = vmatprep.subr.bf16.mxu0 %v1533_v7 }
  0x6e   : > { %941 = vmatprep.subr.bf16.mxu1 %v1535_v8 }
  0x70   : > { %869 = vmatpush2.bf16.msra.mxu0 %v1537_v9  ;;  %v354_v9 = vld [vmem:[%s1745_s12 + $0x40] sm:$0xff] }
  0x71   : > { %942 = vmatpush2.bf16.msra.mxu1 %v1538_v10  ;;  %870 = vmatprep.subr.bf16.mxu0 %v1539_v11 }
  0x72   : > { %943 = vmatprep.subr.bf16.mxu1 %v1541_v12 }
  0x74   : > { %871 = vmatpush2.bf16.msra.mxu0 %v1543_v13 }
  0x75   : > { %944 = vmatpush2.bf16.msra.mxu1 %v1544_v14  ;;  %872 = vmatprep.subr.bf16.mxu0 %v1545_v15  ;;  %v355_v14 = vld [vmem:[%s1745_s12 + $0x48] sm:$0xff] }
  0x76   : > { %945 = vmatprep.subr.bf16.mxu1 %v1547_v16 }
  0x78   : > { %873 = vmatpush2.bf16.msra.mxu0 %v1549_v17 }
  0x79   : > { %946 = vmatpush2.bf16.msra.mxu1 %v1550_v18 }
  0x7b   : > { %875 = vmatmul.mubr.bf16.vlgmr.msra.gmra.mxu0 %v1551_v19  ;;  %v356_v19 = vld [vmem:[%s1745_s12 + $0x50] sm:$0xff] }
  0x7c   : > { %948 = vmatmul.mubr.bf16.vlgmr.msra.gmra.mxu1 %v1554_v20  ;;  %884 = vmatprep.mubr.bf16.mxu0 %v1557_v21 }
  0x7d   : > { %957 = vmatprep.mubr.bf16.mxu1 %v1559_v22 }
  0x83   : > { %885 = vmatmul.mubr.bf16.gmra.mxu0 %v1561_v23 }
  0x84   : > { %958 = vmatmul.mubr.bf16.gmra.mxu1 %v1562_v24  ;;  %894 = vmatprep.mubr.bf16.mxu0 %v1563_v25  ;;  %v357_v24 = vld [vmem:[%s1745_s12 + $0x58] sm:$0xff] }
  0x85   : > { %967 = vmatprep.mubr.bf16.mxu1 %v1565_v26 }
  0x8b   : > { %895 = vmatmul.mubr.bf16.gmra.mxu0 %v1567_v27 }
  0x8c   : > { %968 = vmatmul.mubr.bf16.gmra.mxu1 %v1568_v28  ;;  %904 = vmatprep.mubr.bf16.mxu0 %v1569_v29  ;;  %v358_v29 = vld [vmem:[%s1745_s12 + $0x60] sm:$0xff] }
  0x8d   : > { %977 = vmatprep.mubr.bf16.mxu1 %v1571_v30 }
  0x93   : > { %905 = vmatmul.mubr.bf16.gmra.mxu0 %v1573_v31 }
  0x94   : > { %978 = vmatmul.mubr.bf16.gmra.mxu1 %v1574_v32 }
 0x13b   : > { %v876_v33 = vpop.f32.mrf.mxu0 }
 0x13c   : > { %v949_v35 = vpop.f32.mrf.mxu1 }
 0x13d   : > { %v950_v36 = vadd.f32 %v949_v35, %v876_v33  ;;  %v878_v37 = vpop.f32.mrf.mxu0 }
 0x13e   : > { %v951_v39 = vpop.f32.mrf.mxu1 }
 0x13f   : > { %v988_v40 = vadd.f32 %v950_v36, %v346_v34  ;;  %v952_v41 = vadd.f32 %v951_v39, %v878_v37  ;;  %v880_v42 = vpop.f32.mrf.mxu0  ;;  %v359_v34 = vld [vmem:[%s1745_s12 + $0x68] sm:$0xff]  ;;  %v360_v39 = vld [vmem:[%s1745_s12 + $0x70] sm:$0xff] }
 0x140   : > { %v953_v44 = vpop.f32.mrf.mxu1 }
 0x141   : > { %1004 = vst [vmem:[%s1745_s12] sm:$0xff] %v988_v40  ;;  %v989_v45 = vadd.f32 %v952_v41, %v347_v38  ;;  %v954_v46 = vadd.f32 %v953_v44, %v880_v42  ;;  %v882_v47 = vpop.f32.mrf.mxu0  ;;  %v361_v44 = vld [vmem:[%s1745_s12 + $0x78] sm:$0xff] }
 0x142   : > { %v955_v49 = vpop.f32.mrf.mxu1 }
 0x143   : > { %1005 = vst [vmem:[%s1745_s12 + $0x8] sm:$0xff] %v989_v45  ;;  %v990_v50 = vadd.f32 %v954_v46, %v348_v43  ;;  %v956_v51 = vadd.f32 %v955_v49, %v882_v47  ;;  %v886_v52 = vpop.f32.mrf.mxu0 }
 0x144   : > { %v959_v54 = vpop.f32.mrf.mxu1 }
 0x145   : > { %1006 = vst [vmem:[%s1745_s12 + $0x10] sm:$0xff] %v990_v50  ;;  %v991_v55 = vadd.f32 %v956_v51, %v349_v48  ;;  %v960_v56 = vadd.f32 %v959_v54, %v886_v52  ;;  %v888_v57 = vpop.f32.mrf.mxu0 }
 0x146   : > { %v961_v59 = vpop.f32.mrf.mxu1 }
 0x147   : > { %1007 = vst [vmem:[%s1745_s12 + $0x18] sm:$0xff] %v991_v55  ;;  %v992_v60 = vadd.f32 %v960_v56, %v350_v53  ;;  %v962_v61 = vadd.f32 %v961_v59, %v888_v57  ;;  %v890_v62 = vpop.f32.mrf.mxu0 }
 0x148   : > { %v963_v0 = vpop.f32.mrf.mxu1 }
 0x149   : > { %1008 = vst [vmem:[%s1745_s12 + $0x20] sm:$0xff] %v992_v60  ;;  %v993_v1 = vadd.f32 %v962_v61, %v351_v58  ;;  %v964_v2 = vadd.f32 %v963_v0, %v890_v62  ;;  %v892_v3 = vpop.f32.mrf.mxu0 }
 0x14a   : > { %v965_v5 = vpop.f32.mrf.mxu1 }
 0x14b   : > { %1009 = vst [vmem:[%s1745_s12 + $0x28] sm:$0xff] %v993_v1  ;;  %v994_v6 = vadd.f32 %v964_v2, %v352_v63  ;;  %v966_v7 = vadd.f32 %v965_v5, %v892_v3  ;;  %v896_v8 = vpop.f32.mrf.mxu0 }
 0x14c   : > { %v969_v10 = vpop.f32.mrf.mxu1 }
 0x14d   : > { %1010 = vst [vmem:[%s1745_s12 + $0x30] sm:$0xff] %v994_v6  ;;  %v995_v11 = vadd.f32 %v966_v7, %v353_v4  ;;  %v970_v12 = vadd.f32 %v969_v10, %v896_v8  ;;  %v898_v13 = vpop.f32.mrf.mxu0 }
 0x14e   : > { %v971_v15 = vpop.f32.mrf.mxu1 }
 0x14f   : > { %1011 = vst [vmem:[%s1745_s12 + $0x38] sm:$0xff] %v995_v11  ;;  %v996_v16 = vadd.f32 %v970_v12, %v354_v9  ;;  %v972_v17 = vadd.f32 %v971_v15, %v898_v13  ;;  %v900_v18 = vpop.f32.mrf.mxu0 }
 0x150   : > { %v973_v20 = vpop.f32.mrf.mxu1 }
 0x151   : > { %1012 = vst [vmem:[%s1745_s12 + $0x40] sm:$0xff] %v996_v16  ;;  %v997_v21 = vadd.f32 %v972_v17, %v355_v14  ;;  %v974_v22 = vadd.f32 %v973_v20, %v900_v18  ;;  %v902_v23 = vpop.f32.mrf.mxu0 }
 0x152   : > { %v975_v25 = vpop.f32.mrf.mxu1 }
 0x153   : > { %1013 = vst [vmem:[%s1745_s12 + $0x48] sm:$0xff] %v997_v21  ;;  %v998_v26 = vadd.f32 %v974_v22, %v356_v19  ;;  %v976_v27 = vadd.f32 %v975_v25, %v902_v23  ;;  %v906_v28 = vpop.f32.mrf.mxu0 }
 0x154   : > { %v979_v30 = vpop.f32.mrf.mxu1 }
 0x155   : > { %1014 = vst [vmem:[%s1745_s12 + $0x50] sm:$0xff] %v998_v26  ;;  %v999_v31 = vadd.f32 %v976_v27, %v357_v24  ;;  %v980_v32 = vadd.f32 %v979_v30, %v906_v28  ;;  %v908_v33 = vpop.f32.mrf.mxu0 }
 0x156   : > { %v981_v35 = vpop.f32.mrf.mxu1 }
 0x157   : > { %1015 = vst [vmem:[%s1745_s12 + $0x58] sm:$0xff] %v999_v31  ;;  %v1000_v36 = vadd.f32 %v980_v32, %v358_v29  ;;  %v982_v37 = vadd.f32 %v981_v35, %v908_v33  ;;  %v910_v38 = vpop.f32.mrf.mxu0 }
 0x158   : > { %v983_v40 = vpop.f32.mrf.mxu1 }
 0x159   : > { %1016 = vst [vmem:[%s1745_s12 + $0x60] sm:$0xff] %v1000_v36  ;;  %v1001_v41 = vadd.f32 %v982_v37, %v359_v34  ;;  %v984_v42 = vadd.f32 %v983_v40, %v910_v38  ;;  %v912_v43 = vpop.f32.mrf.mxu0 }
 0x15a   : > { %v985_v45 = vpop.f32.mrf.mxu1 }
 0x15b   : > { %1017 = vst [vmem:[%s1745_s12 + $0x68] sm:$0xff] %v1001_v41  ;;  %v1002_v46 = vadd.f32 %v984_v42, %v360_v39  ;;  %v986_v47 = vadd.f32 %v985_v45, %v912_v43  ;;  %1023 = sbr.rel (%p1390_p0) target bundleno = 386 (0x182), region = 59 }
 0x15d   : > { %1018 = vst [vmem:[%s1745_s12 + $0x70] sm:$0xff] %v1002_v46  ;;  %v1003_v48 = vadd.f32 %v986_v47, %v361_v44 }
 0x15f   : > { %1019 = vst [vmem:[%s1745_s12 + $0x78] sm:$0xff] %v1003_v48 }
 0x160   : > { %v1024_v49 = vld [vmem:[%s1745_s12] sm:$0xff]  ;;  %v1025_v50 = vld [vmem:[%s1745_s12 + $0x8] sm:$0xff]  ;;  %v1026_v51 = vld [vmem:[%s1745_s12 + $0x10] sm:$0xff]  ;;  %vm1108_vm0 = vcmask 1040384  }
 0x161   : > { %v1027_v52 = vld [vmem:[%s1745_s12 + $0x18] sm:$0xff]  ;;  %v1028_v53 = vld [vmem:[%s1745_s12 + $0x20] sm:$0xff]  ;;  %v1029_v54 = vld [vmem:[%s1745_s12 + $0x28] sm:$0xff]  ;;  %v1040_v55 = vadd.f32 %v1026_v51, %v1024_v49  ;;  %v1066_v56 = vmul.f32 %v1024_v49, %v1024_v49  ;;  %v1067_v59 = vmul.f32 %v1025_v50, %v1025_v50  ;;  %v1068_v60 = vmul.f32 %v1026_v51, %v1026_v51 }
 0x162   : > { %v1030_v57 = vld [vmem:[%s1745_s12 + $0x30] sm:$0xff]  ;;  %v1053_v58 = vadd.f32 %v1027_v52, %v1025_v50  ;;  %v1069_v61 = vmul.f32 %v1027_v52, %v1027_v52  ;;  %v1031_v62 = vld [vmem:[%s1745_s12 + $0x38] sm:$0xff]  ;;  %v1032_v0 = vld [vmem:[%s1745_s12 + $0x40] sm:$0xff]  ;;  %v1070_v2 = vmul.f32 %v1028_v53, %v1028_v53  ;;  %v1071_v3 = vmul.f32 %v1029_v54, %v1029_v54 }
 0x163   : > { %v1041_v63 = vadd.f32 %v1040_v55, %v1028_v53  ;;  %v1033_v4 = vld [vmem:[%s1745_s12 + $0x48] sm:$0xff]  ;;  %v1072_v6 = vmul.f32 %v1030_v57, %v1030_v57  ;;  %v1034_v7 = vld [vmem:[%s1745_s12 + $0x50] sm:$0xff]  ;;  %v1073_v9 = vmul.f32 %v1031_v62, %v1031_v62  ;;  %v1082_v10 = vadd.f32 %v1068_v60, %v1066_v56  ;;  %v1035_v12 = vld [vmem:[%s1745_s12 + $0x58] sm:$0xff] }
 0x164   : > { %v1054_v1 = vadd.f32 %v1053_v58, %v1029_v54  ;;  %v1095_v11 = vadd.f32 %v1069_v61, %v1067_v59  ;;  %v1074_v14 = vmul.f32 %v1032_v0, %v1032_v0  ;;  %v1036_v15 = vld [vmem:[%s1745_s12 + $0x60] sm:$0xff]  ;;  %v1075_v17 = vmul.f32 %v1033_v4, %v1033_v4  ;;  %v1037_v20 = vld [vmem:[%s1745_s12 + $0x68] sm:$0xff]  ;;  %v1038_v23 = vld [vmem:[%s1745_s12 + $0x70] sm:$0xff] }
 0x165   : > { %v1042_v5 = vadd.f32 %v1041_v63, %v1030_v57  ;;  %v1083_v18 = vadd.f32 %v1082_v10, %v1070_v2  ;;  %v1076_v22 = vmul.f32 %v1034_v7, %v1034_v7  ;;  %v1077_v25 = vmul.f32 %v1035_v12, %v1035_v12 }
 0x166   : > { %v1055_v8 = vadd.f32 %v1054_v1, %v1031_v62  ;;  %v1096_v19 = vadd.f32 %v1095_v11, %v1071_v3  ;;  %v1039_v28 = vld [vmem:[%s1745_s12 + $0x78] sm:$0xff]  ;;  %v1078_v30 = vmul.f32 %v1036_v15, %v1036_v15  ;;  %v1079_v32 = vmul.f32 %v1037_v20, %v1037_v20 }
 0x167   : > { %v1043_v13 = vadd.f32 %v1042_v5, %v1032_v0  ;;  %v1084_v26 = vadd.f32 %v1083_v18, %v1072_v6  ;;  %v1080_v36 = vmul.f32 %v1038_v23, %v1038_v23  ;;  %v1081_v38 = vmul.f32 %v1039_v28, %v1039_v28 }
 0x168   : > { %v1056_v16 = vadd.f32 %v1055_v8, %v1033_v4  ;;  %v1097_v27 = vadd.f32 %v1096_v19, %v1073_v9 }
 0x169   : > { %v1044_v21 = vadd.f32 %v1043_v13, %v1034_v7  ;;  %v1085_v33 = vadd.f32 %v1084_v26, %v1074_v14 }
 0x16a   : > { %v1057_v24 = vadd.f32 %v1056_v16, %v1035_v12  ;;  %v1098_v34 = vadd.f32 %v1097_v27, %v1075_v17 }
 0x16b   : > { %v1045_v29 = vadd.f32 %v1044_v21, %v1036_v15  ;;  %v1086_v39 = vadd.f32 %v1085_v33, %v1076_v22 }
 0x16c   : > { %v1058_v31 = vadd.f32 %v1057_v24, %v1037_v20  ;;  %v1099_v40 = vadd.f32 %v1098_v34, %v1077_v25 }
 0x16d   : > { %v1046_v35 = vadd.f32 %v1045_v29, %v1038_v23  ;;  %v1087_v43 = vadd.f32 %v1086_v39, %v1078_v30 }
 0x16e   : > { %v1059_v37 = vadd.f32 %v1058_v31, %v1039_v28  ;;  %v1100_v44 = vadd.f32 %v1099_v40, %v1079_v32 }
 0x16f   : > { %v1047_v41 = vrot.slane %v1046_v35, 4  ;;  %v1088_v47 = vadd.f32 %v1087_v43, %v1080_v36 }
 0x170   : > { %v1060_v42 = vrot.slane %v1059_v37, 4  ;;  %v1101_v48 = vadd.f32 %v1100_v44, %v1081_v38 }
 0x171   : > { %v1048_v45 = vadd.f32 %v1047_v41, %v1046_v35  ;;  %v1089_v51 = vrot.slane %v1088_v47, 4 }
 0x172   : > { %v1061_v46 = vadd.f32 %v1060_v42, %v1059_v37  ;;  %v1102_v52 = vrot.slane %v1101_v48, 4 }
 0x173   : > { %v1049_v49 = vrot.slane %v1048_v45, 2  ;;  %v1090_v55 = vadd.f32 %v1089_v51, %v1088_v47 }
 0x174   : > { %v1062_v50 = vrot.slane %v1061_v46, 2  ;;  %v1103_v56 = vadd.f32 %v1102_v52, %v1101_v48 }
 0x175   : > { %v1050_v53 = vadd.f32 %v1049_v49, %v1048_v45  ;;  %v1091_v59 = vrot.slane %v1090_v55, 2 }
 0x176   : > { %v1063_v54 = vadd.f32 %v1062_v50, %v1061_v46  ;;  %v1104_v60 = vrot.slane %v1103_v56, 2 }
 0x177   : > { %v1051_v57 = vrot.slane %v1050_v53, 1  ;;  %v1092_v61 = vadd.f32 %v1091_v59, %v1090_v55 }
 0x178   : > { %v1064_v58 = vrot.slane %v1063_v54, 1  ;;  %v1105_v62 = vadd.f32 %v1104_v60, %v1103_v56 }
 0x179   : > { %v1052_v63 = vadd.f32 %v1051_v57, %v1050_v53  ;;  %v1093_v1 = vrot.slane %v1092_v61, 1 }
 0x17a   : > { %v1065_v0 = vadd.f32 %v1064_v58, %v1063_v54  ;;  %v1106_v2 = vrot.slane %v1105_v62, 1 }
 0x17b   : > { %v1094_v3 = vadd.f32 %v1093_v1, %v1092_v61 }
 0x17c   : > { %v1107_v4 = vadd.f32 %v1106_v2, %v1105_v62 }
 0x17d   : > { %v1109_v5 = vsel %vm1108_vm0, %v1052_v63, %v1094_v3 }
 0x17e   : > { %v1110_v6 = vsel %vm1108_vm0, %v1065_v0, %v1107_v4 }
 0x17f   : > { %v1113_v7 = vcombine.low %v1109_v5, %v1110_v6 }
 0x181   : > { %1391 = vst.sshfl [vmem:[%s1750_s6] sm:$0x33 pattern:$0x76325410] %v1113_v7 }
 0x182 PF: > { %s14_s18 = sadd.s32 1, %s1629_s18   ;;  %s1926_s12 = smov %s1609_s13 }
 0x183   : > { %p11_p1 = scmp.ge.s32.totalorder %s14_s18, 10   ;;  %s1927_s13 = smov %s1703_s25 }
 0x184   : > { %s1928_s14 = smov %s1621_s16  ;;  %s1929_s15 = smov %s1625_s17 }
 0x185   : > { %s1930_s16 = smov %s1933_s19  ;;  %s1931_s17 = smov %s1937_s20 }
 0x186   :  { %13 = sbr.rel (!%p11_p1) target bundleno = 4 (0x4), region = 109 }

// kernel: discriminator_forward.12
= control target key start
LH: loop header
LB: loop body
LE: loop exit
PB: predicated region body
PF: predicated region fallthrough
CT: control target
= control target key end

     0   :  { %v48_v0 = vlaneseq  ;;  %s621_s1 = inlined_call_operand.vmem [shape: f32[1,256], index: 1, kind: input, shape index: {}]   ;;  %s622_s2 = inlined_call_operand.vmem [shape: f32[1,256], index: 2, kind: input, shape index: {}]   ;;  %s623_s0 = inlined_call_operand.vmem [shape: f32[128,256], index: 0, kind: input, shape index: {}]   ;;  %s624_s3 = inlined_call_operand.vmem [shape: bf16[128,256], index: 3, kind: output, shape index: {}]  }
   0x1   :  { %v46_v2 = vld [vmem:[%s621_s1] sm:$0x3]  ;;  %v15_v5 = vld [vmem:[%s623_s0 + $0x8] sm:$0xff]  ;;  %v16_v8 = vld [vmem:[%s623_s0 + $0x10] sm:$0xff] }
   0x2   :  { %v49_v1 = vshrl.u32 %v48_v0, 7  ;;  %v90_v3 = vld [vmem:[%s622_s2] sm:$0x3]  ;;  %v17_v9 = vld [vmem:[%s623_s0 + $0x18] sm:$0xff]  ;;  %v19_v15 = vld [vmem:[%s623_s0 + $0x28] sm:$0xff] }
   0x3   :  { %v14_v4 = vld [vmem:[%s623_s0] sm:$0xff]  ;;  %v20_v16 = vld [vmem:[%s623_s0 + $0x30] sm:$0xff]  ;;  %v21_v17 = vld [vmem:[%s623_s0 + $0x38] sm:$0xff] }
   0x4   :  { %v50_v6 = vsub.s32 0, %v49_v1  ;;  %v54_v7 = vsub.s32 1, %v49_v1  ;;  %v18_v10 = vld [vmem:[%s623_s0 + $0x20] sm:$0xff]  ;;  %v23_v45 = vld [vmem:[%s623_s0 + $0x48] sm:$0xff]  ;;  %v24_v46 = vld [vmem:[%s623_s0 + $0x50] sm:$0xff] }
   0x5   :  { %v22_v40 = vld [vmem:[%s623_s0 + $0x40] sm:$0xff]  ;;  %v25_v47 = vld [vmem:[%s623_s0 + $0x58] sm:$0xff]  ;;  %v27_v59 = vld [vmem:[%s623_s0 + $0x68] sm:$0xff] }
   0x6   :  { %v419_v11 = vrot.slane %v46_v2, %v50_v6  ;;  %v421_v12 = vrot.slane %v46_v2, %v54_v7  ;;  %v423_v13 = vrot.slane %v90_v3, %v50_v6  ;;  %v425_v14 = vrot.slane %v90_v3, %v54_v7  ;;  %v26_v58 = vld [vmem:[%s623_s0 + $0x60] sm:$0xff]  ;;  %v28_v7 = vld [vmem:[%s623_s0 + $0x70] sm:$0xff] }
   0x8   :  { %v58_v18 = vmul.f32 %v419_v11, %v14_v4  ;;  %v59_v19 = vmul.f32 %v421_v12, %v15_v5  ;;  %v60_v20 = vmul.f32 %v419_v11, %v16_v8  ;;  %v61_v21 = vmul.f32 %v421_v12, %v17_v9  ;;  %v29_v8 = vld [vmem:[%s623_s0 + $0x78] sm:$0xff] }
   0x9   :  { %v62_v22 = vmul.f32 %v419_v11, %v18_v10  ;;  %v63_v23 = vmul.f32 %v421_v12, %v19_v15  ;;  %v64_v24 = vmul.f32 %v419_v11, %v20_v16  ;;  %v65_v25 = vmul.f32 %v421_v12, %v21_v17 }
   0xa   :  { %v102_v26 = vadd.f32 %v423_v13, %v58_v18  ;;  %v103_v27 = vadd.f32 %v425_v14, %v59_v19  ;;  %v104_v28 = vadd.f32 %v423_v13, %v60_v20  ;;  %v105_v29 = vadd.f32 %v425_v14, %v61_v21 }
   0xb   :  { %v106_v30 = vadd.f32 %v423_v13, %v62_v22  ;;  %v107_v31 = vadd.f32 %v425_v14, %v63_v23  ;;  %v108_v32 = vadd.f32 %v423_v13, %v64_v24  ;;  %v109_v33 = vadd.f32 %v425_v14, %v65_v25  ;;  %v30_v22 = vld [vmem:[%s623_s0 + $0x80] sm:$0xff]  ;;  %v31_v23 = vld [vmem:[%s623_s0 + $0x88] sm:$0xff] }
   0xc   :  { %vm134_vm0 = vcmp.ge.f32.partialorder %v102_v26, 0.0  ;;  %vm135_vm1 = vcmp.ge.f32.partialorder %v103_v27, 0.0  ;;  %v166_v34 = vmul.f32 0.2, %v102_v26  ;;  %v167_v35 = vmul.f32 0.2, %v103_v27 }
   0xd   :  { %vm136_vm2 = vcmp.ge.f32.partialorder %v104_v28, 0.0  ;;  %vm137_vm3 = vcmp.ge.f32.partialorder %v105_v29, 0.0  ;;  %v168_v36 = vmul.f32 0.2, %v104_v28  ;;  %v169_v37 = vmul.f32 0.2, %v105_v29 }
   0xe   :  { %v198_v38 = vsel %vm134_vm0, %v102_v26, %v166_v34  ;;  %v199_v39 = vsel %vm135_vm1, %v103_v27, %v167_v35  ;;  %vm138_vm4 = vcmp.ge.f32.partialorder %v106_v30, 0.0  ;;  %vm139_vm5 = vcmp.ge.f32.partialorder %v107_v31, 0.0  ;;  %v32_v27 = vld [vmem:[%s623_s0 + $0x90] sm:$0xff] }
   0xf   :  { %v362_v41 = vpack.c.bf16 %v199_v39, %v198_v38  ;;  %v200_v42 = vsel %vm136_vm2, %v104_v28, %v168_v36  ;;  %v201_v43 = vsel %vm137_vm3, %v105_v29, %v169_v37  ;;  %v170_v44 = vmul.f32 0.2, %v106_v30  ;;  %v33_v28 = vld [vmem:[%s623_s0 + $0x98] sm:$0xff] }
  0x10   :  { %v363_v48 = vpack.c.bf16 %v201_v43, %v200_v42  ;;  %v171_v49 = vmul.f32 0.2, %v107_v31  ;;  %vm140_vm6 = vcmp.ge.f32.partialorder %v108_v32, 0.0  ;;  %vm141_vm7 = vcmp.ge.f32.partialorder %v109_v33, 0.0 }
  0x11   :  { %326 = vst [vmem:[%s624_s3] sm:$0xff] %v362_v41  ;;  %v202_v50 = vsel %vm138_vm4, %v106_v30, %v170_v44  ;;  %v172_v51 = vmul.f32 0.2, %v108_v32  ;;  %v173_v52 = vmul.f32 0.2, %v109_v33  ;;  %v66_v53 = vmul.f32 %v419_v11, %v22_v40  ;;  %v34_v40 = vld [vmem:[%s623_s0 + $0xa0] sm:$0xff]  ;;  %v35_v41 = vld [vmem:[%s623_s0 + $0xa8] sm:$0xff] }
  0x12   :  { %327 = vst [vmem:[%s624_s3 + $0x8] sm:$0xff] %v363_v48  ;;  %v203_v54 = vsel %vm139_vm5, %v107_v31, %v171_v49  ;;  %v67_v55 = vmul.f32 %v421_v12, %v23_v45  ;;  %v68_v56 = vmul.f32 %v419_v11, %v24_v46  ;;  %v69_v57 = vmul.f32 %v421_v12, %v25_v47 }
  0x13   :  { %v364_v60 = vpack.c.bf16 %v203_v54, %v202_v50  ;;  %v204_v61 = vsel %vm140_vm6, %v108_v32, %v172_v51  ;;  %v205_v62 = vsel %vm141_vm7, %v109_v33, %v173_v52  ;;  %v110_v63 = vadd.f32 %v423_v13, %v66_v53  ;;  %v36_v54 = vld [vmem:[%s623_s0 + $0xb0] sm:$0xff] }
  0x14   :  { %v365_v0 = vpack.c.bf16 %v205_v62, %v204_v61  ;;  %v111_v1 = vadd.f32 %v425_v14, %v67_v55  ;;  %v112_v2 = vadd.f32 %v423_v13, %v68_v56  ;;  %v113_v3 = vadd.f32 %v425_v14, %v69_v57  ;;  %v37_v55 = vld [vmem:[%s623_s0 + $0xb8] sm:$0xff] }
  0x15   :  { %328 = vst [vmem:[%s624_s3 + $0x10] sm:$0xff] %v364_v60  ;;  %vm142_vm8 = vcmp.ge.f32.partialorder %v110_v63, 0.0  ;;  %v174_v4 = vmul.f32 0.2, %v110_v63  ;;  %v70_v5 = vmul.f32 %v419_v11, %v26_v58  ;;  %v71_v6 = vmul.f32 %v421_v12, %v27_v59 }
  0x16   :  { %329 = vst [vmem:[%s624_s3 + $0x18] sm:$0xff] %v365_v0  ;;  %vm143_vm9 = vcmp.ge.f32.partialorder %v111_v1, 0.0  ;;  %v175_v9 = vmul.f32 0.2, %v111_v1  ;;  %vm144_vm10 = vcmp.ge.f32.partialorder %v112_v2, 0.0  ;;  %vm145_vm11 = vcmp.ge.f32.partialorder %v113_v3, 0.0 }
  0x17   :  { %v206_v10 = vsel %vm142_vm8, %v110_v63, %v174_v4  ;;  %v176_v15 = vmul.f32 0.2, %v112_v2  ;;  %v177_v16 = vmul.f32 0.2, %v113_v3  ;;  %v114_v17 = vadd.f32 %v423_v13, %v70_v5 }
  0x18   :  { %v207_v18 = vsel %vm143_vm9, %v111_v1, %v175_v9  ;;  %v115_v19 = vadd.f32 %v425_v14, %v71_v6  ;;  %v72_v20 = vmul.f32 %v419_v11, %v28_v7  ;;  %v73_v21 = vmul.f32 %v421_v12, %v29_v8  ;;  %v40_v7 = vld [vmem:[%s623_s0 + $0xd0] sm:$0xff]  ;;  %v41_v8 = vld [vmem:[%s623_s0 + $0xd8] sm:$0xff] }
  0x19   :  { %v366_v24 = vpack.c.bf16 %v207_v18, %v206_v10  ;;  %v208_v25 = vsel %vm144_vm10, %v112_v2, %v176_v15  ;;  %v209_v26 = vsel %vm145_vm11, %v113_v3, %v177_v16  ;;  %vm146_vm12 = vcmp.ge.f32.partialorder %v114_v17, 0.0  ;;  %v38_v2 = vld [vmem:[%s623_s0 + $0xc0] sm:$0xff]  ;;  %v39_v3 = vld [vmem:[%s623_s0 + $0xc8] sm:$0xff] }
  0x1a   :  { %v367_v29 = vpack.c.bf16 %v209_v26, %v208_v25  ;;  %vm147_vm13 = vcmp.ge.f32.partialorder %v115_v19, 0.0  ;;  %v178_v30 = vmul.f32 0.2, %v114_v17  ;;  %v179_v31 = vmul.f32 0.2, %v115_v19  ;;  %v43_v25 = vld [vmem:[%s623_s0 + $0xe8] sm:$0xff] }
  0x1b   :  { %330 = vst [vmem:[%s624_s3 + $0x20] sm:$0xff] %v366_v24  ;;  %v116_v32 = vadd.f32 %v423_v13, %v72_v20  ;;  %v117_v33 = vadd.f32 %v425_v14, %v73_v21  ;;  %v74_v34 = vmul.f32 %v419_v11, %v30_v22  ;;  %v75_v35 = vmul.f32 %v421_v12, %v31_v23  ;;  %v42_v24 = vld [vmem:[%s623_s0 + $0xe0] sm:$0xff] }
  0x1c   :  { %331 = vst [vmem:[%s624_s3 + $0x28] sm:$0xff] %v367_v29  ;;  %v210_v36 = vsel %vm146_vm12, %v114_v17, %v178_v30  ;;  %v211_v37 = vsel %vm147_vm13, %v115_v19, %v179_v31  ;;  %v76_v38 = vmul.f32 %v419_v11, %v32_v27  ;;  %v77_v39 = vmul.f32 %v421_v12, %v33_v28 }
  0x1d   :  { %v368_v42 = vpack.c.bf16 %v211_v37, %v210_v36  ;;  %vm148_vm14 = vcmp.ge.f32.partialorder %v116_v32, 0.0  ;;  %vm149_vm15 = vcmp.ge.f32.partialorder %v117_v33, 0.0  ;;  %v180_v43 = vmul.f32 0.2, %v116_v32 }
  0x1e   :  { %v181_v44 = vmul.f32 0.2, %v117_v33  ;;  %v118_v45 = vadd.f32 %v423_v13, %v74_v34  ;;  %v119_v46 = vadd.f32 %v425_v14, %v75_v35  ;;  %v120_v47 = vadd.f32 %v423_v13, %v76_v38  ;;  %v44_v38 = vld [vmem:[%s623_s0 + $0xf0] sm:$0xff] }
  0x1f   :  { %332 = vst [vmem:[%s624_s3 + $0x30] sm:$0xff] %v368_v42  ;;  %v212_v48 = vsel %vm148_vm14, %v116_v32, %v180_v43  ;;  %v121_v49 = vadd.f32 %v425_v14, %v77_v39  ;;  %v78_v50 = vmul.f32 %v419_v11, %v34_v40  ;;  %v79_v51 = vmul.f32 %v421_v12, %v35_v41  ;;  %v45_v39 = vld [vmem:[%s623_s0 + $0xf8] sm:$0xff] }
  0x20   :  { %v213_v52 = vsel %vm149_vm15, %v117_v33, %v181_v44  ;;  %vm150_vm0 = vcmp.ge.f32.partialorder %v118_v45, 0.0  ;;  %vm151_vm1 = vcmp.ge.f32.partialorder %v119_v46, 0.0  ;;  %v182_v53 = vmul.f32 0.2, %v118_v45 }
  0x21   :  { %v369_v56 = vpack.c.bf16 %v213_v52, %v212_v48  ;;  %v183_v57 = vmul.f32 0.2, %v119_v46  ;;  %vm152_vm2 = vcmp.ge.f32.partialorder %v120_v47, 0.0  ;;  %vm153_vm3 = vcmp.ge.f32.partialorder %v121_v49, 0.0 }
  0x22   :  { %v214_v58 = vsel %vm150_vm0, %v118_v45, %v182_v53  ;;  %v184_v59 = vmul.f32 0.2, %v120_v47  ;;  %v185_v60 = vmul.f32 0.2, %v121_v49  ;;  %v122_v61 = vadd.f32 %v423_v13, %v78_v50 }
  0x23   :  { %333 = vst [vmem:[%s624_s3 + $0x38] sm:$0xff] %v369_v56  ;;  %v215_v62 = vsel %vm151_vm1, %v119_v46, %v183_v57  ;;  %v123_v63 = vadd.f32 %v425_v14, %v79_v51  ;;  %v80_v0 = vmul.f32 %v419_v11, %v36_v54  ;;  %v81_v1 = vmul.f32 %v421_v12, %v37_v55 }
  0x24   :  { %v370_v4 = vpack.c.bf16 %v215_v62, %v214_v58  ;;  %v216_v5 = vsel %vm152_vm2, %v120_v47, %v184_v59  ;;  %v217_v6 = vsel %vm153_vm3, %v121_v49, %v185_v60  ;;  %vm154_vm4 = vcmp.ge.f32.partialorder %v122_v61, 0.0 }
  0x25   :  { %v371_v9 = vpack.c.bf16 %v217_v6, %v216_v5  ;;  %vm155_vm5 = vcmp.ge.f32.partialorder %v123_v63, 0.0  ;;  %v186_v10 = vmul.f32 0.2, %v122_v61  ;;  %v187_v15 = vmul.f32 0.2, %v123_v63 }
  0x26   :  { %334 = vst [vmem:[%s624_s3 + $0x40] sm:$0xff] %v370_v4  ;;  %v124_v16 = vadd.f32 %v423_v13, %v80_v0  ;;  %v125_v17 = vadd.f32 %v425_v14, %v81_v1  ;;  %v82_v18 = vmul.f32 %v419_v11, %v38_v2  ;;  %v83_v19 = vmul.f32 %v421_v12, %v39_v3 }
  0x27   :  { %335 = vst [vmem:[%s624_s3 + $0x48] sm:$0xff] %v371_v9  ;;  %v218_v20 = vsel %vm154_vm4, %v122_v61, %v186_v10  ;;  %v219_v21 = vsel %vm155_vm5, %v123_v63, %v187_v15  ;;  %v84_v22 = vmul.f32 %v419_v11, %v40_v7  ;;  %v85_v23 = vmul.f32 %v421_v12, %v41_v8 }
  0x28   :  { %v372_v26 = vpack.c.bf16 %v219_v21, %v218_v20  ;;  %vm156_vm6 = vcmp.ge.f32.partialorder %v124_v16, 0.0  ;;  %vm157_vm7 = vcmp.ge.f32.partialorder %v125_v17, 0.0  ;;  %v188_v27 = vmul.f32 0.2, %v124_v16 }
  0x29   :  { %v189_v28 = vmul.f32 0.2, %v125_v17  ;;  %v126_v29 = vadd.f32 %v423_v13, %v82_v18  ;;  %v127_v30 = vadd.f32 %v425_v14, %v83_v19  ;;  %v128_v31 = vadd.f32 %v423_v13, %v84_v22 }
  0x2a   :  { %336 = vst [vmem:[%s624_s3 + $0x50] sm:$0xff] %v372_v26  ;;  %v220_v32 = vsel %vm156_vm6, %v124_v16, %v188_v27  ;;  %v129_v33 = vadd.f32 %v425_v14, %v85_v23  ;;  %v86_v34 = vmul.f32 %v419_v11, %v42_v24  ;;  %v87_v35 = vmul.f32 %v421_v12, %v43_v25 }
  0x2b   :  { %v221_v36 = vsel %vm157_vm7, %v125_v17, %v189_v28  ;;  %vm158_vm8 = vcmp.ge.f32.partialorder %v126_v29, 0.0  ;;  %vm159_vm9 = vcmp.ge.f32.partialorder %v127_v30, 0.0  ;;  %v190_v37 = vmul.f32 0.2, %v126_v29 }
  0x2c   :  { %v373_v40 = vpack.c.bf16 %v221_v36, %v220_v32  ;;  %v191_v41 = vmul.f32 0.2, %v127_v30  ;;  %vm160_vm10 = vcmp.ge.f32.partialorder %v128_v31, 0.0  ;;  %vm161_vm11 = vcmp.ge.f32.partialorder %v129_v33, 0.0 }
  0x2d   :  { %v222_v42 = vsel %vm158_vm8, %v126_v29, %v190_v37  ;;  %v192_v43 = vmul.f32 0.2, %v128_v31  ;;  %v193_v44 = vmul.f32 0.2, %v129_v33  ;;  %v130_v45 = vadd.f32 %v423_v13, %v86_v34 }
  0x2e   :  { %337 = vst [vmem:[%s624_s3 + $0x58] sm:$0xff] %v373_v40  ;;  %v223_v46 = vsel %vm159_vm9, %v127_v30, %v191_v41  ;;  %v131_v47 = vadd.f32 %v425_v14, %v87_v35  ;;  %v88_v48 = vmul.f32 %v419_v11, %v44_v38  ;;  %v89_v49 = vmul.f32 %v421_v12, %v45_v39 }
  0x2f   :  { %v374_v50 = vpack.c.bf16 %v223_v46, %v222_v42  ;;  %v224_v51 = vsel %vm160_vm10, %v128_v31, %v192_v43  ;;  %v225_v52 = vsel %vm161_vm11, %v129_v33, %v193_v44  ;;  %vm162_vm12 = vcmp.ge.f32.partialorder %v130_v45, 0.0 }
  0x30   :  { %v375_v53 = vpack.c.bf16 %v225_v52, %v224_v51  ;;  %vm163_vm13 = vcmp.ge.f32.partialorder %v131_v47, 0.0  ;;  %v194_v54 = vmul.f32 0.2, %v130_v45  ;;  %v195_v55 = vmul.f32 0.2, %v131_v47 }
  0x31   :  { %338 = vst [vmem:[%s624_s3 + $0x60] sm:$0xff] %v374_v50  ;;  %v132_v56 = vadd.f32 %v423_v13, %v88_v48  ;;  %v133_v57 = vadd.f32 %v425_v14, %v89_v49 }
  0x32   :  { %339 = vst [vmem:[%s624_s3 + $0x68] sm:$0xff] %v375_v53  ;;  %v226_v11 = vsel %vm162_vm12, %v130_v45, %v194_v54  ;;  %v227_v12 = vsel %vm163_vm13, %v131_v47, %v195_v55 }
  0x33   :  { %v376_v58 = vpack.c.bf16 %v227_v12, %v226_v11  ;;  %vm164_vm14 = vcmp.ge.f32.partialorder %v132_v56, 0.0  ;;  %vm165_vm15 = vcmp.ge.f32.partialorder %v133_v57, 0.0  ;;  %v196_v59 = vmul.f32 0.2, %v132_v56 }
  0x34   :  { %v197_v60 = vmul.f32 0.2, %v133_v57 }
  0x35   :  { %340 = vst [vmem:[%s624_s3 + $0x70] sm:$0xff] %v376_v58  ;;  %v228_v61 = vsel %vm164_vm14, %v132_v56, %v196_v59 }
  0x36   :  { %v229_v62 = vsel %vm165_vm15, %v133_v57, %v197_v60 }
  0x37   :  { %v377_v13 = vpack.c.bf16 %v229_v62, %v228_v61 }
  0x39   :  { %341 = vst [vmem:[%s624_s3 + $0x78] sm:$0xff] %v377_v13 }

// kernel: discriminator_forward.13
= control target key start
LH: loop header
LB: loop body
LE: loop exit
PB: predicated region body
PF: predicated region fallthrough
CT: control target
= control target key end

     0   :  { %s2165_s12 = smov 0   ;;  %s2167_s13 = smov 0   ;;  %s2603_s0 = inlined_call_operand.vmem [shape: bf16[32,4096], index: 0, kind: input, shape index: {}]   ;;  %s2604_s1 = inlined_call_operand.vmem [shape: bf16[4096,512], index: 1, kind: input, shape index: {}]   ;;  %s2605_s2 = inlined_call_operand.vmem [shape: f32[32,512], index: 2, kind: output, shape index: {0}]   ;;  %s2606_s3 = inlined_call_operand.vmem [shape: f32[1,2,512], index: 3, kind: output, shape index: {1}]  }
   0x1   :  { %s2169_s14 = smov 0   ;;  %s2171_s15 = smov 0  }
   0x2   :  { %s2173_s16 = smov 0  }
   0x3 LB: > { %s26_s17 = sadd.s32 1, %s2137_s15  ;;  %p49_p1 = scmp.ne.s32.totalorder %s2129_s13, %s2125_s12  ;;  %s2141_s16 = sphi %s2173_s16, %s14_s16   ;;  %s2137_s15 = sphi %s2171_s15, %s2610_s15   ;;  %s2133_s14 = sphi %s2169_s14, %s2609_s14   ;;  %s2129_s13 = sphi %s2167_s13, %s2608_s13   ;;  %s2125_s12 = sphi %s2165_s12, %s2607_s12  }
   0x4   : > { %p27_p0 = scmp.ge.s32.totalorder %s26_s17, 8  ;;  %p50_p2 = scmp.eq.s32.totalorder %s2141_s16, 0 }
   0x5   : > { %s42_s19 = sadd.s32 1, %s2129_s13  ;;  %p1702_p5 = scmp.ge.s32.totalorder %s2141_s16, 8 }
   0x6   : > { %s2612_s17 = smov (%p27_p0, %s26_s17), 0  ;;  %p51_p3 = por %p50_p2, %p49_p1 }
   0x7   : > { %s38_s18 = ssub.s32 %s2137_s15, %s2612_s17  ;;  %159 = sbr.rel (%p1702_p5) target bundleno = 20 (0x14), region = 16 }
   0x8   : > { %p40_p4 = scmp.eq.s32.totalorder %s38_s18, 0 }
   0xa   : > { %s2200_s20 = scalar_select %p40_p4, %s2129_s13, %s42_s19  }
   0xc   : > { %162 = sbr.rel (!%p51_p3) target bundleno = 20 (0x14), region = 20  ;;  %s164_s21 = sand.u32 (%p51_p3), 1, %s2129_s13  }
   0xd   : > { %s1855_s22 = sshll.u32 (%p51_p3), %s2137_s15, 4  ;;  %s1703_s23 = sshll.u32 (%p51_p3), %s164_s21, 6 }
   0xe   : > { %s172_s26 = scalar_lea.vmem (%p51_p3), %s2603_s0, %s1855_s22  ;;  %s166_s27 = scalar_lea.vmem (%p51_p3), [#allocation2], %s1703_s23 }
   0xf   : > { %v185_v0 = vld [vmem:[%s172_s26] sm:$0xff] (%p51_p3)  ;;  %v187_v1 = vld [vmem:[%s172_s26 + $0x8] sm:$0xff] (%p51_p3) }
  0x10   : > { %v189_v2 = vld [vmem:[%s172_s26 + $0x80] sm:$0xff] (%p51_p3)  ;;  %186 = vst [vmem:[%s166_s27] sm:$0xff] (%p51_p3), %v185_v0  ;;  %188 = vst [vmem:[%s166_s27 + $0x8] sm:$0xff] (%p51_p3), %v187_v1  ;;  %v191_v3 = vld [vmem:[%s172_s26 + $0x88] sm:$0xff] (%p51_p3) }
  0x11   : > { %190 = vst [vmem:[%s166_s27 + $0x10] sm:$0xff] %v189_v2  ;;  %v193_v4 = vld [vmem:[%s172_s26 + $0x100] sm:$0xff]  ;;  %v195_v5 = vld [vmem:[%s172_s26 + $0x108] sm:$0xff]  ;;  %192 = vst [vmem:[%s166_s27 + $0x18] sm:$0xff] %v191_v3 }
  0x12   : > { %194 = vst [vmem:[%s166_s27 + $0x20] sm:$0xff] %v193_v4  ;;  %196 = vst [vmem:[%s166_s27 + $0x28] sm:$0xff] %v195_v5  ;;  %v197_v6 = vld [vmem:[%s172_s26 + $0x180] sm:$0xff]  ;;  %v199_v7 = vld [vmem:[%s172_s26 + $0x188] sm:$0xff] }
  0x13   : > { %198 = vst [vmem:[%s166_s27 + $0x30] sm:$0xff] %v197_v6  ;;  %200 = vst [vmem:[%s166_s27 + $0x38] sm:$0xff] %v199_v7 }
  0x14 PF: > { %p1706_p6 = scmp.ge.s32.totalorder %s2141_s16, 1  ;;  %p220_p7 = scmp.lt.s32.totalorder %s2141_s16, 9 }
  0x16   : > { %p221_p8 = pnand %p1706_p6, %p220_p7 }
  0x17   : > { %s227_s28 = sand.u32 (!%p221_p8), 1, %s2125_s12   ;;  %s1708_s29 = sshll.u32 (!%p221_p8), %s2133_s14, 6 }
  0x18   : > { %224 = sbr.rel (%p221_p8) target bundleno = 421 (0x1a5), region = 47  ;;  %s1707_s30 = sshll.u32 (!%p221_p8), %s227_s28, 6 }
  0x19   : > { %p278_p9 = scmp.lt.s32.totalorder (!%p221_p8), %s1708_s29, 511  ;;  %s2217_s8 = scalar_lea.vmem (!%p221_p8), [#allocation2], %s1707_s30 }
  0x1a   : > { %p1711_p10 = scmp.ne.s32.totalorder (!%p221_p8), %s2133_s14, 0 }
  0x1d   : > { %s2614_s29 = smov (!%p278_p9, %s1708_s29), 511  ;;  %313 = sbr.rel (%p1711_p10) target bundleno = 43 (0x2b), region = 55 }
  0x1e   : > { %s1856_s4 = sshll.u32 %s2614_s29, 4 }
  0x1f   : > { %s2215_s7 = scalar_lea.vmem %s2604_s1, %s1856_s4 }
  0x22   : > { %v2143_v8 = vmov 0.0  }
  0x23   : > { %314 = vst [vmem:[%s2605_s2] sm:$0xff] %v2143_v8  ;;  %315 = vst [vmem:[%s2605_s2 + $0x8] sm:$0xff] %v2143_v8 }
  0x24   : > { %316 = vst [vmem:[%s2605_s2 + $0x10] sm:$0xff] %v2143_v8  ;;  %317 = vst [vmem:[%s2605_s2 + $0x18] sm:$0xff] %v2143_v8 }
  0x25   : > { %318 = vst [vmem:[%s2605_s2 + $0x20] sm:$0xff] %v2143_v8  ;;  %319 = vst [vmem:[%s2605_s2 + $0x28] sm:$0xff] %v2143_v8 }
  0x26   : > { %320 = vst [vmem:[%s2605_s2 + $0x30] sm:$0xff] %v2143_v8  ;;  %321 = vst [vmem:[%s2605_s2 + $0x38] sm:$0xff] %v2143_v8 }
  0x27   : > { %322 = vst [vmem:[%s2605_s2 + $0x40] sm:$0xff] %v2143_v8  ;;  %323 = vst [vmem:[%s2605_s2 + $0x48] sm:$0xff] %v2143_v8 }
  0x28   : > { %324 = vst [vmem:[%s2605_s2 + $0x50] sm:$0xff] %v2143_v8  ;;  %325 = vst [vmem:[%s2605_s2 + $0x58] sm:$0xff] %v2143_v8 }
  0x29   : > { %326 = vst [vmem:[%s2605_s2 + $0x60] sm:$0xff] %v2143_v8  ;;  %327 = vst [vmem:[%s2605_s2 + $0x68] sm:$0xff] %v2143_v8 }
  0x2a   : > { %328 = vst [vmem:[%s2605_s2 + $0x70] sm:$0xff] %v2143_v8  ;;  %329 = vst [vmem:[%s2605_s2 + $0x78] sm:$0xff] %v2143_v8 }
  0x2b PF: > { %v1899_v9 = vld [vmem:[%s2215_s7 + $0xe4] ss:$16 sps:$4 sm:$0xff]   ;;  %v1903_v11 = vld [vmem:[%s2215_s7 + $0xe0] ss:$16 sps:$4 sm:$0xff]   ;;  %v2322_v60 = vld [vmem:[%s2217_s8 + $0xc] ss:$16 sps:$4 sm:$0xff]  }
  0x2c   : > { %v1901_v10 = vld [vmem:[%s2215_s7 + $0x2e4] ss:$16 sps:$4 sm:$0xff]   ;;  %1162 = vmatprep.subr.bf16.mxu0 %v1899_v9  ;;  %v1904_v12 = vld [vmem:[%s2215_s7 + $0x2e0] ss:$16 sps:$4 sm:$0xff]   ;;  %1247 = vmatprep.mubr.bf16.mxu1 %v2322_v60  ;;  %p1848_p11 = scmp.ne.s32.totalorder %s2133_s14, 7 }
  0x2d   : > { %1215 = vmatprep.subr.bf16.mxu1 %v1901_v10  ;;  %v1905_v13 = vld [vmem:[%s2215_s7 + $0xc4] ss:$16 sps:$4 sm:$0xff]   ;;  %1163 = vmatpush1.bf16.msra.mxu0 %v1903_v11  ;;  %v1909_v15 = vld [vmem:[%s2215_s7 + $0xc0] ss:$16 sps:$4 sm:$0xff]   ;;  %v2003_v11 = vld [vmem:[%s2215_s7 + $0xec] ss:$16 sps:$4 sm:$0xff]  }
  0x2e   : > { %1216 = vmatpush1.bf16.msra.mxu1 %v1904_v12  ;;  %v1907_v14 = vld [vmem:[%s2215_s7 + $0x2c4] ss:$16 sps:$4 sm:$0xff]   ;;  %1164 = vmatprep.subr.bf16.mxu0 %v1905_v13  ;;  %v1910_v16 = vld [vmem:[%s2215_s7 + $0x2c0] ss:$16 sps:$4 sm:$0xff]   ;;  %v2006_v12 = vld [vmem:[%s2215_s7 + $0x2ec] ss:$16 sps:$4 sm:$0xff]  }
  0x2f   : > { %1217 = vmatprep.subr.bf16.mxu1 %v1907_v14  ;;  %v1911_v17 = vld [vmem:[%s2215_s7 + $0xa4] ss:$16 sps:$4 sm:$0xff]   ;;  %v1915_v19 = vld [vmem:[%s2215_s7 + $0xa0] ss:$16 sps:$4 sm:$0xff]   ;;  %v2346_v14 = vld [vmem:[%s2217_s8 + $0x8] ss:$16 sps:$4 sm:$0xff]  }
  0x30   : > { %v1913_v18 = vld [vmem:[%s2215_s7 + $0x2a4] ss:$16 sps:$4 sm:$0xff]   ;;  %v1916_v20 = vld [vmem:[%s2215_s7 + $0x2a0] ss:$16 sps:$4 sm:$0xff]  }
  0x31   : > { %1165 = vmatpush1.bf16.msra.mxu0 %v1909_v15  ;;  %v1917_v21 = vld [vmem:[%s2215_s7 + $0x84] ss:$16 sps:$4 sm:$0xff]   ;;  %v1921_v23 = vld [vmem:[%s2215_s7 + $0x80] ss:$16 sps:$4 sm:$0xff]   ;;  %v2001_v15 = vld [vmem:[%s2215_s7 + $0xe8] ss:$16 sps:$4 sm:$0xff]  }
  0x32   : > { %1218 = vmatpush1.bf16.msra.mxu1 %v1910_v16  ;;  %1166 = vmatprep.subr.bf16.mxu0 %v1911_v17  ;;  %v1919_v22 = vld [vmem:[%s2215_s7 + $0x284] ss:$16 sps:$4 sm:$0xff]   ;;  %v1922_v24 = vld [vmem:[%s2215_s7 + $0x280] ss:$16 sps:$4 sm:$0xff]   ;;  %v2004_v16 = vld [vmem:[%s2215_s7 + $0x2e8] ss:$16 sps:$4 sm:$0xff]  }
  0x33   : > { %1219 = vmatprep.subr.bf16.mxu1 %v1913_v18  ;;  %v1923_v25 = vld [vmem:[%s2215_s7 + $0x64] ss:$16 sps:$4 sm:$0xff]   ;;  %v1927_v27 = vld [vmem:[%s2215_s7 + $0x60] ss:$16 sps:$4 sm:$0xff]   ;;  %v2009_v17 = vld [vmem:[%s2215_s7 + $0xcc] ss:$16 sps:$4 sm:$0xff]  }
  0x34   : > { %v1925_v26 = vld [vmem:[%s2215_s7 + $0x264] ss:$16 sps:$4 sm:$0xff]   ;;  %v1928_v28 = vld [vmem:[%s2215_s7 + $0x260] ss:$16 sps:$4 sm:$0xff]   ;;  %v2012_v18 = vld [vmem:[%s2215_s7 + $0x2cc] ss:$16 sps:$4 sm:$0xff]  }
  0x35   : > { %1167 = vmatpush1.bf16.msra.mxu0 %v1915_v19  ;;  %v1929_v29 = vld [vmem:[%s2215_s7 + $0x44] ss:$16 sps:$4 sm:$0xff]   ;;  %v1933_v31 = vld [vmem:[%s2215_s7 + $0x40] ss:$16 sps:$4 sm:$0xff]   ;;  %v2007_v19 = vld [vmem:[%s2215_s7 + $0xc8] ss:$16 sps:$4 sm:$0xff]  }
  0x36   : > { %1220 = vmatpush1.bf16.msra.mxu1 %v1916_v20  ;;  %1168 = vmatprep.subr.bf16.mxu0 %v1917_v21  ;;  %v1931_v30 = vld [vmem:[%s2215_s7 + $0x244] ss:$16 sps:$4 sm:$0xff]   ;;  %v1934_v32 = vld [vmem:[%s2215_s7 + $0x240] ss:$16 sps:$4 sm:$0xff]   ;;  %v2010_v20 = vld [vmem:[%s2215_s7 + $0x2c8] ss:$16 sps:$4 sm:$0xff]  }
  0x37   : > { %1221 = vmatprep.subr.bf16.mxu1 %v1919_v22  ;;  %v1935_v33 = vld [vmem:[%s2215_s7 + $0x24] ss:$16 sps:$4 sm:$0xff]   ;;  %v1939_v35 = vld [vmem:[%s2215_s7 + $0x20] ss:$16 sps:$4 sm:$0xff]   ;;  %v2015_v21 = vld [vmem:[%s2215_s7 + $0xac] ss:$16 sps:$4 sm:$0xff]  }
  0x38   : > { %v1937_v34 = vld [vmem:[%s2215_s7 + $0x224] ss:$16 sps:$4 sm:$0xff]   ;;  %v1940_v36 = vld [vmem:[%s2215_s7 + $0x220] ss:$16 sps:$4 sm:$0xff]   ;;  %v2018_v22 = vld [vmem:[%s2215_s7 + $0x2ac] ss:$16 sps:$4 sm:$0xff]  }
  0x39   : > { %1169 = vmatpush1.bf16.msra.mxu0 %v1921_v23  ;;  %v1941_v37 = vld [vmem:[%s2215_s7 + $0x4] ss:$16 sps:$4 sm:$0xff]   ;;  %v1945_v39 = vld [vmem:[%s2215_s7] ss:$16 sps:$4 sm:$0xff]   ;;  %v2013_v23 = vld [vmem:[%s2215_s7 + $0xa8] ss:$16 sps:$4 sm:$0xff]  }
  0x3a   : > { %1222 = vmatpush1.bf16.msra.mxu1 %v1922_v24  ;;  %1170 = vmatprep.subr.bf16.mxu0 %v1923_v25  ;;  %v1943_v38 = vld [vmem:[%s2215_s7 + $0x204] ss:$16 sps:$4 sm:$0xff]   ;;  %v1946_v40 = vld [vmem:[%s2215_s7 + $0x200] ss:$16 sps:$4 sm:$0xff]   ;;  %v2016_v24 = vld [vmem:[%s2215_s7 + $0x2a8] ss:$16 sps:$4 sm:$0xff]  }
  0x3b   : > { %1223 = vmatprep.subr.bf16.mxu1 %v1925_v26  ;;  %v1947_v41 = vld [vmem:[%s2215_s7 + $0x1e4] ss:$16 sps:$4 sm:$0xff]   ;;  %v1951_v43 = vld [vmem:[%s2215_s7 + $0x1e0] ss:$16 sps:$4 sm:$0xff]   ;;  %v2021_v25 = vld [vmem:[%s2215_s7 + $0x8c] ss:$16 sps:$4 sm:$0xff]  }
  0x3c   : > { %v1949_v42 = vld [vmem:[%s2215_s7 + $0x3e4] ss:$16 sps:$4 sm:$0xff]   ;;  %v1952_v44 = vld [vmem:[%s2215_s7 + $0x3e0] ss:$16 sps:$4 sm:$0xff]   ;;  %v2024_v26 = vld [vmem:[%s2215_s7 + $0x28c] ss:$16 sps:$4 sm:$0xff]  }
  0x3d   : > { %1171 = vmatpush1.bf16.msra.mxu0 %v1927_v27  ;;  %v1953_v45 = vld [vmem:[%s2215_s7 + $0x1c4] ss:$16 sps:$4 sm:$0xff]   ;;  %v1957_v47 = vld [vmem:[%s2215_s7 + $0x1c0] ss:$16 sps:$4 sm:$0xff]   ;;  %v2019_v27 = vld [vmem:[%s2215_s7 + $0x88] ss:$16 sps:$4 sm:$0xff]  }
  0x3e   : > { %1224 = vmatpush1.bf16.msra.mxu1 %v1928_v28  ;;  %1172 = vmatprep.subr.bf16.mxu0 %v1929_v29  ;;  %v1955_v46 = vld [vmem:[%s2215_s7 + $0x3c4] ss:$16 sps:$4 sm:$0xff]   ;;  %v1958_v48 = vld [vmem:[%s2215_s7 + $0x3c0] ss:$16 sps:$4 sm:$0xff]   ;;  %v2022_v28 = vld [vmem:[%s2215_s7 + $0x288] ss:$16 sps:$4 sm:$0xff]  }
  0x3f   : > { %1225 = vmatprep.subr.bf16.mxu1 %v1931_v30  ;;  %v1959_v49 = vld [vmem:[%s2215_s7 + $0x1a4] ss:$16 sps:$4 sm:$0xff]   ;;  %v1963_v51 = vld [vmem:[%s2215_s7 + $0x1a0] ss:$16 sps:$4 sm:$0xff]   ;;  %v2027_v29 = vld [vmem:[%s2215_s7 + $0x6c] ss:$16 sps:$4 sm:$0xff]  }
  0x40   : > { %v1961_v50 = vld [vmem:[%s2215_s7 + $0x3a4] ss:$16 sps:$4 sm:$0xff]   ;;  %v1964_v52 = vld [vmem:[%s2215_s7 + $0x3a0] ss:$16 sps:$4 sm:$0xff]   ;;  %v2030_v30 = vld [vmem:[%s2215_s7 + $0x26c] ss:$16 sps:$4 sm:$0xff]  }
  0x41   : > { %1173 = vmatpush1.bf16.msra.mxu0 %v1933_v31  ;;  %v1965_v53 = vld [vmem:[%s2215_s7 + $0x184] ss:$16 sps:$4 sm:$0xff]   ;;  %v1969_v55 = vld [vmem:[%s2215_s7 + $0x180] ss:$16 sps:$4 sm:$0xff]   ;;  %v2025_v31 = vld [vmem:[%s2215_s7 + $0x68] ss:$16 sps:$4 sm:$0xff]  }
  0x42   : > { %1226 = vmatpush1.bf16.msra.mxu1 %v1934_v32  ;;  %1174 = vmatprep.subr.bf16.mxu0 %v1935_v33  ;;  %v1967_v54 = vld [vmem:[%s2215_s7 + $0x384] ss:$16 sps:$4 sm:$0xff]   ;;  %v1970_v56 = vld [vmem:[%s2215_s7 + $0x380] ss:$16 sps:$4 sm:$0xff]   ;;  %v2028_v32 = vld [vmem:[%s2215_s7 + $0x268] ss:$16 sps:$4 sm:$0xff]  }
  0x43   : > { %1227 = vmatprep.subr.bf16.mxu1 %v1937_v34  ;;  %v1971_v57 = vld [vmem:[%s2215_s7 + $0x164] ss:$16 sps:$4 sm:$0xff]   ;;  %v1975_v61 = vld [vmem:[%s2215_s7 + $0x160] ss:$16 sps:$4 sm:$0xff]   ;;  %v2033_v33 = vld [vmem:[%s2215_s7 + $0x4c] ss:$16 sps:$4 sm:$0xff]  }
  0x44   : > { %v2318_v58 = vld [vmem:[%s2217_s8 + $0x4] ss:$16 sps:$4 sm:$0xff]   ;;  %v1976_v62 = vld [vmem:[%s2215_s7 + $0x360] ss:$16 sps:$4 sm:$0xff]   ;;  %v2036_v34 = vld [vmem:[%s2215_s7 + $0x24c] ss:$16 sps:$4 sm:$0xff]  }
  0x45   : > { %1175 = vmatpush1.bf16.msra.mxu0 %v1939_v35  ;;  %v1973_v59 = vld [vmem:[%s2215_s7 + $0x364] ss:$16 sps:$4 sm:$0xff]   ;;  %1194 = vmatprep.mubr.bf16.mxu0 %v2318_v58  ;;  %v1981_v1 = vld [vmem:[%s2215_s7 + $0x140] ss:$16 sps:$4 sm:$0xff]  }
  0x46   : > { %1228 = vmatpush1.bf16.msra.mxu1 %v1940_v36  ;;  %1176 = vmatprep.subr.bf16.mxu0 %v1941_v37  ;;  %v1977_v63 = vld [vmem:[%s2215_s7 + $0x144] ss:$16 sps:$4 sm:$0xff]   ;;  %v1982_v2 = vld [vmem:[%s2215_s7 + $0x340] ss:$16 sps:$4 sm:$0xff]   ;;  %v2374_v36 = vld [vmem:[%s2217_s8 + $0x2c] ss:$16 sps:$4 sm:$0xff]  }
  0x47   : > { %1229 = vmatprep.subr.bf16.mxu1 %v1943_v38  ;;  %v1979_v0 = vld [vmem:[%s2215_s7 + $0x344] ss:$16 sps:$4 sm:$0xff]   ;;  %v1987_v5 = vld [vmem:[%s2215_s7 + $0x120] ss:$16 sps:$4 sm:$0xff]   ;;  %v2381_v38 = vld [vmem:[%s2217_s8 + $0x28] ss:$16 sps:$4 sm:$0xff]  }
  0x48   : > { %v1983_v3 = vld [vmem:[%s2215_s7 + $0x124] ss:$16 sps:$4 sm:$0xff]   ;;  %v1988_v6 = vld [vmem:[%s2215_s7 + $0x320] ss:$16 sps:$4 sm:$0xff]  }
  0x49   : > { %1177 = vmatpush1.bf16.msra.mxu0 %v1945_v39  ;;  %v1985_v4 = vld [vmem:[%s2215_s7 + $0x324] ss:$16 sps:$4 sm:$0xff]   ;;  %v1993_v9 = vld [vmem:[%s2215_s7 + $0x100] ss:$16 sps:$4 sm:$0xff]   ;;  %v2031_v39 = vld [vmem:[%s2215_s7 + $0x48] ss:$16 sps:$4 sm:$0xff]  }
  0x4a   : > { %1230 = vmatpush1.bf16.msra.mxu1 %v1946_v40  ;;  %1178 = vmatprep.subr.bf16.mxu0 %v1947_v41  ;;  %v1989_v7 = vld [vmem:[%s2215_s7 + $0x104] ss:$16 sps:$4 sm:$0xff]   ;;  %v1994_v10 = vld [vmem:[%s2215_s7 + $0x300] ss:$16 sps:$4 sm:$0xff]   ;;  %v2034_v40 = vld [vmem:[%s2215_s7 + $0x248] ss:$16 sps:$4 sm:$0xff]  }
  0x4b   : > { %1231 = vmatprep.subr.bf16.mxu1 %v1949_v42  ;;  %v1991_v8 = vld [vmem:[%s2215_s7 + $0x304] ss:$16 sps:$4 sm:$0xff]   ;;  %v2343_v13 = vld [vmem:[%s2217_s8] ss:$16 sps:$4 sm:$0xff]   ;;  %v2039_v41 = vld [vmem:[%s2215_s7 + $0x2c] ss:$16 sps:$4 sm:$0xff]  }
  0x4c   : > { %v2371_v35 = vld [vmem:[%s2217_s8 + $0x24] ss:$16 sps:$4 sm:$0xff]   ;;  %v2378_v37 = vld [vmem:[%s2217_s8 + $0x20] ss:$16 sps:$4 sm:$0xff]   ;;  %v2042_v42 = vld [vmem:[%s2215_s7 + $0x22c] ss:$16 sps:$4 sm:$0xff]  }
  0x4d   : > { %1179 = vmatpush2.bf16.msra.mxu0 %v1951_v43  ;;  %v2037_v43 = vld [vmem:[%s2215_s7 + $0x28] ss:$16 sps:$4 sm:$0xff]  }
  0x4e   : > { %1232 = vmatpush2.bf16.msra.mxu1 %v1952_v44  ;;  %1180 = vmatprep.subr.bf16.mxu0 %v1953_v45  ;;  %v2040_v44 = vld [vmem:[%s2215_s7 + $0x228] ss:$16 sps:$4 sm:$0xff]   ;;  %v2045_v45 = vld [vmem:[%s2215_s7 + $0xc] ss:$16 sps:$4 sm:$0xff]  }
  0x4f   : > { %1233 = vmatprep.subr.bf16.mxu1 %v1955_v46  ;;  %v2048_v46 = vld [vmem:[%s2215_s7 + $0x20c] ss:$16 sps:$4 sm:$0xff]  }
  0x51   : > { %1181 = vmatpush2.bf16.msra.mxu0 %v1957_v47  ;;  %v2043_v47 = vld [vmem:[%s2215_s7 + $0x8] ss:$16 sps:$4 sm:$0xff]  }
  0x52   : > { %1234 = vmatpush2.bf16.msra.mxu1 %v1958_v48  ;;  %1182 = vmatprep.subr.bf16.mxu0 %v1959_v49  ;;  %v2046_v48 = vld [vmem:[%s2215_s7 + $0x208] ss:$16 sps:$4 sm:$0xff]   ;;  %v2051_v49 = vld [vmem:[%s2215_s7 + $0x1ec] ss:$16 sps:$4 sm:$0xff]  }
  0x53   : > { %1235 = vmatprep.subr.bf16.mxu1 %v1961_v50  ;;  %v2054_v50 = vld [vmem:[%s2215_s7 + $0x3ec] ss:$16 sps:$4 sm:$0xff]  }
  0x55   : > { %1183 = vmatpush2.bf16.msra.mxu0 %v1963_v51  ;;  %v2049_v51 = vld [vmem:[%s2215_s7 + $0x1e8] ss:$16 sps:$4 sm:$0xff]  }
  0x56   : > { %1236 = vmatpush2.bf16.msra.mxu1 %v1964_v52  ;;  %1184 = vmatprep.subr.bf16.mxu0 %v1965_v53  ;;  %v2052_v52 = vld [vmem:[%s2215_s7 + $0x3e8] ss:$16 sps:$4 sm:$0xff]   ;;  %v2057_v53 = vld [vmem:[%s2215_s7 + $0x1cc] ss:$16 sps:$4 sm:$0xff]  }
  0x57   : > { %1237 = vmatprep.subr.bf16.mxu1 %v1967_v54  ;;  %v2060_v54 = vld [vmem:[%s2215_s7 + $0x3cc] ss:$16 sps:$4 sm:$0xff]  }
  0x59   : > { %1185 = vmatpush2.bf16.msra.mxu0 %v1969_v55  ;;  %v2055_v55 = vld [vmem:[%s2215_s7 + $0x1c8] ss:$16 sps:$4 sm:$0xff]  }
  0x5a   : > { %1238 = vmatpush2.bf16.msra.mxu1 %v1970_v56  ;;  %1186 = vmatprep.subr.bf16.mxu0 %v1971_v57  ;;  %v2058_v56 = vld [vmem:[%s2215_s7 + $0x3c8] ss:$16 sps:$4 sm:$0xff]   ;;  %v2063_v57 = vld [vmem:[%s2215_s7 + $0x1ac] ss:$16 sps:$4 sm:$0xff]  }
  0x5b   : > { %1239 = vmatprep.subr.bf16.mxu1 %v1973_v59  ;;  %v2061_v59 = vld [vmem:[%s2215_s7 + $0x1a8] ss:$16 sps:$4 sm:$0xff]  }
  0x5d   : > { %1187 = vmatpush2.bf16.msra.mxu0 %v1975_v61  ;;  %v2069_v61 = vld [vmem:[%s2215_s7 + $0x18c] ss:$16 sps:$4 sm:$0xff]  }
  0x5e   : > { %1240 = vmatpush2.bf16.msra.mxu1 %v1976_v62  ;;  %1188 = vmatprep.subr.bf16.mxu0 %v1977_v63  ;;  %v2072_v62 = vld [vmem:[%s2215_s7 + $0x38c] ss:$16 sps:$4 sm:$0xff]   ;;  %v2067_v63 = vld [vmem:[%s2215_s7 + $0x188] ss:$16 sps:$4 sm:$0xff]  }
  0x5f   : > { %1241 = vmatprep.subr.bf16.mxu1 %v1979_v0  ;;  %v2070_v0 = vld [vmem:[%s2215_s7 + $0x388] ss:$16 sps:$4 sm:$0xff]  }
  0x61   : > { %1189 = vmatpush2.bf16.msra.mxu0 %v1981_v1  ;;  %v2075_v1 = vld [vmem:[%s2215_s7 + $0x16c] ss:$16 sps:$4 sm:$0xff]  }
  0x62   : > { %1242 = vmatpush2.bf16.msra.mxu1 %v1982_v2  ;;  %1190 = vmatprep.subr.bf16.mxu0 %v1983_v3  ;;  %v2078_v2 = vld [vmem:[%s2215_s7 + $0x36c] ss:$16 sps:$4 sm:$0xff]   ;;  %v2073_v3 = vld [vmem:[%s2215_s7 + $0x168] ss:$16 sps:$4 sm:$0xff]  }
  0x63   : > { %1243 = vmatprep.subr.bf16.mxu1 %v1985_v4  ;;  %v2076_v4 = vld [vmem:[%s2215_s7 + $0x368] ss:$16 sps:$4 sm:$0xff]  }
  0x65   : > { %1191 = vmatpush2.bf16.msra.mxu0 %v1987_v5  ;;  %v2087_v5 = vld [vmem:[%s2215_s7 + $0x14c] ss:$16 sps:$4 sm:$0xff]  }
  0x66   : > { %1244 = vmatpush2.bf16.msra.mxu1 %v1988_v6  ;;  %1192 = vmatprep.subr.bf16.mxu0 %v1989_v7  ;;  %v2090_v6 = vld [vmem:[%s2215_s7 + $0x34c] ss:$16 sps:$4 sm:$0xff]   ;;  %v2085_v7 = vld [vmem:[%s2215_s7 + $0x148] ss:$16 sps:$4 sm:$0xff]  }
  0x67   : > { %1245 = vmatprep.subr.bf16.mxu1 %v1991_v8  ;;  %v2088_v8 = vld [vmem:[%s2215_s7 + $0x348] ss:$16 sps:$4 sm:$0xff]  }
  0x69   : > { %1193 = vmatpush2.bf16.msra.mxu0 %v1993_v9  ;;  %v2093_v9 = vld [vmem:[%s2215_s7 + $0x12c] ss:$16 sps:$4 sm:$0xff]  }
  0x6a   : > { %1246 = vmatpush2.bf16.msra.mxu1 %v1994_v10  ;;  %1268 = vmatprep.subr.bf16.mxu0 %v2003_v11  ;;  %v2096_v10 = vld [vmem:[%s2215_s7 + $0x32c] ss:$16 sps:$4 sm:$0xff]   ;;  %v2091_v11 = vld [vmem:[%s2215_s7 + $0x128] ss:$16 sps:$4 sm:$0xff]  }
  0x6b   : > { %1321 = vmatprep.subr.bf16.mxu1 %v2006_v12  ;;  %v2094_v12 = vld [vmem:[%s2215_s7 + $0x328] ss:$16 sps:$4 sm:$0xff]  }
  0x6c   : > { %1195 = vmatmul.mubr.bf16.vlgmr.msra.gmra.mxu0 %v2343_v13 }
  0x6d   : > { %1248 = vmatmul.mubr.bf16.vlgmr.msra.gmra.mxu1 %v2346_v14  ;;  %1269 = vmatpush1.bf16.msra.mxu0 %v2001_v15  ;;  %v2099_v15 = vld [vmem:[%s2215_s7 + $0x10c] ss:$16 sps:$4 sm:$0xff]  }
  0x6e   : > { %1322 = vmatpush1.bf16.msra.mxu1 %v2004_v16  ;;  %1270 = vmatprep.subr.bf16.mxu0 %v2009_v17  ;;  %v2102_v16 = vld [vmem:[%s2215_s7 + $0x30c] ss:$16 sps:$4 sm:$0xff]   ;;  %v2097_v17 = vld [vmem:[%s2215_s7 + $0x108] ss:$16 sps:$4 sm:$0xff]  }
  0x6f   : > { %1323 = vmatprep.subr.bf16.mxu1 %v2012_v18  ;;  %1204 = vmatprep.mubr.bf16.mxu0 %v2371_v35  ;;  %v2100_v18 = vld [vmem:[%s2215_s7 + $0x308] ss:$16 sps:$4 sm:$0xff]  }
  0x70   : > { %1257 = vmatprep.mubr.bf16.mxu1 %v2374_v36 }
  0x71   : > { %1271 = vmatpush1.bf16.msra.mxu0 %v2007_v19 }
  0x72   : > { %1324 = vmatpush1.bf16.msra.mxu1 %v2010_v20  ;;  %1272 = vmatprep.subr.bf16.mxu0 %v2015_v21  ;;  %v330_v20 = vld [vmem:[%s2605_s2] sm:$0xff] }
  0x73   : > { %1325 = vmatprep.subr.bf16.mxu1 %v2018_v22 }
  0x74   : > { %1205 = vmatmul.mubr.bf16.gmra.mxu0 %v2378_v37 }
  0x75   : > { %1273 = vmatpush1.bf16.msra.mxu0 %v2013_v23  ;;  %1258 = vmatmul.mubr.bf16.gmra.mxu1 %v2381_v38 }
  0x76   : > { %1326 = vmatpush1.bf16.msra.mxu1 %v2016_v24  ;;  %1274 = vmatprep.subr.bf16.mxu0 %v2021_v25 }
  0x77   : > { %1327 = vmatprep.subr.bf16.mxu1 %v2024_v26  ;;  %1300 = vmatprep.mubr.bf16.mxu0 %v2318_v58  ;;  %v2066_v58 = vld [vmem:[%s2215_s7 + $0x3ac] ss:$16 sps:$4 sm:$0xff]  }
  0x78   : > { %1353 = vmatprep.mubr.bf16.mxu1 %v2322_v60  ;;  %v2064_v60 = vld [vmem:[%s2215_s7 + $0x3a8] ss:$16 sps:$4 sm:$0xff]  }
  0x79   : > { %1275 = vmatpush1.bf16.msra.mxu0 %v2019_v27  ;;  %v334_v27 = vld [vmem:[%s2605_s2 + $0x20] sm:$0xff] }
  0x7a   : > { %1328 = vmatpush1.bf16.msra.mxu1 %v2022_v28  ;;  %1276 = vmatprep.subr.bf16.mxu0 %v2027_v29 }
  0x7b   : > { %1329 = vmatprep.subr.bf16.mxu1 %v2030_v30 }
  0x7d   : > { %1277 = vmatpush1.bf16.msra.mxu0 %v2025_v31 }
  0x7e   : > { %1330 = vmatpush1.bf16.msra.mxu1 %v2028_v32  ;;  %1278 = vmatprep.subr.bf16.mxu0 %v2033_v33  ;;  %v335_v32 = vld [vmem:[%s2605_s2 + $0x28] sm:$0xff] }
  0x7f   : > { %1331 = vmatprep.subr.bf16.mxu1 %v2036_v34 }
  0x81   : > { %1279 = vmatpush1.bf16.msra.mxu0 %v2031_v39 }
  0x82   : > { %1332 = vmatpush1.bf16.msra.mxu1 %v2034_v40  ;;  %1280 = vmatprep.subr.bf16.mxu0 %v2039_v41 }
  0x83   : > { %1333 = vmatprep.subr.bf16.mxu1 %v2042_v42  ;;  %v339_v42 = vld [vmem:[%s2605_s2 + $0x48] sm:$0xff] }
  0x85   : > { %1281 = vmatpush1.bf16.msra.mxu0 %v2037_v43 }
  0x86   : > { %1334 = vmatpush1.bf16.msra.mxu1 %v2040_v44  ;;  %1282 = vmatprep.subr.bf16.mxu0 %v2045_v45 }
  0x87   : > { %1335 = vmatprep.subr.bf16.mxu1 %v2048_v46 }
  0x89   : > { %1283 = vmatpush1.bf16.msra.mxu0 %v2043_v47  ;;  %v342_v47 = vld [vmem:[%s2605_s2 + $0x60] sm:$0xff] }
  0x8a   : > { %1336 = vmatpush1.bf16.msra.mxu1 %v2046_v48  ;;  %1284 = vmatprep.subr.bf16.mxu0 %v2051_v49 }
  0x8b   : > { %1337 = vmatprep.subr.bf16.mxu1 %v2054_v50 }
  0x8d   : > { %1285 = vmatpush2.bf16.msra.mxu0 %v2049_v51 }
  0x8e   : > { %1338 = vmatpush2.bf16.msra.mxu1 %v2052_v52  ;;  %1286 = vmatprep.subr.bf16.mxu0 %v2057_v53  ;;  %v343_v52 = vld [vmem:[%s2605_s2 + $0x68] sm:$0xff] }
  0x8f   : > { %1339 = vmatprep.subr.bf16.mxu1 %v2060_v54 }
  0x91   : > { %1287 = vmatpush2.bf16.msra.mxu0 %v2055_v55 }
  0x92   : > { %1340 = vmatpush2.bf16.msra.mxu1 %v2058_v56  ;;  %1288 = vmatprep.subr.bf16.mxu0 %v2063_v57 }
  0x93   : > { %1341 = vmatprep.subr.bf16.mxu1 %v2066_v58  ;;  %v332_v58 = vld [vmem:[%s2605_s2 + $0x10] sm:$0xff] }
  0x95   : > { %1289 = vmatpush2.bf16.msra.mxu0 %v2061_v59 }
  0x96   : > { %1342 = vmatpush2.bf16.msra.mxu1 %v2064_v60  ;;  %1290 = vmatprep.subr.bf16.mxu0 %v2069_v61 }
  0x97   : > { %1343 = vmatprep.subr.bf16.mxu1 %v2072_v62  ;;  %v333_v62 = vld [vmem:[%s2605_s2 + $0x18] sm:$0xff] }
  0x99   : > { %1291 = vmatpush2.bf16.msra.mxu0 %v2067_v63 }
  0x9a   : > { %1344 = vmatpush2.bf16.msra.mxu1 %v2070_v0  ;;  %1292 = vmatprep.subr.bf16.mxu0 %v2075_v1 }
  0x9b   : > { %1345 = vmatprep.subr.bf16.mxu1 %v2078_v2 }
  0x9d   : > { %1293 = vmatpush2.bf16.msra.mxu0 %v2073_v3  ;;  %v336_v3 = vld [vmem:[%s2605_s2 + $0x30] sm:$0xff] }
  0x9e   : > { %1346 = vmatpush2.bf16.msra.mxu1 %v2076_v4  ;;  %1294 = vmatprep.subr.bf16.mxu0 %v2087_v5 }
  0x9f   : > { %1347 = vmatprep.subr.bf16.mxu1 %v2090_v6 }
  0xa1   : > { %1295 = vmatpush2.bf16.msra.mxu0 %v2085_v7 }
  0xa2   : > { %1348 = vmatpush2.bf16.msra.mxu1 %v2088_v8  ;;  %1296 = vmatprep.subr.bf16.mxu0 %v2093_v9  ;;  %v337_v8 = vld [vmem:[%s2605_s2 + $0x38] sm:$0xff] }
  0xa3   : > { %1349 = vmatprep.subr.bf16.mxu1 %v2096_v10 }
  0xa5   : > { %1297 = vmatpush2.bf16.msra.mxu0 %v2091_v11 }
  0xa6   : > { %1350 = vmatpush2.bf16.msra.mxu1 %v2094_v12  ;;  %1298 = vmatprep.subr.bf16.mxu0 %v2099_v15  ;;  %v340_v15 = vld [vmem:[%s2605_s2 + $0x50] sm:$0xff] }
  0xa7   : > { %1351 = vmatprep.subr.bf16.mxu1 %v2102_v16 }
  0xa9   : > { %1299 = vmatpush2.bf16.msra.mxu0 %v2097_v17 }
  0xaa   : > { %1352 = vmatpush2.bf16.msra.mxu1 %v2100_v18 }
  0xac   : > { %1301 = vmatmul.mubr.bf16.vlgmr.msra.gmra.mxu0 %v2343_v13  ;;  %v331_v13 = vld [vmem:[%s2605_s2 + $0x8] sm:$0xff] }
  0xad   : > { %1354 = vmatmul.mubr.bf16.vlgmr.msra.gmra.mxu1 %v2346_v14  ;;  %1310 = vmatprep.mubr.bf16.mxu0 %v2371_v35 }
  0xae   : > { %1363 = vmatprep.mubr.bf16.mxu1 %v2374_v36 }
  0xb4   : > { %1311 = vmatmul.mubr.bf16.gmra.mxu0 %v2378_v37 }
  0xb5   : > { %1364 = vmatmul.mubr.bf16.gmra.mxu1 %v2381_v38  ;;  %v338_v38 = vld [vmem:[%s2605_s2 + $0x40] sm:$0xff] }
 0x12c   : > { %v1196_v19 = vpop.f32.mrf.mxu0 }
 0x12d   : > { %v1249_v21 = vpop.f32.mrf.mxu1 }
 0x12e   : > { %v1250_v22 = vadd.f32 %v1249_v21, %v1196_v19  ;;  %v1198_v23 = vpop.f32.mrf.mxu0 }
 0x12f   : > { %v1251_v14 = vpop.f32.mrf.mxu1 }
 0x130   : > { %v1374_v24 = vadd.f32 %v1250_v22, %v330_v20  ;;  %v1252_v25 = vadd.f32 %v1251_v14, %v1198_v23  ;;  %v1200_v26 = vpop.f32.mrf.mxu0  ;;  %v341_v20 = vld [vmem:[%s2605_s2 + $0x58] sm:$0xff]  ;;  %v344_v14 = vld [vmem:[%s2605_s2 + $0x70] sm:$0xff] }
 0x131   : > { %v1253_v28 = vpop.f32.mrf.mxu1 }
 0x132   : > { %1390 = vst [vmem:[%s2605_s2] sm:$0xff] %v1374_v24  ;;  %v1375_v29 = vadd.f32 %v1252_v25, %v331_v13  ;;  %v1254_v30 = vadd.f32 %v1253_v28, %v1200_v26  ;;  %v1202_v31 = vpop.f32.mrf.mxu0  ;;  %v345_v28 = vld [vmem:[%s2605_s2 + $0x78] sm:$0xff] }
 0x133   : > { %v1255_v33 = vpop.f32.mrf.mxu1 }
 0x134   : > { %1391 = vst [vmem:[%s2605_s2 + $0x8] sm:$0xff] %v1375_v29  ;;  %v1378_v34 = vadd.f32 %v1254_v30, %v334_v27  ;;  %v1256_v35 = vadd.f32 %v1255_v33, %v1202_v31  ;;  %v1206_v37 = vpop.f32.mrf.mxu0 }
 0x135   : > { %v1259_v39 = vpop.f32.mrf.mxu1 }
 0x136   : > { %1394 = vst [vmem:[%s2605_s2 + $0x20] sm:$0xff] %v1378_v34  ;;  %v1379_v36 = vadd.f32 %v1256_v35, %v335_v32  ;;  %v1260_v40 = vadd.f32 %v1259_v39, %v1206_v37  ;;  %v1208_v41 = vpop.f32.mrf.mxu0 }
 0x137   : > { %v1261_v43 = vpop.f32.mrf.mxu1 }
 0x138   : > { %1395 = vst [vmem:[%s2605_s2 + $0x28] sm:$0xff] %v1379_v36  ;;  %v1382_v44 = vadd.f32 %v1260_v40, %v338_v38  ;;  %v1262_v45 = vadd.f32 %v1261_v43, %v1208_v41  ;;  %v1210_v46 = vpop.f32.mrf.mxu0 }
 0x139   : > { %v1263_v48 = vpop.f32.mrf.mxu1 }
 0x13a   : > { %1398 = vst [vmem:[%s2605_s2 + $0x40] sm:$0xff] %v1382_v44  ;;  %v1383_v49 = vadd.f32 %v1262_v45, %v339_v42  ;;  %v1264_v50 = vadd.f32 %v1263_v48, %v1210_v46  ;;  %v1212_v51 = vpop.f32.mrf.mxu0 }
 0x13b   : > { %v1265_v53 = vpop.f32.mrf.mxu1 }
 0x13c   : > { %1399 = vst [vmem:[%s2605_s2 + $0x48] sm:$0xff] %v1383_v49  ;;  %v1386_v54 = vadd.f32 %v1264_v50, %v342_v47  ;;  %v1266_v55 = vadd.f32 %v1265_v53, %v1212_v51 }
 0x13e   : > { %1402 = vst [vmem:[%s2605_s2 + $0x60] sm:$0xff] %v1386_v54  ;;  %v1387_v56 = vadd.f32 %v1266_v55, %v343_v52 }
 0x140   : > { %1403 = vst [vmem:[%s2605_s2 + $0x68] sm:$0xff] %v1387_v56 }
 0x16c   : > { %v1302_v57 = vpop.f32.mrf.mxu0 }
 0x16d   : > { %v1355_v59 = vpop.f32.mrf.mxu1 }
 0x16e   : > { %v1356_v60 = vadd.f32 %v1355_v59, %v1302_v57  ;;  %v1304_v61 = vpop.f32.mrf.mxu0 }
 0x16f   : > { %v1357_v63 = vpop.f32.mrf.mxu1 }
 0x170   : > { %v1376_v0 = vadd.f32 %v1356_v60, %v332_v58  ;;  %v1358_v1 = vadd.f32 %v1357_v63, %v1304_v61  ;;  %v1306_v2 = vpop.f32.mrf.mxu0 }
 0x171   : > { %v1359_v4 = vpop.f32.mrf.mxu1 }
 0x172   : > { %1392 = vst [vmem:[%s2605_s2 + $0x10] sm:$0xff] %v1376_v0  ;;  %v1377_v5 = vadd.f32 %v1358_v1, %v333_v62  ;;  %v1360_v6 = vadd.f32 %v1359_v4, %v1306_v2  ;;  %v1308_v7 = vpop.f32.mrf.mxu0 }
 0x173   : > { %v1361_v9 = vpop.f32.mrf.mxu1 }
 0x174   : > { %1393 = vst [vmem:[%s2605_s2 + $0x18] sm:$0xff] %v1377_v5  ;;  %v1380_v10 = vadd.f32 %v1360_v6, %v336_v3  ;;  %v1362_v11 = vadd.f32 %v1361_v9, %v1308_v7  ;;  %v1312_v12 = vpop.f32.mrf.mxu0 }
 0x175   : > { %v1365_v16 = vpop.f32.mrf.mxu1 }
 0x176   : > { %1396 = vst [vmem:[%s2605_s2 + $0x30] sm:$0xff] %v1380_v10  ;;  %v1381_v17 = vadd.f32 %v1362_v11, %v337_v8  ;;  %v1366_v18 = vadd.f32 %v1365_v16, %v1312_v12  ;;  %v1314_v19 = vpop.f32.mrf.mxu0 }
 0x177   : > { %v1367_v21 = vpop.f32.mrf.mxu1 }
 0x178   : > { %1397 = vst [vmem:[%s2605_s2 + $0x38] sm:$0xff] %v1381_v17  ;;  %v1384_v22 = vadd.f32 %v1366_v18, %v340_v15  ;;  %v1368_v23 = vadd.f32 %v1367_v21, %v1314_v19  ;;  %v1316_v13 = vpop.f32.mrf.mxu0 }
 0x179   : > { %v1369_v24 = vpop.f32.mrf.mxu1 }
 0x17a   : > { %1400 = vst [vmem:[%s2605_s2 + $0x50] sm:$0xff] %v1384_v22  ;;  %v1385_v25 = vadd.f32 %v1368_v23, %v341_v20  ;;  %v1370_v26 = vadd.f32 %v1369_v24, %v1316_v13  ;;  %v1318_v27 = vpop.f32.mrf.mxu0 }
 0x17b   : > { %v1371_v29 = vpop.f32.mrf.mxu1 }
 0x17c   : > { %1401 = vst [vmem:[%s2605_s2 + $0x58] sm:$0xff] %v1385_v25  ;;  %v1388_v30 = vadd.f32 %v1370_v26, %v344_v14  ;;  %v1372_v31 = vadd.f32 %v1371_v29, %v1318_v27  ;;  %1409 = sbr.rel (%p1848_p11) target bundleno = 421 (0x1a5), region = 59 }
 0x17e   : > { %1404 = vst [vmem:[%s2605_s2 + $0x70] sm:$0xff] %v1388_v30  ;;  %v1389_v32 = vadd.f32 %v1372_v31, %v345_v28 }
 0x180   : > { %1405 = vst [vmem:[%s2605_s2 + $0x78] sm:$0xff] %v1389_v32 }
 0x181   : > { %v1410_v33 = vld [vmem:[%s2605_s2] sm:$0xff]  ;;  %v1411_v34 = vld [vmem:[%s2605_s2 + $0x8] sm:$0xff]  ;;  %v1412_v35 = vld [vmem:[%s2605_s2 + $0x10] sm:$0xff]  ;;  %vm1514_vm0 = vcmask 1040384  }
 0x182   : > { %v1413_v36 = vld [vmem:[%s2605_s2 + $0x18] sm:$0xff]  ;;  %v1414_v37 = vld [vmem:[%s2605_s2 + $0x20] sm:$0xff]  ;;  %v1415_v38 = vld [vmem:[%s2605_s2 + $0x28] sm:$0xff]  ;;  %v1462_v39 = vmul.f32 %v1410_v33, %v1410_v33  ;;  %v1463_v40 = vmul.f32 %v1411_v34, %v1411_v34  ;;  %v1464_v41 = vmul.f32 %v1412_v35, %v1412_v35 }
 0x183   : > { %v1416_v42 = vld [vmem:[%s2605_s2 + $0x30] sm:$0xff]  ;;  %v1417_v43 = vld [vmem:[%s2605_s2 + $0x38] sm:$0xff]  ;;  %v1418_v44 = vld [vmem:[%s2605_s2 + $0x40] sm:$0xff]  ;;  %v1426_v45 = vadd.f32 %v1414_v37, %v1410_v33  ;;  %v1435_v46 = vadd.f32 %v1415_v38, %v1411_v34  ;;  %v1465_v47 = vmul.f32 %v1413_v36, %v1413_v36  ;;  %v1466_v48 = vmul.f32 %v1414_v37, %v1414_v37 }
 0x184   : > { %v1419_v49 = vld [vmem:[%s2605_s2 + $0x48] sm:$0xff]  ;;  %v1420_v50 = vld [vmem:[%s2605_s2 + $0x50] sm:$0xff]  ;;  %v1421_v51 = vld [vmem:[%s2605_s2 + $0x58] sm:$0xff]  ;;  %v1444_v52 = vadd.f32 %v1416_v42, %v1412_v35  ;;  %v1453_v53 = vadd.f32 %v1417_v43, %v1413_v36  ;;  %v1467_v54 = vmul.f32 %v1415_v38, %v1415_v38  ;;  %v1468_v55 = vmul.f32 %v1416_v42, %v1416_v42 }
 0x185   : > { %v1422_v56 = vld [vmem:[%s2605_s2 + $0x60] sm:$0xff]  ;;  %v1423_v57 = vld [vmem:[%s2605_s2 + $0x68] sm:$0xff]  ;;  %v1424_v58 = vld [vmem:[%s2605_s2 + $0x70] sm:$0xff]  ;;  %v1427_v59 = vadd.f32 %v1426_v45, %v1418_v44  ;;  %v1436_v60 = vadd.f32 %v1435_v46, %v1419_v49  ;;  %v1469_v61 = vmul.f32 %v1417_v43, %v1417_v43  ;;  %v1470_v62 = vmul.f32 %v1418_v44, %v1418_v44 }
 0x186   : > { %v1445_v0 = vadd.f32 %v1444_v52, %v1420_v50  ;;  %v1454_v1 = vadd.f32 %v1453_v53, %v1421_v51  ;;  %v1471_v2 = vmul.f32 %v1419_v49, %v1419_v49  ;;  %v1472_v3 = vmul.f32 %v1420_v50, %v1420_v50 }
 0x187   : > { %v1425_v63 = vld [vmem:[%s2605_s2 + $0x78] sm:$0xff]  ;;  %v1428_v4 = vadd.f32 %v1427_v59, %v1422_v56  ;;  %v1437_v5 = vadd.f32 %v1436_v60, %v1423_v57  ;;  %v1473_v6 = vmul.f32 %v1421_v51, %v1421_v51  ;;  %v1474_v7 = vmul.f32 %v1422_v56, %v1422_v56 }
 0x188   : > { %v1446_v8 = vadd.f32 %v1445_v0, %v1424_v58  ;;  %v1455_v9 = vadd.f32 %v1454_v1, %v1425_v63  ;;  %v1475_v10 = vmul.f32 %v1423_v57, %v1423_v57  ;;  %v1476_v11 = vmul.f32 %v1424_v58, %v1424_v58 }
 0x189   : > { %v1429_v12 = vrot.slane %v1428_v4, 4  ;;  %v1438_v15 = vrot.slane %v1437_v5, 4  ;;  %v1477_v16 = vmul.f32 %v1425_v63, %v1425_v63  ;;  %v1478_v17 = vadd.f32 %v1466_v48, %v1462_v39 }
 0x18a   : > { %v1447_v18 = vrot.slane %v1446_v8, 4  ;;  %v1456_v19 = vrot.slane %v1455_v9, 4  ;;  %v1487_v20 = vadd.f32 %v1467_v54, %v1463_v40  ;;  %v1496_v21 = vadd.f32 %v1468_v55, %v1464_v41 }
 0x18b   : > { %v1430_v22 = vadd.f32 %v1429_v12, %v1428_v4  ;;  %v1439_v23 = vadd.f32 %v1438_v15, %v1437_v5  ;;  %v1479_v13 = vadd.f32 %v1478_v17, %v1470_v62  ;;  %v1505_v14 = vadd.f32 %v1469_v61, %v1465_v47 }
 0x18c   : > { %v1448_v24 = vadd.f32 %v1447_v18, %v1446_v8  ;;  %v1457_v25 = vadd.f32 %v1456_v19, %v1455_v9  ;;  %v1488_v26 = vadd.f32 %v1487_v20, %v1471_v2  ;;  %v1497_v27 = vadd.f32 %v1496_v21, %v1472_v3 }
 0x18d   : > { %v1431_v28 = vrot.slane %v1430_v22, 2  ;;  %v1440_v29 = vrot.slane %v1439_v23, 2  ;;  %v1480_v30 = vadd.f32 %v1479_v13, %v1474_v7  ;;  %v1506_v31 = vadd.f32 %v1505_v14, %v1473_v6 }
 0x18e   : > { %v1449_v32 = vrot.slane %v1448_v24, 2  ;;  %v1458_v33 = vrot.slane %v1457_v25, 2  ;;  %v1489_v34 = vadd.f32 %v1488_v26, %v1475_v10  ;;  %v1498_v35 = vadd.f32 %v1497_v27, %v1476_v11 }
 0x18f   : > { %v1432_v36 = vadd.f32 %v1431_v28, %v1430_v22  ;;  %v1481_v37 = vrot.slane %v1480_v30, 4  ;;  %v1507_v38 = vadd.f32 %v1506_v31, %v1477_v16  ;;  %v1441_v39 = vadd.f32 %v1440_v29, %v1439_v23 }
 0x190   : > { %v1450_v40 = vadd.f32 %v1449_v32, %v1448_v24  ;;  %v1490_v41 = vrot.slane %v1489_v34, 4  ;;  %v1499_v42 = vrot.slane %v1498_v35, 4  ;;  %v1459_v43 = vadd.f32 %v1458_v33, %v1457_v25 }
 0x191   : > { %v1482_v44 = vadd.f32 %v1481_v37, %v1480_v30  ;;  %v1508_v45 = vrot.slane %v1507_v38, 4  ;;  %v1433_v46 = vrot.slane %v1432_v36, 1  ;;  %v2144_v51 = vmov 1983009808  }
 0x192   : > { %v1491_v47 = vadd.f32 %v1490_v41, %v1489_v34  ;;  %v1500_v48 = vadd.f32 %v1499_v42, %v1498_v35  ;;  %v1526_v52 = vunpack.c.l.s4 %v2144_v51  ;;  %v1528_v53 = vlaneseq }
 0x193   : > { %v1483_v49 = vrot.slane %v1482_v44, 2  ;;  %v1509_v50 = vadd.f32 %v1508_v45, %v1507_v38  ;;  %v1442_v54 = vrot.slane %v1441_v39, 1  ;;  %v1451_v55 = vrot.slane %v1450_v40, 1 }
 0x194   : > { %v1492_v56 = vrot.slane %v1491_v47, 2  ;;  %v1501_v57 = vrot.slane %v1500_v48, 2  ;;  %v1460_v58 = vrot.slane %v1459_v43, 1  ;;  %v1434_v61 = vadd.f32 %v1433_v46, %v1432_v36 }
 0x195   : > { %v1484_v59 = vadd.f32 %v1483_v49, %v1482_v44  ;;  %v1510_v60 = vrot.slane %v1509_v50, 2  ;;  %v1527_v2 = vunpack.c.0.s8 %v1526_v52  ;;  %v1529_v3 = vshrl.u32 %v1528_v53, 7 }
 0x196   : > { %v1493_v62 = vadd.f32 %v1492_v56, %v1491_v47  ;;  %v1502_v63 = vadd.f32 %v1501_v57, %v1500_v48  ;;  %v1443_v4 = vadd.f32 %v1442_v54, %v1441_v39  ;;  %v1452_v5 = vadd.f32 %v1451_v55, %v1450_v40 }
 0x197   : > { %v1485_v0 = vrot.slane %v1484_v59, 1  ;;  %v1511_v1 = vadd.f32 %v1510_v60, %v1509_v50  ;;  %v1461_v8 = vadd.f32 %v1460_v58, %v1459_v43  ;;  %v1530_v17 = vsub.s32 %v1527_v2, %v1529_v3 }
 0x198   : > { %v1494_v6 = vrot.slane %v1493_v62, 1  ;;  %v1503_v7 = vrot.slane %v1502_v63, 1 }
 0x199   : > { %v1486_v9 = vadd.f32 %v1485_v0, %v1484_v59  ;;  %v1512_v10 = vrot.slane %v1511_v1, 1 }
 0x19a   : > { %v1495_v11 = vadd.f32 %v1494_v6, %v1493_v62  ;;  %v1504_v12 = vadd.f32 %v1503_v7, %v1502_v63 }
 0x19b   : > { %v1513_v15 = vadd.f32 %v1512_v10, %v1511_v1  ;;  %v1515_v16 = vsel %vm1514_vm0, %v1434_v61, %v1486_v9 }
 0x19c   : > { %v1516_v18 = vsel %vm1514_vm0, %v1443_v4, %v1495_v11  ;;  %v1517_v19 = vsel %vm1514_vm0, %v1452_v5, %v1504_v12 }
 0x19d   : > { %v1518_v20 = vsel %vm1514_vm0, %v1461_v8, %v1513_v15  ;;  %v1523_v21 = vcombine.low %v1515_v16, %v1516_v18 }
 0x19e   : > { %v1524_v22 = vcombine.low %v1517_v19, %v1518_v20 }
 0x19f   : > { %v1531_v23 = vrot.slane %v1523_v21, %v1530_v17 }
 0x1a0   : > { %v1538_v13 = vrot.slane %v1524_v22, %v1530_v17 }
 0x1a2   : > { %v1539_v14 = vcombine.low %v1531_v23, %v1538_v13 }
 0x1a4   : > { %1541 = vst [vmem:[%s2606_s3] sm:$0xff] %v1539_v14 }
 0x1a5 PF: > { %s14_s16 = sadd.s32 1, %s2141_s16   ;;  %s2607_s12 = smov %s2129_s13 }
 0x1a6   : > { %p11_p12 = scmp.ge.s32.totalorder %s14_s16, 10   ;;  %s2608_s13 = smov %s2200_s20 }
 0x1a7   : > { %s2609_s14 = smov %s2137_s15  ;;  %s2610_s15 = smov %s2612_s17 }
 0x1a8   :  { %13 = sbr.rel (!%p11_p12) target bundleno = 3 (0x3), region = 109 }

// kernel: discriminator_forward.14
= control target key start
LH: loop header
LB: loop body
LE: loop exit
PB: predicated region body
PF: predicated region fallthrough
CT: control target
= control target key end

     0   :  { %v32_v0 = vlaneseq  ;;  %s377_s1 = inlined_call_operand.vmem [shape: f32[1,512], index: 1, kind: input, shape index: {}]   ;;  %s378_s2 = inlined_call_operand.vmem [shape: f32[1,512], index: 2, kind: input, shape index: {}]   ;;  %s379_s0 = inlined_call_operand.vmem [shape: f32[32,512], index: 0, kind: input, shape index: {}]   ;;  %s380_s3 = inlined_call_operand.vmem [shape: bf16[32,512], index: 3, kind: output, shape index: {}]  }
   0x1   :  { %v30_v2 = vld [vmem:[%s377_s1] sm:$0xf]  ;;  %v15_v5 = vld [vmem:[%s379_s0 + $0x8] sm:$0xff]  ;;  %v16_v10 = vld [vmem:[%s379_s0 + $0x10] sm:$0xff] }
   0x2   :  { %v33_v1 = vshrl.u32 %v32_v0, 7  ;;  %v68_v3 = vld [vmem:[%s378_s2] sm:$0xf]  ;;  %v19_v12 = vld [vmem:[%s379_s0 + $0x28] sm:$0xff]  ;;  %v17_v17 = vld [vmem:[%s379_s0 + $0x18] sm:$0xff] }
   0x3   :  { %v14_v4 = vld [vmem:[%s379_s0] sm:$0xff]  ;;  %v20_v18 = vld [vmem:[%s379_s0 + $0x30] sm:$0xff]  ;;  %v21_v19 = vld [vmem:[%s379_s0 + $0x38] sm:$0xff] }
   0x4   :  { %v34_v6 = vsub.s32 0, %v33_v1  ;;  %v38_v7 = vsub.s32 1, %v33_v1  ;;  %v42_v8 = vsub.s32 2, %v33_v1  ;;  %v46_v9 = vsub.s32 3, %v33_v1  ;;  %v18_v11 = vld [vmem:[%s379_s0 + $0x20] sm:$0xff]  ;;  %v23_v51 = vld [vmem:[%s379_s0 + $0x48] sm:$0xff] }
   0x5   :  { %v22_v46 = vld [vmem:[%s379_s0 + $0x40] sm:$0xff]  ;;  %v24_v52 = vld [vmem:[%s379_s0 + $0x50] sm:$0xff]  ;;  %v25_v53 = vld [vmem:[%s379_s0 + $0x58] sm:$0xff] }
   0x6   :  { %v271_v13 = vrot.slane %v30_v2, %v34_v6  ;;  %v273_v14 = vrot.slane %v30_v2, %v38_v7  ;;  %v275_v15 = vrot.slane %v68_v3, %v34_v6  ;;  %v277_v16 = vrot.slane %v68_v3, %v38_v7  ;;  %v26_v0 = vld [vmem:[%s379_s0 + $0x60] sm:$0xff]  ;;  %v27_v1 = vld [vmem:[%s379_s0 + $0x68] sm:$0xff] }
   0x7   :  { %v288_v20 = vrot.slane %v30_v2, %v42_v8  ;;  %v290_v21 = vrot.slane %v30_v2, %v46_v9  ;;  %v292_v22 = vrot.slane %v68_v3, %v42_v8  ;;  %v294_v23 = vrot.slane %v68_v3, %v46_v9 }
   0x8   :  { %v52_v24 = vmul.f32 %v271_v13, %v14_v4  ;;  %v53_v25 = vmul.f32 %v273_v14, %v15_v5  ;;  %v56_v26 = vmul.f32 %v271_v13, %v18_v11  ;;  %v57_v27 = vmul.f32 %v273_v14, %v19_v12 }
   0x9   :  { %v54_v28 = vmul.f32 %v288_v20, %v16_v10  ;;  %v55_v29 = vmul.f32 %v290_v21, %v17_v17  ;;  %v58_v30 = vmul.f32 %v288_v20, %v20_v18  ;;  %v59_v31 = vmul.f32 %v290_v21, %v21_v19  ;;  %v28_v17 = vld [vmem:[%s379_s0 + $0x70] sm:$0xff]  ;;  %v29_v18 = vld [vmem:[%s379_s0 + $0x78] sm:$0xff] }
   0xa   :  { %v90_v32 = vadd.f32 %v275_v15, %v52_v24  ;;  %v91_v33 = vadd.f32 %v277_v16, %v53_v25  ;;  %v94_v34 = vadd.f32 %v275_v15, %v56_v26  ;;  %v95_v35 = vadd.f32 %v277_v16, %v57_v27 }
   0xb   :  { %v92_v36 = vadd.f32 %v292_v22, %v54_v28  ;;  %v93_v37 = vadd.f32 %v294_v23, %v55_v29  ;;  %v96_v38 = vadd.f32 %v292_v22, %v58_v30  ;;  %v97_v39 = vadd.f32 %v294_v23, %v59_v31 }
   0xc   :  { %vm106_vm0 = vcmp.ge.f32.partialorder %v90_v32, 0.0  ;;  %vm107_vm1 = vcmp.ge.f32.partialorder %v91_v33, 0.0  ;;  %v122_v40 = vmul.f32 0.2, %v90_v32  ;;  %v123_v41 = vmul.f32 0.2, %v91_v33 }
   0xd   :  { %vm108_vm2 = vcmp.ge.f32.partialorder %v92_v36, 0.0  ;;  %vm109_vm3 = vcmp.ge.f32.partialorder %v93_v37, 0.0  ;;  %v124_v42 = vmul.f32 0.2, %v92_v36  ;;  %v125_v43 = vmul.f32 0.2, %v93_v37 }
   0xe   :  { %v138_v44 = vsel %vm106_vm0, %v90_v32, %v122_v40  ;;  %v139_v45 = vsel %vm107_vm1, %v91_v33, %v123_v41  ;;  %vm110_vm4 = vcmp.ge.f32.partialorder %v94_v34, 0.0  ;;  %vm111_vm5 = vcmp.ge.f32.partialorder %v95_v35, 0.0 }
   0xf   :  { %v222_v47 = vpack.c.bf16 %v139_v45, %v138_v44  ;;  %v140_v48 = vsel %vm108_vm2, %v92_v36, %v124_v42  ;;  %v141_v49 = vsel %vm109_vm3, %v93_v37, %v125_v43  ;;  %v126_v50 = vmul.f32 0.2, %v94_v34 }
  0x10   :  { %v223_v54 = vpack.c.bf16 %v141_v49, %v140_v48  ;;  %v127_v55 = vmul.f32 0.2, %v95_v35  ;;  %vm112_vm6 = vcmp.ge.f32.partialorder %v96_v38, 0.0  ;;  %vm113_vm7 = vcmp.ge.f32.partialorder %v97_v39, 0.0 }
  0x11   :  { %202 = vst [vmem:[%s380_s3] sm:$0xff] %v222_v47  ;;  %v142_v56 = vsel %vm110_vm4, %v94_v34, %v126_v50  ;;  %v128_v57 = vmul.f32 0.2, %v96_v38  ;;  %v129_v58 = vmul.f32 0.2, %v97_v39  ;;  %v60_v59 = vmul.f32 %v271_v13, %v22_v46 }
  0x12   :  { %203 = vst [vmem:[%s380_s3 + $0x8] sm:$0xff] %v223_v54  ;;  %v143_v60 = vsel %vm111_vm5, %v95_v35, %v127_v55  ;;  %v61_v61 = vmul.f32 %v273_v14, %v23_v51  ;;  %v62_v62 = vmul.f32 %v288_v20, %v24_v52  ;;  %v63_v63 = vmul.f32 %v290_v21, %v25_v53 }
  0x13   :  { %v224_v2 = vpack.c.bf16 %v143_v60, %v142_v56  ;;  %v144_v3 = vsel %vm112_vm6, %v96_v38, %v128_v57  ;;  %v145_v4 = vsel %vm113_vm7, %v97_v39, %v129_v58  ;;  %v98_v5 = vadd.f32 %v275_v15, %v60_v59 }
  0x14   :  { %v225_v6 = vpack.c.bf16 %v145_v4, %v144_v3  ;;  %v99_v7 = vadd.f32 %v277_v16, %v61_v61  ;;  %v100_v8 = vadd.f32 %v292_v22, %v62_v62  ;;  %v101_v9 = vadd.f32 %v294_v23, %v63_v63 }
  0x15   :  { %204 = vst [vmem:[%s380_s3 + $0x10] sm:$0xff] %v224_v2  ;;  %vm114_vm8 = vcmp.ge.f32.partialorder %v98_v5, 0.0  ;;  %v130_v10 = vmul.f32 0.2, %v98_v5  ;;  %v64_v11 = vmul.f32 %v271_v13, %v26_v0  ;;  %v65_v12 = vmul.f32 %v273_v14, %v27_v1 }
  0x16   :  { %205 = vst [vmem:[%s380_s3 + $0x18] sm:$0xff] %v225_v6  ;;  %vm115_vm9 = vcmp.ge.f32.partialorder %v99_v7, 0.0  ;;  %v131_v19 = vmul.f32 0.2, %v99_v7  ;;  %vm116_vm10 = vcmp.ge.f32.partialorder %v100_v8, 0.0  ;;  %vm117_vm11 = vcmp.ge.f32.partialorder %v101_v9, 0.0 }
  0x17   :  { %v146_v24 = vsel %vm114_vm8, %v98_v5, %v130_v10  ;;  %v132_v13 = vmul.f32 0.2, %v100_v8  ;;  %v133_v25 = vmul.f32 0.2, %v101_v9  ;;  %v102_v14 = vadd.f32 %v275_v15, %v64_v11 }
  0x18   :  { %v147_v26 = vsel %vm115_vm9, %v99_v7, %v131_v19  ;;  %v103_v27 = vadd.f32 %v277_v16, %v65_v12  ;;  %v66_v28 = vmul.f32 %v288_v20, %v28_v17  ;;  %v67_v29 = vmul.f32 %v290_v21, %v29_v18 }
  0x19   :  { %v226_v30 = vpack.c.bf16 %v147_v26, %v146_v24  ;;  %v148_v31 = vsel %vm116_vm10, %v100_v8, %v132_v13  ;;  %v149_v32 = vsel %vm117_vm11, %v101_v9, %v133_v25  ;;  %vm118_vm12 = vcmp.ge.f32.partialorder %v102_v14, 0.0 }
  0x1a   :  { %v227_v33 = vpack.c.bf16 %v149_v32, %v148_v31  ;;  %vm119_vm13 = vcmp.ge.f32.partialorder %v103_v27, 0.0  ;;  %v134_v34 = vmul.f32 0.2, %v102_v14  ;;  %v135_v35 = vmul.f32 0.2, %v103_v27 }
  0x1b   :  { %206 = vst [vmem:[%s380_s3 + $0x20] sm:$0xff] %v226_v30  ;;  %v104_v15 = vadd.f32 %v292_v22, %v66_v28  ;;  %v105_v16 = vadd.f32 %v294_v23, %v67_v29 }
  0x1c   :  { %207 = vst [vmem:[%s380_s3 + $0x28] sm:$0xff] %v227_v33  ;;  %v150_v20 = vsel %vm118_vm12, %v102_v14, %v134_v34  ;;  %v151_v21 = vsel %vm119_vm13, %v103_v27, %v135_v35 }
  0x1d   :  { %v228_v36 = vpack.c.bf16 %v151_v21, %v150_v20  ;;  %vm120_vm14 = vcmp.ge.f32.partialorder %v104_v15, 0.0  ;;  %vm121_vm15 = vcmp.ge.f32.partialorder %v105_v16, 0.0  ;;  %v136_v37 = vmul.f32 0.2, %v104_v15 }
  0x1e   :  { %v137_v38 = vmul.f32 0.2, %v105_v16 }
  0x1f   :  { %208 = vst [vmem:[%s380_s3 + $0x30] sm:$0xff] %v228_v36  ;;  %v152_v39 = vsel %vm120_vm14, %v104_v15, %v136_v37 }
  0x20   :  { %v153_v40 = vsel %vm121_vm15, %v105_v16, %v137_v38 }
  0x21   :  { %v229_v22 = vpack.c.bf16 %v153_v40, %v152_v39 }
  0x23   :  { %209 = vst [vmem:[%s380_s3 + $0x38] sm:$0xff] %v229_v22 }

// kernel: discriminator_forward.15
= control target key start
LH: loop header
LB: loop body
LE: loop exit
PB: predicated region body
PF: predicated region fallthrough
CT: control target
= control target key end

     0   :  { %v123_v0 = vlaneseq  ;;  %vm578_vm0 = vcmask 7168   ;;  %s1112_s0 = inlined_call_operand.vmem [shape: bf16[8,8192], index: 0, kind: input, shape index: {}]   ;;  %s1113_s1 = inlined_call_operand.vmem [shape: f32[1,8192], index: 1, kind: input, shape index: {}]   ;;  %s1114_s2 = inlined_call_operand.vmem [shape: f32[8,1], index: 2, kind: output, shape index: {}]  }
   0x1   :  { %v606_v1 = vld [vmem:[%s1112_s0] sm:$0xff]  ;;  %v611_v2 = vld [vmem:[%s1112_s0 + $0x8] sm:$0xff]  ;;  %v616_v3 = vld [vmem:[%s1112_s0 + $0x10] sm:$0xff] }
   0x2   :  { %v621_v4 = vld [vmem:[%s1112_s0 + $0x88] sm:$0xff]  ;;  %v626_v5 = vld [vmem:[%s1112_s0 + $0x90] sm:$0xff]  ;;  %v631_v6 = vld [vmem:[%s1112_s0 + $0x98] sm:$0xff]  ;;  %v43_v9 = vunpack.c.l.bf16 %v606_v1  ;;  %v44_v10 = vunpack.c.h.bf16 %v606_v1  ;;  %v45_v11 = vunpack.c.l.bf16 %v611_v2  ;;  %v124_v12 = vshrl.u32 %v123_v0, 7 }
   0x3   :  { %v636_v7 = vld [vmem:[%s1112_s0 + $0xa0] sm:$0xff]  ;;  %v641_v8 = vld [vmem:[%s1112_s0 + $0xa8] sm:$0xff]  ;;  %v77_v15 = vunpack.c.l.bf16 %v621_v4  ;;  %v78_v16 = vunpack.c.h.bf16 %v621_v4  ;;  %v79_v17 = vunpack.c.l.bf16 %v626_v5  ;;  %v674_v30 = vld [vmem:[%s1113_s1 + $0x30] sm:$0xff]  ;;  %v1116_v1 = vunpack.c.l.bf16 %v631_v6 }
   0x4   :  { %v661_v25 = vld [vmem:[%s1113_s1 + $0x28] sm:$0xff]  ;;  %v663_v26 = vsub.s32 0, %v124_v12  ;;  %v665_v27 = vsub.s32 1, %v124_v12  ;;  %v667_v28 = vsub.s32 2, %v124_v12  ;;  %v669_v29 = vsub.s32 3, %v124_v12  ;;  %v695_v39 = vld [vmem:[%s1113_s1 + $0x38] sm:$0xff] }
   0x5   :  { %v676_v31 = vsub.s32 4, %v124_v12  ;;  %v678_v32 = vsub.s32 5, %v124_v12  ;;  %v680_v33 = vsub.s32 6, %v124_v12  ;;  %v682_v34 = vsub.s32 7, %v124_v12  ;;  %v716_v48 = vld [vmem:[%s1112_s0 + $0xb0] sm:$0xff]  ;;  %v721_v49 = vld [vmem:[%s1112_s0 + $0xb8] sm:$0xff] }
   0x6   :  { %v734_v54 = vld [vmem:[%s1112_s0 + $0xc0] sm:$0xff]  ;;  %v739_v55 = vld [vmem:[%s1112_s0 + $0xc8] sm:$0xff]  ;;  %v752_v60 = vld [vmem:[%s1112_s0 + $0xd0] sm:$0xff]  ;;  %v87_v62 = vunpack.c.l.bf16 %v716_v48  ;;  %v88_v63 = vunpack.c.h.bf16 %v716_v48  ;;  %v89_v59 = vunpack.c.l.bf16 %v721_v49  ;;  %v90_v0 = vunpack.c.h.bf16 %v721_v49 }
   0x7   :  { %v757_v61 = vld [vmem:[%s1112_s0 + $0xd8] sm:$0xff]  ;;  %v770_v14 = vld [vmem:[%s1112_s0 + $0xe0] sm:$0xff]  ;;  %v775_v13 = vld [vmem:[%s1112_s0 + $0xe8] sm:$0xff]  ;;  %v91_v58 = vunpack.c.l.bf16 %v734_v54  ;;  %v92_v57 = vunpack.c.h.bf16 %v734_v54  ;;  %v93_v56 = vunpack.c.l.bf16 %v739_v55  ;;  %v94_v53 = vunpack.c.h.bf16 %v739_v55 }
   0x8   :  { %v784_v12 = vld [vmem:[%s1113_s1] sm:$0xff]  ;;  %v95_v52 = vunpack.c.l.bf16 %v752_v60  ;;  %v96_v48 = vunpack.c.h.bf16 %v752_v60  ;;  %v97_v51 = vunpack.c.l.bf16 %v757_v61  ;;  %v98_v49 = vunpack.c.h.bf16 %v757_v61  ;;  %v41_v50 = vld [vmem:[%s1112_s0 + $0xf0] sm:$0xff]  ;;  %v42_v54 = vld [vmem:[%s1112_s0 + $0xf8] sm:$0xff] }
   0x9   :  { %v99_v47 = vunpack.c.l.bf16 %v770_v14  ;;  %v100_v55 = vunpack.c.h.bf16 %v770_v14  ;;  %v101_v46 = vunpack.c.l.bf16 %v775_v13  ;;  %v806_v60 = vld [vmem:[%s1113_s1 + $0x20] sm:$0xff]  ;;  %v126_v61 = vrot.slane %v784_v12, %v663_v26 }
   0xa   :  { %v130_v45 = vrot.slane %v784_v12, %v665_v27  ;;  %v134_v44 = vrot.slane %v784_v12, %v667_v28  ;;  %v262_v43 = vrot.slane %v806_v60, %v667_v28  ;;  %v266_v14 = vrot.slane %v806_v60, %v669_v29 }
   0xb   :  { %v270_v42 = vrot.slane %v806_v60, %v676_v31  ;;  %v274_v41 = vrot.slane %v806_v60, %v678_v32  ;;  %v278_v40 = vrot.slane %v806_v60, %v680_v33  ;;  %v282_v38 = vrot.slane %v806_v60, %v682_v34 }
   0xc   :  { %v102_v24 = vunpack.c.h.bf16 %v775_v13  ;;  %v103_v37 = vunpack.c.l.bf16 %v41_v50  ;;  %v104_v23 = vunpack.c.h.bf16 %v41_v50  ;;  %v105_v36 = vunpack.c.l.bf16 %v42_v54 }
   0xd   :  { %v106_v22 = vunpack.c.h.bf16 %v42_v54  ;;  %v138_v35 = vrot.slane %v784_v12, %v669_v29  ;;  %v142_v21 = vrot.slane %v784_v12, %v676_v31  ;;  %v443_v20 = vmul.f32 %v126_v61, %v43_v9 }
   0xe   :  { %v444_v19 = vmul.f32 %v130_v45, %v44_v10  ;;  %v445_v18 = vmul.f32 %v134_v44, %v45_v11  ;;  %v839_v13 = vmul.f32 %v262_v43, %v77_v15  ;;  %v843_v50 = vmul.f32 %v266_v14, %v78_v16 }
   0xf   :  { %v847_v54 = vmul.f32 %v270_v42, %v79_v17  ;;  %v1115_v9 = vunpack.c.h.bf16 %v626_v5  ;;  %v855_v10 = vmul.f32 %v278_v40, %v1116_v1  ;;  %v1117_v11 = vunpack.c.h.bf16 %v631_v6 }
  0x10   :  { %v1118_v4 = vunpack.c.l.bf16 %v636_v7  ;;  %v1119_v16 = vrot.slane %v661_v25, %v663_v26  ;;  %v1120_v17 = vunpack.c.h.bf16 %v636_v7  ;;  %v1121_v5 = vrot.slane %v661_v25, %v665_v27 }
  0x11   :  { %v851_v61 = vmul.f32 %v274_v41, %v1115_v9  ;;  %v859_v15 = vmul.f32 %v282_v38, %v1117_v11  ;;  %v1122_v40 = vunpack.c.l.bf16 %v641_v8  ;;  %v1123_v6 = vrot.slane %v661_v25, %v667_v28 }
  0x12   :  { %v866_v43 = vmul.f32 %v1119_v16, %v1118_v4  ;;  %v873_v41 = vmul.f32 %v1121_v5, %v1120_v17  ;;  %v1124_v42 = vunpack.c.h.bf16 %v641_v8  ;;  %v1125_v44 = vrot.slane %v661_v25, %v669_v29 }
  0x13   :  { %v880_v38 = vmul.f32 %v1123_v6, %v1122_v40  ;;  %v1126_v7 = vrot.slane %v661_v25, %v676_v31  ;;  %v1127_v9 = vrot.slane %v661_v25, %v678_v32  ;;  %v1128_v11 = vrot.slane %v661_v25, %v680_v33 }
  0x14   :  { %v887_v45 = vmul.f32 %v1125_v44, %v1124_v42  ;;  %v1129_v8 = vrot.slane %v661_v25, %v682_v34  ;;  %v1130_v17 = vrot.slane %v674_v30, %v663_v26  ;;  %v1131_v5 = vrot.slane %v674_v30, %v665_v27 }
  0x15   :  { %v892_v14 = vmul.f32 %v1126_v7, %v87_v62  ;;  %v897_v1 = vmul.f32 %v1127_v9, %v88_v63  ;;  %v902_v4 = vmul.f32 %v1128_v11, %v89_v59  ;;  %v1132_v40 = vrot.slane %v674_v30, %v667_v28 }
  0x16   :  { %v907_v16 = vmul.f32 %v1129_v8, %v90_v0  ;;  %v912_v62 = vmul.f32 %v1130_v17, %v91_v58  ;;  %v917_v63 = vmul.f32 %v1131_v5, %v92_v57  ;;  %v1133_v25 = vrot.slane %v674_v30, %v669_v29 }
  0x17   :  { %v922_v59 = vmul.f32 %v1132_v40, %v93_v56  ;;  %v1134_v6 = vrot.slane %v674_v30, %v676_v31  ;;  %v1135_v42 = vrot.slane %v674_v30, %v678_v32  ;;  %v1136_v44 = vrot.slane %v674_v30, %v680_v33 }
  0x18   :  { %v927_v0 = vmul.f32 %v1133_v25, %v94_v53  ;;  %v1137_v7 = vrot.slane %v674_v30, %v682_v34  ;;  %v1138_v9 = vrot.slane %v695_v39, %v663_v26  ;;  %v1139_v11 = vrot.slane %v695_v39, %v665_v27 }
  0x19   :  { %v932_v58 = vmul.f32 %v1134_v6, %v95_v52  ;;  %v937_v57 = vmul.f32 %v1135_v42, %v96_v48  ;;  %v942_v56 = vmul.f32 %v1136_v44, %v97_v51  ;;  %v1140_v8 = vrot.slane %v695_v39, %v667_v28 }
  0x1a   :  { %v947_v53 = vmul.f32 %v1137_v7, %v98_v49  ;;  %v952_v52 = vmul.f32 %v1138_v9, %v99_v47  ;;  %v957_v48 = vmul.f32 %v1139_v11, %v100_v55  ;;  %v1141_v30 = vrot.slane %v695_v39, %v669_v29  ;;  %v14_v47 = vld [vmem:[%s1112_s0 + $0x18] sm:$0xff] }
  0x1b   :  { %v962_v51 = vmul.f32 %v1140_v8, %v101_v46  ;;  %v1142_v17 = vrot.slane %v695_v39, %v676_v31  ;;  %v1143_v55 = vrot.slane %v695_v39, %v678_v32  ;;  %v1144_v46 = vrot.slane %v695_v39, %v680_v33 }
  0x1c   :  { %v967_v49 = vmul.f32 %v1141_v30, %v102_v24  ;;  %v1145_v24 = vrot.slane %v695_v39, %v682_v34  ;;  %v48_v42 = vunpack.c.h.bf16 %v616_v3  ;;  %v1146_v44 = vunpack.c.h.bf16 %v611_v2  ;;  %v108_v39 = vld [vmem:[%s1113_s1 + $0x8] sm:$0xff] }
  0x1d   :  { %v975_v5 = vmul.f32 %v1142_v17, %v103_v37  ;;  %v980_v40 = vmul.f32 %v1143_v55, %v104_v23  ;;  %v985_v25 = vmul.f32 %v1144_v46, %v105_v36  ;;  %v146_v37 = vrot.slane %v784_v12, %v678_v32 }
  0x1e   :  { %v990_v6 = vmul.f32 %v1145_v24, %v106_v22  ;;  %v446_v7 = vmul.f32 %v138_v35, %v1146_v44  ;;  %v507_v23 = vadd.f32 %v444_v19, %v443_v20  ;;  %v49_v9 = vunpack.c.l.bf16 %v14_v47  ;;  %v15_v22 = vld [vmem:[%s1112_s0 + $0x20] sm:$0xff] }
  0x1f   :  { %v150_v11 = vrot.slane %v784_v12, %v680_v33  ;;  %v1147_v36 = vunpack.c.l.bf16 %v616_v3  ;;  %v50_v17 = vunpack.c.h.bf16 %v14_v47  ;;  %v154_v2 = vrot.slane %v784_v12, %v682_v34 }
  0x20   :  { %v508_v30 = vadd.f32 %v507_v23, %v445_v18  ;;  %v448_v19 = vmul.f32 %v146_v37, %v48_v42  ;;  %v51_v35 = vunpack.c.l.bf16 %v15_v22  ;;  %v158_v55 = vrot.slane %v108_v39, %v663_v26  ;;  %v16_v18 = vld [vmem:[%s1112_s0 + $0x28] sm:$0xff]  ;;  %v17_v37 = vld [vmem:[%s1112_s0 + $0x30] sm:$0xff] }
  0x21   :  { %v447_v8 = vmul.f32 %v142_v21, %v1147_v36  ;;  %v449_v3 = vmul.f32 %v150_v11, %v49_v9  ;;  %v52_v46 = vunpack.c.h.bf16 %v15_v22  ;;  %v162_v24 = vrot.slane %v108_v39, %v665_v27 }
  0x22   :  { %v509_v20 = vadd.f32 %v508_v30, %v446_v7  ;;  %v450_v44 = vmul.f32 %v154_v2, %v50_v17  ;;  %v53_v47 = vunpack.c.l.bf16 %v16_v18  ;;  %v166_v36 = vrot.slane %v108_v39, %v667_v28  ;;  %v18_v2 = vld [vmem:[%s1112_s0 + $0x38] sm:$0xff] }
  0x23   :  { %v451_v12 = vmul.f32 %v158_v55, %v51_v35  ;;  %v54_v7 = vunpack.c.h.bf16 %v16_v18  ;;  %v170_v9 = vrot.slane %v108_v39, %v669_v29  ;;  %v452_v11 = vmul.f32 %v162_v24, %v52_v46  ;;  %v19_v24 = vld [vmem:[%s1112_s0 + $0x40] sm:$0xff] }
  0x24   :  { %v510_v21 = vadd.f32 %v509_v20, %v447_v8  ;;  %v55_v30 = vunpack.c.l.bf16 %v17_v37  ;;  %v174_v22 = vrot.slane %v108_v39, %v676_v31  ;;  %v453_v20 = vmul.f32 %v166_v36, %v53_v47 }
  0x25   :  { %v178_v35 = vrot.slane %v108_v39, %v678_v32  ;;  %v454_v55 = vmul.f32 %v170_v9, %v54_v7  ;;  %v182_v18 = vrot.slane %v108_v39, %v680_v33  ;;  %v58_v47 = vunpack.c.h.bf16 %v18_v2 }
  0x26   :  { %v511_v23 = vadd.f32 %v510_v21, %v448_v19  ;;  %v56_v19 = vunpack.c.h.bf16 %v17_v37  ;;  %v57_v21 = vunpack.c.l.bf16 %v18_v2  ;;  %v186_v36 = vrot.slane %v108_v39, %v682_v34 }
  0x27   :  { %v59_v37 = vunpack.c.l.bf16 %v19_v24 }
  0x28   :  { %v512_v42 = vadd.f32 %v511_v23, %v449_v3  ;;  %v455_v23 = vmul.f32 %v174_v22, %v55_v30  ;;  %v457_v9 = vmul.f32 %v182_v18, %v57_v21  ;;  %v60_v30 = vunpack.c.h.bf16 %v19_v24 }
  0x2a   :  { %v513_v8 = vadd.f32 %v512_v42, %v450_v44  ;;  %v109_v44 = vld [vmem:[%s1113_s1 + $0x10] sm:$0xff] }
  0x2b   :  { %v190_v7 = vrot.slane %v109_v44, %v663_v26  ;;  %v194_v22 = vrot.slane %v109_v44, %v665_v27  ;;  %v198_v2 = vrot.slane %v109_v44, %v667_v28  ;;  %v202_v21 = vrot.slane %v109_v44, %v669_v29 }
  0x2c   :  { %v514_v17 = vadd.f32 %v513_v8, %v451_v12  ;;  %v456_v12 = vmul.f32 %v178_v35, %v56_v19  ;;  %v20_v8 = vld [vmem:[%s1112_s0 + $0x48] sm:$0xff]  ;;  %v21_v35 = vld [vmem:[%s1112_s0 + $0x50] sm:$0xff]  ;;  %v206_v24 = vrot.slane %v109_v44, %v676_v31 }
  0x2d   :  { %v459_v39 = vmul.f32 %v190_v7, %v59_v37  ;;  %v460_v18 = vmul.f32 %v194_v22, %v60_v30  ;;  %v210_v37 = vrot.slane %v109_v44, %v678_v32  ;;  %v23_v22 = vld [vmem:[%s1112_s0 + $0x60] sm:$0xff] }
  0x2e   :  { %v515_v3 = vadd.f32 %v514_v17, %v452_v11 }
  0x30   :  { %v516_v46 = vadd.f32 %v515_v3, %v453_v20  ;;  %v458_v20 = vmul.f32 %v186_v36, %v58_v47  ;;  %v61_v3 = vunpack.c.l.bf16 %v20_v8  ;;  %v22_v36 = vld [vmem:[%s1112_s0 + $0x58] sm:$0xff] }
  0x32   :  { %v517_v42 = vadd.f32 %v516_v46, %v454_v55  ;;  %v62_v55 = vunpack.c.h.bf16 %v20_v8  ;;  %v63_v46 = vunpack.c.l.bf16 %v21_v35  ;;  %v214_v8 = vrot.slane %v109_v44, %v680_v33 }
  0x34   :  { %v518_v11 = vadd.f32 %v517_v42, %v455_v23  ;;  %v461_v42 = vmul.f32 %v198_v2, %v61_v3  ;;  %v462_v7 = vmul.f32 %v202_v21, %v62_v55  ;;  %v66_v3 = vunpack.c.h.bf16 %v22_v36 }
  0x35   :  { %v218_v2 = vrot.slane %v109_v44, %v682_v34 }
  0x36   :  { %v519_v17 = vadd.f32 %v518_v11, %v456_v12  ;;  %v64_v12 = vunpack.c.h.bf16 %v21_v35  ;;  %v65_v11 = vunpack.c.l.bf16 %v22_v36  ;;  %v67_v35 = vunpack.c.l.bf16 %v23_v22 }
  0x38   :  { %v520_v19 = vadd.f32 %v519_v17, %v457_v9  ;;  %v463_v17 = vmul.f32 %v206_v24, %v63_v46  ;;  %v465_v21 = vmul.f32 %v214_v8, %v65_v11  ;;  %v68_v46 = vunpack.c.h.bf16 %v23_v22 }
  0x3a   :  { %v521_v23 = vadd.f32 %v520_v19, %v458_v20  ;;  %v110_v20 = vld [vmem:[%s1113_s1 + $0x18] sm:$0xff] }
  0x3b   :  { %v222_v55 = vrot.slane %v110_v20, %v663_v26  ;;  %v226_v24 = vrot.slane %v110_v20, %v665_v27  ;;  %v230_v36 = vrot.slane %v110_v20, %v667_v28  ;;  %v234_v11 = vrot.slane %v110_v20, %v669_v29  ;;  %v26_v28 = vld [vmem:[%s1112_s0 + $0x78] sm:$0xff] }
  0x3c   :  { %v522_v47 = vadd.f32 %v521_v23, %v459_v39  ;;  %v464_v39 = vmul.f32 %v210_v37, %v64_v12  ;;  %v24_v23 = vld [vmem:[%s1112_s0 + $0x68] sm:$0xff]  ;;  %v25_v37 = vld [vmem:[%s1112_s0 + $0x70] sm:$0xff]  ;;  %v238_v22 = vrot.slane %v110_v20, %v676_v31  ;;  %v27_v31 = vld [vmem:[%s1112_s0 + $0x80] sm:$0xff] }
  0x3d   :  { %v467_v44 = vmul.f32 %v222_v55, %v67_v35  ;;  %v468_v8 = vmul.f32 %v226_v24, %v68_v46  ;;  %v74_v46 = vunpack.c.h.bf16 %v26_v28  ;;  %v250_v24 = vrot.slane %v110_v20, %v682_v34 }
  0x3e   :  { %v523_v9 = vadd.f32 %v522_v47, %v460_v18 }
  0x40   :  { %v524_v30 = vadd.f32 %v523_v9, %v461_v42  ;;  %v466_v42 = vmul.f32 %v218_v2, %v66_v3  ;;  %v69_v9 = vunpack.c.l.bf16 %v24_v23  ;;  %v72_v2 = vunpack.c.h.bf16 %v25_v37 }
  0x42   :  { %v525_v19 = vadd.f32 %v524_v30, %v462_v7  ;;  %v70_v7 = vunpack.c.h.bf16 %v24_v23  ;;  %v71_v30 = vunpack.c.l.bf16 %v25_v37  ;;  %v474_v37 = vmul.f32 %v250_v24, %v74_v46 }
  0x44   :  { %v526_v18 = vadd.f32 %v525_v19, %v463_v17  ;;  %v469_v19 = vmul.f32 %v230_v36, %v69_v9  ;;  %v470_v35 = vmul.f32 %v234_v11, %v70_v7  ;;  %v471_v29 = vmul.f32 %v238_v22, %v71_v30 }
  0x45   :  { %v75_v9 = vunpack.c.l.bf16 %v27_v31 }
  0x46   :  { %v527_v47 = vadd.f32 %v526_v18, %v464_v39  ;;  %v242_v39 = vrot.slane %v110_v20, %v678_v32  ;;  %v246_v18 = vrot.slane %v110_v20, %v680_v33  ;;  %v254_v32 = vrot.slane %v806_v60, %v663_v26 }
  0x47   :  { %v258_v33 = vrot.slane %v806_v60, %v665_v27 }
  0x48   :  { %v528_v12 = vadd.f32 %v527_v47, %v465_v21  ;;  %v73_v21 = vunpack.c.l.bf16 %v26_v28  ;;  %v475_v11 = vmul.f32 %v254_v32, %v75_v9 }
  0x4a   :  { %v529_v17 = vadd.f32 %v528_v12, %v466_v42  ;;  %v472_v42 = vmul.f32 %v242_v39, %v72_v2  ;;  %v473_v36 = vmul.f32 %v246_v18, %v73_v21  ;;  %v76_v12 = vunpack.c.h.bf16 %v27_v31 }
  0x4c   :  { %v530_v3 = vadd.f32 %v529_v17, %v467_v44  ;;  %v476_v17 = vmul.f32 %v258_v33, %v76_v12 }
  0x4e   :  { %v531_v55 = vadd.f32 %v530_v3, %v468_v8 }
  0x50   :  { %v532_v23 = vadd.f32 %v531_v55, %v469_v19 }
  0x52   :  { %v533_v47 = vadd.f32 %v532_v23, %v470_v35 }
  0x54   :  { %v534_v44 = vadd.f32 %v533_v47, %v471_v29 }
  0x56   :  { %v535_v7 = vadd.f32 %v534_v44, %v472_v42 }
  0x58   :  { %v536_v8 = vadd.f32 %v535_v7, %v473_v36 }
  0x5a   :  { %v537_v30 = vadd.f32 %v536_v8, %v474_v37 }
  0x5c   :  { %v538_v22 = vadd.f32 %v537_v30, %v475_v11 }
  0x5e   :  { %v539_v34 = vadd.f32 %v538_v22, %v476_v17 }
  0x60   :  { %v540_v20 = vadd.f32 %v539_v34, %v839_v13 }
  0x62   :  { %v541_v19 = vadd.f32 %v540_v20, %v843_v50 }
  0x64   :  { %v542_v26 = vadd.f32 %v541_v19, %v847_v54 }
  0x66   :  { %v543_v3 = vadd.f32 %v542_v26, %v851_v61 }
  0x68   :  { %v544_v28 = vadd.f32 %v543_v3, %v855_v10 }
  0x6a   :  { %v545_v27 = vadd.f32 %v544_v28, %v859_v15 }
  0x6c   :  { %v546_v60 = vadd.f32 %v545_v27, %v866_v43 }
  0x6e   :  { %v547_v2 = vadd.f32 %v546_v60, %v873_v41 }
  0x70   :  { %v548_v39 = vadd.f32 %v547_v2, %v880_v38 }
  0x72   :  { %v549_v35 = vadd.f32 %v548_v39, %v887_v45 }
  0x74   :  { %v550_v13 = vadd.f32 %v549_v35, %v892_v14 }
  0x76   :  { %v551_v50 = vadd.f32 %v550_v13, %v897_v1 }
  0x78   :  { %v552_v54 = vadd.f32 %v551_v50, %v902_v4 }
  0x7a   :  { %v553_v61 = vadd.f32 %v552_v54, %v907_v16 }
  0x7c   :  { %v554_v10 = vadd.f32 %v553_v61, %v912_v62 }
  0x7e   :  { %v555_v15 = vadd.f32 %v554_v10, %v917_v63 }
  0x80   :  { %v556_v43 = vadd.f32 %v555_v15, %v922_v59 }
  0x82   :  { %v557_v41 = vadd.f32 %v556_v43, %v927_v0 }
  0x84   :  { %v558_v38 = vadd.f32 %v557_v41, %v932_v58 }
  0x86   :  { %v559_v45 = vadd.f32 %v558_v38, %v937_v57 }
  0x88   :  { %v560_v14 = vadd.f32 %v559_v45, %v942_v56 }
  0x8a   :  { %v561_v1 = vadd.f32 %v560_v14, %v947_v53 }
  0x8c   :  { %v562_v4 = vadd.f32 %v561_v1, %v952_v52 }
  0x8e   :  { %v563_v16 = vadd.f32 %v562_v4, %v957_v48 }
  0x90   :  { %v564_v62 = vadd.f32 %v563_v16, %v962_v51 }
  0x92   :  { %v565_v63 = vadd.f32 %v564_v62, %v967_v49 }
  0x94   :  { %v566_v59 = vadd.f32 %v565_v63, %v975_v5 }
  0x96   :  { %v567_v0 = vadd.f32 %v566_v59, %v980_v40 }
  0x98   :  { %v568_v58 = vadd.f32 %v567_v0, %v985_v25 }
  0x9a   :  { %v569_v57 = vadd.f32 %v568_v58, %v990_v6 }
  0x9c   :  { %570 = vadd.xlane.f32.xlu0 %v569_v57 }
 0x125   :  { %v571_v56 = vpop.xlane.xlu0 %570 }
 0x126   :  { %v572_v55 = vsub.f32 0.0, %v571_v56 }
 0x128   :  { %v573_v53 = vmul.f32 1.442695, %v572_v55 }
 0x12a   :  { %584 = vpow2.f32 %v573_v53 }
 0x137   :  { %v585_v52 = vpop.eup %584 }
 0x138   :  { %v575_v21 = vadd.f32 1.0, %v585_v52 }
 0x13a   :  { %586 = vrcp.f32 %v575_v21 }
 0x147   :  { %v587_v48 = vpop.eup %586 }
 0x148   :  { %579 = vst.msk [vmem:[%s1114_s2] sm:$0xff] %vm578_vm0, %v587_v48 }

</bundles_post_ra>
